<compile_context>
chip_gen: v6e
topology: v6e:2x2x1
jax: 0.10.0
libtpu: 0.0.40
codegen_flags: <defaults>
</compile_context>

<pallas_src>
import functools

import jax
import jax.numpy as jnp
from jax.experimental import pallas as pl
from jax.experimental.pallas import tpu as pltpu

BN_EPS = 1e-5
K = 4                                    # all ConvTranspose2d layers use 4x4 kernels
_VMEM_LIMIT = 32 * 1024 * 1024           # <= 64 MiB physical VMEM on v7x, with headroom
_ROW_TILE_CAP = 1024                     # row-tile cap (measured sweet spot 512-2048)

# architecture constants fixed by the PyTorch module
_FC_OUT = 512
_STRIDES = (1, 2, 2, 2, 2)
_PADS = (0, 1, 1, 1, 1)


def _pick_row_tile(m, cap=_ROW_TILE_CAP):
    """Largest divisor of m obtained by halving, capped at `cap` rows."""
    t = m
    while t > cap and t % 2 == 0:
        t //= 2
    return t


# ------------------------------ Pallas kernels ------------------------------ #
def _mm_kernel(x_ref, w_ref, *rest, prologue, add_bias):
    """[BN-affine + ReLU prologue] -> bf16 MXU matmul -> [+bias]."""
    o_ref = rest[-1]
    pos = 0
    x = x_ref[...].astype(jnp.float32)
    if prologue:                       # previous layer's BN (scale/shift) + ReLU
        scale = rest[pos][...]
        shift = rest[pos + 1][...]
        pos += 2
        x = jnp.maximum(x * scale + shift, 0.0)
    y = jnp.dot(x.astype(jnp.bfloat16), w_ref[...],
                preferred_element_type=jnp.float32)
    if add_bias:
        y = y + rest[pos][...]
        pos += 1
    o_ref[...] = y


def matmul_fused(x, w, *, bias=None, prologue=None):
    """(M,Cin) @ (Cin,Ncol) with optional fused BN-affine+ReLU prologue / bias.

    M is tiled along a "parallel" grid axis (megacore-friendly); the weight and
    the (1,C) affine vectors are broadcast to every tile.
    """
    m, kdim = x.shape
    kdim2, ncol = w.shape
    assert kdim == kdim2
    tm = _pick_row_tile(m)
    grid = (m // tm,)

    args = [x, w]
    in_specs = [
        pl.BlockSpec((tm, kdim), lambda i: (i, 0)),
        pl.BlockSpec((kdim, ncol), lambda i: (0, 0)),
    ]
    if prologue is not None:
        scale, shift = prologue
        args += [scale, shift]
        in_specs += [
            pl.BlockSpec((1, kdim), lambda i: (0, 0)),
            pl.BlockSpec((1, kdim), lambda i: (0, 0)),
        ]
    if bias is not None:
        args.append(bias)
        in_specs.append(pl.BlockSpec((1, ncol), lambda i: (0, 0)))

    kernel = functools.partial(
        _mm_kernel, prologue=prologue is not None, add_bias=bias is not None)
    return pl.pallas_call(
        kernel,
        out_shape=jax.ShapeDtypeStruct((m, ncol), jnp.float32),
        grid=grid,
        in_specs=in_specs,
        out_specs=pl.BlockSpec((tm, ncol), lambda i: (i, 0)),
        compiler_params=pltpu.CompilerParams(
            dimension_semantics=("parallel",),
            vmem_limit_bytes=_VMEM_LIMIT),
    )(*args)


def _bn_stats_kernel(x_ref, gamma_ref, beta_ref, scale_ref, shift_ref,
                     sum_ref, sq_ref, *, count, eps):
    """Accumulate per-channel sum / sum-of-squares over row tiles; finalize the
    training-mode BatchNorm into a per-channel affine (scale, shift)."""
    i = pl.program_id(0)

    @pl.when(i == 0)
    def _():
        sum_ref[...] = jnp.zeros_like(sum_ref)
        sq_ref[...] = jnp.zeros_like(sq_ref)

    x = x_ref[...]
    sum_ref[...] += jnp.sum(x, axis=0, keepdims=True)
    sq_ref[...] += jnp.sum(x * x, axis=0, keepdims=True)

    @pl.when(i == pl.num_programs(0) - 1)
    def _():
        inv_n = 1.0 / count
        mean = sum_ref[...] * inv_n
        var = jnp.maximum(sq_ref[...] * inv_n - mean * mean, 0.0)  # biased var
        scale = gamma_ref[...] * jax.lax.rsqrt(var + eps)
        scale_ref[...] = scale
        shift_ref[...] = beta_ref[...] - mean * scale


def bn_scale_shift(x, gamma, beta, *, eps=BN_EPS):
    """Training-mode BatchNorm over rows of x -> per-channel (scale, shift)."""
    m, c = x.shape
    tm = _pick_row_tile(m)
    grid = (m // tm,)
    kernel = functools.partial(_bn_stats_kernel, count=float(m), eps=eps)
    return pl.pallas_call(
        kernel,
        out_shape=(jax.ShapeDtypeStruct((1, c), jnp.float32),
                   jax.ShapeDtypeStruct((1, c), jnp.float32)),
        grid=grid,
        in_specs=[
            pl.BlockSpec((tm, c), lambda i: (i, 0)),
            pl.BlockSpec((1, c), lambda i: (0, 0)),
            pl.BlockSpec((1, c), lambda i: (0, 0)),
        ],
        out_specs=(pl.BlockSpec((1, c), lambda i: (0, 0)),
                   pl.BlockSpec((1, c), lambda i: (0, 0))),
        scratch_shapes=[pltpu.VMEM((1, c), jnp.float32),
                        pltpu.VMEM((1, c), jnp.float32)],
        compiler_params=pltpu.CompilerParams(
            dimension_semantics=("arbitrary",),      # reduction over row tiles
            vmem_limit_bytes=_VMEM_LIMIT),
    )(x, gamma, beta)


def _sigmoid_kernel(x_ref, o_ref):
    y = x_ref[...]
    s = pl.reciprocal(1.0 + jnp.exp(-y), approx=True)   # exp + rcp on the EUP
    o_ref[...] = jnp.minimum(jnp.maximum(s, 0.0), 1.0)


def sigmoid_pallas(x):
    m, c = x.shape
    tm = _pick_row_tile(m, cap=2048)
    grid = (m // tm,)
    return pl.pallas_call(
        _sigmoid_kernel,
        out_shape=jax.ShapeDtypeStruct((m, c), jnp.float32),
        grid=grid,
        in_specs=[pl.BlockSpec((tm, c), lambda i: (i, 0))],
        out_specs=pl.BlockSpec((tm, c), lambda i: (i, 0)),
        compiler_params=pltpu.CompilerParams(
            dimension_semantics=("parallel",),
            vmem_limit_bytes=_VMEM_LIMIT),
    )(x)


# --------------------------------- XLA glue --------------------------------- #
def _col2im(y, n, h, w, c, stride, pad):
    """Overlap-add (col2im) of the K*K taps of the direct-form transposed-conv
    matmul.  Rows of `y` are in (n, iy, ix) raster order, columns (a, b, cout)
    with cout fastest.  Output: (n, H_out, W_out, c) NHWC."""
    y = y.reshape(n, h, w, K, K, c)
    hd = (h - 1) * stride + 1
    wd = (w - 1) * stride + 1
    hp = hd + K - 1
    wp = wd + K - 1
    zero = jnp.zeros((), y.dtype)
    out = jnp.zeros((n, hp, wp, c), y.dtype)
    for a in range(K):
        for b in range(K):
            out = out + jax.lax.pad(
                y[:, :, :, a, b, :], zero,
                ((0, 0, 0),
                 (a, hp - a - hd, stride - 1),   # place tap row a, dilate by stride
                 (b, wp - b - wd, stride - 1),
                 (0, 0, 0)))
    return out[:, pad:hp - pad, pad:wp - pad, :]


# ---------------------------- parameters / model ---------------------------- #
def init_params(key, embedding_size, output_channels=1):
    cm = 16
    keys = jax.random.split(key, 9)
    p = {}
    p["fc_w"] = (0.05 * jax.random.normal(
        keys[0], (embedding_size, _FC_OUT), jnp.float32)).astype(jnp.bfloat16)
    p["fc_b"] = 0.05 * jax.random.normal(keys[1], (1, _FC_OUT), jnp.float32)
    p["fc_gamma"] = 1.0 + 0.1 * jax.random.normal(keys[2], (1, _FC_OUT), jnp.float32)
    p["fc_beta"] = 0.1 * jax.random.normal(keys[3], (1, _FC_OUT), jnp.float32)

    chans = [_FC_OUT, cm * 4, cm * 2, cm, cm // 2, output_channels]
    layers = []
    for li in range(5):
        cin, cout = chans[li], chans[li + 1]
        kw = jax.random.split(keys[4 + li], 3)
        # PyTorch ConvTranspose2d weight layout: (Cin, Cout, K, K), bias=False.
        w_t = 0.05 * jax.random.normal(kw[0], (cin, cout, K, K), jnp.float32)
        # Precompute the direct-form matmul layout once: (Cin, K*K*Cout),
        # column index = (a*K + b)*Cout + cout  (no spatial flip in direct form).
        w_mat = jnp.transpose(w_t, (0, 2, 3, 1)).reshape(cin, K * K * cout)
        layer = {"w_mat": w_mat.astype(jnp.bfloat16)}
        if li < 4:                       # last deconv layer has no BatchNorm
            layer["gamma"] = 1.0 + 0.1 * jax.random.normal(kw[1], (1, cout), jnp.float32)
            layer["beta"] = 0.1 * jax.random.normal(kw[2], (1, cout), jnp.float32)
        layers.append(layer)
    p["deconv"] = layers
    return p


def cnn_decoder_forward(params, x):
    n = x.shape[0]

    # fc (Linear): X @ W + b, pre-BN (raw)
    h_raw = matmul_fused(x, params["fc_w"], bias=params["fc_b"])        # (N, 512)

    # BatchNorm1d (training stats) folded into a per-channel affine; applied as
    # the prologue of the next matmul kernel together with ReLU.
    scale, shift = bn_scale_shift(h_raw, params["fc_gamma"], params["fc_beta"])

    feat_raw = h_raw          # rows = (n, y, x) raster, cols = channels (pre-BN)
    h_sp = w_sp = 1
    n_layers = len(params["deconv"])
    for li, layer in enumerate(params["deconv"]):
        cout = layer["w_mat"].shape[1] // (K * K)
        stride, pad = _STRIDES[li], _PADS[li]
        # BN(prev)+ReLU prologue fused with the direct-form transposed-conv matmul:
        #   (n*h*w, Cin) @ (Cin, K*K*Cout)
        y = matmul_fused(feat_raw, layer["w_mat"], prologue=(scale, shift))
        # overlap-add of the K*K taps -> (n, H_out, W_out, Cout)   [XLA glue]
        out_map = _col2im(y, n, h_sp, w_sp, cout, stride, pad)
        _, h_sp, w_sp, _ = out_map.shape
        feat_raw = out_map.reshape(n * h_sp * w_sp, cout)
        if li < n_layers - 1:
            scale, shift = bn_scale_shift(feat_raw, layer["gamma"], layer["beta"])

    # final Sigmoid on a lane-dense reshape of the output map
    c_last = feat_raw.shape[1]
    total = feat_raw.shape[0] * c_last
    if total % 128 == 0:
        flat = feat_raw.reshape(total // 128, 128)
    else:
        flat = feat_raw
    out_flat = sigmoid_pallas(flat)
    out_nhwc = out_flat.reshape(n, h_sp, w_sp, c_last)
    return jnp.transpose(out_nhwc, (0, 3, 1, 2))     # NCHW, matches PyTorch


# ------------------------------------ main ----------------------------------- #
if __name__ == "__main__":
    key = jax.random.PRNGKey(0)
    k_x, k_p = jax.random.split(key)

    embedding_size = 32
    batch = 2
    params = init_params(k_p, embedding_size, output_channels=1)
    x = jax.random.normal(k_x, (batch, embedding_size), jnp.float32)

    fwd = jax.jit(cnn_decoder_forward)
    out = jax.block_until_ready(fwd(params, x))

    # decoder upsamples 1x1 -> 4 -> 8 -> 16 -> 32 -> 64 regardless of input_size
    assert out.shape == (batch, 1, 64, 64), out.shape
    assert bool(jnp.all(jnp.isfinite(out)))
    assert bool(jnp.all((out >= 0.0) & (out <= 1.0)))  # sigmoid output range

    print("KERNEL_OK")
</pallas_src>

<mosaic_0001>
module attributes {stable_mosaic.version = 11 : i64} {
  func.func @_mm_kernel(%arg0: i32, %arg1: memref<2x512xf32, #tpu.memory_space<vmem>>, %arg2: memref<512x1024xbf16, #tpu.memory_space<vmem>>, %arg3: memref<1x512xf32, #tpu.memory_space<vmem>>, %arg4: memref<1x512xf32, #tpu.memory_space<vmem>>, %arg5: memref<2x1024xf32, #tpu.memory_space<vmem>>) attributes {dimension_semantics = [#tpu.dimension_semantics<parallel>], iteration_bounds = array<i64: 1>, scalar_prefetch = 0 : i64, scratch_operands = 0 : i64, tpu.core_type = #tpu.core_type<tc>, window_params = [{transform_indices = @transform_0, window_bounds = array<i64: 2, 512>}, {pipeline_mode = #tpu.pipeline_mode<synchronous>, transform_indices = @transform_1, window_bounds = array<i64: 512, 1024>}, {pipeline_mode = #tpu.pipeline_mode<synchronous>, transform_indices = @transform_2, window_bounds = array<i64: 1, 512>}, {pipeline_mode = #tpu.pipeline_mode<synchronous>, transform_indices = @transform_3, window_bounds = array<i64: 1, 512>}, {transform_indices = @transform_4, window_bounds = array<i64: 2, 1024>}]} {
    %c0 = arith.constant 0 : index
    %c0_0 = arith.constant 0 : index
    %0 = vector.load %arg1[%c0, %c0_0] : memref<2x512xf32, #tpu.memory_space<vmem>>, vector<2x512xf32>
    %c0_1 = arith.constant 0 : index
    %c0_2 = arith.constant 0 : index
    %1 = vector.load %arg3[%c0_1, %c0_2] : memref<1x512xf32, #tpu.memory_space<vmem>>, vector<1x512xf32>
    %c0_3 = arith.constant 0 : index
    %c0_4 = arith.constant 0 : index
    %2 = vector.load %arg4[%c0_3, %c0_4] : memref<1x512xf32, #tpu.memory_space<vmem>>, vector<1x512xf32>
    %3 = vector.broadcast %1 : vector<1x512xf32> to vector<2x512xf32>
    %4 = arith.mulf %0, %3 : vector<2x512xf32>
    %5 = vector.broadcast %2 : vector<1x512xf32> to vector<2x512xf32>
    %6 = arith.addf %4, %5 : vector<2x512xf32>
    %cst = arith.constant 0.000000e+00 : f32
    %7 = vector.broadcast %cst : f32 to vector<2x512xf32>
    %8 = arith.maximumf %6, %7 : vector<2x512xf32>
    %9 = arith.truncf %8 : vector<2x512xf32> to vector<2x512xbf16>
    %c0_5 = arith.constant 0 : index
    %c0_6 = arith.constant 0 : index
    %10 = vector.load %arg2[%c0_5, %c0_6] : memref<512x1024xbf16, #tpu.memory_space<vmem>>, vector<512x1024xbf16>
    %cst_7 = arith.constant dense<0.000000e+00> : vector<2x1024xf32>
    %11 = tpu.matmul %9, %10, %cst_7 {dimension_numbers = #tpu.dot_dimension_numbers<[1], [0], [0], [1], [0, 0, 1, 1], [], []>} : vector<2x512xbf16>, vector<512x1024xbf16>, vector<2x1024xf32> -> vector<2x1024xf32>
    %c0_8 = arith.constant 0 : index
    %c0_9 = arith.constant 0 : index
    %12 = vector.load %arg5[%c0_8, %c0_9] : memref<2x1024xf32, #tpu.memory_space<vmem>>, vector<2x1024xf32>
    tpu.vector_store %arg5[%c0_8, %c0_9], %11 {strides = array<i32>} : memref<2x1024xf32, #tpu.memory_space<vmem>>, vector<2x1024xf32>,
    return
  }
  func.func @transform_0(%arg0: i32) -> (i32, i32) {
    %c0_i32 = arith.constant 0 : i32
    %c0_i32_0 = arith.constant 0 : i32
    return %arg0, %c0_i32 : i32, i32
  }
  func.func @transform_1(%arg0: i32) -> (i32, i32) {
    %c0_i32 = arith.constant 0 : i32
    %c0_i32_0 = arith.constant 0 : i32
    %c0_i32_1 = arith.constant 0 : i32
    return %c0_i32, %c0_i32_0 : i32, i32
  }
  func.func @transform_2(%arg0: i32) -> (i32, i32) {
    %c0_i32 = arith.constant 0 : i32
    %c0_i32_0 = arith.constant 0 : i32
    %c0_i32_1 = arith.constant 0 : i32
    return %c0_i32, %c0_i32_0 : i32, i32
  }
  func.func @transform_3(%arg0: i32) -> (i32, i32) {
    %c0_i32 = arith.constant 0 : i32
    %c0_i32_0 = arith.constant 0 : i32
    %c0_i32_1 = arith.constant 0 : i32
    return %c0_i32, %c0_i32_0 : i32, i32
  }
  func.func @transform_4(%arg0: i32) -> (i32, i32) {
    %c0_i32 = arith.constant 0 : i32
    %c0_i32_0 = arith.constant 0 : i32
    return %arg0, %c0_i32 : i32, i32
  }
}

module attributes {stable_mosaic.version = 11 : i64} {
  func.func @_mm_kernel(%arg0: i32, %arg1: memref<2x32xf32, #tpu.memory_space<vmem>>, %arg2: memref<32x512xbf16, #tpu.memory_space<vmem>>, %arg3: memref<1x512xf32, #tpu.memory_space<vmem>>, %arg4: memref<2x512xf32, #tpu.memory_space<vmem>>) attributes {dimension_semantics = [#tpu.dimension_semantics<parallel>], iteration_bounds = array<i64: 1>, scalar_prefetch = 0 : i64, scratch_operands = 0 : i64, tpu.core_type = #tpu.core_type<tc>, window_params = [{transform_indices = @transform_0, window_bounds = array<i64: 2, 32>}, {pipeline_mode = #tpu.pipeline_mode<synchronous>, transform_indices = @transform_1, window_bounds = array<i64: 32, 512>}, {pipeline_mode = #tpu.pipeline_mode<synchronous>, transform_indices = @transform_2, window_bounds = array<i64: 1, 512>}, {transform_indices = @transform_3, window_bounds = array<i64: 2, 512>}]} {
    %c0 = arith.constant 0 : index
    %c0_0 = arith.constant 0 : index
    %0 = vector.load %arg1[%c0, %c0_0] : memref<2x32xf32, #tpu.memory_space<vmem>>, vector<2x32xf32>
    %1 = arith.truncf %0 : vector<2x32xf32> to vector<2x32xbf16>
    %c0_1 = arith.constant 0 : index
    %c0_2 = arith.constant 0 : index
    %2 = vector.load %arg2[%c0_1, %c0_2] : memref<32x512xbf16, #tpu.memory_space<vmem>>, vector<32x512xbf16>
    %cst = arith.constant dense<0.000000e+00> : vector<2x512xf32>
    %3 = tpu.matmul %1, %2, %cst {dimension_numbers = #tpu.dot_dimension_numbers<[1], [0], [0], [1], [0, 0, 1, 1], [], []>} : vector<2x32xbf16>, vector<32x512xbf16>, vector<2x512xf32> -> vector<2x512xf32>
    %c0_3 = arith.constant 0 : index
    %c0_4 = arith.constant 0 : index
    %4 = vector.load %arg3[%c0_3, %c0_4] : memref<1x512xf32, #tpu.memory_space<vmem>>, vector<1x512xf32>
    %5 = vector.broadcast %4 : vector<1x512xf32> to vector<2x512xf32>
    %6 = arith.addf %3, %5 : vector<2x512xf32>
    %c0_5 = arith.constant 0 : index
    %c0_6 = arith.constant 0 : index
    %7 = vector.load %arg4[%c0_5, %c0_6] : memref<2x512xf32, #tpu.memory_space<vmem>>, vector<2x512xf32>
    tpu.vector_store %arg4[%c0_5, %c0_6], %6 {strides = array<i32>} : memref<2x512xf32, #tpu.memory_space<vmem>>, vector<2x512xf32>,
    return
  }
  func.func @transform_0(%arg0: i32) -> (i32, i32) {
    %c0_i32 = arith.constant 0 : i32
    %c0_i32_0 = arith.constant 0 : i32
    return %arg0, %c0_i32 : i32, i32
  }
  func.func @transform_1(%arg0: i32) -> (i32, i32) {
    %c0_i32 = arith.constant 0 : i32
    %c0_i32_0 = arith.constant 0 : i32
    %c0_i32_1 = arith.constant 0 : i32
    return %c0_i32, %c0_i32_0 : i32, i32
  }
  func.func @transform_2(%arg0: i32) -> (i32, i32) {
    %c0_i32 = arith.constant 0 : i32
    %c0_i32_0 = arith.constant 0 : i32
    %c0_i32_1 = arith.constant 0 : i32
    return %c0_i32, %c0_i32_0 : i32, i32
  }
  func.func @transform_3(%arg0: i32) -> (i32, i32) {
    %c0_i32 = arith.constant 0 : i32
    %c0_i32_0 = arith.constant 0 : i32
    return %arg0, %c0_i32 : i32, i32
  }
}

module attributes {stable_mosaic.version = 11 : i64} {
  func.func @_bn_stats_kernel(%arg0: i32, %arg1: memref<2x512xf32, #tpu.memory_space<vmem>>, %arg2: memref<1x512xf32, #tpu.memory_space<vmem>>, %arg3: memref<1x512xf32, #tpu.memory_space<vmem>>, %arg4: memref<1x512xf32, #tpu.memory_space<vmem>>, %arg5: memref<1x512xf32, #tpu.memory_space<vmem>>, %arg6: memref<1x512xf32, #tpu.memory_space<vmem>>, %arg7: memref<1x512xf32, #tpu.memory_space<vmem>>) attributes {dimension_semantics = [#tpu.dimension_semantics<arbitrary>], iteration_bounds = array<i64: 1>, scalar_prefetch = 0 : i64, scratch_operands = 2 : i64, tpu.core_type = #tpu.core_type<tc>, window_params = [{transform_indices = @transform_0, window_bounds = array<i64: 2, 512>}, {pipeline_mode = #tpu.pipeline_mode<synchronous>, transform_indices = @transform_1, window_bounds = array<i64: 1, 512>}, {pipeline_mode = #tpu.pipeline_mode<synchronous>, transform_indices = @transform_2, window_bounds = array<i64: 1, 512>}, {pipeline_mode = #tpu.pipeline_mode<synchronous>, transform_indices = @transform_3, window_bounds = array<i64: 1, 512>}, {pipeline_mode = #tpu.pipeline_mode<synchronous>, transform_indices = @transform_4, window_bounds = array<i64: 1, 512>}]} {
    %c0_i32 = arith.constant 0 : i32
    %0 = arith.cmpi eq, %arg0, %c0_i32 : i32
    %1 = arith.extui %0 : i1 to i32
    %c0_i32_0 = arith.constant 0 : i32
    %2 = arith.cmpi ne, %1, %c0_i32_0 : i32
    scf.if %2 {
      %cst_13 = arith.constant 0.000000e+00 : f32
      %18 = vector.broadcast %cst_13 : f32 to vector<1x512xf32>
      %c0_14 = arith.constant 0 : index
      %c0_15 = arith.constant 0 : index
      %19 = vector.load %arg6[%c0_14, %c0_15] : memref<1x512xf32, #tpu.memory_space<vmem>>, vector<1x512xf32>
      tpu.vector_store %arg6[%c0_14, %c0_15], %18 {strides = array<i32>} : memref<1x512xf32, #tpu.memory_space<vmem>>, vector<1x512xf32>,
      %cst_16 = arith.constant 0.000000e+00 : f32
      %20 = vector.broadcast %cst_16 : f32 to vector<1x512xf32>
      %c0_17 = arith.constant 0 : index
      %c0_18 = arith.constant 0 : index
      %21 = vector.load %arg7[%c0_17, %c0_18] : memref<1x512xf32, #tpu.memory_space<vmem>>, vector<1x512xf32>
      tpu.vector_store %arg7[%c0_17, %c0_18], %20 {strides = array<i32>} : memref<1x512xf32, #tpu.memory_space<vmem>>, vector<1x512xf32>,
    } else {
    }
    %c0 = arith.constant 0 : index
    %c0_1 = arith.constant 0 : index
    %3 = vector.load %arg1[%c0, %c0_1] : memref<2x512xf32, #tpu.memory_space<vmem>>, vector<2x512xf32>
    %c0_2 = arith.constant 0 : index
    %c0_3 = arith.constant 0 : index
    %4 = vector.load %arg6[%c0_2, %c0_3] : memref<1x512xf32, #tpu.memory_space<vmem>>, vector<1x512xf32>
    %cst = arith.constant dense<0.000000e+00> : vector<512xf32>
    %5 = vector.multi_reduction <add>, %3, %cst [0] : vector<2x512xf32> to vector<512xf32>
    %6 = vector.shape_cast %5 : vector<512xf32> to vector<1x512xf32>
    %7 = arith.addf %4, %6 : vector<1x512xf32>
    %c0_4 = arith.constant 0 : index
    %c0_5 = arith.constant 0 : index
    %8 = vector.load %arg6[%c0_4, %c0_5] : memref<1x512xf32, #tpu.memory_space<vmem>>, vector<1x512xf32>
    tpu.vector_store %arg6[%c0_4, %c0_5], %7 {strides = array<i32>} : memref<1x512xf32, #tpu.memory_space<vmem>>, vector<1x512xf32>,
    %c0_6 = arith.constant 0 : index
    %c0_7 = arith.constant 0 : index
    %9 = vector.load %arg7[%c0_6, %c0_7] : memref<1x512xf32, #tpu.memory_space<vmem>>, vector<1x512xf32>
    %10 = arith.mulf %3, %3 : vector<2x512xf32>
    %cst_8 = arith.constant dense<0.000000e+00> : vector<512xf32>
    %11 = vector.multi_reduction <add>, %10, %cst_8 [0] : vector<2x512xf32> to vector<512xf32>
    %12 = vector.shape_cast %11 : vector<512xf32> to vector<1x512xf32>
    %13 = arith.addf %9, %12 : vector<1x512xf32>
    %c0_9 = arith.constant 0 : index
    %c0_10 = arith.constant 0 : index
    %14 = vector.load %arg7[%c0_9, %c0_10] : memref<1x512xf32, #tpu.memory_space<vmem>>, vector<1x512xf32>
    tpu.vector_store %arg7[%c0_9, %c0_10], %13 {strides = array<i32>} : memref<1x512xf32, #tpu.memory_space<vmem>>, vector<1x512xf32>,
    %c0_i32_11 = arith.constant 0 : i32
    %15 = arith.cmpi eq, %arg0, %c0_i32_11 : i32
    %16 = arith.extui %15 : i1 to i32
    %c0_i32_12 = arith.constant 0 : i32
    %17 = arith.cmpi ne, %16, %c0_i32_12 : i32
    scf.if %17 {
      %c0_13 = arith.constant 0 : index
      %c0_14 = arith.constant 0 : index
      %18 = vector.load %arg6[%c0_13, %c0_14] : memref<1x512xf32, #tpu.memory_space<vmem>>, vector<1x512xf32>
      %cst_15 = arith.constant 5.000000e-01 : f32
      %19 = vector.broadcast %cst_15 : f32 to vector<1x512xf32>
      %20 = arith.mulf %18, %19 : vector<1x512xf32>
      %c0_16 = arith.constant 0 : index
      %c0_17 = arith.constant 0 : index
      %21 = vector.load %arg7[%c0_16, %c0_17] : memref<1x512xf32, #tpu.memory_space<vmem>>, vector<1x512xf32>
      %cst_18 = arith.constant 5.000000e-01 : f32
      %22 = vector.broadcast %cst_18 : f32 to vector<1x512xf32>
      %23 = arith.mulf %21, %22 : vector<1x512xf32>
      %24 = arith.mulf %20, %20 : vector<1x512xf32>
      %25 = arith.subf %23, %24 : vector<1x512xf32>
      %cst_19 = arith.constant 0.000000e+00 : f32
      %26 = vector.broadcast %cst_19 : f32 to vector<1x512xf32>
      %27 = arith.maximumf %25, %26 : vector<1x512xf32>
      %c0_20 = arith.constant 0 : index
      %c0_21 = arith.constant 0 : index
      %28 = vector.load %arg2[%c0_20, %c0_21] : memref<1x512xf32, #tpu.memory_space<vmem>>, vector<1x512xf32>
      %cst_22 = arith.constant 9.99999974E-6 : f32
      %29 = vector.broadcast %cst_22 : f32 to vector<1x512xf32>
      %30 = arith.addf %27, %29 : vector<1x512xf32>
      %31 = math.rsqrt %30 : vector<1x512xf32>
      %32 = arith.mulf %28, %31 : vector<1x512xf32>
      %c0_23 = arith.constant 0 : index
      %c0_24 = arith.constant 0 : index
      %33 = vector.load %arg4[%c0_23, %c0_24] : memref<1x512xf32, #tpu.memory_space<vmem>>, vector<1x512xf32>
      tpu.vector_store %arg4[%c0_23, %c0_24], %32 {strides = array<i32>} : memref<1x512xf32, #tpu.memory_space<vmem>>, vector<1x512xf32>,
      %c0_25 = arith.constant 0 : index
      %c0_26 = arith.constant 0 : index
      %34 = vector.load %arg3[%c0_25, %c0_26] : memref<1x512xf32, #tpu.memory_space<vmem>>, vector<1x512xf32>
      %35 = arith.mulf %20, %32 : vector<1x512xf32>
      %36 = arith.subf %34, %35 : vector<1x512xf32>
      %c0_27 = arith.constant 0 : index
      %c0_28 = arith.constant 0 : index
      %37 = vector.load %arg5[%c0_27, %c0_28] : memref<1x512xf32, #tpu.memory_space<vmem>>, vector<1x512xf32>
      tpu.vector_store %arg5[%c0_27, %c0_28], %36 {strides = array<i32>} : memref<1x512xf32, #tpu.memory_space<vmem>>, vector<1x512xf32>,
    } else {
    }
    return
  }
  func.func @transform_0(%arg0: i32) -> (i32, i32) {
    %c0_i32 = arith.constant 0 : i32
    %c0_i32_0 = arith.constant 0 : i32
    return %arg0, %c0_i32 : i32, i32
  }
  func.func @transform_1(%arg0: i32) -> (i32, i32) {
    %c0_i32 = arith.constant 0 : i32
    %c0_i32_0 = arith.constant 0 : i32
    %c0_i32_1 = arith.constant 0 : i32
    return %c0_i32, %c0_i32_0 : i32, i32
  }
  func.func @transform_2(%arg0: i32) -> (i32, i32) {
    %c0_i32 = arith.constant 0 : i32
    %c0_i32_0 = arith.constant 0 : i32
    %c0_i32_1 = arith.constant 0 : i32
    return %c0_i32, %c0_i32_0 : i32, i32
  }
  func.func @transform_3(%arg0: i32) -> (i32, i32) {
    %c0_i32 = arith.constant 0 : i32
    %c0_i32_0 = arith.constant 0 : i32
    %c0_i32_1 = arith.constant 0 : i32
    return %c0_i32, %c0_i32_0 : i32, i32
  }
  func.func @transform_4(%arg0: i32) -> (i32, i32) {
    %c0_i32 = arith.constant 0 : i32
    %c0_i32_0 = arith.constant 0 : i32
    %c0_i32_1 = arith.constant 0 : i32
    return %c0_i32, %c0_i32_0 : i32, i32
  }
}

module attributes {stable_mosaic.version = 11 : i64} {
  func.func @_bn_stats_kernel(%arg0: i32, %arg1: memref<32x64xf32, #tpu.memory_space<vmem>>, %arg2: memref<1x64xf32, #tpu.memory_space<vmem>>, %arg3: memref<1x64xf32, #tpu.memory_space<vmem>>, %arg4: memref<1x64xf32, #tpu.memory_space<vmem>>, %arg5: memref<1x64xf32, #tpu.memory_space<vmem>>, %arg6: memref<1x64xf32, #tpu.memory_space<vmem>>, %arg7: memref<1x64xf32, #tpu.memory_space<vmem>>) attributes {dimension_semantics = [#tpu.dimension_semantics<arbitrary>], iteration_bounds = array<i64: 1>, scalar_prefetch = 0 : i64, scratch_operands = 2 : i64, tpu.core_type = #tpu.core_type<tc>, window_params = [{transform_indices = @transform_0, window_bounds = array<i64: 32, 64>}, {pipeline_mode = #tpu.pipeline_mode<synchronous>, transform_indices = @transform_1, window_bounds = array<i64: 1, 64>}, {pipeline_mode = #tpu.pipeline_mode<synchronous>, transform_indices = @transform_2, window_bounds = array<i64: 1, 64>}, {pipeline_mode = #tpu.pipeline_mode<synchronous>, transform_indices = @transform_3, window_bounds = array<i64: 1, 64>}, {pipeline_mode = #tpu.pipeline_mode<synchronous>, transform_indices = @transform_4, window_bounds = array<i64: 1, 64>}]} {
    %c0_i32 = arith.constant 0 : i32
    %0 = arith.cmpi eq, %arg0, %c0_i32 : i32
    %1 = arith.extui %0 : i1 to i32
    %c0_i32_0 = arith.constant 0 : i32
    %2 = arith.cmpi ne, %1, %c0_i32_0 : i32
    scf.if %2 {
      %cst_13 = arith.constant 0.000000e+00 : f32
      %18 = vector.broadcast %cst_13 : f32 to vector<1x64xf32>
      %c0_14 = arith.constant 0 : index
      %c0_15 = arith.constant 0 : index
      %19 = vector.load %arg6[%c0_14, %c0_15] : memref<1x64xf32, #tpu.memory_space<vmem>>, vector<1x64xf32>
      tpu.vector_store %arg6[%c0_14, %c0_15], %18 {strides = array<i32>} : memref<1x64xf32, #tpu.memory_space<vmem>>, vector<1x64xf32>,
      %cst_16 = arith.constant 0.000000e+00 : f32
      %20 = vector.broadcast %cst_16 : f32 to vector<1x64xf32>
      %c0_17 = arith.constant 0 : index
      %c0_18 = arith.constant 0 : index
      %21 = vector.load %arg7[%c0_17, %c0_18] : memref<1x64xf32, #tpu.memory_space<vmem>>, vector<1x64xf32>
      tpu.vector_store %arg7[%c0_17, %c0_18], %20 {strides = array<i32>} : memref<1x64xf32, #tpu.memory_space<vmem>>, vector<1x64xf32>,
    } else {
    }
    %c0 = arith.constant 0 : index
    %c0_1 = arith.constant 0 : index
    %3 = vector.load %arg1[%c0, %c0_1] : memref<32x64xf32, #tpu.memory_space<vmem>>, vector<32x64xf32>
    %c0_2 = arith.constant 0 : index
    %c0_3 = arith.constant 0 : index
    %4 = vector.load %arg6[%c0_2, %c0_3] : memref<1x64xf32, #tpu.memory_space<vmem>>, vector<1x64xf32>
    %cst = arith.constant dense<0.000000e+00> : vector<64xf32>
    %5 = vector.multi_reduction <add>, %3, %cst [0] : vector<32x64xf32> to vector<64xf32>
    %6 = vector.shape_cast %5 : vector<64xf32> to vector<1x64xf32>
    %7 = arith.addf %4, %6 : vector<1x64xf32>
    %c0_4 = arith.constant 0 : index
    %c0_5 = arith.constant 0 : index
    %8 = vector.load %arg6[%c0_4, %c0_5] : memref<1x64xf32, #tpu.memory_space<vmem>>, vector<1x64xf32>
    tpu.vector_store %arg6[%c0_4, %c0_5], %7 {strides = array<i32>} : memref<1x64xf32, #tpu.memory_space<vmem>>, vector<1x64xf32>,
    %c0_6 = arith.constant 0 : index
    %c0_7 = arith.constant 0 : index
    %9 = vector.load %arg7[%c0_6, %c0_7] : memref<1x64xf32, #tpu.memory_space<vmem>>, vector<1x64xf32>
    %10 = arith.mulf %3, %3 : vector<32x64xf32>
    %cst_8 = arith.constant dense<0.000000e+00> : vector<64xf32>
    %11 = vector.multi_reduction <add>, %10, %cst_8 [0] : vector<32x64xf32> to vector<64xf32>
    %12 = vector.shape_cast %11 : vector<64xf32> to vector<1x64xf32>
    %13 = arith.addf %9, %12 : vector<1x64xf32>
    %c0_9 = arith.constant 0 : index
    %c0_10 = arith.constant 0 : index
    %14 = vector.load %arg7[%c0_9, %c0_10] : memref<1x64xf32, #tpu.memory_space<vmem>>, vector<1x64xf32>
    tpu.vector_store %arg7[%c0_9, %c0_10], %13 {strides = array<i32>} : memref<1x64xf32, #tpu.memory_space<vmem>>, vector<1x64xf32>,
    %c0_i32_11 = arith.constant 0 : i32
    %15 = arith.cmpi eq, %arg0, %c0_i32_11 : i32
    %16 = arith.extui %15 : i1 to i32
    %c0_i32_12 = arith.constant 0 : i32
    %17 = arith.cmpi ne, %16, %c0_i32_12 : i32
    scf.if %17 {
      %c0_13 = arith.constant 0 : index
      %c0_14 = arith.constant 0 : index
      %18 = vector.load %arg6[%c0_13, %c0_14] : memref<1x64xf32, #tpu.memory_space<vmem>>, vector<1x64xf32>
      %cst_15 = arith.constant 3.125000e-02 : f32
      %19 = vector.broadcast %cst_15 : f32 to vector<1x64xf32>
      %20 = arith.mulf %18, %19 : vector<1x64xf32>
      %c0_16 = arith.constant 0 : index
      %c0_17 = arith.constant 0 : index
      %21 = vector.load %arg7[%c0_16, %c0_17] : memref<1x64xf32, #tpu.memory_space<vmem>>, vector<1x64xf32>
      %cst_18 = arith.constant 3.125000e-02 : f32
      %22 = vector.broadcast %cst_18 : f32 to vector<1x64xf32>
      %23 = arith.mulf %21, %22 : vector<1x64xf32>
      %24 = arith.mulf %20, %20 : vector<1x64xf32>
      %25 = arith.subf %23, %24 : vector<1x64xf32>
      %cst_19 = arith.constant 0.000000e+00 : f32
      %26 = vector.broadcast %cst_19 : f32 to vector<1x64xf32>
      %27 = arith.maximumf %25, %26 : vector<1x64xf32>
      %c0_20 = arith.constant 0 : index
      %c0_21 = arith.constant 0 : index
      %28 = vector.load %arg2[%c0_20, %c0_21] : memref<1x64xf32, #tpu.memory_space<vmem>>, vector<1x64xf32>
      %cst_22 = arith.constant 9.99999974E-6 : f32
      %29 = vector.broadcast %cst_22 : f32 to vector<1x64xf32>
      %30 = arith.addf %27, %29 : vector<1x64xf32>
      %31 = math.rsqrt %30 : vector<1x64xf32>
      %32 = arith.mulf %28, %31 : vector<1x64xf32>
      %c0_23 = arith.constant 0 : index
      %c0_24 = arith.constant 0 : index
      %33 = vector.load %arg4[%c0_23, %c0_24] : memref<1x64xf32, #tpu.memory_space<vmem>>, vector<1x64xf32>
      tpu.vector_store %arg4[%c0_23, %c0_24], %32 {strides = array<i32>} : memref<1x64xf32, #tpu.memory_space<vmem>>, vector<1x64xf32>,
      %c0_25 = arith.constant 0 : index
      %c0_26 = arith.constant 0 : index
      %34 = vector.load %arg3[%c0_25, %c0_26] : memref<1x64xf32, #tpu.memory_space<vmem>>, vector<1x64xf32>
      %35 = arith.mulf %20, %32 : vector<1x64xf32>
      %36 = arith.subf %34, %35 : vector<1x64xf32>
      %c0_27 = arith.constant 0 : index
      %c0_28 = arith.constant 0 : index
      %37 = vector.load %arg5[%c0_27, %c0_28] : memref<1x64xf32, #tpu.memory_space<vmem>>, vector<1x64xf32>
      tpu.vector_store %arg5[%c0_27, %c0_28], %36 {strides = array<i32>} : memref<1x64xf32, #tpu.memory_space<vmem>>, vector<1x64xf32>,
    } else {
    }
    return
  }
  func.func @transform_0(%arg0: i32) -> (i32, i32) {
    %c0_i32 = arith.constant 0 : i32
    %c0_i32_0 = arith.constant 0 : i32
    return %arg0, %c0_i32 : i32, i32
  }
  func.func @transform_1(%arg0: i32) -> (i32, i32) {
    %c0_i32 = arith.constant 0 : i32
    %c0_i32_0 = arith.constant 0 : i32
    %c0_i32_1 = arith.constant 0 : i32
    return %c0_i32, %c0_i32_0 : i32, i32
  }
  func.func @transform_2(%arg0: i32) -> (i32, i32) {
    %c0_i32 = arith.constant 0 : i32
    %c0_i32_0 = arith.constant 0 : i32
    %c0_i32_1 = arith.constant 0 : i32
    return %c0_i32, %c0_i32_0 : i32, i32
  }
  func.func @transform_3(%arg0: i32) -> (i32, i32) {
    %c0_i32 = arith.constant 0 : i32
    %c0_i32_0 = arith.constant 0 : i32
    %c0_i32_1 = arith.constant 0 : i32
    return %c0_i32, %c0_i32_0 : i32, i32
  }
  func.func @transform_4(%arg0: i32) -> (i32, i32) {
    %c0_i32 = arith.constant 0 : i32
    %c0_i32_0 = arith.constant 0 : i32
    %c0_i32_1 = arith.constant 0 : i32
    return %c0_i32, %c0_i32_0 : i32, i32
  }
}

module attributes {stable_mosaic.version = 11 : i64} {
  func.func @_mm_kernel(%arg0: i32, %arg1: memref<32x64xf32, #tpu.memory_space<vmem>>, %arg2: memref<64x512xbf16, #tpu.memory_space<vmem>>, %arg3: memref<1x64xf32, #tpu.memory_space<vmem>>, %arg4: memref<1x64xf32, #tpu.memory_space<vmem>>, %arg5: memref<32x512xf32, #tpu.memory_space<vmem>>) attributes {dimension_semantics = [#tpu.dimension_semantics<parallel>], iteration_bounds = array<i64: 1>, scalar_prefetch = 0 : i64, scratch_operands = 0 : i64, tpu.core_type = #tpu.core_type<tc>, window_params = [{transform_indices = @transform_0, window_bounds = array<i64: 32, 64>}, {pipeline_mode = #tpu.pipeline_mode<synchronous>, transform_indices = @transform_1, window_bounds = array<i64: 64, 512>}, {pipeline_mode = #tpu.pipeline_mode<synchronous>, transform_indices = @transform_2, window_bounds = array<i64: 1, 64>}, {pipeline_mode = #tpu.pipeline_mode<synchronous>, transform_indices = @transform_3, window_bounds = array<i64: 1, 64>}, {transform_indices = @transform_4, window_bounds = array<i64: 32, 512>}]} {
    %c0 = arith.constant 0 : index
    %c0_0 = arith.constant 0 : index
    %0 = vector.load %arg1[%c0, %c0_0] : memref<32x64xf32, #tpu.memory_space<vmem>>, vector<32x64xf32>
    %c0_1 = arith.constant 0 : index
    %c0_2 = arith.constant 0 : index
    %1 = vector.load %arg3[%c0_1, %c0_2] : memref<1x64xf32, #tpu.memory_space<vmem>>, vector<1x64xf32>
    %c0_3 = arith.constant 0 : index
    %c0_4 = arith.constant 0 : index
    %2 = vector.load %arg4[%c0_3, %c0_4] : memref<1x64xf32, #tpu.memory_space<vmem>>, vector<1x64xf32>
    %3 = vector.broadcast %1 : vector<1x64xf32> to vector<32x64xf32>
    %4 = arith.mulf %0, %3 : vector<32x64xf32>
    %5 = vector.broadcast %2 : vector<1x64xf32> to vector<32x64xf32>
    %6 = arith.addf %4, %5 : vector<32x64xf32>
    %cst = arith.constant 0.000000e+00 : f32
    %7 = vector.broadcast %cst : f32 to vector<32x64xf32>
    %8 = arith.maximumf %6, %7 : vector<32x64xf32>
    %9 = arith.truncf %8 : vector<32x64xf32> to vector<32x64xbf16>
    %c0_5 = arith.constant 0 : index
    %c0_6 = arith.constant 0 : index
    %10 = vector.load %arg2[%c0_5, %c0_6] : memref<64x512xbf16, #tpu.memory_space<vmem>>, vector<64x512xbf16>
    %cst_7 = arith.constant dense<0.000000e+00> : vector<32x512xf32>
    %11 = tpu.matmul %9, %10, %cst_7 {dimension_numbers = #tpu.dot_dimension_numbers<[1], [0], [0], [1], [0, 0, 1, 1], [], []>} : vector<32x64xbf16>, vector<64x512xbf16>, vector<32x512xf32> -> vector<32x512xf32>
    %c0_8 = arith.constant 0 : index
    %c0_9 = arith.constant 0 : index
    %12 = vector.load %arg5[%c0_8, %c0_9] : memref<32x512xf32, #tpu.memory_space<vmem>>, vector<32x512xf32>
    tpu.vector_store %arg5[%c0_8, %c0_9], %11 {strides = array<i32>} : memref<32x512xf32, #tpu.memory_space<vmem>>, vector<32x512xf32>,
    return
  }
  func.func @transform_0(%arg0: i32) -> (i32, i32) {
    %c0_i32 = arith.constant 0 : i32
    %c0_i32_0 = arith.constant 0 : i32
    return %arg0, %c0_i32 : i32, i32
  }
  func.func @transform_1(%arg0: i32) -> (i32, i32) {
    %c0_i32 = arith.constant 0 : i32
    %c0_i32_0 = arith.constant 0 : i32
    %c0_i32_1 = arith.constant 0 : i32
    return %c0_i32, %c0_i32_0 : i32, i32
  }
  func.func @transform_2(%arg0: i32) -> (i32, i32) {
    %c0_i32 = arith.constant 0 : i32
    %c0_i32_0 = arith.constant 0 : i32
    %c0_i32_1 = arith.constant 0 : i32
    return %c0_i32, %c0_i32_0 : i32, i32
  }
  func.func @transform_3(%arg0: i32) -> (i32, i32) {
    %c0_i32 = arith.constant 0 : i32
    %c0_i32_0 = arith.constant 0 : i32
    %c0_i32_1 = arith.constant 0 : i32
    return %c0_i32, %c0_i32_0 : i32, i32
  }
  func.func @transform_4(%arg0: i32) -> (i32, i32) {
    %c0_i32 = arith.constant 0 : i32
    %c0_i32_0 = arith.constant 0 : i32
    return %arg0, %c0_i32 : i32, i32
  }
}

module attributes {stable_mosaic.version = 11 : i64} {
  func.func @_bn_stats_kernel(%arg0: i32, %arg1: memref<128x32xf32, #tpu.memory_space<vmem>>, %arg2: memref<1x32xf32, #tpu.memory_space<vmem>>, %arg3: memref<1x32xf32, #tpu.memory_space<vmem>>, %arg4: memref<1x32xf32, #tpu.memory_space<vmem>>, %arg5: memref<1x32xf32, #tpu.memory_space<vmem>>, %arg6: memref<1x32xf32, #tpu.memory_space<vmem>>, %arg7: memref<1x32xf32, #tpu.memory_space<vmem>>) attributes {dimension_semantics = [#tpu.dimension_semantics<arbitrary>], iteration_bounds = array<i64: 1>, scalar_prefetch = 0 : i64, scratch_operands = 2 : i64, tpu.core_type = #tpu.core_type<tc>, window_params = [{transform_indices = @transform_0, window_bounds = array<i64: 128, 32>}, {pipeline_mode = #tpu.pipeline_mode<synchronous>, transform_indices = @transform_1, window_bounds = array<i64: 1, 32>}, {pipeline_mode = #tpu.pipeline_mode<synchronous>, transform_indices = @transform_2, window_bounds = array<i64: 1, 32>}, {pipeline_mode = #tpu.pipeline_mode<synchronous>, transform_indices = @transform_3, window_bounds = array<i64: 1, 32>}, {pipeline_mode = #tpu.pipeline_mode<synchronous>, transform_indices = @transform_4, window_bounds = array<i64: 1, 32>}]} {
    %c0_i32 = arith.constant 0 : i32
    %0 = arith.cmpi eq, %arg0, %c0_i32 : i32
    %1 = arith.extui %0 : i1 to i32
    %c0_i32_0 = arith.constant 0 : i32
    %2 = arith.cmpi ne, %1, %c0_i32_0 : i32
    scf.if %2 {
      %cst_13 = arith.constant 0.000000e+00 : f32
      %18 = vector.broadcast %cst_13 : f32 to vector<1x32xf32>
      %c0_14 = arith.constant 0 : index
      %c0_15 = arith.constant 0 : index
      %19 = vector.load %arg6[%c0_14, %c0_15] : memref<1x32xf32, #tpu.memory_space<vmem>>, vector<1x32xf32>
      tpu.vector_store %arg6[%c0_14, %c0_15], %18 {strides = array<i32>} : memref<1x32xf32, #tpu.memory_space<vmem>>, vector<1x32xf32>,
      %cst_16 = arith.constant 0.000000e+00 : f32
      %20 = vector.broadcast %cst_16 : f32 to vector<1x32xf32>
      %c0_17 = arith.constant 0 : index
      %c0_18 = arith.constant 0 : index
      %21 = vector.load %arg7[%c0_17, %c0_18] : memref<1x32xf32, #tpu.memory_space<vmem>>, vector<1x32xf32>
      tpu.vector_store %arg7[%c0_17, %c0_18], %20 {strides = array<i32>} : memref<1x32xf32, #tpu.memory_space<vmem>>, vector<1x32xf32>,
    } else {
    }
    %c0 = arith.constant 0 : index
    %c0_1 = arith.constant 0 : index
    %3 = vector.load %arg1[%c0, %c0_1] : memref<128x32xf32, #tpu.memory_space<vmem>>, vector<128x32xf32>
    %c0_2 = arith.constant 0 : index
    %c0_3 = arith.constant 0 : index
    %4 = vector.load %arg6[%c0_2, %c0_3] : memref<1x32xf32, #tpu.memory_space<vmem>>, vector<1x32xf32>
    %cst = arith.constant dense<0.000000e+00> : vector<32xf32>
    %5 = vector.multi_reduction <add>, %3, %cst [0] : vector<128x32xf32> to vector<32xf32>
    %6 = vector.shape_cast %5 : vector<32xf32> to vector<1x32xf32>
    %7 = arith.addf %4, %6 : vector<1x32xf32>
    %c0_4 = arith.constant 0 : index
    %c0_5 = arith.constant 0 : index
    %8 = vector.load %arg6[%c0_4, %c0_5] : memref<1x32xf32, #tpu.memory_space<vmem>>, vector<1x32xf32>
    tpu.vector_store %arg6[%c0_4, %c0_5], %7 {strides = array<i32>} : memref<1x32xf32, #tpu.memory_space<vmem>>, vector<1x32xf32>,
    %c0_6 = arith.constant 0 : index
    %c0_7 = arith.constant 0 : index
    %9 = vector.load %arg7[%c0_6, %c0_7] : memref<1x32xf32, #tpu.memory_space<vmem>>, vector<1x32xf32>
    %10 = arith.mulf %3, %3 : vector<128x32xf32>
    %cst_8 = arith.constant dense<0.000000e+00> : vector<32xf32>
    %11 = vector.multi_reduction <add>, %10, %cst_8 [0] : vector<128x32xf32> to vector<32xf32>
    %12 = vector.shape_cast %11 : vector<32xf32> to vector<1x32xf32>
    %13 = arith.addf %9, %12 : vector<1x32xf32>
    %c0_9 = arith.constant 0 : index
    %c0_10 = arith.constant 0 : index
    %14 = vector.load %arg7[%c0_9, %c0_10] : memref<1x32xf32, #tpu.memory_space<vmem>>, vector<1x32xf32>
    tpu.vector_store %arg7[%c0_9, %c0_10], %13 {strides = array<i32>} : memref<1x32xf32, #tpu.memory_space<vmem>>, vector<1x32xf32>,
    %c0_i32_11 = arith.constant 0 : i32
    %15 = arith.cmpi eq, %arg0, %c0_i32_11 : i32
    %16 = arith.extui %15 : i1 to i32
    %c0_i32_12 = arith.constant 0 : i32
    %17 = arith.cmpi ne, %16, %c0_i32_12 : i32
    scf.if %17 {
      %c0_13 = arith.constant 0 : index
      %c0_14 = arith.constant 0 : index
      %18 = vector.load %arg6[%c0_13, %c0_14] : memref<1x32xf32, #tpu.memory_space<vmem>>, vector<1x32xf32>
      %cst_15 = arith.constant 7.812500e-03 : f32
      %19 = vector.broadcast %cst_15 : f32 to vector<1x32xf32>
      %20 = arith.mulf %18, %19 : vector<1x32xf32>
      %c0_16 = arith.constant 0 : index
      %c0_17 = arith.constant 0 : index
      %21 = vector.load %arg7[%c0_16, %c0_17] : memref<1x32xf32, #tpu.memory_space<vmem>>, vector<1x32xf32>
      %cst_18 = arith.constant 7.812500e-03 : f32
      %22 = vector.broadcast %cst_18 : f32 to vector<1x32xf32>
      %23 = arith.mulf %21, %22 : vector<1x32xf32>
      %24 = arith.mulf %20, %20 : vector<1x32xf32>
      %25 = arith.subf %23, %24 : vector<1x32xf32>
      %cst_19 = arith.constant 0.000000e+00 : f32
      %26 = vector.broadcast %cst_19 : f32 to vector<1x32xf32>
      %27 = arith.maximumf %25, %26 : vector<1x32xf32>
      %c0_20 = arith.constant 0 : index
      %c0_21 = arith.constant 0 : index
      %28 = vector.load %arg2[%c0_20, %c0_21] : memref<1x32xf32, #tpu.memory_space<vmem>>, vector<1x32xf32>
      %cst_22 = arith.constant 9.99999974E-6 : f32
      %29 = vector.broadcast %cst_22 : f32 to vector<1x32xf32>
      %30 = arith.addf %27, %29 : vector<1x32xf32>
      %31 = math.rsqrt %30 : vector<1x32xf32>
      %32 = arith.mulf %28, %31 : vector<1x32xf32>
      %c0_23 = arith.constant 0 : index
      %c0_24 = arith.constant 0 : index
      %33 = vector.load %arg4[%c0_23, %c0_24] : memref<1x32xf32, #tpu.memory_space<vmem>>, vector<1x32xf32>
      tpu.vector_store %arg4[%c0_23, %c0_24], %32 {strides = array<i32>} : memref<1x32xf32, #tpu.memory_space<vmem>>, vector<1x32xf32>,
      %c0_25 = arith.constant 0 : index
      %c0_26 = arith.constant 0 : index
      %34 = vector.load %arg3[%c0_25, %c0_26] : memref<1x32xf32, #tpu.memory_space<vmem>>, vector<1x32xf32>
      %35 = arith.mulf %20, %32 : vector<1x32xf32>
      %36 = arith.subf %34, %35 : vector<1x32xf32>
      %c0_27 = arith.constant 0 : index
      %c0_28 = arith.constant 0 : index
      %37 = vector.load %arg5[%c0_27, %c0_28] : memref<1x32xf32, #tpu.memory_space<vmem>>, vector<1x32xf32>
      tpu.vector_store %arg5[%c0_27, %c0_28], %36 {strides = array<i32>} : memref<1x32xf32, #tpu.memory_space<vmem>>, vector<1x32xf32>,
    } else {
    }
    return
  }
  func.func @transform_0(%arg0: i32) -> (i32, i32) {
    %c0_i32 = arith.constant 0 : i32
    %c0_i32_0 = arith.constant 0 : i32
    return %arg0, %c0_i32 : i32, i32
  }
  func.func @transform_1(%arg0: i32) -> (i32, i32) {
    %c0_i32 = arith.constant 0 : i32
    %c0_i32_0 = arith.constant 0 : i32
    %c0_i32_1 = arith.constant 0 : i32
    return %c0_i32, %c0_i32_0 : i32, i32
  }
  func.func @transform_2(%arg0: i32) -> (i32, i32) {
    %c0_i32 = arith.constant 0 : i32
    %c0_i32_0 = arith.constant 0 : i32
    %c0_i32_1 = arith.constant 0 : i32
    return %c0_i32, %c0_i32_0 : i32, i32
  }
  func.func @transform_3(%arg0: i32) -> (i32, i32) {
    %c0_i32 = arith.constant 0 : i32
    %c0_i32_0 = arith.constant 0 : i32
    %c0_i32_1 = arith.constant 0 : i32
    return %c0_i32, %c0_i32_0 : i32, i32
  }
  func.func @transform_4(%arg0: i32) -> (i32, i32) {
    %c0_i32 = arith.constant 0 : i32
    %c0_i32_0 = arith.constant 0 : i32
    %c0_i32_1 = arith.constant 0 : i32
    return %c0_i32, %c0_i32_0 : i32, i32
  }
}

module attributes {stable_mosaic.version = 11 : i64} {
  func.func @_mm_kernel(%arg0: i32, %arg1: memref<128x32xf32, #tpu.memory_space<vmem>>, %arg2: memref<32x256xbf16, #tpu.memory_space<vmem>>, %arg3: memref<1x32xf32, #tpu.memory_space<vmem>>, %arg4: memref<1x32xf32, #tpu.memory_space<vmem>>, %arg5: memref<128x256xf32, #tpu.memory_space<vmem>>) attributes {dimension_semantics = [#tpu.dimension_semantics<parallel>], iteration_bounds = array<i64: 1>, scalar_prefetch = 0 : i64, scratch_operands = 0 : i64, tpu.core_type = #tpu.core_type<tc>, window_params = [{transform_indices = @transform_0, window_bounds = array<i64: 128, 32>}, {pipeline_mode = #tpu.pipeline_mode<synchronous>, transform_indices = @transform_1, window_bounds = array<i64: 32, 256>}, {pipeline_mode = #tpu.pipeline_mode<synchronous>, transform_indices = @transform_2, window_bounds = array<i64: 1, 32>}, {pipeline_mode = #tpu.pipeline_mode<synchronous>, transform_indices = @transform_3, window_bounds = array<i64: 1, 32>}, {transform_indices = @transform_4, window_bounds = array<i64: 128, 256>}]} {
    %c0 = arith.constant 0 : index
    %c0_0 = arith.constant 0 : index
    %0 = vector.load %arg1[%c0, %c0_0] : memref<128x32xf32, #tpu.memory_space<vmem>>, vector<128x32xf32>
    %c0_1 = arith.constant 0 : index
    %c0_2 = arith.constant 0 : index
    %1 = vector.load %arg3[%c0_1, %c0_2] : memref<1x32xf32, #tpu.memory_space<vmem>>, vector<1x32xf32>
    %c0_3 = arith.constant 0 : index
    %c0_4 = arith.constant 0 : index
    %2 = vector.load %arg4[%c0_3, %c0_4] : memref<1x32xf32, #tpu.memory_space<vmem>>, vector<1x32xf32>
    %3 = vector.broadcast %1 : vector<1x32xf32> to vector<128x32xf32>
    %4 = arith.mulf %0, %3 : vector<128x32xf32>
    %5 = vector.broadcast %2 : vector<1x32xf32> to vector<128x32xf32>
    %6 = arith.addf %4, %5 : vector<128x32xf32>
    %cst = arith.constant 0.000000e+00 : f32
    %7 = vector.broadcast %cst : f32 to vector<128x32xf32>
    %8 = arith.maximumf %6, %7 : vector<128x32xf32>
    %9 = arith.truncf %8 : vector<128x32xf32> to vector<128x32xbf16>
    %c0_5 = arith.constant 0 : index
    %c0_6 = arith.constant 0 : index
    %10 = vector.load %arg2[%c0_5, %c0_6] : memref<32x256xbf16, #tpu.memory_space<vmem>>, vector<32x256xbf16>
    %cst_7 = arith.constant dense<0.000000e+00> : vector<128x256xf32>
    %11 = tpu.matmul %9, %10, %cst_7 {dimension_numbers = #tpu.dot_dimension_numbers<[1], [0], [0], [1], [0, 0, 1, 1], [], []>} : vector<128x32xbf16>, vector<32x256xbf16>, vector<128x256xf32> -> vector<128x256xf32>
    %c0_8 = arith.constant 0 : index
    %c0_9 = arith.constant 0 : index
    %12 = vector.load %arg5[%c0_8, %c0_9] : memref<128x256xf32, #tpu.memory_space<vmem>>, vector<128x256xf32>
    tpu.vector_store %arg5[%c0_8, %c0_9], %11 {strides = array<i32>} : memref<128x256xf32, #tpu.memory_space<vmem>>, vector<128x256xf32>,
    return
  }
  func.func @transform_0(%arg0: i32) -> (i32, i32) {
    %c0_i32 = arith.constant 0 : i32
    %c0_i32_0 = arith.constant 0 : i32
    return %arg0, %c0_i32 : i32, i32
  }
  func.func @transform_1(%arg0: i32) -> (i32, i32) {
    %c0_i32 = arith.constant 0 : i32
    %c0_i32_0 = arith.constant 0 : i32
    %c0_i32_1 = arith.constant 0 : i32
    return %c0_i32, %c0_i32_0 : i32, i32
  }
  func.func @transform_2(%arg0: i32) -> (i32, i32) {
    %c0_i32 = arith.constant 0 : i32
    %c0_i32_0 = arith.constant 0 : i32
    %c0_i32_1 = arith.constant 0 : i32
    return %c0_i32, %c0_i32_0 : i32, i32
  }
  func.func @transform_3(%arg0: i32) -> (i32, i32) {
    %c0_i32 = arith.constant 0 : i32
    %c0_i32_0 = arith.constant 0 : i32
    %c0_i32_1 = arith.constant 0 : i32
    return %c0_i32, %c0_i32_0 : i32, i32
  }
  func.func @transform_4(%arg0: i32) -> (i32, i32) {
    %c0_i32 = arith.constant 0 : i32
    %c0_i32_0 = arith.constant 0 : i32
    return %arg0, %c0_i32 : i32, i32
  }
}

module attributes {stable_mosaic.version = 11 : i64} {
  func.func @_bn_stats_kernel(%arg0: i32, %arg1: memref<512x16xf32, #tpu.memory_space<vmem>>, %arg2: memref<1x16xf32, #tpu.memory_space<vmem>>, %arg3: memref<1x16xf32, #tpu.memory_space<vmem>>, %arg4: memref<1x16xf32, #tpu.memory_space<vmem>>, %arg5: memref<1x16xf32, #tpu.memory_space<vmem>>, %arg6: memref<1x16xf32, #tpu.memory_space<vmem>>, %arg7: memref<1x16xf32, #tpu.memory_space<vmem>>) attributes {dimension_semantics = [#tpu.dimension_semantics<arbitrary>], iteration_bounds = array<i64: 1>, scalar_prefetch = 0 : i64, scratch_operands = 2 : i64, tpu.core_type = #tpu.core_type<tc>, window_params = [{transform_indices = @transform_0, window_bounds = array<i64: 512, 16>}, {pipeline_mode = #tpu.pipeline_mode<synchronous>, transform_indices = @transform_1, window_bounds = array<i64: 1, 16>}, {pipeline_mode = #tpu.pipeline_mode<synchronous>, transform_indices = @transform_2, window_bounds = array<i64: 1, 16>}, {pipeline_mode = #tpu.pipeline_mode<synchronous>, transform_indices = @transform_3, window_bounds = array<i64: 1, 16>}, {pipeline_mode = #tpu.pipeline_mode<synchronous>, transform_indices = @transform_4, window_bounds = array<i64: 1, 16>}]} {
    %c0_i32 = arith.constant 0 : i32
    %0 = arith.cmpi eq, %arg0, %c0_i32 : i32
    %1 = arith.extui %0 : i1 to i32
    %c0_i32_0 = arith.constant 0 : i32
    %2 = arith.cmpi ne, %1, %c0_i32_0 : i32
    scf.if %2 {
      %cst_13 = arith.constant 0.000000e+00 : f32
      %18 = vector.broadcast %cst_13 : f32 to vector<1x16xf32>
      %c0_14 = arith.constant 0 : index
      %c0_15 = arith.constant 0 : index
      %19 = vector.load %arg6[%c0_14, %c0_15] : memref<1x16xf32, #tpu.memory_space<vmem>>, vector<1x16xf32>
      tpu.vector_store %arg6[%c0_14, %c0_15], %18 {strides = array<i32>} : memref<1x16xf32, #tpu.memory_space<vmem>>, vector<1x16xf32>,
      %cst_16 = arith.constant 0.000000e+00 : f32
      %20 = vector.broadcast %cst_16 : f32 to vector<1x16xf32>
      %c0_17 = arith.constant 0 : index
      %c0_18 = arith.constant 0 : index
      %21 = vector.load %arg7[%c0_17, %c0_18] : memref<1x16xf32, #tpu.memory_space<vmem>>, vector<1x16xf32>
      tpu.vector_store %arg7[%c0_17, %c0_18], %20 {strides = array<i32>} : memref<1x16xf32, #tpu.memory_space<vmem>>, vector<1x16xf32>,
    } else {
    }
    %c0 = arith.constant 0 : index
    %c0_1 = arith.constant 0 : index
    %3 = vector.load %arg1[%c0, %c0_1] : memref<512x16xf32, #tpu.memory_space<vmem>>, vector<512x16xf32>
    %c0_2 = arith.constant 0 : index
    %c0_3 = arith.constant 0 : index
    %4 = vector.load %arg6[%c0_2, %c0_3] : memref<1x16xf32, #tpu.memory_space<vmem>>, vector<1x16xf32>
    %cst = arith.constant dense<0.000000e+00> : vector<16xf32>
    %5 = vector.multi_reduction <add>, %3, %cst [0] : vector<512x16xf32> to vector<16xf32>
    %6 = vector.shape_cast %5 : vector<16xf32> to vector<1x16xf32>
    %7 = arith.addf %4, %6 : vector<1x16xf32>
    %c0_4 = arith.constant 0 : index
    %c0_5 = arith.constant 0 : index
    %8 = vector.load %arg6[%c0_4, %c0_5] : memref<1x16xf32, #tpu.memory_space<vmem>>, vector<1x16xf32>
    tpu.vector_store %arg6[%c0_4, %c0_5], %7 {strides = array<i32>} : memref<1x16xf32, #tpu.memory_space<vmem>>, vector<1x16xf32>,
    %c0_6 = arith.constant 0 : index
    %c0_7 = arith.constant 0 : index
    %9 = vector.load %arg7[%c0_6, %c0_7] : memref<1x16xf32, #tpu.memory_space<vmem>>, vector<1x16xf32>
    %10 = arith.mulf %3, %3 : vector<512x16xf32>
    %cst_8 = arith.constant dense<0.000000e+00> : vector<16xf32>
    %11 = vector.multi_reduction <add>, %10, %cst_8 [0] : vector<512x16xf32> to vector<16xf32>
    %12 = vector.shape_cast %11 : vector<16xf32> to vector<1x16xf32>
    %13 = arith.addf %9, %12 : vector<1x16xf32>
    %c0_9 = arith.constant 0 : index
    %c0_10 = arith.constant 0 : index
    %14 = vector.load %arg7[%c0_9, %c0_10] : memref<1x16xf32, #tpu.memory_space<vmem>>, vector<1x16xf32>
    tpu.vector_store %arg7[%c0_9, %c0_10], %13 {strides = array<i32>} : memref<1x16xf32, #tpu.memory_space<vmem>>, vector<1x16xf32>,
    %c0_i32_11 = arith.constant 0 : i32
    %15 = arith.cmpi eq, %arg0, %c0_i32_11 : i32
    %16 = arith.extui %15 : i1 to i32
    %c0_i32_12 = arith.constant 0 : i32
    %17 = arith.cmpi ne, %16, %c0_i32_12 : i32
    scf.if %17 {
      %c0_13 = arith.constant 0 : index
      %c0_14 = arith.constant 0 : index
      %18 = vector.load %arg6[%c0_13, %c0_14] : memref<1x16xf32, #tpu.memory_space<vmem>>, vector<1x16xf32>
      %cst_15 = arith.constant 0.001953125 : f32
      %19 = vector.broadcast %cst_15 : f32 to vector<1x16xf32>
      %20 = arith.mulf %18, %19 : vector<1x16xf32>
      %c0_16 = arith.constant 0 : index
      %c0_17 = arith.constant 0 : index
      %21 = vector.load %arg7[%c0_16, %c0_17] : memref<1x16xf32, #tpu.memory_space<vmem>>, vector<1x16xf32>
      %cst_18 = arith.constant 0.001953125 : f32
      %22 = vector.broadcast %cst_18 : f32 to vector<1x16xf32>
      %23 = arith.mulf %21, %22 : vector<1x16xf32>
      %24 = arith.mulf %20, %20 : vector<1x16xf32>
      %25 = arith.subf %23, %24 : vector<1x16xf32>
      %cst_19 = arith.constant 0.000000e+00 : f32
      %26 = vector.broadcast %cst_19 : f32 to vector<1x16xf32>
      %27 = arith.maximumf %25, %26 : vector<1x16xf32>
      %c0_20 = arith.constant 0 : index
      %c0_21 = arith.constant 0 : index
      %28 = vector.load %arg2[%c0_20, %c0_21] : memref<1x16xf32, #tpu.memory_space<vmem>>, vector<1x16xf32>
      %cst_22 = arith.constant 9.99999974E-6 : f32
      %29 = vector.broadcast %cst_22 : f32 to vector<1x16xf32>
      %30 = arith.addf %27, %29 : vector<1x16xf32>
      %31 = math.rsqrt %30 : vector<1x16xf32>
      %32 = arith.mulf %28, %31 : vector<1x16xf32>
      %c0_23 = arith.constant 0 : index
      %c0_24 = arith.constant 0 : index
      %33 = vector.load %arg4[%c0_23, %c0_24] : memref<1x16xf32, #tpu.memory_space<vmem>>, vector<1x16xf32>
      tpu.vector_store %arg4[%c0_23, %c0_24], %32 {strides = array<i32>} : memref<1x16xf32, #tpu.memory_space<vmem>>, vector<1x16xf32>,
      %c0_25 = arith.constant 0 : index
      %c0_26 = arith.constant 0 : index
      %34 = vector.load %arg3[%c0_25, %c0_26] : memref<1x16xf32, #tpu.memory_space<vmem>>, vector<1x16xf32>
      %35 = arith.mulf %20, %32 : vector<1x16xf32>
      %36 = arith.subf %34, %35 : vector<1x16xf32>
      %c0_27 = arith.constant 0 : index
      %c0_28 = arith.constant 0 : index
      %37 = vector.load %arg5[%c0_27, %c0_28] : memref<1x16xf32, #tpu.memory_space<vmem>>, vector<1x16xf32>
      tpu.vector_store %arg5[%c0_27, %c0_28], %36 {strides = array<i32>} : memref<1x16xf32, #tpu.memory_space<vmem>>, vector<1x16xf32>,
    } else {
    }
    return
  }
  func.func @transform_0(%arg0: i32) -> (i32, i32) {
    %c0_i32 = arith.constant 0 : i32
    %c0_i32_0 = arith.constant 0 : i32
    return %arg0, %c0_i32 : i32, i32
  }
  func.func @transform_1(%arg0: i32) -> (i32, i32) {
    %c0_i32 = arith.constant 0 : i32
    %c0_i32_0 = arith.constant 0 : i32
    %c0_i32_1 = arith.constant 0 : i32
    return %c0_i32, %c0_i32_0 : i32, i32
  }
  func.func @transform_2(%arg0: i32) -> (i32, i32) {
    %c0_i32 = arith.constant 0 : i32
    %c0_i32_0 = arith.constant 0 : i32
    %c0_i32_1 = arith.constant 0 : i32
    return %c0_i32, %c0_i32_0 : i32, i32
  }
  func.func @transform_3(%arg0: i32) -> (i32, i32) {
    %c0_i32 = arith.constant 0 : i32
    %c0_i32_0 = arith.constant 0 : i32
    %c0_i32_1 = arith.constant 0 : i32
    return %c0_i32, %c0_i32_0 : i32, i32
  }
  func.func @transform_4(%arg0: i32) -> (i32, i32) {
    %c0_i32 = arith.constant 0 : i32
    %c0_i32_0 = arith.constant 0 : i32
    %c0_i32_1 = arith.constant 0 : i32
    return %c0_i32, %c0_i32_0 : i32, i32
  }
}

module attributes {stable_mosaic.version = 11 : i64} {
  func.func @_mm_kernel(%arg0: i32, %arg1: memref<512x16xf32, #tpu.memory_space<vmem>>, %arg2: memref<16x128xbf16, #tpu.memory_space<vmem>>, %arg3: memref<1x16xf32, #tpu.memory_space<vmem>>, %arg4: memref<1x16xf32, #tpu.memory_space<vmem>>, %arg5: memref<512x128xf32, #tpu.memory_space<vmem>>) attributes {dimension_semantics = [#tpu.dimension_semantics<parallel>], iteration_bounds = array<i64: 1>, scalar_prefetch = 0 : i64, scratch_operands = 0 : i64, tpu.core_type = #tpu.core_type<tc>, window_params = [{transform_indices = @transform_0, window_bounds = array<i64: 512, 16>}, {pipeline_mode = #tpu.pipeline_mode<synchronous>, transform_indices = @transform_1, window_bounds = array<i64: 16, 128>}, {pipeline_mode = #tpu.pipeline_mode<synchronous>, transform_indices = @transform_2, window_bounds = array<i64: 1, 16>}, {pipeline_mode = #tpu.pipeline_mode<synchronous>, transform_indices = @transform_3, window_bounds = array<i64: 1, 16>}, {transform_indices = @transform_4, window_bounds = array<i64: 512, 128>}]} {
    %c0 = arith.constant 0 : index
    %c0_0 = arith.constant 0 : index
    %0 = vector.load %arg1[%c0, %c0_0] : memref<512x16xf32, #tpu.memory_space<vmem>>, vector<512x16xf32>
    %c0_1 = arith.constant 0 : index
    %c0_2 = arith.constant 0 : index
    %1 = vector.load %arg3[%c0_1, %c0_2] : memref<1x16xf32, #tpu.memory_space<vmem>>, vector<1x16xf32>
    %c0_3 = arith.constant 0 : index
    %c0_4 = arith.constant 0 : index
    %2 = vector.load %arg4[%c0_3, %c0_4] : memref<1x16xf32, #tpu.memory_space<vmem>>, vector<1x16xf32>
    %3 = vector.broadcast %1 : vector<1x16xf32> to vector<512x16xf32>
    %4 = arith.mulf %0, %3 : vector<512x16xf32>
    %5 = vector.broadcast %2 : vector<1x16xf32> to vector<512x16xf32>
    %6 = arith.addf %4, %5 : vector<512x16xf32>
    %cst = arith.constant 0.000000e+00 : f32
    %7 = vector.broadcast %cst : f32 to vector<512x16xf32>
    %8 = arith.maximumf %6, %7 : vector<512x16xf32>
    %9 = arith.truncf %8 : vector<512x16xf32> to vector<512x16xbf16>
    %c0_5 = arith.constant 0 : index
    %c0_6 = arith.constant 0 : index
    %10 = vector.load %arg2[%c0_5, %c0_6] : memref<16x128xbf16, #tpu.memory_space<vmem>>, vector<16x128xbf16>
    %cst_7 = arith.constant dense<0.000000e+00> : vector<512x128xf32>
    %11 = tpu.matmul %9, %10, %cst_7 {dimension_numbers = #tpu.dot_dimension_numbers<[1], [0], [0], [1], [0, 0, 1, 1], [], []>} : vector<512x16xbf16>, vector<16x128xbf16>, vector<512x128xf32> -> vector<512x128xf32>
    %c0_8 = arith.constant 0 : index
    %c0_9 = arith.constant 0 : index
    %12 = vector.load %arg5[%c0_8, %c0_9] : memref<512x128xf32, #tpu.memory_space<vmem>>, vector<512x128xf32>
    tpu.vector_store %arg5[%c0_8, %c0_9], %11 {strides = array<i32>} : memref<512x128xf32, #tpu.memory_space<vmem>>, vector<512x128xf32>,
    return
  }
  func.func @transform_0(%arg0: i32) -> (i32, i32) {
    %c0_i32 = arith.constant 0 : i32
    %c0_i32_0 = arith.constant 0 : i32
    return %arg0, %c0_i32 : i32, i32
  }
  func.func @transform_1(%arg0: i32) -> (i32, i32) {
    %c0_i32 = arith.constant 0 : i32
    %c0_i32_0 = arith.constant 0 : i32
    %c0_i32_1 = arith.constant 0 : i32
    return %c0_i32, %c0_i32_0 : i32, i32
  }
  func.func @transform_2(%arg0: i32) -> (i32, i32) {
    %c0_i32 = arith.constant 0 : i32
    %c0_i32_0 = arith.constant 0 : i32
    %c0_i32_1 = arith.constant 0 : i32
    return %c0_i32, %c0_i32_0 : i32, i32
  }
  func.func @transform_3(%arg0: i32) -> (i32, i32) {
    %c0_i32 = arith.constant 0 : i32
    %c0_i32_0 = arith.constant 0 : i32
    %c0_i32_1 = arith.constant 0 : i32
    return %c0_i32, %c0_i32_0 : i32, i32
  }
  func.func @transform_4(%arg0: i32) -> (i32, i32) {
    %c0_i32 = arith.constant 0 : i32
    %c0_i32_0 = arith.constant 0 : i32
    return %arg0, %c0_i32 : i32, i32
  }
}

module attributes {stable_mosaic.version = 11 : i64} {
  func.func @_bn_stats_kernel(%arg0: i32, %arg1: memref<1024x8xf32, #tpu.memory_space<vmem>>, %arg2: memref<1x8xf32, #tpu.memory_space<vmem>>, %arg3: memref<1x8xf32, #tpu.memory_space<vmem>>, %arg4: memref<1x8xf32, #tpu.memory_space<vmem>>, %arg5: memref<1x8xf32, #tpu.memory_space<vmem>>, %arg6: memref<1x8xf32, #tpu.memory_space<vmem>>, %arg7: memref<1x8xf32, #tpu.memory_space<vmem>>) attributes {dimension_semantics = [#tpu.dimension_semantics<arbitrary>], iteration_bounds = array<i64: 2>, scalar_prefetch = 0 : i64, scratch_operands = 2 : i64, tpu.core_type = #tpu.core_type<tc>, window_params = [{transform_indices = @transform_0, window_bounds = array<i64: 1024, 8>}, {pipeline_mode = #tpu.pipeline_mode<synchronous>, transform_indices = @transform_1, window_bounds = array<i64: 1, 8>}, {pipeline_mode = #tpu.pipeline_mode<synchronous>, transform_indices = @transform_2, window_bounds = array<i64: 1, 8>}, {pipeline_mode = #tpu.pipeline_mode<synchronous>, transform_indices = @transform_3, window_bounds = array<i64: 1, 8>}, {pipeline_mode = #tpu.pipeline_mode<synchronous>, transform_indices = @transform_4, window_bounds = array<i64: 1, 8>}]} {
    %c0_i32 = arith.constant 0 : i32
    %0 = arith.cmpi eq, %arg0, %c0_i32 : i32
    %1 = arith.extui %0 : i1 to i32
    %c0_i32_0 = arith.constant 0 : i32
    %2 = arith.cmpi ne, %1, %c0_i32_0 : i32
    scf.if %2 {
      %cst_12 = arith.constant 0.000000e+00 : f32
      %18 = vector.broadcast %cst_12 : f32 to vector<1x8xf32>
      %c0_13 = arith.constant 0 : index
      %c0_14 = arith.constant 0 : index
      %19 = vector.load %arg6[%c0_13, %c0_14] : memref<1x8xf32, #tpu.memory_space<vmem>>, vector<1x8xf32>
      tpu.vector_store %arg6[%c0_13, %c0_14], %18 {strides = array<i32>} : memref<1x8xf32, #tpu.memory_space<vmem>>, vector<1x8xf32>,
      %cst_15 = arith.constant 0.000000e+00 : f32
      %20 = vector.broadcast %cst_15 : f32 to vector<1x8xf32>
      %c0_16 = arith.constant 0 : index
      %c0_17 = arith.constant 0 : index
      %21 = vector.load %arg7[%c0_16, %c0_17] : memref<1x8xf32, #tpu.memory_space<vmem>>, vector<1x8xf32>
      tpu.vector_store %arg7[%c0_16, %c0_17], %20 {strides = array<i32>} : memref<1x8xf32, #tpu.memory_space<vmem>>, vector<1x8xf32>,
    } else {
    }
    %c0 = arith.constant 0 : index
    %c0_1 = arith.constant 0 : index
    %3 = vector.load %arg1[%c0, %c0_1] : memref<1024x8xf32, #tpu.memory_space<vmem>>, vector<1024x8xf32>
    %c0_2 = arith.constant 0 : index
    %c0_3 = arith.constant 0 : index
    %4 = vector.load %arg6[%c0_2, %c0_3] : memref<1x8xf32, #tpu.memory_space<vmem>>, vector<1x8xf32>
    %cst = arith.constant dense<0.000000e+00> : vector<8xf32>
    %5 = vector.multi_reduction <add>, %3, %cst [0] : vector<1024x8xf32> to vector<8xf32>
    %6 = vector.shape_cast %5 : vector<8xf32> to vector<1x8xf32>
    %7 = arith.addf %4, %6 : vector<1x8xf32>
    %c0_4 = arith.constant 0 : index
    %c0_5 = arith.constant 0 : index
    %8 = vector.load %arg6[%c0_4, %c0_5] : memref<1x8xf32, #tpu.memory_space<vmem>>, vector<1x8xf32>
    tpu.vector_store %arg6[%c0_4, %c0_5], %7 {strides = array<i32>} : memref<1x8xf32, #tpu.memory_space<vmem>>, vector<1x8xf32>,
    %c0_6 = arith.constant 0 : index
    %c0_7 = arith.constant 0 : index
    %9 = vector.load %arg7[%c0_6, %c0_7] : memref<1x8xf32, #tpu.memory_space<vmem>>, vector<1x8xf32>
    %10 = arith.mulf %3, %3 : vector<1024x8xf32>
    %cst_8 = arith.constant dense<0.000000e+00> : vector<8xf32>
    %11 = vector.multi_reduction <add>, %10, %cst_8 [0] : vector<1024x8xf32> to vector<8xf32>
    %12 = vector.shape_cast %11 : vector<8xf32> to vector<1x8xf32>
    %13 = arith.addf %9, %12 : vector<1x8xf32>
    %c0_9 = arith.constant 0 : index
    %c0_10 = arith.constant 0 : index
    %14 = vector.load %arg7[%c0_9, %c0_10] : memref<1x8xf32, #tpu.memory_space<vmem>>, vector<1x8xf32>
    tpu.vector_store %arg7[%c0_9, %c0_10], %13 {strides = array<i32>} : memref<1x8xf32, #tpu.memory_space<vmem>>, vector<1x8xf32>,
    %c1_i32 = arith.constant 1 : i32
    %15 = arith.cmpi eq, %arg0, %c1_i32 : i32
    %16 = arith.extui %15 : i1 to i32
    %c0_i32_11 = arith.constant 0 : i32
    %17 = arith.cmpi ne, %16, %c0_i32_11 : i32
    scf.if %17 {
      %c0_12 = arith.constant 0 : index
      %c0_13 = arith.constant 0 : index
      %18 = vector.load %arg6[%c0_12, %c0_13] : memref<1x8xf32, #tpu.memory_space<vmem>>, vector<1x8xf32>
      %cst_14 = arith.constant 4.8828125E-4 : f32
      %19 = vector.broadcast %cst_14 : f32 to vector<1x8xf32>
      %20 = arith.mulf %18, %19 : vector<1x8xf32>
      %c0_15 = arith.constant 0 : index
      %c0_16 = arith.constant 0 : index
      %21 = vector.load %arg7[%c0_15, %c0_16] : memref<1x8xf32, #tpu.memory_space<vmem>>, vector<1x8xf32>
      %cst_17 = arith.constant 4.8828125E-4 : f32
      %22 = vector.broadcast %cst_17 : f32 to vector<1x8xf32>
      %23 = arith.mulf %21, %22 : vector<1x8xf32>
      %24 = arith.mulf %20, %20 : vector<1x8xf32>
      %25 = arith.subf %23, %24 : vector<1x8xf32>
      %cst_18 = arith.constant 0.000000e+00 : f32
      %26 = vector.broadcast %cst_18 : f32 to vector<1x8xf32>
      %27 = arith.maximumf %25, %26 : vector<1x8xf32>
      %c0_19 = arith.constant 0 : index
      %c0_20 = arith.constant 0 : index
      %28 = vector.load %arg2[%c0_19, %c0_20] : memref<1x8xf32, #tpu.memory_space<vmem>>, vector<1x8xf32>
      %cst_21 = arith.constant 9.99999974E-6 : f32
      %29 = vector.broadcast %cst_21 : f32 to vector<1x8xf32>
      %30 = arith.addf %27, %29 : vector<1x8xf32>
      %31 = math.rsqrt %30 : vector<1x8xf32>
      %32 = arith.mulf %28, %31 : vector<1x8xf32>
      %c0_22 = arith.constant 0 : index
      %c0_23 = arith.constant 0 : index
      %33 = vector.load %arg4[%c0_22, %c0_23] : memref<1x8xf32, #tpu.memory_space<vmem>>, vector<1x8xf32>
      tpu.vector_store %arg4[%c0_22, %c0_23], %32 {strides = array<i32>} : memref<1x8xf32, #tpu.memory_space<vmem>>, vector<1x8xf32>,
      %c0_24 = arith.constant 0 : index
      %c0_25 = arith.constant 0 : index
      %34 = vector.load %arg3[%c0_24, %c0_25] : memref<1x8xf32, #tpu.memory_space<vmem>>, vector<1x8xf32>
      %35 = arith.mulf %20, %32 : vector<1x8xf32>
      %36 = arith.subf %34, %35 : vector<1x8xf32>
      %c0_26 = arith.constant 0 : index
      %c0_27 = arith.constant 0 : index
      %37 = vector.load %arg5[%c0_26, %c0_27] : memref<1x8xf32, #tpu.memory_space<vmem>>, vector<1x8xf32>
      tpu.vector_store %arg5[%c0_26, %c0_27], %36 {strides = array<i32>} : memref<1x8xf32, #tpu.memory_space<vmem>>, vector<1x8xf32>,
    } else {
    }
    return
  }
  func.func @transform_0(%arg0: i32) -> (i32, i32) {
    %c0_i32 = arith.constant 0 : i32
    %c0_i32_0 = arith.constant 0 : i32
    return %arg0, %c0_i32 : i32, i32
  }
  func.func @transform_1(%arg0: i32) -> (i32, i32) {
    %c0_i32 = arith.constant 0 : i32
    %c0_i32_0 = arith.constant 0 : i32
    %c0_i32_1 = arith.constant 0 : i32
    return %c0_i32, %c0_i32_0 : i32, i32
  }
  func.func @transform_2(%arg0: i32) -> (i32, i32) {
    %c0_i32 = arith.constant 0 : i32
    %c0_i32_0 = arith.constant 0 : i32
    %c0_i32_1 = arith.constant 0 : i32
    return %c0_i32, %c0_i32_0 : i32, i32
  }
  func.func @transform_3(%arg0: i32) -> (i32, i32) {
    %c0_i32 = arith.constant 0 : i32
    %c0_i32_0 = arith.constant 0 : i32
    %c0_i32_1 = arith.constant 0 : i32
    return %c0_i32, %c0_i32_0 : i32, i32
  }
  func.func @transform_4(%arg0: i32) -> (i32, i32) {
    %c0_i32 = arith.constant 0 : i32
    %c0_i32_0 = arith.constant 0 : i32
    %c0_i32_1 = arith.constant 0 : i32
    return %c0_i32, %c0_i32_0 : i32, i32
  }
}

module attributes {stable_mosaic.version = 11 : i64} {
  func.func @_mm_kernel(%arg0: i32, %arg1: memref<1024x8xf32, #tpu.memory_space<vmem>>, %arg2: memref<8x16xbf16, #tpu.memory_space<vmem>>, %arg3: memref<1x8xf32, #tpu.memory_space<vmem>>, %arg4: memref<1x8xf32, #tpu.memory_space<vmem>>, %arg5: memref<1024x16xf32, #tpu.memory_space<vmem>>) attributes {dimension_semantics = [#tpu.dimension_semantics<parallel>], iteration_bounds = array<i64: 2>, scalar_prefetch = 0 : i64, scratch_operands = 0 : i64, tpu.core_type = #tpu.core_type<tc>, window_params = [{transform_indices = @transform_0, window_bounds = array<i64: 1024, 8>}, {pipeline_mode = #tpu.pipeline_mode<synchronous>, transform_indices = @transform_1, window_bounds = array<i64: 8, 16>}, {pipeline_mode = #tpu.pipeline_mode<synchronous>, transform_indices = @transform_2, window_bounds = array<i64: 1, 8>}, {pipeline_mode = #tpu.pipeline_mode<synchronous>, transform_indices = @transform_3, window_bounds = array<i64: 1, 8>}, {transform_indices = @transform_4, window_bounds = array<i64: 1024, 16>}]} {
    %c0 = arith.constant 0 : index
    %c0_0 = arith.constant 0 : index
    %0 = vector.load %arg1[%c0, %c0_0] : memref<1024x8xf32, #tpu.memory_space<vmem>>, vector<1024x8xf32>
    %c0_1 = arith.constant 0 : index
    %c0_2 = arith.constant 0 : index
    %1 = vector.load %arg3[%c0_1, %c0_2] : memref<1x8xf32, #tpu.memory_space<vmem>>, vector<1x8xf32>
    %c0_3 = arith.constant 0 : index
    %c0_4 = arith.constant 0 : index
    %2 = vector.load %arg4[%c0_3, %c0_4] : memref<1x8xf32, #tpu.memory_space<vmem>>, vector<1x8xf32>
    %3 = vector.broadcast %1 : vector<1x8xf32> to vector<1024x8xf32>
    %4 = arith.mulf %0, %3 : vector<1024x8xf32>
    %5 = vector.broadcast %2 : vector<1x8xf32> to vector<1024x8xf32>
    %6 = arith.addf %4, %5 : vector<1024x8xf32>
    %cst = arith.constant 0.000000e+00 : f32
    %7 = vector.broadcast %cst : f32 to vector<1024x8xf32>
    %8 = arith.maximumf %6, %7 : vector<1024x8xf32>
    %9 = arith.truncf %8 : vector<1024x8xf32> to vector<1024x8xbf16>
    %c0_5 = arith.constant 0 : index
    %c0_6 = arith.constant 0 : index
    %10 = vector.load %arg2[%c0_5, %c0_6] : memref<8x16xbf16, #tpu.memory_space<vmem>>, vector<8x16xbf16>
    %cst_7 = arith.constant dense<0.000000e+00> : vector<1024x16xf32>
    %11 = tpu.matmul %9, %10, %cst_7 {dimension_numbers = #tpu.dot_dimension_numbers<[1], [0], [0], [1], [0, 0, 1, 1], [], []>} : vector<1024x8xbf16>, vector<8x16xbf16>, vector<1024x16xf32> -> vector<1024x16xf32>
    %c0_8 = arith.constant 0 : index
    %c0_9 = arith.constant 0 : index
    %12 = vector.load %arg5[%c0_8, %c0_9] : memref<1024x16xf32, #tpu.memory_space<vmem>>, vector<1024x16xf32>
    tpu.vector_store %arg5[%c0_8, %c0_9], %11 {strides = array<i32>} : memref<1024x16xf32, #tpu.memory_space<vmem>>, vector<1024x16xf32>,
    return
  }
  func.func @transform_0(%arg0: i32) -> (i32, i32) {
    %c0_i32 = arith.constant 0 : i32
    %c0_i32_0 = arith.constant 0 : i32
    return %arg0, %c0_i32 : i32, i32
  }
  func.func @transform_1(%arg0: i32) -> (i32, i32) {
    %c0_i32 = arith.constant 0 : i32
    %c0_i32_0 = arith.constant 0 : i32
    %c0_i32_1 = arith.constant 0 : i32
    return %c0_i32, %c0_i32_0 : i32, i32
  }
  func.func @transform_2(%arg0: i32) -> (i32, i32) {
    %c0_i32 = arith.constant 0 : i32
    %c0_i32_0 = arith.constant 0 : i32
    %c0_i32_1 = arith.constant 0 : i32
    return %c0_i32, %c0_i32_0 : i32, i32
  }
  func.func @transform_3(%arg0: i32) -> (i32, i32) {
    %c0_i32 = arith.constant 0 : i32
    %c0_i32_0 = arith.constant 0 : i32
    %c0_i32_1 = arith.constant 0 : i32
    return %c0_i32, %c0_i32_0 : i32, i32
  }
  func.func @transform_4(%arg0: i32) -> (i32, i32) {
    %c0_i32 = arith.constant 0 : i32
    %c0_i32_0 = arith.constant 0 : i32
    return %arg0, %c0_i32 : i32, i32
  }
}

module attributes {stable_mosaic.version = 11 : i64} {
  func.func @_sigmoid_kernel(%arg0: i32, %arg1: memref<64x128xf32, #tpu.memory_space<vmem>>, %arg2: memref<64x128xf32, #tpu.memory_space<vmem>>) attributes {dimension_semantics = [#tpu.dimension_semantics<parallel>], iteration_bounds = array<i64: 1>, scalar_prefetch = 0 : i64, scratch_operands = 0 : i64, tpu.core_type = #tpu.core_type<tc>, window_params = [{transform_indices = @transform_0, window_bounds = array<i64: 64, 128>}, {transform_indices = @transform_1, window_bounds = array<i64: 64, 128>}]} {
    %c0 = arith.constant 0 : index
    %c0_0 = arith.constant 0 : index
    %0 = vector.load %arg1[%c0, %c0_0] : memref<64x128xf32, #tpu.memory_space<vmem>>, vector<64x128xf32>
    %cst = arith.constant 0.000000e+00 : f32
    %1 = vector.broadcast %cst : f32 to vector<64x128xf32>
    %2 = arith.subf %1, %0 : vector<64x128xf32>
    %3 = math.exp %2 : vector<64x128xf32>
    %cst_1 = arith.constant 1.000000e+00 : f32
    %4 = vector.broadcast %cst_1 : f32 to vector<64x128xf32>
    %5 = arith.addf %4, %3 : vector<64x128xf32>
    %6 = tpu.reciprocal %5 {approx = true} : vector<64x128xf32> -> vector<64x128xf32>
    %cst_2 = arith.constant 0.000000e+00 : f32
    %7 = vector.broadcast %cst_2 : f32 to vector<64x128xf32>
    %8 = arith.maximumf %6, %7 : vector<64x128xf32>
    %cst_3 = arith.constant 1.000000e+00 : f32
    %9 = vector.broadcast %cst_3 : f32 to vector<64x128xf32>
    %10 = arith.minimumf %8, %9 : vector<64x128xf32>
    %c0_4 = arith.constant 0 : index
    %c0_5 = arith.constant 0 : index
    %11 = vector.load %arg2[%c0_4, %c0_5] : memref<64x128xf32, #tpu.memory_space<vmem>>, vector<64x128xf32>
    tpu.vector_store %arg2[%c0_4, %c0_5], %10 {strides = array<i32>} : memref<64x128xf32, #tpu.memory_space<vmem>>, vector<64x128xf32>,
    return
  }
  func.func @transform_0(%arg0: i32) -> (i32, i32) {
    %c0_i32 = arith.constant 0 : i32
    %c0_i32_0 = arith.constant 0 : i32
    return %arg0, %c0_i32 : i32, i32
  }
  func.func @transform_1(%arg0: i32) -> (i32, i32) {
    %c0_i32 = arith.constant 0 : i32
    %c0_i32_0 = arith.constant 0 : i32
    return %arg0, %c0_i32 : i32, i32
  }
}

</mosaic_0001>

<bundles_post_ra>
// kernel: cnn_decoder_forward.12
= control target key start
LH: loop header
LB: loop body
LE: loop exit
PB: predicated region body
PF: predicated region fallthrough
CT: control target
= control target key end

     0   :  { %8 = vsyncpa [#allocation3], 0  ;;  %s371_s0 = inlined_call_operand.hbm [shape: f32[2,32], index: 0, kind: input, shape index: {}]   ;;  %s372_s1 = inlined_call_operand.hbm [shape: bf16[32,512], index: 1, kind: input, shape index: {}]   ;;  %s373_s2 = inlined_call_operand.hbm [shape: f32[1,512], index: 2, kind: input, shape index: {}]   ;;  %s374_s3 = inlined_call_operand.vmem [shape: f32[2,512], index: 3, kind: output, shape index: {}]  }
   0x1   :  { %9 = vsyncpa [#allocation5], 0  ;;  %s332_s12 = smov [#allocation4]  }
   0x2   :  { %s25_s13 = sshll.u32 %s332_s12, 4  ;;  %s26_s13 = int_to_ptr.vmem [resolvable:$true] %s25_s13 }
   0x3   :  { %s276_s14 = scalar_lea.vmem %s26_s13, 1024  ;;  %p281_p1 = scmp.lt.s32.totalorder %s26_s13, %s26_s13 }
   0x4   :  { %p277_p0 = scmp.ne.s32.totalorder %s26_s13, %s276_s14  ;;  %p282_p2 = scmp.lt.s32.totalorder %s276_s14, %s276_s14 }
   0x6   :  { %p283_p3 = por %p282_p2, %p281_p1 }
   0x8   :  { %p284_p4 = pnand %p283_p3, %p277_p0 }
   0xa   :  { %287 = shalt.err (!%p284_p4)
}
   0xb   :  { %s333_s15 = smov 256   ;;  %s334_s16 = smov 16  }
   0xc   :  { %31 = dma.hbm_to_vmem [thread:$0]  %s372_s1, 1024, %s26_s13, [#allocation5], %s333_s15, %s333_s15, %s334_s16  }
   0xd   :  { %s335_s19 = smov [#allocation2]   ;;  %s336_s21 = smov [#allocation6]  }
   0xe   :  { %s16_s20 = sshll.u32 %s335_s19, 4  ;;  %s38_s22 = sshll.u32 %s336_s21, 4  ;;  %s17_s20 = int_to_ptr.vmem [resolvable:$true] %s16_s20  ;;  %s39_s22 = int_to_ptr.vmem [resolvable:$true] %s38_s22 }
   0xf   :  { %s296_s23 = scalar_lea.vmem %s17_s20, 32  ;;  %p301_p6 = scmp.lt.s32.totalorder %s17_s20, %s17_s20 }
  0x10   :  { %p297_p5 = scmp.ne.s32.totalorder %s17_s20, %s296_s23  ;;  %p302_p7 = scmp.lt.s32.totalorder %s296_s23, %s296_s23 }
  0x12   :  { %p303_p8 = por %p302_p7, %p301_p6 }
  0x14   :  { %p304_p9 = pnand %p303_p8, %p297_p5 }
  0x16   :  { %307 = shalt.err (!%p304_p9)
}
  0x17   :  { %19 = dma.hbm_to_vmem [thread:$0]  %s371_s0, 32, %s17_s20, [#allocation3]  }
  0x18   :  { %s316_s26 = scalar_lea.vmem %s39_s22, 64  ;;  %p321_p11 = scmp.lt.s32.totalorder %s39_s22, %s39_s22 }
  0x19   :  { %p317_p10 = scmp.ne.s32.totalorder %s39_s22, %s316_s26  ;;  %p322_p12 = scmp.lt.s32.totalorder %s316_s26, %s316_s26 }
  0x1b   :  { %p323_p13 = por %p322_p12, %p321_p11 }
  0x1d   :  { %p324_p0 = pnand %p323_p13, %p317_p10 }
  0x1f   :  { %327 = shalt.err (!%p324_p0)
}
  0x20   :  { %41 = dma.hbm_to_vmem [thread:$0]  %s373_s2, 64, %s39_s22, [#allocation5]  }
  0x21   :  { %328 = dma.done.wait [#allocation3], 32  }
  0x22   :  { %329 = vsyncadd [#allocation3], 4294967264 }
  0x23   :  { %330 = dma.done.wait [#allocation5], 1088  }
  0x24   :  { %331 = vsyncadd [#allocation5], 4294966208  ;;  %v337_v0 = vmov 0   ;;  %v256_v1 = vld [vmem:[#allocation4 + $0x24] ss:$16 sps:$4 sm:$0xff]   ;;  %vm124_vm0 = vcmask 261120   ;;  %v64_v11 = vlaneseq }
  0x25   :  { %160 = vmatprep.mubr.bf16.mxu0 %v337_v0  ;;  %201 = vmatprep.mubr.bf16.mxu1 %v337_v0  ;;  %v258_v2 = vld [vmem:[#allocation4 + $0x2c] ss:$16 sps:$4 sm:$0xff]   ;;  %v260_v3 = vld [vmem:[#allocation4 + $0x20] ss:$16 sps:$4 sm:$0xff]   ;;  %v261_v4 = vld [vmem:[#allocation4 + $0x28] ss:$16 sps:$4 sm:$0xff]  }
  0x26   :  { %140 = vmatprep.subr.bf16.mxu0 %v256_v1  ;;  %181 = vmatprep.subr.bf16.mxu1 %v258_v2  ;;  %v262_v5 = vld [vmem:[#allocation4 + $0x4] ss:$16 sps:$4 sm:$0xff]   ;;  %v264_v6 = vld [vmem:[#allocation4 + $0xc] ss:$16 sps:$4 sm:$0xff]   ;;  %v266_v7 = vld [vmem:[#allocation4] ss:$16 sps:$4 sm:$0xff]  }
  0x27   :  { %141 = vmatpush1.bf16.msra.mxu0 %v260_v3  ;;  %182 = vmatpush1.bf16.msra.mxu1 %v261_v4  ;;  %v267_v8 = vld [vmem:[#allocation4 + $0x8] ss:$16 sps:$4 sm:$0xff]   ;;  %v52_v9 = vld [vmem:[#allocation2] sm:$0x3]  ;;  %v65_v12 = vshrl.u32 %v64_v11, 7 }
  0x28   :  { %142 = vmatprep.subr.bf16.mxu0 %v262_v5  ;;  %183 = vmatprep.subr.bf16.mxu1 %v264_v6  ;;  %v53_v10 = vpack.c.bf16 %v52_v9, %v52_v9  ;;  %v338_v13 = vmov 1983009808   ;;  %v62_v19 = vld [vmem:[#allocation6] sm:$0xf] }
  0x29   :  { %v217_v14 = vunpack.c.l.s4 %v338_v13  ;;  %v66_v15 = vsub.s32 0, %v65_v12  ;;  %v74_v16 = vsub.s32 2, %v65_v12  ;;  %v70_v17 = vsub.s32 1, %v65_v12 }
  0x2a   :  { %v78_v18 = vsub.s32 3, %v65_v12 }
  0x2b   :  { %143 = vmatpush1.bf16.msra.mxu0 %v266_v7  ;;  %184 = vmatpush1.bf16.msra.mxu1 %v267_v8  ;;  %v218_v20 = vunpack.c.0.s8 %v217_v14  ;;  %v67_v21 = vrot.slane %v62_v19, %v66_v15  ;;  %v75_v22 = vrot.slane %v62_v19, %v74_v16  ;;  %v71_v23 = vrot.slane %v62_v19, %v70_v17 }
  0x2c   :  { %v79_v24 = vrot.slane %v62_v19, %v78_v18 }
  0x2d   :  { %v221_v28 = vsub.s32 %v218_v20, %v65_v12 }
  0x2e   :  { %247 = vmatmul.mubr.msk.bf16.vlgmr.msra.gmra.mxu0 %vm124_vm0, %v53_v10  ;;  %248 = vmatmul.mubr.msk.bf16.vlgmr.msra.gmra.mxu1 %vm124_vm0, %v53_v10 }
  0xee   :  { %v162_v25 = vpop.f32.mrf.mxu0  ;;  %v203_v26 = vpop.f32.mrf.mxu1 }
  0xef   :  { %v163_v30 = vadd.f32 %v162_v25, %v67_v21  ;;  %v204_v31 = vadd.f32 %v203_v26, %v75_v22 }
  0xf0   :  { %v164_v27 = vpop.f32.mrf.mxu0  ;;  %v205_v29 = vpop.f32.mrf.mxu1 }
  0xf1   :  { %v165_v32 = vadd.f32 %v164_v27, %v71_v23  ;;  %v206_v33 = vadd.f32 %v205_v29, %v79_v24 }
  0xf2   :  { %v166_v34 = vpop.f32.mrf.mxu0  ;;  %v207_v35 = vpop.f32.mrf.mxu1 }
  0xf3   :  { %v214_v36 = vcombine.low %v163_v30, %v165_v32  ;;  %v215_v37 = vcombine.low %v204_v31, %v206_v33 }
  0xf4   :  { %v167_v38 = vpop.f32.mrf.mxu0  ;;  %v208_v39 = vpop.f32.mrf.mxu1 }
  0xf5   :  { %v222_v40 = vrot.slane %v214_v36, %v221_v28  ;;  %v229_v41 = vrot.slane %v215_v37, %v221_v28 }
  0xf7   :  { %v230_v42 = vcombine.low %v222_v40, %v229_v41 }
  0xf9   :  { %232 = vst [vmem:[%s374_s3] sm:$0xff] %v230_v42 }
  0xfa   :  { %237 = vsyncpa [#allocation3], 1 }
  0xfb   :  { %238 = vsyncpa [#allocation5], 1 }

// kernel: cnn_decoder_forward.13
= control target key start
LH: loop header
LB: loop body
LE: loop exit
PB: predicated region body
PF: predicated region fallthrough
CT: control target
= control target key end

     0   :  { %10 = vsyncpa [#allocation5], 0  ;;  %s379_s0 = inlined_call_operand.vmem [shape: f32[2,512], index: 0, kind: input, shape index: {}]   ;;  %s380_s1 = inlined_call_operand.hbm [shape: f32[1,512], index: 1, kind: input, shape index: {}]   ;;  %s381_s2 = inlined_call_operand.hbm [shape: f32[1,512], index: 2, kind: input, shape index: {}]   ;;  %s382_s3 = inlined_call_operand.vmem [shape: f32[1,512], index: 3, kind: output, shape index: {0}]   ;;  %s383_s4 = inlined_call_operand.vmem [shape: f32[1,512], index: 4, kind: output, shape index: {1}]  }
   0x1   :  { %11 = vsyncpa [#allocation7], 0  ;;  %s302_s15 = smov [#allocation4]   ;;  %s303_s17 = smov [#allocation6]  }
   0x2   :  { %s20_s16 = sshll.u32 %s302_s15, 4  ;;  %s30_s18 = sshll.u32 %s303_s17, 4  ;;  %s21_s16 = int_to_ptr.vmem [resolvable:$true] %s20_s16  ;;  %s31_s18 = int_to_ptr.vmem [resolvable:$true] %s30_s18 }
   0x3   :  { %s266_s19 = scalar_lea.vmem %s21_s16, 64  ;;  %p271_p1 = scmp.lt.s32.totalorder %s21_s16, %s21_s16 }
   0x4   :  { %p267_p0 = scmp.ne.s32.totalorder %s21_s16, %s266_s19  ;;  %p272_p2 = scmp.lt.s32.totalorder %s266_s19, %s266_s19 }
   0x6   :  { %p273_p3 = por %p272_p2, %p271_p1 }
   0x8   :  { %p274_p4 = pnand %p273_p3, %p267_p0 }
   0xa   :  { %277 = shalt.err (!%p274_p4)
}
   0xb   :  { %23 = dma.hbm_to_vmem [thread:$0]  %s380_s1, 64, %s21_s16, [#allocation5]  }
   0xc   :  { %s286_s22 = scalar_lea.vmem %s31_s18, 64  ;;  %p291_p6 = scmp.lt.s32.totalorder %s31_s18, %s31_s18 }
   0xd   :  { %p287_p5 = scmp.ne.s32.totalorder %s31_s18, %s286_s22  ;;  %p292_p7 = scmp.lt.s32.totalorder %s286_s22, %s286_s22 }
   0xf   :  { %p293_p8 = por %p292_p7, %p291_p6 }
  0x11   :  { %p294_p9 = pnand %p293_p8, %p287_p5 }
  0x13   :  { %297 = shalt.err (!%p294_p9)
}
  0x14   :  { %33 = dma.hbm_to_vmem [thread:$0]  %s381_s2, 64, %s31_s18, [#allocation7]  }
  0x15   :  { %298 = dma.done.wait [#allocation5], 64  }
  0x16   :  { %299 = vsyncadd [#allocation5], 4294967232 }
  0x17   :  { %300 = dma.done.wait [#allocation7], 64  }
  0x18   :  { %301 = vsyncadd [#allocation7], 4294967232  ;;  %v44_v0 = vlaneseq  ;;  %v304_v1 = vmov 1983009808   ;;  %v305_v5 = vmov 0.0   ;;  %v50_v10 = vld [vmem:[%s379_s0] sm:$0xff] }
  0x19   :  { %v55_v2 = vunpack.c.l.s4 %v304_v1  ;;  %v306_v7 = vmov 1966171168   ;;  %v53_v12 = vcombine.high %v50_v10, %v50_v10  ;;  %v139_v14 = vmul.f32 %v50_v10, %v50_v10 }
  0x1a   :  { %vm338_vm0 = vcmp.lt.s32.totalorder %v44_v0, 512  ;;  %v58_v4 = vshrl.u32 %v44_v0, 7  ;;  %v110_v8 = vunpack.c.l.s4 %v306_v7  ;;  %vm74_vm1 = vcmask 1041408  }
  0x1b   :  { %48 = vst.msk [vmem:[#allocation2] sm:$0xf] %vm338_vm0, %v305_v5  ;;  %v56_v6 = vunpack.c.0.s8 %v55_v2  ;;  %49 = vst.msk [vmem:[#allocation3] sm:$0xf] %vm338_vm0, %v305_v5  ;;  %v141_v16 = vcombine.high %v139_v14, %v139_v14 }
  0x1c   :  { %v111_v11 = vunpack.c.0.s8 %v110_v8 }
  0x1d   :  { %v59_v9 = vsub.s32 %v56_v6, %v58_v4 }
  0x1e   :  { %v349_v19 = vsub.s32 %v111_v11, %v58_v4 }
  0x1f   :  { %v60_v13 = vrot.slane %v50_v10, %v59_v9  ;;  %v67_v15 = vrot.slane %v53_v12, %v59_v9  ;;  %v148_v17 = vrot.slane %v139_v14, %v59_v9  ;;  %v155_v21 = vrot.slane %v141_v16, %v59_v9 }
  0x21   :  { %v68_v18 = vcombine.high %v60_v13, %v60_v13  ;;  %v75_v20 = vsel %vm74_vm1, %v60_v13, 0.0  ;;  %v69_v22 = vcombine.high %v67_v15, %v67_v15  ;;  %v89_v26 = vsel %vm74_vm1, %v67_v15, 0.0 }
  0x22   :  { %v76_v23 = vrot.slane %v75_v20, 4  ;;  %v156_v27 = vcombine.high %v148_v17, %v148_v17  ;;  %v162_v28 = vsel %vm74_vm1, %v148_v17, 0.0  ;;  %v90_v30 = vrot.slane %v89_v26, 4 }
  0x23   :  { %v82_v24 = vsel %vm74_vm1, %v68_v18, 0.0  ;;  %v96_v31 = vsel %vm74_vm1, %v69_v22, 0.0  ;;  %v157_v32 = vcombine.high %v155_v21, %v155_v21  ;;  %v163_v35 = vrot.slane %v162_v28, 4 }
  0x24   :  { %v83_v25 = vrot.slane %v82_v24, 4  ;;  %v77_v29 = vadd.f32 %v76_v23, %v75_v20  ;;  %v97_v34 = vrot.slane %v96_v31, 4  ;;  %v169_v36 = vsel %vm74_vm1, %v156_v27, 0.0 }
  0x25   :  { %v91_v38 = vadd.f32 %v90_v30, %v89_v26  ;;  %v170_v39 = vrot.slane %v169_v36, 4  ;;  %v176_v40 = vsel %vm74_vm1, %v155_v21, 0.0  ;;  %v164_v43 = vadd.f32 %v163_v35, %v162_v28 }
  0x26   :  { %v84_v33 = vadd.f32 %v83_v25, %v82_v24  ;;  %v78_v37 = vrot.slane %v77_v29, 2  ;;  %v98_v42 = vadd.f32 %v97_v34, %v96_v31  ;;  %v177_v44 = vrot.slane %v176_v40, 4  ;;  %v51_v24 = vld [vmem:[#allocation2] sm:$0xf]  ;;  %v138_v31 = vld [vmem:[#allocation3] sm:$0xf] }
  0x27   :  { %v92_v46 = vrot.slane %v91_v38, 2  ;;  %v171_v47 = vadd.f32 %v170_v39, %v169_v36  ;;  %v183_v48 = vsel %vm74_vm1, %v157_v32, 0.0  ;;  %v165_v51 = vrot.slane %v164_v43, 2 }
  0x28   :  { %v85_v41 = vrot.slane %v84_v33, 2  ;;  %v79_v45 = vadd.f32 %v78_v37, %v77_v29  ;;  %v99_v50 = vrot.slane %v98_v42, 2  ;;  %v178_v52 = vadd.f32 %v177_v44, %v176_v40 }
  0x29   :  { %v93_v54 = vadd.f32 %v92_v46, %v91_v38  ;;  %v172_v55 = vrot.slane %v171_v47, 2  ;;  %v184_v56 = vrot.slane %v183_v48, 4  ;;  %v166_v59 = vadd.f32 %v165_v51, %v164_v43 }
  0x2a   :  { %v86_v49 = vadd.f32 %v85_v41, %v84_v33  ;;  %v80_v53 = vrot.slane %v79_v45, 1  ;;  %v100_v58 = vadd.f32 %v99_v50, %v98_v42  ;;  %v179_v60 = vrot.slane %v178_v52, 2  ;;  %v231_v42 = vld [vmem:[#allocation4] sm:$0xf] }
  0x2b   :  { %v94_v62 = vrot.slane %v93_v54, 1  ;;  %v173_v63 = vadd.f32 %v172_v55, %v171_v47  ;;  %v185_v0 = vadd.f32 %v184_v56, %v183_v48  ;;  %v167_v4 = vrot.slane %v166_v59, 1 }
  0x2c   :  { %v87_v57 = vrot.slane %v86_v49, 1  ;;  %v81_v61 = vadd.f32 %v80_v53, %v79_v45  ;;  %v101_v2 = vrot.slane %v100_v58, 1  ;;  %v180_v5 = vadd.f32 %v179_v60, %v178_v52  ;;  %v236_v45 = vld [vmem:[#allocation6] sm:$0xf] }
  0x2d   :  { %v95_v6 = vadd.f32 %v94_v62, %v93_v54  ;;  %v174_v7 = vrot.slane %v173_v63, 1  ;;  %v186_v8 = vrot.slane %v185_v0, 2  ;;  %v168_v11 = vadd.f32 %v167_v4, %v166_v59 }
  0x2e   :  { %v88_v1 = vadd.f32 %v87_v57, %v86_v49  ;;  %v102_v9 = vadd.f32 %v101_v2, %v100_v58  ;;  %v181_v12 = vrot.slane %v180_v5, 1 }
  0x2f   :  { %v175_v13 = vadd.f32 %v174_v7, %v173_v63  ;;  %v187_v14 = vadd.f32 %v186_v8, %v185_v0 }
  0x30   :  { %v107_v10 = vcombine.low %v81_v61, %v88_v1  ;;  %v108_v15 = vcombine.low %v95_v6, %v102_v9  ;;  %v182_v17 = vadd.f32 %v181_v12, %v180_v5 }
  0x31   :  { %v188_v18 = vrot.slane %v187_v14, 1  ;;  %v194_v20 = vcombine.low %v168_v11, %v175_v13 }
  0x32   :  { %v115_v16 = vrot.slane %v107_v10, %v349_v19  ;;  %v122_v21 = vrot.slane %v108_v15, %v349_v19 }
  0x33   :  { %v189_v22 = vadd.f32 %v188_v18, %v187_v14  ;;  %v202_v26 = vrot.slane %v194_v20, %v349_v19 }
  0x34   :  { %v123_v23 = vcombine.low %v115_v16, %v122_v21 }
  0x35   :  { %v195_v25 = vcombine.low %v182_v17, %v189_v22 }
  0x36   :  { %v130_v27 = vrot.slane %v123_v23, %v349_v19 }
  0x37   :  { %v209_v28 = vrot.slane %v195_v25, %v349_v19 }
  0x38   :  { %v132_v29 = vadd.f32 %v130_v27, %v51_v24 }
  0x39   :  { %v210_v30 = vcombine.low %v202_v26, %v209_v28 }
  0x3a   :  { %137 = vst.msk [vmem:[#allocation2] sm:$0xf] %vm338_vm0, %v132_v29 }
  0x3b   :  { %v217_v32 = vrot.slane %v210_v30, %v349_v19 }
  0x3d   :  { %v219_v33 = vadd.f32 %v217_v32, %v138_v31 }
  0x3f   :  { %220 = vst.msk [vmem:[#allocation3] sm:$0xf] %vm338_vm0, %v219_v33 }
  0x41   :  { %v224_v34 = vld [vmem:[#allocation2] sm:$0xf] }
  0x42   :  { %v225_v35 = vmul.f32 0.5, %v224_v34 }
  0x44   :  { %v228_v36 = vmul.f32 %v225_v35, %v225_v35 }
  0x46   :  { %v226_v37 = vld [vmem:[#allocation3] sm:$0xf] }
  0x47   :  { %v227_v38 = vmul.f32 0.5, %v226_v37 }
  0x49   :  { %v229_v39 = vsub.f32 %v227_v38, %v228_v36 }
  0x4b   :  { %v230_v40 = vmax.f32 %v229_v39, 0.0 }
  0x4d   :  { %v232_v41 = vadd.f32 1e-05, %v230_v40 }
  0x4f   :  { %256 = vrsqrt.f32 %v232_v41 }
  0x5c   :  { %v257_v43 = vpop.eup %256 }
  0x5d   :  { %v234_v44 = vmul.f32 %v257_v43, %v231_v42 }
  0x5f   :  { %235 = vst.msk [vmem:[%s382_s3] sm:$0xf] %vm338_vm0, %v234_v44  ;;  %v237_v19 = vmul.f32 %v234_v44, %v225_v35 }
  0x61   :  { %v238_v46 = vsub.f32 %v236_v45, %v237_v19 }
  0x63   :  { %239 = vst.msk [vmem:[%s383_s4] sm:$0xf] %vm338_vm0, %v238_v46 }
  0x64   :  { %248 = vsyncpa [#allocation5], 1 }
  0x65   :  { %249 = vsyncpa [#allocation7], 1 }

// kernel: cnn_decoder_forward.15
= control target key start
LH: loop header
LB: loop body
LE: loop exit
PB: predicated region body
PF: predicated region fallthrough
CT: control target
= control target key end

     0   :  { %10 = vsyncpa [#allocation5], 0  ;;  %s233_s0 = inlined_call_operand.vmem [shape: f32[32,64], index: 0, kind: input, shape index: {}]   ;;  %s234_s1 = inlined_call_operand.hbm [shape: f32[1,64], index: 1, kind: input, shape index: {}]   ;;  %s235_s2 = inlined_call_operand.hbm [shape: f32[1,64], index: 2, kind: input, shape index: {}]   ;;  %s236_s3 = inlined_call_operand.vmem [shape: f32[1,64], index: 3, kind: output, shape index: {0}]   ;;  %s237_s4 = inlined_call_operand.vmem [shape: f32[1,64], index: 4, kind: output, shape index: {1}]  }
   0x1   :  { %11 = vsyncpa [#allocation7], 0  ;;  %s167_s15 = smov [#allocation4]   ;;  %s168_s17 = smov [#allocation6]  }
   0x2   :  { %s20_s16 = sshll.u32 %s167_s15, 4  ;;  %s30_s18 = sshll.u32 %s168_s17, 4  ;;  %s21_s16 = int_to_ptr.vmem [resolvable:$true] %s20_s16  ;;  %s31_s18 = int_to_ptr.vmem [resolvable:$true] %s30_s18 }
   0x3   :  { %s131_s19 = scalar_lea.vmem %s21_s16, 16  ;;  %s135_s20 = scalar_lea.vmem %s21_s16, 32 }
   0x4   :  { %p132_p0 = scmp.ne.s32.totalorder %s21_s16, %s131_s19  ;;  %p136_p1 = scmp.lt.s32.totalorder %s21_s16, %s21_s16 }
   0x5   :  { %p137_p2 = scmp.lt.s32.totalorder %s135_s20, %s131_s19 }
   0x7   :  { %p138_p3 = por %p137_p2, %p136_p1 }
   0x9   :  { %p139_p4 = pnand %p138_p3, %p132_p0 }
   0xb   :  { %142 = shalt.err (!%p139_p4)
}
   0xc   :  { %23 = dma.hbm_to_vmem [thread:$0]  %s234_s1, 16, %s21_s16, [#allocation5]  }
   0xd   :  { %s151_s23 = scalar_lea.vmem %s31_s18, 16  ;;  %s155_s24 = scalar_lea.vmem %s31_s18, 32 }
   0xe   :  { %p152_p5 = scmp.ne.s32.totalorder %s31_s18, %s151_s23  ;;  %p156_p6 = scmp.lt.s32.totalorder %s31_s18, %s31_s18 }
   0xf   :  { %p157_p7 = scmp.lt.s32.totalorder %s155_s24, %s151_s23 }
  0x11   :  { %p158_p8 = por %p157_p7, %p156_p6 }
  0x13   :  { %p159_p9 = pnand %p158_p8, %p152_p5 }
  0x15   :  { %162 = shalt.err (!%p159_p9)
}
  0x16   :  { %33 = dma.hbm_to_vmem [thread:$0]  %s235_s2, 16, %s31_s18, [#allocation7]  }
  0x17   :  { %163 = dma.done.wait [#allocation5], 16  }
  0x18   :  { %164 = vsyncadd [#allocation5], 4294967280 }
  0x19   :  { %165 = dma.done.wait [#allocation7], 16  }
  0x1a   :  { %166 = vsyncadd [#allocation7], 4294967280  ;;  %vm44_vm0 = vcmask 516096   ;;  %v169_v0 = vmov 0.0   ;;  %vm52_vm1 = vcmask 523264   ;;  %v47_v1 = vld [vmem:[%s233_s0] sm:$0xff] }
  0x1b   :  { %45 = vst.msk [vmem:[#allocation2] sm:$0x1] %vm44_vm0, %v169_v0  ;;  %46 = vst.msk [vmem:[#allocation3] sm:$0x1] %vm44_vm0, %v169_v0  ;;  %v48_v2 = vld [vmem:[%s233_s0 + $0x8] sm:$0xff]  ;;  %v49_v3 = vld [vmem:[%s233_s0 + $0x10] sm:$0xff]  ;;  %v70_v8 = vmul.f32 %v47_v1, %v47_v1 }
  0x1c   :  { %v50_v4 = vld [vmem:[%s233_s0 + $0x18] sm:$0xff]  ;;  %v53_v5 = vsel %vm52_vm1, %v47_v1, 0.0  ;;  %v54_v6 = vsel %vm52_vm1, %v48_v2, 0.0  ;;  %v56_v7 = vsel %vm52_vm1, %v49_v3, 0.0  ;;  %v71_v10 = vmul.f32 %v48_v2, %v48_v2  ;;  %v99_v47 = vld [vmem:[#allocation4] sm:$0x1] }
  0x1d   :  { %v55_v9 = vadd.f32 %v54_v6, %v53_v5  ;;  %v72_v11 = vmul.f32 %v49_v3, %v49_v3  ;;  %v58_v12 = vsel %vm52_vm1, %v50_v4, 0.0  ;;  %v73_v13 = vmul.f32 %v50_v4, %v50_v4  ;;  %v104_v50 = vld [vmem:[#allocation6] sm:$0x1] }
  0x1e   :  { %v74_v14 = vsel %vm52_vm1, %v70_v8, 0.0  ;;  %v75_v16 = vsel %vm52_vm1, %v71_v10, 0.0 }
  0x1f   :  { %v57_v15 = vadd.f32 %v56_v7, %v55_v9  ;;  %v77_v17 = vsel %vm52_vm1, %v72_v11, 0.0  ;;  %v76_v18 = vadd.f32 %v75_v16, %v74_v14  ;;  %v79_v20 = vsel %vm52_vm1, %v73_v13, 0.0 }
  0x21   :  { %v59_v19 = vadd.f32 %v58_v12, %v57_v15  ;;  %v78_v21 = vadd.f32 %v77_v17, %v76_v18 }
  0x22   :  { %v51_v31 = vld [vmem:[#allocation2] sm:$0x1]  ;;  %v69_v36 = vld [vmem:[#allocation3] sm:$0x1] }
  0x23   :  { %v60_v22 = vrot.slane %v59_v19, 4  ;;  %v80_v23 = vadd.f32 %v79_v20, %v78_v21 }
  0x25   :  { %v61_v24 = vadd.f32 %v60_v22, %v59_v19  ;;  %v81_v25 = vrot.slane %v80_v23, 4 }
  0x27   :  { %v62_v26 = vrot.slane %v61_v24, 2  ;;  %v82_v27 = vadd.f32 %v81_v25, %v80_v23 }
  0x29   :  { %v63_v28 = vadd.f32 %v62_v26, %v61_v24  ;;  %v83_v29 = vrot.slane %v82_v27, 2 }
  0x2b   :  { %v64_v30 = vrot.slane %v63_v28, 1  ;;  %v84_v32 = vadd.f32 %v83_v29, %v82_v27 }
  0x2d   :  { %v65_v33 = vadd.f32 %v64_v30, %v63_v28  ;;  %v85_v34 = vrot.slane %v84_v32, 1 }
  0x2f   :  { %v66_v35 = vadd.f32 %v65_v33, %v51_v31  ;;  %v86_v37 = vadd.f32 %v85_v34, %v84_v32 }
  0x31   :  { %68 = vst.msk [vmem:[#allocation2] sm:$0x1] %vm44_vm0, %v66_v35  ;;  %v87_v38 = vadd.f32 %v86_v37, %v69_v36 }
  0x33   :  { %88 = vst.msk [vmem:[#allocation3] sm:$0x1] %vm44_vm0, %v87_v38 }
  0x38   :  { %v92_v39 = vld [vmem:[#allocation2] sm:$0x1] }
  0x39   :  { %v93_v40 = vmul.f32 0.03125, %v92_v39 }
  0x3a   :  { %v94_v41 = vld [vmem:[#allocation3] sm:$0x1] }
  0x3b   :  { %v96_v42 = vmul.f32 %v93_v40, %v93_v40  ;;  %v95_v43 = vmul.f32 0.03125, %v94_v41 }
  0x3d   :  { %v97_v44 = vsub.f32 %v95_v43, %v96_v42 }
  0x3f   :  { %v98_v45 = vmax.f32 %v97_v44, 0.0 }
  0x41   :  { %v100_v46 = vadd.f32 1e-05, %v98_v45 }
  0x43   :  { %121 = vrsqrt.f32 %v100_v46 }
  0x50   :  { %v122_v48 = vpop.eup %121 }
  0x51   :  { %v102_v49 = vmul.f32 %v122_v48, %v99_v47 }
  0x53   :  { %103 = vst.msk [vmem:[%s236_s3] sm:$0x1] %vm44_vm0, %v102_v49  ;;  %v105_v51 = vmul.f32 %v102_v49, %v93_v40 }
  0x55   :  { %v106_v52 = vsub.f32 %v104_v50, %v105_v51 }
  0x57   :  { %107 = vst.msk [vmem:[%s237_s4] sm:$0x1] %vm44_vm0, %v106_v52 }
  0x58   :  { %116 = vsyncpa [#allocation5], 1 }
  0x59   :  { %117 = vsyncpa [#allocation7], 1 }

// kernel: cnn_decoder_forward.16
= control target key start
LH: loop header
LB: loop body
LE: loop exit
PB: predicated region body
PF: predicated region fallthrough
CT: control target
= control target key end

     0   :  { %9 = vsyncpa [#allocation3], 0  ;;  %s366_s15 = smov [#allocation2]   ;;  %s464_s0 = inlined_call_operand.vmem [shape: f32[32,64], index: 0, kind: input, shape index: {}]   ;;  %s465_s1 = inlined_call_operand.hbm [shape: bf16[64,512], index: 1, kind: input, shape index: {}]   ;;  %s466_s2 = inlined_call_operand.vmem [shape: f32[1,64], index: 2, kind: input, shape index: {}]   ;;  %s467_s3 = inlined_call_operand.vmem [shape: f32[1,64], index: 3, kind: input, shape index: {}]   ;;  %s468_s4 = inlined_call_operand.vmem [shape: f32[32,512], index: 4, kind: output, shape index: {}]  }
   0x1   :  { %s17_s16 = sshll.u32 %s366_s15, 4  ;;  %s18_s16 = int_to_ptr.vmem [resolvable:$true] %s17_s16 }
   0x2   :  { %s352_s17 = scalar_lea.vmem %s18_s16, 2048  ;;  %p357_p1 = scmp.lt.s32.totalorder %s18_s16, %s18_s16 }
   0x3   :  { %p353_p0 = scmp.ne.s32.totalorder %s18_s16, %s352_s17  ;;  %p358_p2 = scmp.lt.s32.totalorder %s352_s17, %s352_s17 }
   0x5   :  { %p359_p3 = por %p358_p2, %p357_p1 }
   0x7   :  { %p360_p4 = pnand %p359_p3, %p353_p0 }
   0x9   :  { %363 = shalt.err (!%p360_p4)
}
   0xa   :  { %s367_s18 = smov 256   ;;  %s368_s19 = smov 16  }
   0xb   :  { %23 = dma.hbm_to_vmem [thread:$0]  %s465_s1, 2048, %s18_s16, [#allocation3], %s367_s18, %s367_s18, %s368_s19  }
   0xc   :  { %364 = dma.done.wait [#allocation3], 2048  }
   0xd   :  { %365 = vsyncadd [#allocation3], 4294965248  ;;  %v369_v0 = vmov 0   ;;  %v320_v1 = vld [vmem:[#allocation2 + $0x64] ss:$16 sps:$4 sm:$0xff]   ;;  %v33_v17 = vld [vmem:[%s464_s0 + $0x8] sm:$0xff] }
   0xe   :  { %199 = vmatprep.mubr.bf16.mxu0 %v369_v0  ;;  %252 = vmatprep.mubr.bf16.mxu1 %v369_v0  ;;  %v322_v2 = vld [vmem:[#allocation2 + $0x6c] ss:$16 sps:$4 sm:$0xff]   ;;  %v324_v3 = vld [vmem:[#allocation2 + $0x60] ss:$16 sps:$4 sm:$0xff]   ;;  %v325_v4 = vld [vmem:[#allocation2 + $0x68] ss:$16 sps:$4 sm:$0xff]  }
   0xf   :  { %175 = vmatprep.subr.bf16.mxu0 %v320_v1  ;;  %228 = vmatprep.subr.bf16.mxu1 %v322_v2  ;;  %v326_v5 = vld [vmem:[#allocation2 + $0x44] ss:$16 sps:$4 sm:$0xff]   ;;  %v328_v6 = vld [vmem:[#allocation2 + $0x4c] ss:$16 sps:$4 sm:$0xff]   ;;  %v330_v7 = vld [vmem:[#allocation2 + $0x40] ss:$16 sps:$4 sm:$0xff]  }
  0x10   :  { %176 = vmatpush1.bf16.msra.mxu0 %v324_v3  ;;  %229 = vmatpush1.bf16.msra.mxu1 %v325_v4  ;;  %v331_v8 = vld [vmem:[#allocation2 + $0x48] ss:$16 sps:$4 sm:$0xff]   ;;  %v332_v9 = vld [vmem:[#allocation2 + $0x24] ss:$16 sps:$4 sm:$0xff]   ;;  %v334_v10 = vld [vmem:[#allocation2 + $0x2c] ss:$16 sps:$4 sm:$0xff]  }
  0x11   :  { %177 = vmatprep.subr.bf16.mxu0 %v326_v5  ;;  %230 = vmatprep.subr.bf16.mxu1 %v328_v6  ;;  %v336_v11 = vld [vmem:[#allocation2 + $0x20] ss:$16 sps:$4 sm:$0xff]   ;;  %v337_v12 = vld [vmem:[#allocation2 + $0x28] ss:$16 sps:$4 sm:$0xff]   ;;  %v338_v13 = vld [vmem:[#allocation2 + $0x4] ss:$16 sps:$4 sm:$0xff]  }
  0x12   :  { %v340_v14 = vld [vmem:[#allocation2 + $0xc] ss:$16 sps:$4 sm:$0xff]   ;;  %v342_v15 = vld [vmem:[#allocation2] ss:$16 sps:$4 sm:$0xff]   ;;  %v343_v20 = vld [vmem:[#allocation2 + $0x8] ss:$16 sps:$4 sm:$0xff]  }
  0x13   :  { %v32_v16 = vld [vmem:[%s464_s0] sm:$0xff]  ;;  %v34_v23 = vld [vmem:[%s464_s0 + $0x10] sm:$0xff]  ;;  %v35_v24 = vld [vmem:[%s464_s0 + $0x18] sm:$0xff]  ;;  %vm160_vm0 = vcmask 523264  }
  0x14   :  { %178 = vmatpush1.bf16.msra.mxu0 %v330_v7  ;;  %231 = vmatpush1.bf16.msra.mxu1 %v331_v8  ;;  %v294_v18 = vld [vmem:[%s466_s2] ss:$0 sm:$0xff] }
  0x15   :  { %179 = vmatprep.subr.bf16.mxu0 %v332_v9  ;;  %232 = vmatprep.subr.bf16.mxu1 %v334_v10  ;;  %v295_v19 = vld [vmem:[%s467_s3] ss:$0 sm:$0xff]  ;;  %v44_v21 = vmul.f32 %v294_v18, %v32_v16  ;;  %v45_v22 = vmul.f32 %v294_v18, %v33_v17  ;;  %v46_v25 = vmul.f32 %v294_v18, %v34_v23 }
  0x16   :  { %v47_v26 = vmul.f32 %v294_v18, %v35_v24 }
  0x17   :  { %v54_v27 = vadd.f32 %v295_v19, %v44_v21  ;;  %v55_v28 = vadd.f32 %v295_v19, %v45_v22  ;;  %v56_v31 = vadd.f32 %v295_v19, %v46_v25 }
  0x18   :  { %180 = vmatpush1.bf16.msra.mxu0 %v336_v11  ;;  %233 = vmatpush1.bf16.msra.mxu1 %v337_v12  ;;  %v57_v32 = vadd.f32 %v295_v19, %v47_v26 }
  0x19   :  { %181 = vmatprep.subr.bf16.mxu0 %v338_v13  ;;  %234 = vmatprep.subr.bf16.mxu1 %v340_v14  ;;  %v58_v29 = vmax.f32 %v54_v27, 0.0  ;;  %v59_v30 = vmax.f32 %v55_v28, 0.0  ;;  %v60_v34 = vmax.f32 %v56_v31, 0.0 }
  0x1a   :  { %v61_v35 = vmax.f32 %v57_v32, 0.0 }
  0x1b   :  { %v62_v33 = vpack.c.bf16 %v59_v30, %v58_v29 }
  0x1c   :  { %182 = vmatpush1.bf16.msra.mxu0 %v342_v15  ;;  %235 = vmatpush1.bf16.msra.mxu1 %v343_v20  ;;  %v63_v36 = vpack.c.bf16 %v61_v35, %v60_v34 }
  0x1f   :  { %312 = vmatmul.mubr.msk.bf16.vlgmr.msra.gmra.mxu0 %vm160_vm0, %v62_v33  ;;  %314 = vmatmul.mubr.msk.bf16.vlgmr.msra.gmra.mxu1 %vm160_vm0, %v62_v33 }
  0x20   :  { %209 = vmatprep.mubr.bf16.mxu0 %v369_v0  ;;  %262 = vmatprep.mubr.bf16.mxu1 %v369_v0 }
  0x27   :  { %313 = vmatmul.mubr.msk.bf16.gmra.mxu0 %vm160_vm0, %v63_v36  ;;  %315 = vmatmul.mubr.msk.bf16.gmra.mxu1 %vm160_vm0, %v63_v36 }
  0xdf   :  { %v201_v37 = vpop.f32.mrf.mxu0  ;;  %v254_v38 = vpop.f32.mrf.mxu1 }
  0xe0   :  { %273 = vst [vmem:[%s468_s4] sm:$0xff] %v201_v37  ;;  %275 = vst [vmem:[%s468_s4 + $0x10] sm:$0xff] %v254_v38 }
  0xe1   :  { %v203_v39 = vpop.f32.mrf.mxu0  ;;  %v256_v40 = vpop.f32.mrf.mxu1 }
  0xe2   :  { %274 = vst [vmem:[%s468_s4 + $0x8] sm:$0xff] %v203_v39  ;;  %276 = vst [vmem:[%s468_s4 + $0x18] sm:$0xff] %v256_v40 }
  0xe3   :  { %v205_v41 = vpop.f32.mrf.mxu0  ;;  %v258_v42 = vpop.f32.mrf.mxu1 }
  0xe4   :  { %277 = vst [vmem:[%s468_s4 + $0x20] sm:$0xff] %v205_v41  ;;  %279 = vst [vmem:[%s468_s4 + $0x30] sm:$0xff] %v258_v42 }
  0xe5   :  { %v207_v43 = vpop.f32.mrf.mxu0  ;;  %v260_v44 = vpop.f32.mrf.mxu1 }
  0xe6   :  { %278 = vst [vmem:[%s468_s4 + $0x28] sm:$0xff] %v207_v43  ;;  %280 = vst [vmem:[%s468_s4 + $0x38] sm:$0xff] %v260_v44 }
  0xe7   :  { %v211_v45 = vpop.f32.mrf.mxu0  ;;  %v264_v46 = vpop.f32.mrf.mxu1 }
  0xe8   :  { %281 = vst [vmem:[%s468_s4 + $0x40] sm:$0xff] %v211_v45  ;;  %283 = vst [vmem:[%s468_s4 + $0x50] sm:$0xff] %v264_v46 }
  0xe9   :  { %v213_v47 = vpop.f32.mrf.mxu0  ;;  %v266_v48 = vpop.f32.mrf.mxu1 }
  0xea   :  { %282 = vst [vmem:[%s468_s4 + $0x48] sm:$0xff] %v213_v47  ;;  %284 = vst [vmem:[%s468_s4 + $0x58] sm:$0xff] %v266_v48 }
  0xeb   :  { %v215_v49 = vpop.f32.mrf.mxu0  ;;  %v268_v50 = vpop.f32.mrf.mxu1 }
  0xec   :  { %285 = vst [vmem:[%s468_s4 + $0x60] sm:$0xff] %v215_v49  ;;  %287 = vst [vmem:[%s468_s4 + $0x70] sm:$0xff] %v268_v50 }
  0xed   :  { %v217_v51 = vpop.f32.mrf.mxu0  ;;  %v270_v52 = vpop.f32.mrf.mxu1 }
  0xee   :  { %286 = vst [vmem:[%s468_s4 + $0x68] sm:$0xff] %v217_v51  ;;  %288 = vst [vmem:[%s468_s4 + $0x78] sm:$0xff] %v270_v52 }
  0xef   :  { %293 = vsyncpa [#allocation3], 1 }

// kernel: cnn_decoder_forward.14
= control target key start
LH: loop header
LB: loop body
LE: loop exit
PB: predicated region body
PF: predicated region fallthrough
CT: control target
= control target key end

     0   :  { %9 = vsyncpa [#allocation3], 0  ;;  %s2330_s15 = smov [#allocation2]   ;;  %s2425_s0 = inlined_call_operand.vmem [shape: f32[2,512], index: 0, kind: input, shape index: {}]   ;;  %s2426_s1 = inlined_call_operand.hbm [shape: bf16[512,1024], index: 1, kind: input, shape index: {}]   ;;  %s2427_s2 = inlined_call_operand.vmem [shape: f32[1,512], index: 2, kind: input, shape index: {}]   ;;  %s2428_s3 = inlined_call_operand.vmem [shape: f32[1,512], index: 3, kind: input, shape index: {}]   ;;  %s2429_s4 = inlined_call_operand.vmem [shape: f32[2,1024], index: 4, kind: output, shape index: {}]  }
   0x1   :  { %s17_s16 = sshll.u32 %s2330_s15, 4  ;;  %s18_s16 = int_to_ptr.vmem [resolvable:$true] %s17_s16 }
   0x2   :  { %s2316_s17 = scalar_lea.vmem %s18_s16, 32768  ;;  %p2321_p1 = scmp.lt.s32.totalorder %s18_s16, %s18_s16 }
   0x3   :  { %p2317_p0 = scmp.ne.s32.totalorder %s18_s16, %s2316_s17  ;;  %p2322_p2 = scmp.lt.s32.totalorder %s2316_s17, %s2316_s17 }
   0x5   :  { %p2323_p3 = por %p2322_p2, %p2321_p1 }
   0x7   :  { %p2324_p4 = pnand %p2323_p3, %p2317_p0 }
   0x9   :  { %2327 = shalt.err (!%p2324_p4)
}
   0xa   :  { %s2331_s18 = smov 512   ;;  %s2332_s19 = smov 32  }
   0xb   :  { %23 = dma.hbm_to_vmem [thread:$0]  %s2426_s1, 32768, %s18_s16, [#allocation3], %s2331_s18, %s2331_s18, %s2332_s19  }
   0xc   :  { %2328 = dma.done.wait [#allocation3], 32768  }
   0xd   :  { %2329 = vsyncadd [#allocation3], 4294934528  ;;  %v189_v0 = vld [vmem:[#allocation2 + $0x1c0] sm:$0xff]  ;;  %v35_v32 = vlaneseq  ;;  %v2333_v38 = vmov 1983009808  }
   0xe   :  { %v193_v1 = vld [vmem:[#allocation2 + $0x1e0] sm:$0xff]  ;;  %v54_v39 = vunpack.c.l.s4 %v2333_v38 }
   0xf   :  { %v317_v2 = vld [vmem:[#allocation2 + $0x5c0] sm:$0xff]  ;;  %v2105_v3 = vcombine.high %v189_v0, %v193_v1  ;;  %v2104_v5 = vcombine.low %v189_v0, %v193_v1  ;;  %v36_v43 = vshrl.u32 %v35_v32, 7 }
  0x10   :  { %v321_v4 = vld [vmem:[#allocation2 + $0x5e0] sm:$0xff]  ;;  %v55_v49 = vunpack.c.0.s8 %v54_v39 }
  0x11   :  { %v181_v6 = vld [vmem:[#allocation2 + $0x180] sm:$0xff]  ;;  %v2233_v8 = vcombine.high %v317_v2, %v321_v4  ;;  %v2232_v9 = vcombine.low %v317_v2, %v321_v4  ;;  %1669 = vmatprep.subr.bf16.mxu0 %v2105_v3  ;;  %v37_v53 = vsub.s32 0, %v36_v43  ;;  %v41_v54 = vsub.s32 1, %v36_v43 }
  0x12   :  { %v185_v7 = vld [vmem:[#allocation2 + $0x1a0] sm:$0xff]  ;;  %1670 = vmatpush1.bf16.msra.mxu0 %v2104_v5  ;;  %v45_v57 = vsub.s32 2, %v36_v43  ;;  %v49_v58 = vsub.s32 3, %v36_v43  ;;  %v2365_v63 = vsub.s32 %v55_v49, %v36_v43 }
  0x13   :  { %v2097_v10 = vcombine.high %v181_v6, %v185_v7  ;;  %v309_v11 = vld [vmem:[#allocation2 + $0x580] sm:$0xff]  ;;  %1710 = vmatprep.subr.bf16.mxu1 %v2233_v8  ;;  %v2096_v18 = vcombine.low %v181_v6, %v185_v7 }
  0x14   :  { %v313_v12 = vld [vmem:[#allocation2 + $0x5a0] sm:$0xff]  ;;  %1711 = vmatpush1.bf16.msra.mxu1 %v2232_v9 }
  0x15   :  { %v173_v13 = vld [vmem:[#allocation2 + $0x140] sm:$0xff]  ;;  %v2225_v14 = vcombine.high %v309_v11, %v313_v12  ;;  %1671 = vmatprep.subr.bf16.mxu0 %v2097_v10  ;;  %v2224_v19 = vcombine.low %v309_v11, %v313_v12 }
  0x16   :  { %v177_v15 = vld [vmem:[#allocation2 + $0x160] sm:$0xff]  ;;  %1672 = vmatpush1.bf16.msra.mxu0 %v2096_v18 }
  0x17   :  { %v301_v16 = vld [vmem:[#allocation2 + $0x540] sm:$0xff]  ;;  %v2089_v20 = vcombine.high %v173_v13, %v177_v15  ;;  %1712 = vmatprep.subr.bf16.mxu1 %v2225_v14  ;;  %v2088_v26 = vcombine.low %v173_v13, %v177_v15 }
  0x18   :  { %v305_v17 = vld [vmem:[#allocation2 + $0x560] sm:$0xff]  ;;  %1713 = vmatpush1.bf16.msra.mxu1 %v2224_v19 }
  0x19   :  { %v2217_v21 = vcombine.high %v301_v16, %v305_v17  ;;  %v165_v22 = vld [vmem:[#allocation2 + $0x100] sm:$0xff]  ;;  %1673 = vmatprep.subr.bf16.mxu0 %v2089_v20  ;;  %v2216_v27 = vcombine.low %v301_v16, %v305_v17 }
  0x1a   :  { %v169_v23 = vld [vmem:[#allocation2 + $0x120] sm:$0xff]  ;;  %1674 = vmatpush1.bf16.msra.mxu0 %v2088_v26 }
  0x1b   :  { %v293_v24 = vld [vmem:[#allocation2 + $0x500] sm:$0xff]  ;;  %v2081_v28 = vcombine.high %v165_v22, %v169_v23  ;;  %1714 = vmatprep.subr.bf16.mxu1 %v2217_v21  ;;  %v2080_v35 = vcombine.low %v165_v22, %v169_v23 }
  0x1c   :  { %v297_v25 = vld [vmem:[#allocation2 + $0x520] sm:$0xff]  ;;  %1715 = vmatpush1.bf16.msra.mxu1 %v2216_v27 }
  0x1d   :  { %v2209_v29 = vcombine.high %v293_v24, %v297_v25  ;;  %v157_v30 = vld [vmem:[#allocation2 + $0xc0] sm:$0xff]  ;;  %1675 = vmatprep.subr.bf16.mxu0 %v2081_v28  ;;  %v2208_v36 = vcombine.low %v293_v24, %v297_v25 }
  0x1e   :  { %v161_v31 = vld [vmem:[#allocation2 + $0xe0] sm:$0xff]  ;;  %1676 = vmatpush1.bf16.msra.mxu0 %v2080_v35 }
  0x1f   :  { %v285_v33 = vld [vmem:[#allocation2 + $0x4c0] sm:$0xff]  ;;  %v2073_v37 = vcombine.high %v157_v30, %v161_v31  ;;  %1716 = vmatprep.subr.bf16.mxu1 %v2209_v29  ;;  %v2072_v46 = vcombine.low %v157_v30, %v161_v31 }
  0x20   :  { %v289_v34 = vld [vmem:[#allocation2 + $0x4e0] sm:$0xff]  ;;  %1717 = vmatpush1.bf16.msra.mxu1 %v2208_v36 }
  0x21   :  { %v2201_v40 = vcombine.high %v285_v33, %v289_v34  ;;  %v149_v41 = vld [vmem:[#allocation2 + $0x80] sm:$0xff]  ;;  %1677 = vmatprep.subr.bf16.mxu0 %v2073_v37  ;;  %v2200_v47 = vcombine.low %v285_v33, %v289_v34 }
  0x22   :  { %v153_v42 = vld [vmem:[#allocation2 + $0xa0] sm:$0xff]  ;;  %1678 = vmatpush1.bf16.msra.mxu0 %v2072_v46 }
  0x23   :  { %v277_v44 = vld [vmem:[#allocation2 + $0x480] sm:$0xff]  ;;  %v2065_v48 = vcombine.high %v149_v41, %v153_v42  ;;  %1718 = vmatprep.subr.bf16.mxu1 %v2201_v40  ;;  %v2064_v59 = vcombine.low %v149_v41, %v153_v42 }
  0x24   :  { %v281_v45 = vld [vmem:[#allocation2 + $0x4a0] sm:$0xff]  ;;  %1719 = vmatpush1.bf16.msra.mxu1 %v2200_v47 }
  0x25   :  { %v2193_v50 = vcombine.high %v277_v44, %v281_v45  ;;  %v141_v51 = vld [vmem:[#allocation2 + $0x40] sm:$0xff]  ;;  %1679 = vmatprep.subr.bf16.mxu0 %v2065_v48  ;;  %v2192_v60 = vcombine.low %v277_v44, %v281_v45 }
  0x26   :  { %v145_v52 = vld [vmem:[#allocation2 + $0x60] sm:$0xff]  ;;  %1680 = vmatpush1.bf16.msra.mxu0 %v2064_v59 }
  0x27   :  { %v269_v55 = vld [vmem:[#allocation2 + $0x440] sm:$0xff]  ;;  %v2057_v61 = vcombine.high %v141_v51, %v145_v52  ;;  %1720 = vmatprep.subr.bf16.mxu1 %v2193_v50  ;;  %v2056_v1 = vcombine.low %v141_v51, %v145_v52 }
  0x28   :  { %v273_v56 = vld [vmem:[#allocation2 + $0x460] sm:$0xff]  ;;  %1721 = vmatpush1.bf16.msra.mxu1 %v2192_v60 }
  0x29   :  { %v32_v62 = vld [vmem:[%s2427_s2] sm:$0xf]  ;;  %v2185_v0 = vcombine.high %v269_v55, %v273_v56  ;;  %v2184_v13 = vcombine.low %v269_v55, %v273_v56  ;;  %1681 = vmatprep.subr.bf16.mxu0 %v2057_v61 }
  0x2a   :  { %v133_v2 = vld [vmem:[#allocation2] sm:$0xff]  ;;  %v38_v5 = vrot.slane %v32_v62, %v37_v53  ;;  %v42_v6 = vrot.slane %v32_v62, %v41_v54  ;;  %v46_v9 = vrot.slane %v32_v62, %v45_v57  ;;  %v50_v10 = vrot.slane %v32_v62, %v49_v58  ;;  %1682 = vmatpush1.bf16.msra.mxu0 %v2056_v1 }
  0x2b   :  { %v137_v3 = vld [vmem:[#allocation2 + $0x20] sm:$0xff]  ;;  %1722 = vmatprep.subr.bf16.mxu1 %v2185_v0 }
  0x2c   :  { %v33_v4 = vld [vmem:[%s2428_s3] sm:$0xf]  ;;  %v51_v14 = vcombine.low %v38_v5, %v42_v6  ;;  %v2049_v17 = vcombine.high %v133_v2, %v137_v3  ;;  %v52_v18 = vcombine.low %v46_v9, %v50_v10  ;;  %v2048_v29 = vcombine.low %v133_v2, %v137_v3  ;;  %1723 = vmatpush1.bf16.msra.mxu1 %v2184_v13 }
  0x2d   :  { %v261_v7 = vld [vmem:[#allocation2 + $0x400] sm:$0xff]  ;;  %v74_v11 = vrot.slane %v33_v4, %v37_v53  ;;  %v78_v12 = vrot.slane %v33_v4, %v41_v54  ;;  %v82_v15 = vrot.slane %v33_v4, %v45_v57  ;;  %v86_v16 = vrot.slane %v33_v4, %v49_v58 }
  0x2e   :  { %v265_v8 = vld [vmem:[#allocation2 + $0x420] sm:$0xff]  ;;  %v59_v23 = vrot.slane %v51_v14, %v2365_v63  ;;  %v66_v27 = vrot.slane %v52_v18, %v2365_v63  ;;  %1683 = vmatprep.subr.bf16.mxu0 %v2049_v17 }
  0x2f   :  { %v87_v19 = vcombine.low %v74_v11, %v78_v12  ;;  %v2177_v20 = vcombine.high %v261_v7, %v265_v8  ;;  %v253_v21 = vld [vmem:[#allocation2 + $0x3c0] sm:$0xff]  ;;  %v88_v24 = vcombine.low %v82_v15, %v86_v16  ;;  %v2176_v32 = vcombine.low %v261_v7, %v265_v8  ;;  %1684 = vmatpush1.bf16.msra.mxu0 %v2048_v29 }
  0x30   :  { %v257_v22 = vld [vmem:[#allocation2 + $0x3e0] sm:$0xff]  ;;  %v67_v34 = vcombine.low %v59_v23, %v66_v27 }
  0x31   :  { %v381_v25 = vld [vmem:[#allocation2 + $0x7c0] sm:$0xff]  ;;  %v95_v28 = vrot.slane %v87_v19, %v2365_v63  ;;  %v102_v31 = vrot.slane %v88_v24, %v2365_v63  ;;  %v2169_v33 = vcombine.high %v253_v21, %v257_v22  ;;  %1724 = vmatprep.subr.bf16.mxu1 %v2177_v20  ;;  %v2168_v42 = vcombine.low %v253_v21, %v257_v22 }
  0x32   :  { %v385_v26 = vld [vmem:[#allocation2 + $0x7e0] sm:$0xff]  ;;  %1725 = vmatpush1.bf16.msra.mxu1 %v2176_v32 }
  0x33   :  { %v31_v30 = vld [vmem:[%s2425_s0] sm:$0xff]  ;;  %v2297_v35 = vcombine.high %v381_v25, %v385_v26  ;;  %v103_v38 = vcombine.low %v95_v28, %v102_v31  ;;  %1685 = vmatprep.subr.bf16.mxu0 %v2169_v33  ;;  %v2296_v43 = vcombine.low %v381_v25, %v385_v26 }
  0x34   :  { %v245_v36 = vld [vmem:[#allocation2 + $0x380] sm:$0xff]  ;;  %v69_v41 = vmul.f32 %v67_v34, %v31_v30  ;;  %1686 = vmatpush2.bf16.msra.mxu0 %v2168_v42  ;;  %v318_v42 = vld [vmem:[#allocation2 + $0x5c8] sm:$0xff] }
  0x35   :  { %v249_v37 = vld [vmem:[#allocation2 + $0x3a0] sm:$0xff]  ;;  %1726 = vmatprep.subr.bf16.mxu1 %v2297_v35 }
  0x36   :  { %v373_v39 = vld [vmem:[#allocation2 + $0x780] sm:$0xff]  ;;  %v2161_v44 = vcombine.high %v245_v36, %v249_v37  ;;  %v105_v45 = vadd.f32 %v103_v38, %v69_v41  ;;  %v2160_v52 = vcombine.low %v245_v36, %v249_v37  ;;  %1727 = vmatpush2.bf16.msra.mxu1 %v2296_v43  ;;  %v194_v41 = vld [vmem:[#allocation2 + $0x1e8] sm:$0xff] }
  0x37   :  { %v377_v40 = vld [vmem:[#allocation2 + $0x7a0] sm:$0xff]  ;;  %v322_v43 = vld [vmem:[#allocation2 + $0x5e8] sm:$0xff] }
  0x38   :  { %v2289_v46 = vcombine.high %v373_v39, %v377_v40  ;;  %v237_v47 = vld [vmem:[#allocation2 + $0x340] sm:$0xff]  ;;  %v106_v51 = vmax.f32 %v105_v45, 0.0  ;;  %v2288_v53 = vcombine.low %v373_v39, %v377_v40  ;;  %1687 = vmatprep.subr.bf16.mxu0 %v2161_v44  ;;  %v190_v40 = vld [vmem:[#allocation2 + $0x1c8] sm:$0xff] }
  0x39   :  { %v241_v48 = vld [vmem:[#allocation2 + $0x360] sm:$0xff]  ;;  %1688 = vmatpush2.bf16.msra.mxu0 %v2160_v52  ;;  %v314_v52 = vld [vmem:[#allocation2 + $0x5a8] sm:$0xff] }
  0x3a   :  { %v365_v49 = vld [vmem:[#allocation2 + $0x740] sm:$0xff]  ;;  %v2153_v54 = vcombine.high %v237_v47, %v241_v48  ;;  %v2378_v55 = vrot.slane %v106_v51, %v2365_v63  ;;  %v108_v56 = vcombine.high %v106_v51, %v106_v51  ;;  %1728 = vmatprep.subr.bf16.mxu1 %v2289_v46  ;;  %v2152_v1 = vcombine.low %v237_v47, %v241_v48  ;;  %v182_v48 = vld [vmem:[#allocation2 + $0x188] sm:$0xff] }
  0x3b   :  { %v369_v50 = vld [vmem:[#allocation2 + $0x760] sm:$0xff]  ;;  %1729 = vmatpush2.bf16.msra.mxu1 %v2288_v53  ;;  %v2107_v46 = vcombine.high %v190_v40, %v194_v41  ;;  %v2235_v47 = vcombine.high %v318_v42, %v322_v43  ;;  %v310_v51 = vld [vmem:[#allocation2 + $0x588] sm:$0xff] }
  0x3c   :  { %v2281_v57 = vcombine.high %v365_v49, %v369_v50  ;;  %v229_v58 = vld [vmem:[#allocation2 + $0x300] sm:$0xff]  ;;  %v123_v62 = vcombine.high %v2378_v55, %v2378_v55  ;;  %v2383_v0 = vrot.slane %v108_v56, %v2365_v63  ;;  %v2280_v2 = vcombine.low %v365_v49, %v369_v50  ;;  %1689 = vmatprep.subr.bf16.mxu0 %v2153_v54  ;;  %v186_v49 = vld [vmem:[#allocation2 + $0x1a8] sm:$0xff] }
  0x3d   :  { %v233_v59 = vld [vmem:[#allocation2 + $0x320] sm:$0xff]  ;;  %1690 = vmatpush2.bf16.msra.mxu0 %v2152_v1  ;;  %v2395_v50 = vpack.c.bf16 %v2378_v55, %v2378_v55  ;;  %v2106_v54 = vcombine.low %v190_v40, %v194_v41  ;;  %v2234_v56 = vcombine.low %v318_v42, %v322_v43  ;;  %v302_v55 = vld [vmem:[#allocation2 + $0x548] sm:$0xff] }
  0x3e   :  { %v357_v60 = vld [vmem:[#allocation2 + $0x700] sm:$0xff]  ;;  %v2145_v3 = vcombine.high %v229_v58, %v233_v59  ;;  %v2385_v4 = vpack.c.bf16 %v123_v62, %v123_v62  ;;  %v124_v5 = vcombine.high %v2383_v0, %v2383_v0  ;;  %1730 = vmatprep.subr.bf16.mxu1 %v2281_v57  ;;  %v2144_v12 = vcombine.low %v229_v58, %v233_v59  ;;  %v174_v59 = vld [vmem:[#allocation2 + $0x148] sm:$0xff] }
  0x3f   :  { %v361_v61 = vld [vmem:[#allocation2 + $0x720] sm:$0xff]  ;;  %1731 = vmatpush2.bf16.msra.mxu1 %v2280_v2  ;;  %v2399_v53 = vpack.c.bf16 %v2383_v0, %v2383_v0  ;;  %v2099_v57 = vcombine.high %v182_v48, %v186_v49  ;;  %v2227_v58 = vcombine.high %v310_v51, %v314_v52  ;;  %v2098_v62 = vcombine.low %v182_v48, %v186_v49  ;;  %v266_v40 = vld [vmem:[#allocation2 + $0x428] sm:$0xff] }
  0x40   :  { %v2273_v6 = vcombine.high %v357_v60, %v361_v61  ;;  %v221_v7 = vld [vmem:[#allocation2 + $0x2c0] sm:$0xff]  ;;  %1701 = vmatprep.mubr.bf16.mxu0 %v2385_v4  ;;  %v2390_v11 = vpack.c.bf16 %v124_v5, %v124_v5  ;;  %1691 = vmatprep.subr.bf16.mxu0 %v2145_v3  ;;  %v2272_v13 = vcombine.low %v357_v60, %v361_v61  ;;  %v178_v60 = vld [vmem:[#allocation2 + $0x168] sm:$0xff] }
  0x41   :  { %v225_v8 = vld [vmem:[#allocation2 + $0x2e0] sm:$0xff]  ;;  %1692 = vmatpush2.bf16.msra.mxu0 %v2144_v12  ;;  %v306_v61 = vld [vmem:[#allocation2 + $0x568] sm:$0xff]  ;;  %v2226_v0 = vcombine.low %v310_v51, %v314_v52  ;;  %v2091_v1 = vcombine.high %v174_v59, %v178_v60 }
  0x42   :  { %v349_v9 = vld [vmem:[#allocation2 + $0x6c0] sm:$0xff]  ;;  %v2137_v14 = vcombine.high %v221_v7, %v225_v8  ;;  %1732 = vmatprep.subr.bf16.mxu1 %v2273_v6  ;;  %1742 = vmatprep.mubr.bf16.mxu1 %v2390_v11  ;;  %v2136_v20 = vcombine.low %v221_v7, %v225_v8  ;;  %v2219_v2 = vcombine.high %v302_v55, %v306_v61  ;;  %v166_v3 = vld [vmem:[#allocation2 + $0x108] sm:$0xff] }
  0x43   :  { %v353_v10 = vld [vmem:[#allocation2 + $0x6e0] sm:$0xff]  ;;  %1733 = vmatpush2.bf16.msra.mxu1 %v2272_v13  ;;  %v170_v5 = vld [vmem:[#allocation2 + $0x128] sm:$0xff]  ;;  %v2090_v8 = vcombine.low %v174_v59, %v178_v60 }
  0x44   :  { %v2265_v15 = vcombine.high %v349_v9, %v353_v10  ;;  %v213_v16 = vld [vmem:[#allocation2 + $0x280] sm:$0xff]  ;;  %1693 = vmatprep.subr.bf16.mxu0 %v2137_v14  ;;  %v2264_v21 = vcombine.low %v349_v9, %v353_v10  ;;  %v294_v6 = vld [vmem:[#allocation2 + $0x508] sm:$0xff]  ;;  %v2218_v9 = vcombine.low %v302_v55, %v306_v61  ;;  %v2083_v10 = vcombine.high %v166_v3, %v170_v5 }
  0x45   :  { %v217_v17 = vld [vmem:[#allocation2 + $0x2a0] sm:$0xff]  ;;  %1694 = vmatpush2.bf16.msra.mxu0 %v2136_v20  ;;  %v298_v7 = vld [vmem:[#allocation2 + $0x528] sm:$0xff] }
  0x46   :  { %v341_v18 = vld [vmem:[#allocation2 + $0x680] sm:$0xff]  ;;  %v2129_v22 = vcombine.high %v213_v16, %v217_v17  ;;  %1734 = vmatprep.subr.bf16.mxu1 %v2265_v15  ;;  %v2128_v28 = vcombine.low %v213_v16, %v217_v17  ;;  %v2211_v12 = vcombine.high %v294_v6, %v298_v7  ;;  %v158_v13 = vld [vmem:[#allocation2 + $0xc8] sm:$0xff]  ;;  %v2082_v17 = vcombine.low %v166_v3, %v170_v5 }
  0x47   :  { %v345_v19 = vld [vmem:[#allocation2 + $0x6a0] sm:$0xff]  ;;  %1735 = vmatpush2.bf16.msra.mxu1 %v2264_v21  ;;  %v162_v14 = vld [vmem:[#allocation2 + $0xe8] sm:$0xff] }
  0x48   :  { %v2257_v23 = vcombine.high %v341_v18, %v345_v19  ;;  %v205_v24 = vld [vmem:[#allocation2 + $0x240] sm:$0xff]  ;;  %1695 = vmatprep.subr.bf16.mxu0 %v2129_v22  ;;  %v2256_v29 = vcombine.low %v341_v18, %v345_v19  ;;  %v286_v15 = vld [vmem:[#allocation2 + $0x4c8] sm:$0xff]  ;;  %v2210_v18 = vcombine.low %v294_v6, %v298_v7  ;;  %v2075_v19 = vcombine.high %v158_v13, %v162_v14 }
  0x49   :  { %v209_v25 = vld [vmem:[#allocation2 + $0x260] sm:$0xff]  ;;  %1696 = vmatpush2.bf16.msra.mxu0 %v2128_v28  ;;  %v290_v16 = vld [vmem:[#allocation2 + $0x4e8] sm:$0xff] }
  0x4a   :  { %v333_v26 = vld [vmem:[#allocation2 + $0x640] sm:$0xff]  ;;  %v2121_v30 = vcombine.high %v205_v24, %v209_v25  ;;  %1736 = vmatprep.subr.bf16.mxu1 %v2257_v23  ;;  %v2120_v36 = vcombine.low %v205_v24, %v209_v25  ;;  %v2203_v20 = vcombine.high %v286_v15, %v290_v16  ;;  %v150_v21 = vld [vmem:[#allocation2 + $0x88] sm:$0xff]  ;;  %v2074_v25 = vcombine.low %v158_v13, %v162_v14 }
  0x4b   :  { %v337_v27 = vld [vmem:[#allocation2 + $0x660] sm:$0xff]  ;;  %1737 = vmatpush2.bf16.msra.mxu1 %v2256_v29  ;;  %v154_v22 = vld [vmem:[#allocation2 + $0xa8] sm:$0xff] }
  0x4c   :  { %v2249_v31 = vcombine.high %v333_v26, %v337_v27  ;;  %v197_v32 = vld [vmem:[#allocation2 + $0x200] sm:$0xff]  ;;  %1697 = vmatprep.subr.bf16.mxu0 %v2121_v30  ;;  %v2248_v37 = vcombine.low %v333_v26, %v337_v27  ;;  %v278_v23 = vld [vmem:[#allocation2 + $0x488] sm:$0xff]  ;;  %v2202_v26 = vcombine.low %v286_v15, %v290_v16  ;;  %v2067_v27 = vcombine.high %v150_v21, %v154_v22 }
  0x4d   :  { %v201_v33 = vld [vmem:[#allocation2 + $0x220] sm:$0xff]  ;;  %1698 = vmatpush2.bf16.msra.mxu0 %v2120_v36  ;;  %v282_v24 = vld [vmem:[#allocation2 + $0x4a8] sm:$0xff] }
  0x4e   :  { %v325_v34 = vld [vmem:[#allocation2 + $0x600] sm:$0xff]  ;;  %v2113_v38 = vcombine.high %v197_v32, %v201_v33  ;;  %1738 = vmatprep.subr.bf16.mxu1 %v2249_v31  ;;  %v2112_v44 = vcombine.low %v197_v32, %v201_v33  ;;  %v2195_v28 = vcombine.high %v278_v23, %v282_v24  ;;  %v142_v29 = vld [vmem:[#allocation2 + $0x48] sm:$0xff]  ;;  %v2066_v33 = vcombine.low %v150_v21, %v154_v22 }
  0x4f   :  { %v329_v35 = vld [vmem:[#allocation2 + $0x620] sm:$0xff]  ;;  %1739 = vmatpush2.bf16.msra.mxu1 %v2248_v37  ;;  %v146_v30 = vld [vmem:[#allocation2 + $0x68] sm:$0xff] }
  0x50   :  { %v2241_v39 = vcombine.high %v325_v34, %v329_v35  ;;  %1699 = vmatprep.subr.bf16.mxu0 %v2113_v38  ;;  %v2240_v45 = vcombine.low %v325_v34, %v329_v35  ;;  %v270_v31 = vld [vmem:[#allocation2 + $0x448] sm:$0xff]  ;;  %v2194_v34 = vcombine.low %v278_v23, %v282_v24  ;;  %v2059_v35 = vcombine.high %v142_v29, %v146_v30 }
  0x51   :  { %1700 = vmatpush2.bf16.msra.mxu0 %v2112_v44  ;;  %v274_v32 = vld [vmem:[#allocation2 + $0x468] sm:$0xff]  ;;  %v2058_v41 = vcombine.low %v142_v29, %v146_v30 }
  0x52   :  { %1740 = vmatprep.subr.bf16.mxu1 %v2241_v39  ;;  %1751 = vmatprep.subr.bf16.mxu0 %v2107_v46  ;;  %v2187_v36 = vcombine.high %v270_v31, %v274_v32  ;;  %v134_v37 = vld [vmem:[#allocation2 + $0x8] sm:$0xff]  ;;  %v2186_v42 = vcombine.low %v270_v31, %v274_v32 }
  0x53   :  { %1741 = vmatpush2.bf16.msra.mxu1 %v2240_v45  ;;  %v138_v38 = vld [vmem:[#allocation2 + $0x28] sm:$0xff] }
  0x54   :  { %1792 = vmatprep.subr.bf16.mxu1 %v2235_v47  ;;  %1702 = vmatmul.mubr.bf16.vlgmr.msra.gmra.mxu0 %v2395_v50  ;;  %v262_v39 = vld [vmem:[#allocation2 + $0x408] sm:$0xff]  ;;  %v2051_v43 = vcombine.high %v134_v37, %v138_v38  ;;  %v2050_v49 = vcombine.low %v134_v37, %v138_v38 }
  0x55   :  { %1752 = vmatpush1.bf16.msra.mxu0 %v2106_v54  ;;  %1783 = vmatprep.mubr.bf16.mxu0 %v2385_v4  ;;  %v2179_v44 = vcombine.high %v262_v39, %v266_v40  ;;  %v254_v45 = vld [vmem:[#allocation2 + $0x3c8] sm:$0xff]  ;;  %v2178_v51 = vcombine.low %v262_v39, %v266_v40 }
  0x56   :  { %1743 = vmatmul.mubr.bf16.vlgmr.msra.gmra.mxu1 %v2399_v53  ;;  %1753 = vmatprep.subr.bf16.mxu0 %v2099_v57  ;;  %v258_v46 = vld [vmem:[#allocation2 + $0x3e8] sm:$0xff] }
  0x57   :  { %1793 = vmatpush1.bf16.msra.mxu1 %v2234_v56  ;;  %1824 = vmatprep.mubr.bf16.mxu1 %v2390_v11  ;;  %v382_v47 = vld [vmem:[#allocation2 + $0x7c8] sm:$0xff]  ;;  %v2171_v52 = vcombine.high %v254_v45, %v258_v46  ;;  %v2170_v60 = vcombine.low %v254_v45, %v258_v46 }
  0x58   :  { %1794 = vmatprep.subr.bf16.mxu1 %v2227_v58  ;;  %v386_v48 = vld [vmem:[#allocation2 + $0x7e8] sm:$0xff] }
  0x59   :  { %1754 = vmatpush1.bf16.msra.mxu0 %v2098_v62  ;;  %v2299_v54 = vcombine.high %v382_v47, %v386_v48  ;;  %v246_v56 = vld [vmem:[#allocation2 + $0x388] sm:$0xff]  ;;  %v2298_v55 = vcombine.low %v382_v47, %v386_v48 }
  0x5a   :  { %1755 = vmatprep.subr.bf16.mxu0 %v2091_v1  ;;  %v250_v57 = vld [vmem:[#allocation2 + $0x3a8] sm:$0xff] }
  0x5b   :  { %1795 = vmatpush1.bf16.msra.mxu1 %v2226_v0  ;;  %v374_v58 = vld [vmem:[#allocation2 + $0x788] sm:$0xff]  ;;  %v2163_v61 = vcombine.high %v246_v56, %v250_v57  ;;  %v2162_v5 = vcombine.low %v246_v56, %v250_v57  ;;  %v323_v56 = vld [vmem:[#allocation2 + $0x5f0] sm:$0xff] }
  0x5c   :  { %1796 = vmatprep.subr.bf16.mxu1 %v2219_v2  ;;  %v378_v59 = vld [vmem:[#allocation2 + $0x7a8] sm:$0xff] }
  0x5d   :  { %1756 = vmatpush1.bf16.msra.mxu0 %v2090_v8  ;;  %v2291_v62 = vcombine.high %v374_v58, %v378_v59  ;;  %v238_v0 = vld [vmem:[#allocation2 + $0x348] sm:$0xff]  ;;  %v2290_v6 = vcombine.low %v374_v58, %v378_v59 }
  0x5e   :  { %1757 = vmatprep.subr.bf16.mxu0 %v2083_v10  ;;  %v242_v1 = vld [vmem:[#allocation2 + $0x368] sm:$0xff] }
  0x5f   :  { %1797 = vmatpush1.bf16.msra.mxu1 %v2218_v9  ;;  %v366_v2 = vld [vmem:[#allocation2 + $0x748] sm:$0xff]  ;;  %v2155_v7 = vcombine.high %v238_v0, %v242_v1  ;;  %v2154_v14 = vcombine.low %v238_v0, %v242_v1  ;;  %v315_v0 = vld [vmem:[#allocation2 + $0x5b0] sm:$0xff] }
  0x60   :  { %1798 = vmatprep.subr.bf16.mxu1 %v2211_v12  ;;  %v370_v3 = vld [vmem:[#allocation2 + $0x768] sm:$0xff] }
  0x61   :  { %1758 = vmatpush1.bf16.msra.mxu0 %v2082_v17  ;;  %v2283_v8 = vcombine.high %v366_v2, %v370_v3  ;;  %v230_v9 = vld [vmem:[#allocation2 + $0x308] sm:$0xff]  ;;  %v2282_v15 = vcombine.low %v366_v2, %v370_v3 }
  0x62   :  { %1759 = vmatprep.subr.bf16.mxu0 %v2075_v19  ;;  %v234_v10 = vld [vmem:[#allocation2 + $0x328] sm:$0xff] }
  0x63   :  { %1799 = vmatpush1.bf16.msra.mxu1 %v2210_v18  ;;  %v358_v12 = vld [vmem:[#allocation2 + $0x708] sm:$0xff]  ;;  %v2147_v16 = vcombine.high %v230_v9, %v234_v10  ;;  %v2146_v22 = vcombine.low %v230_v9, %v234_v10  ;;  %v307_v9 = vld [vmem:[#allocation2 + $0x570] sm:$0xff] }
  0x64   :  { %1800 = vmatprep.subr.bf16.mxu1 %v2203_v20  ;;  %v362_v13 = vld [vmem:[#allocation2 + $0x728] sm:$0xff] }
  0x65   :  { %1760 = vmatpush1.bf16.msra.mxu0 %v2074_v25  ;;  %v2275_v17 = vcombine.high %v358_v12, %v362_v13  ;;  %v222_v18 = vld [vmem:[#allocation2 + $0x2c8] sm:$0xff]  ;;  %v2274_v23 = vcombine.low %v358_v12, %v362_v13 }
  0x66   :  { %1761 = vmatprep.subr.bf16.mxu0 %v2067_v27  ;;  %v226_v19 = vld [vmem:[#allocation2 + $0x2e8] sm:$0xff] }
  0x67   :  { %1801 = vmatpush1.bf16.msra.mxu1 %v2202_v26  ;;  %v350_v20 = vld [vmem:[#allocation2 + $0x6c8] sm:$0xff]  ;;  %v2139_v24 = vcombine.high %v222_v18, %v226_v19  ;;  %v2138_v30 = vcombine.low %v222_v18, %v226_v19  ;;  %v299_v18 = vld [vmem:[#allocation2 + $0x530] sm:$0xff] }
  0x68   :  { %1802 = vmatprep.subr.bf16.mxu1 %v2195_v28  ;;  %v354_v21 = vld [vmem:[#allocation2 + $0x6e8] sm:$0xff] }
  0x69   :  { %1762 = vmatpush1.bf16.msra.mxu0 %v2066_v33  ;;  %v2267_v25 = vcombine.high %v350_v20, %v354_v21  ;;  %v214_v26 = vld [vmem:[#allocation2 + $0x288] sm:$0xff]  ;;  %v2266_v31 = vcombine.low %v350_v20, %v354_v21 }
  0x6a   :  { %1763 = vmatprep.subr.bf16.mxu0 %v2059_v35  ;;  %v218_v27 = vld [vmem:[#allocation2 + $0x2a8] sm:$0xff] }
  0x6b   :  { %1803 = vmatpush1.bf16.msra.mxu1 %v2194_v34  ;;  %v342_v28 = vld [vmem:[#allocation2 + $0x688] sm:$0xff]  ;;  %v2131_v32 = vcombine.high %v214_v26, %v218_v27  ;;  %v2130_v38 = vcombine.low %v214_v26, %v218_v27  ;;  %v291_v26 = vld [vmem:[#allocation2 + $0x4f0] sm:$0xff] }
  0x6c   :  { %1804 = vmatprep.subr.bf16.mxu1 %v2187_v36  ;;  %v346_v29 = vld [vmem:[#allocation2 + $0x6a8] sm:$0xff] }
  0x6d   :  { %1764 = vmatpush1.bf16.msra.mxu0 %v2058_v41  ;;  %v2259_v33 = vcombine.high %v342_v28, %v346_v29  ;;  %v206_v34 = vld [vmem:[#allocation2 + $0x248] sm:$0xff]  ;;  %v2258_v39 = vcombine.low %v342_v28, %v346_v29 }
  0x6e   :  { %1765 = vmatprep.subr.bf16.mxu0 %v2051_v43  ;;  %v210_v35 = vld [vmem:[#allocation2 + $0x268] sm:$0xff] }
  0x6f   :  { %1805 = vmatpush1.bf16.msra.mxu1 %v2186_v42  ;;  %v334_v36 = vld [vmem:[#allocation2 + $0x648] sm:$0xff]  ;;  %v2123_v40 = vcombine.high %v206_v34, %v210_v35  ;;  %v2122_v46 = vcombine.low %v206_v34, %v210_v35  ;;  %v283_v34 = vld [vmem:[#allocation2 + $0x4b0] sm:$0xff] }
  0x70   :  { %1806 = vmatprep.subr.bf16.mxu1 %v2179_v44  ;;  %v338_v37 = vld [vmem:[#allocation2 + $0x668] sm:$0xff] }
  0x71   :  { %1766 = vmatpush1.bf16.msra.mxu0 %v2050_v49  ;;  %v2251_v41 = vcombine.high %v334_v36, %v338_v37  ;;  %v198_v42 = vld [vmem:[#allocation2 + $0x208] sm:$0xff]  ;;  %v2250_v47 = vcombine.low %v334_v36, %v338_v37 }
  0x72   :  { %1767 = vmatprep.subr.bf16.mxu0 %v2171_v52  ;;  %v202_v43 = vld [vmem:[#allocation2 + $0x228] sm:$0xff]  ;;  %v195_v52 = vld [vmem:[#allocation2 + $0x1f0] sm:$0xff] }
  0x73   :  { %1807 = vmatpush1.bf16.msra.mxu1 %v2178_v51  ;;  %v326_v44 = vld [vmem:[#allocation2 + $0x608] sm:$0xff]  ;;  %v2115_v48 = vcombine.high %v198_v42, %v202_v43  ;;  %v191_v51 = vld [vmem:[#allocation2 + $0x1d0] sm:$0xff]  ;;  %v2114_v57 = vcombine.low %v198_v42, %v202_v43 }
  0x74   :  { %1808 = vmatprep.subr.bf16.mxu1 %v2299_v54  ;;  %v330_v45 = vld [vmem:[#allocation2 + $0x628] sm:$0xff]  ;;  %v319_v54 = vld [vmem:[#allocation2 + $0x5d0] sm:$0xff]  ;;  %v2109_v59 = vcombine.high %v191_v51, %v195_v52  ;;  %v2108_v1 = vcombine.low %v191_v51, %v195_v52 }
  0x75   :  { %1768 = vmatpush2.bf16.msra.mxu0 %v2170_v60  ;;  %v2243_v49 = vcombine.high %v326_v44, %v330_v45  ;;  %v2242_v58 = vcombine.low %v326_v44, %v330_v45  ;;  %v2237_v60 = vcombine.high %v319_v54, %v323_v56  ;;  %v2236_v2 = vcombine.low %v319_v54, %v323_v56  ;;  %v275_v42 = vld [vmem:[#allocation2 + $0x470] sm:$0xff] }
  0x76   :  { %1769 = vmatprep.subr.bf16.mxu0 %v2163_v61  ;;  %v187_v61 = vld [vmem:[#allocation2 + $0x1b0] sm:$0xff] }
  0x77   :  { %1809 = vmatpush2.bf16.msra.mxu1 %v2298_v55  ;;  %v183_v55 = vld [vmem:[#allocation2 + $0x190] sm:$0xff] }
  0x78   :  { %1810 = vmatprep.subr.bf16.mxu1 %v2291_v62  ;;  %v311_v62 = vld [vmem:[#allocation2 + $0x590] sm:$0xff]  ;;  %v2101_v3 = vcombine.high %v183_v55, %v187_v61  ;;  %v2100_v10 = vcombine.low %v183_v55, %v187_v61 }
  0x79   :  { %1770 = vmatpush2.bf16.msra.mxu0 %v2162_v5  ;;  %v2229_v5 = vcombine.high %v311_v62, %v315_v0  ;;  %v2228_v12 = vcombine.low %v311_v62, %v315_v0  ;;  %v267_v51 = vld [vmem:[#allocation2 + $0x430] sm:$0xff] }
  0x7a   :  { %1771 = vmatprep.subr.bf16.mxu0 %v2155_v7  ;;  %v179_v7 = vld [vmem:[#allocation2 + $0x170] sm:$0xff] }
  0x7b   :  { %1811 = vmatpush2.bf16.msra.mxu1 %v2290_v6  ;;  %v175_v6 = vld [vmem:[#allocation2 + $0x150] sm:$0xff] }
  0x7c   :  { %1812 = vmatprep.subr.bf16.mxu1 %v2283_v8  ;;  %v303_v8 = vld [vmem:[#allocation2 + $0x550] sm:$0xff]  ;;  %v2093_v13 = vcombine.high %v175_v6, %v179_v7  ;;  %v2092_v19 = vcombine.low %v175_v6, %v179_v7 }
  0x7d   :  { %1772 = vmatpush2.bf16.msra.mxu0 %v2154_v14  ;;  %v2221_v14 = vcombine.high %v303_v8, %v307_v9  ;;  %v2220_v20 = vcombine.low %v303_v8, %v307_v9  ;;  %v387_v55 = vld [vmem:[#allocation2 + $0x7f0] sm:$0xff] }
  0x7e   :  { %1773 = vmatprep.subr.bf16.mxu0 %v2147_v16  ;;  %v171_v16 = vld [vmem:[#allocation2 + $0x130] sm:$0xff] }
  0x7f   :  { %1813 = vmatpush2.bf16.msra.mxu1 %v2282_v15  ;;  %v167_v15 = vld [vmem:[#allocation2 + $0x110] sm:$0xff] }
  0x80   :  { %1814 = vmatprep.subr.bf16.mxu1 %v2275_v17  ;;  %v295_v17 = vld [vmem:[#allocation2 + $0x510] sm:$0xff]  ;;  %v2085_v21 = vcombine.high %v167_v15, %v171_v16  ;;  %v2084_v27 = vcombine.low %v167_v15, %v171_v16 }
  0x81   :  { %1774 = vmatpush2.bf16.msra.mxu0 %v2146_v22  ;;  %v2213_v22 = vcombine.high %v295_v17, %v299_v18  ;;  %v2212_v28 = vcombine.low %v295_v17, %v299_v18  ;;  %v379_v6 = vld [vmem:[#allocation2 + $0x7b0] sm:$0xff] }
  0x82   :  { %1775 = vmatprep.subr.bf16.mxu0 %v2139_v24  ;;  %v163_v24 = vld [vmem:[#allocation2 + $0xf0] sm:$0xff] }
  0x83   :  { %1815 = vmatpush2.bf16.msra.mxu1 %v2274_v23  ;;  %v159_v23 = vld [vmem:[#allocation2 + $0xd0] sm:$0xff] }
  0x84   :  { %1816 = vmatprep.subr.bf16.mxu1 %v2267_v25  ;;  %v287_v25 = vld [vmem:[#allocation2 + $0x4d0] sm:$0xff]  ;;  %v2077_v29 = vcombine.high %v159_v23, %v163_v24  ;;  %v2076_v35 = vcombine.low %v159_v23, %v163_v24 }
  0x85   :  { %1776 = vmatpush2.bf16.msra.mxu0 %v2138_v30  ;;  %v2205_v30 = vcombine.high %v287_v25, %v291_v26  ;;  %v2204_v36 = vcombine.low %v287_v25, %v291_v26  ;;  %v371_v15 = vld [vmem:[#allocation2 + $0x770] sm:$0xff] }
  0x86   :  { %1777 = vmatprep.subr.bf16.mxu0 %v2131_v32  ;;  %v155_v32 = vld [vmem:[#allocation2 + $0xb0] sm:$0xff] }
  0x87   :  { %1817 = vmatpush2.bf16.msra.mxu1 %v2266_v31  ;;  %v151_v31 = vld [vmem:[#allocation2 + $0x90] sm:$0xff] }
  0x88   :  { %1818 = vmatprep.subr.bf16.mxu1 %v2259_v33  ;;  %v279_v33 = vld [vmem:[#allocation2 + $0x490] sm:$0xff]  ;;  %v2069_v37 = vcombine.high %v151_v31, %v155_v32  ;;  %v2068_v43 = vcombine.low %v151_v31, %v155_v32 }
  0x89   :  { %1778 = vmatpush2.bf16.msra.mxu0 %v2130_v38  ;;  %v2197_v38 = vcombine.high %v279_v33, %v283_v34  ;;  %v2196_v44 = vcombine.low %v279_v33, %v283_v34  ;;  %v363_v23 = vld [vmem:[#allocation2 + $0x730] sm:$0xff] }
  0x8a   :  { %1779 = vmatprep.subr.bf16.mxu0 %v2123_v40  ;;  %v147_v40 = vld [vmem:[#allocation2 + $0x70] sm:$0xff] }
  0x8b   :  { %1819 = vmatpush2.bf16.msra.mxu1 %v2258_v39  ;;  %v143_v39 = vld [vmem:[#allocation2 + $0x50] sm:$0xff] }
  0x8c   :  { %1820 = vmatprep.subr.bf16.mxu1 %v2251_v41  ;;  %v271_v41 = vld [vmem:[#allocation2 + $0x450] sm:$0xff]  ;;  %v2061_v45 = vcombine.high %v143_v39, %v147_v40  ;;  %v2060_v52 = vcombine.low %v143_v39, %v147_v40 }
  0x8d   :  { %1780 = vmatpush2.bf16.msra.mxu0 %v2122_v46  ;;  %v2189_v46 = vcombine.high %v271_v41, %v275_v42  ;;  %v2188_v54 = vcombine.low %v271_v41, %v275_v42  ;;  %v355_v31 = vld [vmem:[#allocation2 + $0x6f0] sm:$0xff] }
  0x8e   :  { %1781 = vmatprep.subr.bf16.mxu0 %v2115_v48  ;;  %v139_v48 = vld [vmem:[#allocation2 + $0x30] sm:$0xff] }
  0x8f   :  { %1821 = vmatpush2.bf16.msra.mxu1 %v2250_v47  ;;  %v135_v47 = vld [vmem:[#allocation2 + $0x10] sm:$0xff] }
  0x90   :  { %1822 = vmatprep.subr.bf16.mxu1 %v2243_v49  ;;  %v263_v49 = vld [vmem:[#allocation2 + $0x410] sm:$0xff]  ;;  %v2053_v56 = vcombine.high %v135_v47, %v139_v48  ;;  %v2052_v61 = vcombine.low %v135_v47, %v139_v48 }
  0x91   :  { %1782 = vmatpush2.bf16.msra.mxu0 %v2114_v57  ;;  %v2181_v57 = vcombine.high %v263_v49, %v267_v51  ;;  %v2180_v62 = vcombine.low %v263_v49, %v267_v51  ;;  %v347_v39 = vld [vmem:[#allocation2 + $0x6b0] sm:$0xff] }
  0x92   :  { %1833 = vmatprep.subr.bf16.mxu0 %v2109_v59  ;;  %v259_v59 = vld [vmem:[#allocation2 + $0x3f0] sm:$0xff] }
  0x93   :  { %1823 = vmatpush2.bf16.msra.mxu1 %v2242_v58  ;;  %v255_v58 = vld [vmem:[#allocation2 + $0x3d0] sm:$0xff] }
  0x94   :  { %1874 = vmatprep.subr.bf16.mxu1 %v2237_v60  ;;  %1784 = vmatmul.mubr.bf16.vlgmr.msra.gmra.mxu0 %v2395_v50  ;;  %v383_v60 = vld [vmem:[#allocation2 + $0x7d0] sm:$0xff]  ;;  %v2173_v0 = vcombine.high %v255_v58, %v259_v59  ;;  %v2172_v7 = vcombine.low %v255_v58, %v259_v59 }
  0x95   :  { %1834 = vmatpush1.bf16.msra.mxu0 %v2108_v1  ;;  %1865 = vmatprep.mubr.bf16.mxu0 %v2385_v4  ;;  %v2301_v1 = vcombine.high %v383_v60, %v387_v55  ;;  %v2300_v8 = vcombine.low %v383_v60, %v387_v55  ;;  %v339_v47 = vld [vmem:[#allocation2 + $0x670] sm:$0xff] }
  0x96   :  { %1825 = vmatmul.mubr.bf16.vlgmr.msra.gmra.mxu1 %v2399_v53  ;;  %1835 = vmatprep.subr.bf16.mxu0 %v2101_v3  ;;  %v251_v3 = vld [vmem:[#allocation2 + $0x3b0] sm:$0xff] }
  0x97   :  { %1875 = vmatpush1.bf16.msra.mxu1 %v2236_v2  ;;  %1906 = vmatprep.mubr.bf16.mxu1 %v2390_v11  ;;  %v247_v2 = vld [vmem:[#allocation2 + $0x390] sm:$0xff] }
  0x98   :  { %1876 = vmatprep.subr.bf16.mxu1 %v2229_v5  ;;  %v375_v5 = vld [vmem:[#allocation2 + $0x790] sm:$0xff]  ;;  %v2165_v9 = vcombine.high %v247_v2, %v251_v3  ;;  %v2164_v16 = vcombine.low %v247_v2, %v251_v3  ;;  %v324_v2 = vld [vmem:[#allocation2 + $0x5f8] sm:$0xff] }
  0x99   :  { %1836 = vmatpush1.bf16.msra.mxu0 %v2100_v10  ;;  %v2293_v10 = vcombine.high %v375_v5, %v379_v6  ;;  %v2292_v17 = vcombine.low %v375_v5, %v379_v6  ;;  %v331_v58 = vld [vmem:[#allocation2 + $0x630] sm:$0xff] }
  0x9a   :  { %1837 = vmatprep.subr.bf16.mxu0 %v2093_v13  ;;  %v243_v13 = vld [vmem:[#allocation2 + $0x370] sm:$0xff] }
  0x9b   :  { %1877 = vmatpush1.bf16.msra.mxu1 %v2228_v12  ;;  %v239_v12 = vld [vmem:[#allocation2 + $0x350] sm:$0xff] }
  0x9c   :  { %1878 = vmatprep.subr.bf16.mxu1 %v2221_v14  ;;  %v367_v14 = vld [vmem:[#allocation2 + $0x750] sm:$0xff]  ;;  %v2157_v18 = vcombine.high %v239_v12, %v243_v13  ;;  %v2156_v24 = vcombine.low %v239_v12, %v243_v13  ;;  %v316_v12 = vld [vmem:[#allocation2 + $0x5b8] sm:$0xff] }
  0x9d   :  { %1838 = vmatpush1.bf16.msra.mxu0 %v2092_v19  ;;  %v2285_v19 = vcombine.high %v367_v14, %v371_v15  ;;  %v2284_v25 = vcombine.low %v367_v14, %v371_v15 }
  0x9e   :  { %1839 = vmatprep.subr.bf16.mxu0 %v2085_v21  ;;  %v235_v21 = vld [vmem:[#allocation2 + $0x330] sm:$0xff] }
  0x9f   :  { %1879 = vmatpush1.bf16.msra.mxu1 %v2220_v20  ;;  %v231_v20 = vld [vmem:[#allocation2 + $0x310] sm:$0xff] }
  0xa0   :  { %1880 = vmatprep.subr.bf16.mxu1 %v2213_v22  ;;  %v359_v22 = vld [vmem:[#allocation2 + $0x710] sm:$0xff]  ;;  %v2149_v26 = vcombine.high %v231_v20, %v235_v21  ;;  %v2148_v32 = vcombine.low %v231_v20, %v235_v21  ;;  %v308_v20 = vld [vmem:[#allocation2 + $0x578] sm:$0xff] }
  0xa1   :  { %1840 = vmatpush1.bf16.msra.mxu0 %v2084_v27  ;;  %v2277_v27 = vcombine.high %v359_v22, %v363_v23  ;;  %v2276_v33 = vcombine.low %v359_v22, %v363_v23 }
  0xa2   :  { %1841 = vmatprep.subr.bf16.mxu0 %v2077_v29  ;;  %v227_v29 = vld [vmem:[#allocation2 + $0x2f0] sm:$0xff] }
  0xa3   :  { %1881 = vmatpush1.bf16.msra.mxu1 %v2212_v28  ;;  %v223_v28 = vld [vmem:[#allocation2 + $0x2d0] sm:$0xff] }
  0xa4   :  { %1882 = vmatprep.subr.bf16.mxu1 %v2205_v30  ;;  %v351_v30 = vld [vmem:[#allocation2 + $0x6d0] sm:$0xff]  ;;  %v2141_v34 = vcombine.high %v223_v28, %v227_v29  ;;  %v2140_v40 = vcombine.low %v223_v28, %v227_v29  ;;  %v300_v28 = vld [vmem:[#allocation2 + $0x538] sm:$0xff] }
  0xa5   :  { %1842 = vmatpush1.bf16.msra.mxu0 %v2076_v35  ;;  %v2269_v35 = vcombine.high %v351_v30, %v355_v31  ;;  %v2268_v41 = vcombine.low %v351_v30, %v355_v31 }
  0xa6   :  { %1843 = vmatprep.subr.bf16.mxu0 %v2069_v37  ;;  %v219_v37 = vld [vmem:[#allocation2 + $0x2b0] sm:$0xff] }
  0xa7   :  { %1883 = vmatpush1.bf16.msra.mxu1 %v2204_v36  ;;  %v215_v36 = vld [vmem:[#allocation2 + $0x290] sm:$0xff] }
  0xa8   :  { %1884 = vmatprep.subr.bf16.mxu1 %v2197_v38  ;;  %v343_v38 = vld [vmem:[#allocation2 + $0x690] sm:$0xff]  ;;  %v2133_v42 = vcombine.high %v215_v36, %v219_v37  ;;  %v2132_v48 = vcombine.low %v215_v36, %v219_v37  ;;  %v292_v36 = vld [vmem:[#allocation2 + $0x4f8] sm:$0xff] }
  0xa9   :  { %1844 = vmatpush1.bf16.msra.mxu0 %v2068_v43  ;;  %v2261_v43 = vcombine.high %v343_v38, %v347_v39  ;;  %v2260_v49 = vcombine.low %v343_v38, %v347_v39  ;;  %v152_v39 = vld [vmem:[#allocation2 + $0x98] sm:$0xff] }
  0xaa   :  { %1845 = vmatprep.subr.bf16.mxu0 %v2061_v45  ;;  %v211_v45 = vld [vmem:[#allocation2 + $0x270] sm:$0xff] }
  0xab   :  { %1885 = vmatpush1.bf16.msra.mxu1 %v2196_v44  ;;  %v207_v44 = vld [vmem:[#allocation2 + $0x250] sm:$0xff] }
  0xac   :  { %1886 = vmatprep.subr.bf16.mxu1 %v2189_v46  ;;  %v335_v46 = vld [vmem:[#allocation2 + $0x650] sm:$0xff]  ;;  %v2125_v51 = vcombine.high %v207_v44, %v211_v45  ;;  %v2124_v59 = vcombine.low %v207_v44, %v211_v45 }
  0xad   :  { %1846 = vmatpush1.bf16.msra.mxu0 %v2060_v52  ;;  %v2253_v52 = vcombine.high %v335_v46, %v339_v47  ;;  %v2252_v60 = vcombine.low %v335_v46, %v339_v47  ;;  %v144_v47 = vld [vmem:[#allocation2 + $0x58] sm:$0xff] }
  0xae   :  { %1847 = vmatprep.subr.bf16.mxu0 %v2053_v56  ;;  %v203_v56 = vld [vmem:[#allocation2 + $0x230] sm:$0xff] }
  0xaf   :  { %1887 = vmatpush1.bf16.msra.mxu1 %v2188_v54  ;;  %v199_v54 = vld [vmem:[#allocation2 + $0x210] sm:$0xff] }
  0xb0   :  { %1888 = vmatprep.subr.bf16.mxu1 %v2181_v57  ;;  %v327_v57 = vld [vmem:[#allocation2 + $0x610] sm:$0xff]  ;;  %v2117_v55 = vcombine.high %v199_v54, %v203_v56  ;;  %v2116_v3 = vcombine.low %v199_v54, %v203_v56 }
  0xb1   :  { %1848 = vmatpush1.bf16.msra.mxu0 %v2052_v61  ;;  %v2245_v61 = vcombine.high %v327_v57, %v331_v58  ;;  %v2244_v5 = vcombine.low %v327_v57, %v331_v58  ;;  %v136_v58 = vld [vmem:[#allocation2 + $0x18] sm:$0xff] }
  0xb2   :  { %1849 = vmatprep.subr.bf16.mxu0 %v2173_v0  ;;  %v196_v0 = vld [vmem:[#allocation2 + $0x1f8] sm:$0xff] }
  0xb3   :  { %1889 = vmatpush1.bf16.msra.mxu1 %v2180_v62  ;;  %v192_v62 = vld [vmem:[#allocation2 + $0x1d8] sm:$0xff] }
  0xb4   :  { %1890 = vmatprep.subr.bf16.mxu1 %v2301_v1  ;;  %v320_v1 = vld [vmem:[#allocation2 + $0x5d8] sm:$0xff]  ;;  %v2111_v6 = vcombine.high %v192_v62, %v196_v0  ;;  %v2110_v13 = vcombine.low %v192_v62, %v196_v0 }
  0xb5   :  { %1850 = vmatpush2.bf16.msra.mxu0 %v2172_v7  ;;  %v2239_v7 = vcombine.high %v320_v1, %v324_v2  ;;  %v2238_v14 = vcombine.low %v320_v1, %v324_v2  ;;  %v256_v2 = vld [vmem:[#allocation2 + $0x3d8] sm:$0xff] }
  0xb6   :  { %1851 = vmatprep.subr.bf16.mxu0 %v2165_v9  ;;  %v188_v9 = vld [vmem:[#allocation2 + $0x1b8] sm:$0xff] }
  0xb7   :  { %1891 = vmatpush2.bf16.msra.mxu1 %v2300_v8  ;;  %v184_v8 = vld [vmem:[#allocation2 + $0x198] sm:$0xff] }
  0xb8   :  { %1892 = vmatprep.subr.bf16.mxu1 %v2293_v10  ;;  %v312_v10 = vld [vmem:[#allocation2 + $0x598] sm:$0xff]  ;;  %v2103_v15 = vcombine.high %v184_v8, %v188_v9  ;;  %v2102_v21 = vcombine.low %v184_v8, %v188_v9 }
  0xb9   :  { %1852 = vmatpush2.bf16.msra.mxu0 %v2164_v16  ;;  %v2231_v16 = vcombine.high %v312_v10, %v316_v12  ;;  %v2230_v22 = vcombine.low %v312_v10, %v316_v12  ;;  %v248_v12 = vld [vmem:[#allocation2 + $0x398] sm:$0xff] }
  0xba   :  { %1853 = vmatprep.subr.bf16.mxu0 %v2157_v18  ;;  %v180_v18 = vld [vmem:[#allocation2 + $0x178] sm:$0xff] }
  0xbb   :  { %1893 = vmatpush2.bf16.msra.mxu1 %v2292_v17  ;;  %v176_v17 = vld [vmem:[#allocation2 + $0x158] sm:$0xff] }
  0xbc   :  { %1894 = vmatprep.subr.bf16.mxu1 %v2285_v19  ;;  %v304_v19 = vld [vmem:[#allocation2 + $0x558] sm:$0xff]  ;;  %v2095_v23 = vcombine.high %v176_v17, %v180_v18  ;;  %v2094_v29 = vcombine.low %v176_v17, %v180_v18 }
  0xbd   :  { %1854 = vmatpush2.bf16.msra.mxu0 %v2156_v24  ;;  %v2223_v24 = vcombine.high %v304_v19, %v308_v20  ;;  %v2222_v30 = vcombine.low %v304_v19, %v308_v20  ;;  %v240_v20 = vld [vmem:[#allocation2 + $0x358] sm:$0xff] }
  0xbe   :  { %1855 = vmatprep.subr.bf16.mxu0 %v2149_v26  ;;  %v172_v26 = vld [vmem:[#allocation2 + $0x138] sm:$0xff] }
  0xbf   :  { %1895 = vmatpush2.bf16.msra.mxu1 %v2284_v25  ;;  %v168_v25 = vld [vmem:[#allocation2 + $0x118] sm:$0xff] }
  0xc0   :  { %1896 = vmatprep.subr.bf16.mxu1 %v2277_v27  ;;  %v296_v27 = vld [vmem:[#allocation2 + $0x518] sm:$0xff]  ;;  %v2087_v31 = vcombine.high %v168_v25, %v172_v26  ;;  %v2086_v37 = vcombine.low %v168_v25, %v172_v26 }
  0xc1   :  { %1856 = vmatpush2.bf16.msra.mxu0 %v2148_v32  ;;  %v2215_v32 = vcombine.high %v296_v27, %v300_v28 }
  0xc2   :  { %1857 = vmatprep.subr.bf16.mxu0 %v2141_v34  ;;  %v164_v34 = vld [vmem:[#allocation2 + $0xf8] sm:$0xff] }
  0xc3   :  { %1897 = vmatpush2.bf16.msra.mxu1 %v2276_v33  ;;  %v160_v33 = vld [vmem:[#allocation2 + $0xd8] sm:$0xff] }
  0xc4   :  { %1898 = vmatprep.subr.bf16.mxu1 %v2269_v35  ;;  %v288_v35 = vld [vmem:[#allocation2 + $0x4d8] sm:$0xff]  ;;  %v2079_v38 = vcombine.high %v160_v33, %v164_v34 }
  0xc5   :  { %1858 = vmatpush2.bf16.msra.mxu0 %v2140_v40  ;;  %v156_v40 = vld [vmem:[#allocation2 + $0xb8] sm:$0xff]  ;;  %v2206_v44 = vcombine.low %v288_v35, %v292_v36 }
  0xc6   :  { %1859 = vmatprep.subr.bf16.mxu0 %v2133_v42  ;;  %v284_v42 = vld [vmem:[#allocation2 + $0x4b8] sm:$0xff]  ;;  %v2071_v45 = vcombine.high %v152_v39, %v156_v40 }
  0xc7   :  { %1899 = vmatpush2.bf16.msra.mxu1 %v2268_v41  ;;  %v280_v41 = vld [vmem:[#allocation2 + $0x498] sm:$0xff] }
  0xc8   :  { %1900 = vmatprep.subr.bf16.mxu1 %v2261_v43  ;;  %v2078_v43 = vcombine.low %v160_v33, %v164_v34  ;;  %v2199_v46 = vcombine.high %v280_v41, %v284_v42  ;;  %v2198_v54 = vcombine.low %v280_v41, %v284_v42  ;;  %v216_v42 = vld [vmem:[#allocation2 + $0x298] sm:$0xff] }
  0xc9   :  { %1860 = vmatpush2.bf16.msra.mxu0 %v2132_v48  ;;  %v148_v48 = vld [vmem:[#allocation2 + $0x78] sm:$0xff] }
  0xca   :  { %1861 = vmatprep.subr.bf16.mxu0 %v2125_v51  ;;  %v276_v51 = vld [vmem:[#allocation2 + $0x478] sm:$0xff]  ;;  %v2063_v56 = vcombine.high %v144_v47, %v148_v48 }
  0xcb   :  { %1901 = vmatpush2.bf16.msra.mxu1 %v2260_v49  ;;  %v272_v49 = vld [vmem:[#allocation2 + $0x458] sm:$0xff] }
  0xcc   :  { %1902 = vmatprep.subr.bf16.mxu1 %v2253_v52  ;;  %v2070_v52 = vcombine.low %v152_v39, %v156_v40  ;;  %v2191_v57 = vcombine.high %v272_v49, %v276_v51  ;;  %v2190_v62 = vcombine.low %v272_v49, %v276_v51  ;;  %v208_v51 = vld [vmem:[#allocation2 + $0x258] sm:$0xff] }
  0xcd   :  { %1862 = vmatpush2.bf16.msra.mxu0 %v2124_v59  ;;  %v140_v59 = vld [vmem:[#allocation2 + $0x38] sm:$0xff] }
  0xce   :  { %1863 = vmatprep.subr.bf16.mxu0 %v2117_v55  ;;  %v268_v55 = vld [vmem:[#allocation2 + $0x438] sm:$0xff]  ;;  %v2055_v0 = vcombine.high %v136_v58, %v140_v59 }
  0xcf   :  { %1903 = vmatpush2.bf16.msra.mxu1 %v2252_v60  ;;  %v264_v60 = vld [vmem:[#allocation2 + $0x418] sm:$0xff] }
  0xd0   :  { %1904 = vmatprep.subr.bf16.mxu1 %v2245_v61  ;;  %v2062_v61 = vcombine.low %v144_v47, %v148_v48  ;;  %v2183_v1 = vcombine.high %v264_v60, %v268_v55  ;;  %v2182_v8 = vcombine.low %v264_v60, %v268_v55  ;;  %v200_v55 = vld [vmem:[#allocation2 + $0x218] sm:$0xff] }
  0xd1   :  { %1864 = vmatpush2.bf16.msra.mxu0 %v2116_v3  ;;  %v260_v3 = vld [vmem:[#allocation2 + $0x3f8] sm:$0xff] }
  0xd2   :  { %1915 = vmatprep.subr.bf16.mxu0 %v2111_v6  ;;  %v388_v6 = vld [vmem:[#allocation2 + $0x7f8] sm:$0xff]  ;;  %v2175_v9 = vcombine.high %v256_v2, %v260_v3 }
  0xd3   :  { %1905 = vmatpush2.bf16.msra.mxu1 %v2244_v5  ;;  %v384_v5 = vld [vmem:[#allocation2 + $0x7d8] sm:$0xff] }
  0xd4   :  { %1956 = vmatprep.subr.bf16.mxu1 %v2239_v7  ;;  %1866 = vmatmul.mubr.bf16.vlgmr.msra.gmra.mxu0 %v2395_v50  ;;  %v2054_v7 = vcombine.low %v136_v58, %v140_v59  ;;  %v2303_v10 = vcombine.high %v384_v5, %v388_v6  ;;  %v2302_v17 = vcombine.low %v384_v5, %v388_v6 }
  0xd5   :  { %1916 = vmatpush1.bf16.msra.mxu0 %v2110_v13  ;;  %1947 = vmatprep.mubr.bf16.mxu0 %v2385_v4  ;;  %v2214_v4 = vcombine.low %v296_v27, %v300_v28  ;;  %v252_v13 = vld [vmem:[#allocation2 + $0x3b8] sm:$0xff] }
  0xd6   :  { %1907 = vmatmul.mubr.bf16.vlgmr.msra.gmra.mxu1 %v2399_v53  ;;  %1917 = vmatprep.subr.bf16.mxu0 %v2103_v15  ;;  %v380_v15 = vld [vmem:[#allocation2 + $0x7b8] sm:$0xff]  ;;  %v2167_v18 = vcombine.high %v248_v12, %v252_v13 }
  0xd7   :  { %1957 = vmatpush1.bf16.msra.mxu1 %v2238_v14  ;;  %1988 = vmatprep.mubr.bf16.mxu1 %v2390_v11  ;;  %v2207_v11 = vcombine.high %v288_v35, %v292_v36  ;;  %v376_v14 = vld [vmem:[#allocation2 + $0x798] sm:$0xff] }
  0xd8   :  { %1958 = vmatprep.subr.bf16.mxu1 %v2231_v16  ;;  %v2174_v16 = vcombine.low %v256_v2, %v260_v3  ;;  %v2295_v19 = vcombine.high %v376_v14, %v380_v15  ;;  %v2294_v25 = vcombine.low %v376_v14, %v380_v15  ;;  %v232_v28 = vld [vmem:[#allocation2 + $0x318] sm:$0xff] }
  0xd9   :  { %1918 = vmatpush1.bf16.msra.mxu0 %v2102_v21  ;;  %v244_v21 = vld [vmem:[#allocation2 + $0x378] sm:$0xff] }
  0xda   :  { %1919 = vmatprep.subr.bf16.mxu0 %v2095_v23  ;;  %v372_v23 = vld [vmem:[#allocation2 + $0x778] sm:$0xff]  ;;  %v2159_v26 = vcombine.high %v240_v20, %v244_v21 }
  0xdb   :  { %1959 = vmatpush1.bf16.msra.mxu1 %v2230_v22  ;;  %v368_v22 = vld [vmem:[#allocation2 + $0x758] sm:$0xff] }
  0xdc   :  { %1960 = vmatprep.subr.bf16.mxu1 %v2223_v24  ;;  %v2166_v24 = vcombine.low %v248_v12, %v252_v13  ;;  %v2287_v27 = vcombine.high %v368_v22, %v372_v23  ;;  %v2286_v33 = vcombine.low %v368_v22, %v372_v23  ;;  %v224_v36 = vld [vmem:[#allocation2 + $0x2d8] sm:$0xff] }
  0xdd   :  { %1920 = vmatpush1.bf16.msra.mxu0 %v2094_v29  ;;  %v236_v29 = vld [vmem:[#allocation2 + $0x338] sm:$0xff] }
  0xde   :  { %1921 = vmatprep.subr.bf16.mxu0 %v2087_v31  ;;  %v364_v31 = vld [vmem:[#allocation2 + $0x738] sm:$0xff]  ;;  %v2151_v34 = vcombine.high %v232_v28, %v236_v29 }
  0xdf   :  { %1961 = vmatpush1.bf16.msra.mxu1 %v2222_v30  ;;  %v360_v30 = vld [vmem:[#allocation2 + $0x718] sm:$0xff] }
  0xe0   :  { %1962 = vmatprep.subr.bf16.mxu1 %v2215_v32  ;;  %v2158_v32 = vcombine.low %v240_v20, %v244_v21  ;;  %v2279_v35 = vcombine.high %v360_v30, %v364_v31  ;;  %v2278_v39 = vcombine.low %v360_v30, %v364_v31 }
  0xe1   :  { %1922 = vmatpush1.bf16.msra.mxu0 %v2086_v37  ;;  %v228_v37 = vld [vmem:[#allocation2 + $0x2f8] sm:$0xff] }
  0xe2   :  { %1923 = vmatprep.subr.bf16.mxu0 %v2079_v38  ;;  %v356_v38 = vld [vmem:[#allocation2 + $0x6f8] sm:$0xff]  ;;  %v2143_v40 = vcombine.high %v224_v36, %v228_v37 }
  0xe3   :  { %1963 = vmatpush1.bf16.msra.mxu1 %v2214_v4  ;;  %v352_v4 = vld [vmem:[#allocation2 + $0x6d8] sm:$0xff] }
  0xe4   :  { %1964 = vmatprep.subr.bf16.mxu1 %v2207_v11  ;;  %v2150_v11 = vcombine.low %v232_v28, %v236_v29  ;;  %v2271_v41 = vcombine.high %v352_v4, %v356_v38  ;;  %v2270_v47 = vcombine.low %v352_v4, %v356_v38 }
  0xe5   :  { %1924 = vmatpush1.bf16.msra.mxu0 %v2078_v43  ;;  %v220_v43 = vld [vmem:[#allocation2 + $0x2b8] sm:$0xff] }
  0xe6   :  { %1925 = vmatprep.subr.bf16.mxu0 %v2071_v45  ;;  %v348_v45 = vld [vmem:[#allocation2 + $0x6b8] sm:$0xff]  ;;  %v2135_v48 = vcombine.high %v216_v42, %v220_v43 }
  0xe7   :  { %1965 = vmatpush1.bf16.msra.mxu1 %v2206_v44  ;;  %v344_v44 = vld [vmem:[#allocation2 + $0x698] sm:$0xff] }
  0xe8   :  { %1966 = vmatprep.subr.bf16.mxu1 %v2199_v46  ;;  %v2142_v46 = vcombine.low %v224_v36, %v228_v37  ;;  %v2263_v49 = vcombine.high %v344_v44, %v348_v45  ;;  %v2262_v58 = vcombine.low %v344_v44, %v348_v45 }
  0xe9   :  { %1926 = vmatpush1.bf16.msra.mxu0 %v2070_v52  ;;  %v212_v52 = vld [vmem:[#allocation2 + $0x278] sm:$0xff] }
  0xea   :  { %1927 = vmatprep.subr.bf16.mxu0 %v2063_v56  ;;  %v340_v56 = vld [vmem:[#allocation2 + $0x678] sm:$0xff]  ;;  %v2127_v59 = vcombine.high %v208_v51, %v212_v52 }
  0xeb   :  { %1967 = vmatpush1.bf16.msra.mxu1 %v2198_v54  ;;  %v336_v54 = vld [vmem:[#allocation2 + $0x658] sm:$0xff] }
  0xec   :  { %1968 = vmatprep.subr.bf16.mxu1 %v2191_v57  ;;  %v2134_v57 = vcombine.low %v216_v42, %v220_v43  ;;  %v2255_v60 = vcombine.high %v336_v54, %v340_v56  ;;  %v2254_v2 = vcombine.low %v336_v54, %v340_v56 }
  0xed   :  { %1928 = vmatpush1.bf16.msra.mxu0 %v2062_v61  ;;  %v204_v61 = vld [vmem:[#allocation2 + $0x238] sm:$0xff] }
  0xee   :  { %1929 = vmatprep.subr.bf16.mxu0 %v2055_v0  ;;  %v332_v0 = vld [vmem:[#allocation2 + $0x638] sm:$0xff]  ;;  %v2119_v3 = vcombine.high %v200_v55, %v204_v61  ;;  %v2118_v6 = vcombine.low %v200_v55, %v204_v61 }
  0xef   :  { %1969 = vmatpush1.bf16.msra.mxu1 %v2190_v62  ;;  %v328_v62 = vld [vmem:[#allocation2 + $0x618] sm:$0xff] }
  0xf0   :  { %1970 = vmatprep.subr.bf16.mxu1 %v2183_v1  ;;  %v2126_v1 = vcombine.low %v208_v51, %v212_v52  ;;  %v2247_v5 = vcombine.high %v328_v62, %v332_v0 }
  0xf1   :  { %1930 = vmatpush1.bf16.msra.mxu0 %v2054_v7  ;;  %v2246_v7 = vcombine.low %v328_v62, %v332_v0 }
  0xf2   :  { %1931 = vmatprep.subr.bf16.mxu0 %v2175_v9 }
  0xf3   :  { %1971 = vmatpush1.bf16.msra.mxu1 %v2182_v8 }
  0xf4   :  { %1972 = vmatprep.subr.bf16.mxu1 %v2303_v10 }
  0xf5   :  { %1932 = vmatpush2.bf16.msra.mxu0 %v2174_v16 }
  0xf6   :  { %1933 = vmatprep.subr.bf16.mxu0 %v2167_v18 }
  0xf7   :  { %1973 = vmatpush2.bf16.msra.mxu1 %v2302_v17 }
  0xf8   :  { %1974 = vmatprep.subr.bf16.mxu1 %v2295_v19 }
  0xf9   :  { %1934 = vmatpush2.bf16.msra.mxu0 %v2166_v24 }
  0xfa   :  { %1935 = vmatprep.subr.bf16.mxu0 %v2159_v26 }
  0xfb   :  { %1975 = vmatpush2.bf16.msra.mxu1 %v2294_v25 }
  0xfc   :  { %1976 = vmatprep.subr.bf16.mxu1 %v2287_v27 }
  0xfd   :  { %1936 = vmatpush2.bf16.msra.mxu0 %v2158_v32 }
  0xfe   :  { %1937 = vmatprep.subr.bf16.mxu0 %v2151_v34 }
  0xff   :  { %1977 = vmatpush2.bf16.msra.mxu1 %v2286_v33 }
 0x100   :  { %1978 = vmatprep.subr.bf16.mxu1 %v2279_v35 }
 0x101   :  { %1938 = vmatpush2.bf16.msra.mxu0 %v2150_v11 }
 0x102   :  { %1939 = vmatprep.subr.bf16.mxu0 %v2143_v40 }
 0x103   :  { %1979 = vmatpush2.bf16.msra.mxu1 %v2278_v39 }
 0x104   :  { %1980 = vmatprep.subr.bf16.mxu1 %v2271_v41 }
 0x105   :  { %1940 = vmatpush2.bf16.msra.mxu0 %v2142_v46 }
 0x106   :  { %1941 = vmatprep.subr.bf16.mxu0 %v2135_v48 }
 0x107   :  { %1981 = vmatpush2.bf16.msra.mxu1 %v2270_v47 }
 0x108   :  { %1982 = vmatprep.subr.bf16.mxu1 %v2263_v49 }
 0x109   :  { %1942 = vmatpush2.bf16.msra.mxu0 %v2134_v57 }
 0x10a   :  { %1943 = vmatprep.subr.bf16.mxu0 %v2127_v59 }
 0x10b   :  { %1983 = vmatpush2.bf16.msra.mxu1 %v2262_v58 }
 0x10c   :  { %1984 = vmatprep.subr.bf16.mxu1 %v2255_v60 }
 0x10d   :  { %1944 = vmatpush2.bf16.msra.mxu0 %v2126_v1 }
 0x10e   :  { %1945 = vmatprep.subr.bf16.mxu0 %v2119_v3 }
 0x10f   :  { %1985 = vmatpush2.bf16.msra.mxu1 %v2254_v2 }
 0x110   :  { %1986 = vmatprep.subr.bf16.mxu1 %v2247_v5 }
 0x111   :  { %1946 = vmatpush2.bf16.msra.mxu0 %v2118_v6 }
 0x113   :  { %1987 = vmatpush2.bf16.msra.mxu1 %v2246_v7 }
 0x114   :  { %v1703_v8 = vpop.f32.mrf.mxu0  ;;  %1948 = vmatmul.mubr.bf16.vlgmr.msra.gmra.mxu0 %v2395_v50 }
 0x116   :  { %v1744_v9 = vpop.f32.mrf.mxu1  ;;  %1989 = vmatmul.mubr.bf16.vlgmr.msra.gmra.mxu1 %v2399_v53  ;;  %v1705_v12 = vpop.f32.mrf.mxu0 }
 0x117   :  { %v1745_v10 = vadd.f32 %v1744_v9, %v1703_v8 }
 0x118   :  { %v1746_v13 = vpop.f32.mrf.mxu1  ;;  %v1707_v15 = vpop.f32.mrf.mxu0 }
 0x119   :  { %v1747_v14 = vadd.f32 %v1746_v13, %v1705_v12 }
 0x11a   :  { %v1748_v16 = vpop.f32.mrf.mxu1  ;;  %v1708_v18 = vpop.f32.mrf.mxu0 }
 0x11b   :  { %v2005_v17 = vcombine.low %v1745_v10, %v1747_v14 }
 0x11c   :  { %v1749_v19 = vpop.f32.mrf.mxu1 }
 0x11d   :  { %v2013_v29 = vrot.slane %v2005_v17, %v2365_v63 }
 0x154   :  { %v1785_v20 = vpop.f32.mrf.mxu0 }
 0x156   :  { %v1826_v21 = vpop.f32.mrf.mxu1  ;;  %v1787_v23 = vpop.f32.mrf.mxu0 }
 0x157   :  { %v1827_v22 = vadd.f32 %v1826_v21, %v1785_v20 }
 0x158   :  { %v1828_v24 = vpop.f32.mrf.mxu1  ;;  %v1789_v26 = vpop.f32.mrf.mxu0 }
 0x159   :  { %v1829_v25 = vadd.f32 %v1828_v24, %v1787_v23 }
 0x15a   :  { %v1830_v50 = vpop.f32.mrf.mxu1  ;;  %v1790_v28 = vpop.f32.mrf.mxu0 }
 0x15b   :  { %v2006_v27 = vcombine.low %v1827_v22, %v1829_v25 }
 0x15c   :  { %v1831_v53 = vpop.f32.mrf.mxu1 }
 0x15d   :  { %v2020_v30 = vrot.slane %v2006_v27, %v2365_v63 }
 0x15f   :  { %v2021_v31 = vcombine.low %v2013_v29, %v2020_v30 }
 0x161   :  { %2041 = vst [vmem:[%s2429_s4] sm:$0xff] %v2021_v31 }
 0x194   :  { %v1867_v32 = vpop.f32.mrf.mxu0 }
 0x196   :  { %v1908_v33 = vpop.f32.mrf.mxu1  ;;  %v1869_v35 = vpop.f32.mrf.mxu0 }
 0x197   :  { %v1909_v34 = vadd.f32 %v1908_v33, %v1867_v32 }
 0x198   :  { %v1910_v36 = vpop.f32.mrf.mxu1  ;;  %v1871_v4 = vpop.f32.mrf.mxu0 }
 0x199   :  { %v1911_v37 = vadd.f32 %v1910_v36, %v1869_v35 }
 0x19a   :  { %v1912_v38 = vpop.f32.mrf.mxu1  ;;  %v1872_v39 = vpop.f32.mrf.mxu0 }
 0x19b   :  { %v2022_v11 = vcombine.low %v1909_v34, %v1911_v37 }
 0x19c   :  { %v1913_v40 = vpop.f32.mrf.mxu1 }
 0x19d   :  { %v2030_v54 = vrot.slane %v2022_v11, %v2365_v63 }
 0x1d4   :  { %v1949_v41 = vpop.f32.mrf.mxu0 }
 0x1d6   :  { %v1990_v42 = vpop.f32.mrf.mxu1  ;;  %v1951_v43 = vpop.f32.mrf.mxu0 }
 0x1d7   :  { %v1991_v45 = vadd.f32 %v1990_v42, %v1949_v41 }
 0x1d8   :  { %v1992_v44 = vpop.f32.mrf.mxu1  ;;  %v1953_v47 = vpop.f32.mrf.mxu0 }
 0x1d9   :  { %v1993_v46 = vadd.f32 %v1992_v44, %v1951_v43 }
 0x1da   :  { %v1994_v48 = vpop.f32.mrf.mxu1  ;;  %v1954_v51 = vpop.f32.mrf.mxu0 }
 0x1db   :  { %v2023_v49 = vcombine.low %v1991_v45, %v1993_v46 }
 0x1dc   :  { %v1995_v52 = vpop.f32.mrf.mxu1 }
 0x1dd   :  { %v2037_v56 = vrot.slane %v2023_v49, %v2365_v63 }
 0x1df   :  { %v2038_v57 = vcombine.low %v2030_v54, %v2037_v56 }
 0x1e1   :  { %2042 = vst [vmem:[%s2429_s4 + $0x8] sm:$0xff] %v2038_v57 }
 0x1e2   :  { %2047 = vsyncpa [#allocation3], 1 }

// kernel: cnn_decoder_forward.17
= control target key start
LH: loop header
LB: loop body
LE: loop exit
PB: predicated region body
PF: predicated region fallthrough
CT: control target
= control target key end

     0   :  { %vm20_vm0 = vcmask 253952   ;;  %vm40_vm1 = vcmask 261120   ;;  %v167_v0 = vmov 0.0   ;;  %s291_s0 = inlined_call_operand.vmem [shape: f32[128,32], index: 0, kind: input, shape index: {}]   ;;  %s292_s1 = inlined_call_operand.vmem [shape: f32[1,32], index: 1, kind: input, shape index: {}]   ;;  %s293_s2 = inlined_call_operand.vmem [shape: f32[1,32], index: 2, kind: input, shape index: {}]   ;;  %s294_s3 = inlined_call_operand.vmem [shape: f32[1,32], index: 3, kind: output, shape index: {0}]   ;;  %s295_s4 = inlined_call_operand.vmem [shape: f32[1,32], index: 4, kind: output, shape index: {1}]  }
   0x1   :  { %21 = vst.msk [vmem:[#allocation2] sm:$0x1] %vm20_vm0, %v167_v0  ;;  %22 = vst.msk [vmem:[#allocation3] sm:$0x1] %vm20_vm0, %v167_v0  ;;  %v23_v1 = vld [vmem:[%s291_s0] sm:$0xff]  ;;  %v24_v2 = vld [vmem:[%s291_s0 + $0x8] sm:$0xff] }
   0x2   :  { %v25_v3 = vld [vmem:[%s291_s0 + $0x10] sm:$0xff]  ;;  %v26_v4 = vld [vmem:[%s291_s0 + $0x18] sm:$0xff]  ;;  %v41_v5 = vsel %vm40_vm1, %v23_v1, 0.0  ;;  %v42_v6 = vsel %vm40_vm1, %v24_v2, 0.0  ;;  %v27_v8 = vld [vmem:[%s291_s0 + $0x20] sm:$0xff]  ;;  %v82_v16 = vmul.f32 %v23_v1, %v23_v1  ;;  %v83_v17 = vmul.f32 %v24_v2, %v24_v2 }
   0x3   :  { %v44_v7 = vsel %vm40_vm1, %v25_v3, 0.0  ;;  %v43_v9 = vadd.f32 %v42_v6, %v41_v5  ;;  %v46_v10 = vsel %vm40_vm1, %v26_v4, 0.0  ;;  %v28_v11 = vld [vmem:[%s291_s0 + $0x28] sm:$0xff]  ;;  %v48_v13 = vsel %vm40_vm1, %v27_v8, 0.0  ;;  %v29_v14 = vld [vmem:[%s291_s0 + $0x30] sm:$0xff]  ;;  %v30_v20 = vld [vmem:[%s291_s0 + $0x38] sm:$0xff] }
   0x4   :  { %v84_v18 = vmul.f32 %v25_v3, %v25_v3  ;;  %v50_v19 = vsel %vm40_vm1, %v28_v11, 0.0  ;;  %v85_v22 = vmul.f32 %v26_v4, %v26_v4  ;;  %v52_v23 = vsel %vm40_vm1, %v29_v14, 0.0  ;;  %v31_v25 = vld [vmem:[%s291_s0 + $0x40] sm:$0xff]  ;;  %v32_v32 = vld [vmem:[%s291_s0 + $0x48] sm:$0xff]  ;;  %v33_v38 = vld [vmem:[%s291_s0 + $0x50] sm:$0xff] }
   0x5   :  { %v45_v12 = vadd.f32 %v44_v7, %v43_v9  ;;  %v86_v24 = vmul.f32 %v27_v8, %v27_v8  ;;  %v98_v27 = vsel %vm40_vm1, %v82_v16, 0.0  ;;  %v99_v28 = vsel %vm40_vm1, %v83_v17, 0.0  ;;  %v34_v44 = vld [vmem:[%s291_s0 + $0x58] sm:$0xff]  ;;  %v35_v50 = vld [vmem:[%s291_s0 + $0x60] sm:$0xff]  ;;  %v36_v56 = vld [vmem:[%s291_s0 + $0x68] sm:$0xff] }
   0x6   :  { %v101_v29 = vsel %vm40_vm1, %v84_v18, 0.0  ;;  %v54_v30 = vsel %vm40_vm1, %v30_v20, 0.0  ;;  %v100_v31 = vadd.f32 %v99_v28, %v98_v27  ;;  %v87_v34 = vmul.f32 %v28_v11, %v28_v11  ;;  %v37_v62 = vld [vmem:[%s291_s0 + $0x70] sm:$0xff]  ;;  %v38_v4 = vld [vmem:[%s291_s0 + $0x78] sm:$0xff] }
   0x7   :  { %v47_v15 = vadd.f32 %v46_v10, %v45_v12  ;;  %v103_v35 = vsel %vm40_vm1, %v85_v22, 0.0  ;;  %v56_v36 = vsel %vm40_vm1, %v31_v25, 0.0  ;;  %v88_v40 = vmul.f32 %v29_v14, %v29_v14 }
   0x8   :  { %v102_v37 = vadd.f32 %v101_v29, %v100_v31  ;;  %v105_v41 = vsel %vm40_vm1, %v86_v24, 0.0  ;;  %v58_v42 = vsel %vm40_vm1, %v32_v32, 0.0  ;;  %v89_v46 = vmul.f32 %v30_v20, %v30_v20 }
   0x9   :  { %v49_v21 = vadd.f32 %v48_v13, %v47_v15  ;;  %v107_v47 = vsel %vm40_vm1, %v87_v34, 0.0  ;;  %v60_v48 = vsel %vm40_vm1, %v33_v38, 0.0  ;;  %v90_v52 = vmul.f32 %v31_v25, %v31_v25 }
   0xa   :  { %v104_v43 = vadd.f32 %v103_v35, %v102_v37  ;;  %v109_v53 = vsel %vm40_vm1, %v88_v40, 0.0  ;;  %v62_v54 = vsel %vm40_vm1, %v34_v44, 0.0  ;;  %v91_v58 = vmul.f32 %v32_v32, %v32_v32 }
   0xb   :  { %v51_v26 = vadd.f32 %v50_v19, %v49_v21  ;;  %v111_v59 = vsel %vm40_vm1, %v89_v46, 0.0  ;;  %v64_v60 = vsel %vm40_vm1, %v35_v50, 0.0  ;;  %v92_v0 = vmul.f32 %v33_v38, %v33_v38 }
   0xc   :  { %v106_v49 = vadd.f32 %v105_v41, %v104_v43  ;;  %v113_v1 = vsel %vm40_vm1, %v90_v52, 0.0  ;;  %v66_v2 = vsel %vm40_vm1, %v36_v56, 0.0  ;;  %v93_v6 = vmul.f32 %v34_v44, %v34_v44  ;;  %v81_v44 = vld [vmem:[#allocation3] sm:$0x1] }
   0xd   :  { %v53_v33 = vadd.f32 %v52_v23, %v51_v26  ;;  %v115_v7 = vsel %vm40_vm1, %v91_v58, 0.0  ;;  %v68_v8 = vsel %vm40_vm1, %v37_v62, 0.0  ;;  %v94_v11 = vmul.f32 %v35_v50, %v35_v50  ;;  %v152_v58 = vld [vmem:[%s293_s2] sm:$0x1] }
   0xe   :  { %v108_v55 = vadd.f32 %v107_v47, %v106_v49  ;;  %v117_v12 = vsel %vm40_vm1, %v92_v0, 0.0  ;;  %v70_v13 = vsel %vm40_vm1, %v38_v4, 0.0  ;;  %v95_v16 = vmul.f32 %v36_v56, %v36_v56 }
   0xf   :  { %v55_v39 = vadd.f32 %v54_v30, %v53_v33  ;;  %v119_v17 = vsel %vm40_vm1, %v93_v6, 0.0  ;;  %v96_v20 = vmul.f32 %v37_v62, %v37_v62  ;;  %v121_v21 = vsel %vm40_vm1, %v94_v11, 0.0 }
  0x10   :  { %v110_v61 = vadd.f32 %v109_v53, %v108_v55  ;;  %v97_v24 = vmul.f32 %v38_v4, %v38_v4  ;;  %v123_v25 = vsel %vm40_vm1, %v95_v16, 0.0  ;;  %v147_v55 = vld [vmem:[%s292_s1] sm:$0x1] }
  0x11   :  { %v57_v45 = vadd.f32 %v56_v36, %v55_v39  ;;  %v125_v28 = vsel %vm40_vm1, %v96_v20, 0.0  ;;  %v39_v36 = vld [vmem:[#allocation2] sm:$0x1] }
  0x12   :  { %v112_v3 = vadd.f32 %v111_v59, %v110_v61  ;;  %v127_v31 = vsel %vm40_vm1, %v97_v24, 0.0 }
  0x13   :  { %v59_v51 = vadd.f32 %v58_v42, %v57_v45 }
  0x14   :  { %v114_v9 = vadd.f32 %v113_v1, %v112_v3 }
  0x15   :  { %v61_v57 = vadd.f32 %v60_v48, %v59_v51 }
  0x16   :  { %v116_v14 = vadd.f32 %v115_v7, %v114_v9 }
  0x17   :  { %v63_v63 = vadd.f32 %v62_v54, %v61_v57 }
  0x18   :  { %v118_v18 = vadd.f32 %v117_v12, %v116_v14 }
  0x19   :  { %v65_v5 = vadd.f32 %v64_v60, %v63_v63 }
  0x1a   :  { %v120_v22 = vadd.f32 %v119_v17, %v118_v18 }
  0x1b   :  { %v67_v10 = vadd.f32 %v66_v2, %v65_v5 }
  0x1c   :  { %v122_v26 = vadd.f32 %v121_v21, %v120_v22 }
  0x1d   :  { %v69_v15 = vadd.f32 %v68_v8, %v67_v10 }
  0x1e   :  { %v124_v29 = vadd.f32 %v123_v25, %v122_v26 }
  0x1f   :  { %v71_v19 = vadd.f32 %v70_v13, %v69_v15 }
  0x20   :  { %v126_v32 = vadd.f32 %v125_v28, %v124_v29 }
  0x21   :  { %v72_v23 = vrot.slane %v71_v19, 4 }
  0x22   :  { %v128_v34 = vadd.f32 %v127_v31, %v126_v32 }
  0x23   :  { %v73_v27 = vadd.f32 %v72_v23, %v71_v19 }
  0x24   :  { %v129_v37 = vrot.slane %v128_v34, 4 }
  0x25   :  { %v74_v30 = vrot.slane %v73_v27, 2 }
  0x26   :  { %v130_v39 = vadd.f32 %v129_v37, %v128_v34 }
  0x27   :  { %v75_v33 = vadd.f32 %v74_v30, %v73_v27 }
  0x28   :  { %v131_v41 = vrot.slane %v130_v39, 2 }
  0x29   :  { %v76_v35 = vrot.slane %v75_v33, 1 }
  0x2a   :  { %v132_v42 = vadd.f32 %v131_v41, %v130_v39 }
  0x2b   :  { %v77_v38 = vadd.f32 %v76_v35, %v75_v33 }
  0x2c   :  { %v133_v43 = vrot.slane %v132_v42, 1 }
  0x2d   :  { %v78_v40 = vadd.f32 %v77_v38, %v39_v36 }
  0x2e   :  { %v134_v45 = vadd.f32 %v133_v43, %v132_v42 }
  0x2f   :  { %80 = vst.msk [vmem:[#allocation2] sm:$0x1] %vm20_vm0, %v78_v40 }
  0x30   :  { %v135_v46 = vadd.f32 %v134_v45, %v81_v44 }
  0x32   :  { %136 = vst.msk [vmem:[#allocation3] sm:$0x1] %vm20_vm0, %v135_v46 }
  0x36   :  { %v140_v47 = vld [vmem:[#allocation2] sm:$0x1] }
  0x37   :  { %v141_v48 = vmul.f32 0.0078125, %v140_v47 }
  0x39   :  { %v144_v49 = vmul.f32 %v141_v48, %v141_v48  ;;  %v142_v50 = vld [vmem:[#allocation3] sm:$0x1] }
  0x3a   :  { %v143_v51 = vmul.f32 0.0078125, %v142_v50 }
  0x3c   :  { %v145_v52 = vsub.f32 %v143_v51, %v144_v49 }
  0x3e   :  { %v146_v53 = vmax.f32 %v145_v52, 0.0 }
  0x40   :  { %v148_v54 = vadd.f32 1e-05, %v146_v53 }
  0x42   :  { %165 = vrsqrt.f32 %v148_v54 }
  0x4f   :  { %v166_v56 = vpop.eup %165 }
  0x50   :  { %v150_v57 = vmul.f32 %v166_v56, %v147_v55 }
  0x52   :  { %151 = vst.msk [vmem:[%s294_s3] sm:$0x1] %vm20_vm0, %v150_v57  ;;  %v153_v59 = vmul.f32 %v150_v57, %v141_v48 }
  0x54   :  { %v154_v60 = vsub.f32 %v152_v58, %v153_v59 }
  0x56   :  { %155 = vst.msk [vmem:[%s295_s4] sm:$0x1] %vm20_vm0, %v154_v60 }

// kernel: cnn_decoder_forward.18
= control target key start
LH: loop header
LB: loop body
LE: loop exit
PB: predicated region body
PF: predicated region fallthrough
CT: control target
= control target key end

     0   :  { %v327_v1 = vmov 0   ;;  %vm128_vm0 = vcmask 261120   ;;  %s567_s1 = inlined_call_operand.vmem [shape: bf16[32,256], index: 1, kind: input, shape index: {}]   ;;  %s568_s0 = inlined_call_operand.vmem [shape: f32[128,32], index: 0, kind: input, shape index: {}]   ;;  %s569_s2 = inlined_call_operand.vmem [shape: f32[1,32], index: 2, kind: input, shape index: {}]   ;;  %s570_s3 = inlined_call_operand.vmem [shape: f32[1,32], index: 3, kind: input, shape index: {}]   ;;  %s571_s4 = inlined_call_operand.vmem [shape: f32[128,256], index: 4, kind: output, shape index: {}]  }
   0x1   :  { %v321_v0 = vld [vmem:[%s567_s1 + $0x14] ss:$8 sps:$4 sm:$0xff]   ;;  %185 = vmatprep.mubr.bf16.mxu0 %v327_v1  ;;  %225 = vmatprep.mubr.bf16.mxu1 %v327_v1  ;;  %v323_v2 = vld [vmem:[%s567_s1 + $0x10] ss:$8 sps:$4 sm:$0xff]   ;;  %v324_v3 = vld [vmem:[%s567_s1 + $0x4] ss:$8 sps:$4 sm:$0xff]  }
   0x2   :  { %165 = vmatprep.subr.bf16.mxu0 %v321_v0  ;;  %316 = vmatprep.subr.bf16.mxu1 %v321_v0  ;;  %v326_v4 = vld [vmem:[%s567_s1] ss:$8 sps:$4 sm:$0xff]   ;;  %v20_v13 = vld [vmem:[%s568_s0 + $0x10] sm:$0xff]  ;;  %v21_v16 = vld [vmem:[%s568_s0 + $0x18] sm:$0xff] }
   0x3   :  { %v18_v5 = vld [vmem:[%s568_s0] sm:$0xff]  ;;  %166 = vmatpush1.bf16.msra.mxu0 %v323_v2  ;;  %318 = vmatpush1.bf16.msra.mxu1 %v323_v2  ;;  %v19_v6 = vld [vmem:[%s568_s0 + $0x8] sm:$0xff]  ;;  %v28_v18 = vld [vmem:[%s568_s0 + $0x50] sm:$0xff] }
   0x4   :  { %v376_v7 = vld [vmem:[%s569_s2] ss:$0 sm:$0xff]  ;;  %167 = vmatprep.subr.bf16.mxu0 %v324_v3  ;;  %317 = vmatprep.subr.bf16.mxu1 %v324_v3  ;;  %v27_v12 = vld [vmem:[%s568_s0 + $0x48] sm:$0xff]  ;;  %v29_v19 = vld [vmem:[%s568_s0 + $0x58] sm:$0xff] }
   0x5   :  { %v381_v8 = vld [vmem:[%s570_s3] ss:$0 sm:$0xff]  ;;  %v42_v9 = vmul.f32 %v376_v7, %v18_v5  ;;  %v43_v10 = vmul.f32 %v376_v7, %v19_v6  ;;  %v51_v15 = vmul.f32 %v376_v7, %v27_v12  ;;  %v44_v17 = vmul.f32 %v376_v7, %v20_v13  ;;  %v23_v35 = vld [vmem:[%s568_s0 + $0x28] sm:$0xff]  ;;  %v24_v55 = vld [vmem:[%s568_s0 + $0x30] sm:$0xff] }
   0x6   :  { %v26_v11 = vld [vmem:[%s568_s0 + $0x40] sm:$0xff]  ;;  %v45_v22 = vmul.f32 %v376_v7, %v21_v16  ;;  %v52_v23 = vmul.f32 %v376_v7, %v28_v18  ;;  %v53_v30 = vmul.f32 %v376_v7, %v29_v19  ;;  %v31_v39 = vld [vmem:[%s568_s0 + $0x68] sm:$0xff]  ;;  %v47_v44 = vmul.f32 %v376_v7, %v23_v35  ;;  %v25_v56 = vld [vmem:[%s568_s0 + $0x38] sm:$0xff] }
   0x7   :  { %v50_v14 = vmul.f32 %v376_v7, %v26_v11  ;;  %v64_v20 = vadd.f32 %v381_v8, %v42_v9  ;;  %v65_v21 = vadd.f32 %v381_v8, %v43_v10  ;;  %168 = vmatpush1.bf16.msra.mxu0 %v326_v4  ;;  %319 = vmatpush1.bf16.msra.mxu1 %v326_v4  ;;  %v22_v34 = vld [vmem:[%s568_s0 + $0x20] sm:$0xff]  ;;  %v32_v57 = vld [vmem:[%s568_s0 + $0x70] sm:$0xff]  ;;  %v33_v58 = vld [vmem:[%s568_s0 + $0x78] sm:$0xff] }
   0x8   :  { %v73_v25 = vadd.f32 %v381_v8, %v51_v15  ;;  %v66_v26 = vadd.f32 %v381_v8, %v44_v17  ;;  %v67_v29 = vadd.f32 %v381_v8, %v45_v22  ;;  %v74_v33 = vadd.f32 %v381_v8, %v52_v23  ;;  %v30_v38 = vld [vmem:[%s568_s0 + $0x60] sm:$0xff] }
   0x9   :  { %v72_v24 = vadd.f32 %v381_v8, %v50_v14  ;;  %v80_v27 = vmax.f32 %v64_v20, 0.0  ;;  %v81_v28 = vmax.f32 %v65_v21, 0.0  ;;  %v75_v37 = vadd.f32 %v381_v8, %v53_v30 }
   0xa   :  { %v89_v32 = vmax.f32 %v73_v25, 0.0  ;;  %v82_v41 = vmax.f32 %v66_v26, 0.0  ;;  %v83_v42 = vmax.f32 %v67_v29, 0.0  ;;  %v46_v43 = vmul.f32 %v376_v7, %v22_v34 }
   0xb   :  { %v88_v31 = vmax.f32 %v72_v24, 0.0  ;;  %v96_v36 = vpack.c.bf16 %v81_v28, %v80_v27  ;;  %v90_v45 = vmax.f32 %v74_v33, 0.0  ;;  %v91_v46 = vmax.f32 %v75_v37, 0.0 }
   0xc   :  { %v54_v47 = vmul.f32 %v376_v7, %v30_v38  ;;  %v55_v48 = vmul.f32 %v376_v7, %v31_v39  ;;  %v97_v49 = vpack.c.bf16 %v83_v42, %v82_v41  ;;  %v68_v50 = vadd.f32 %v381_v8, %v46_v43 }
   0xd   :  { %v100_v40 = vpack.c.bf16 %v89_v32, %v88_v31  ;;  %308 = vmatmul.mubr.msk.bf16.vlgmr.msra.gmra.mxu0 %vm128_vm0, %v96_v36  ;;  %v69_v51 = vadd.f32 %v381_v8, %v47_v44  ;;  %v101_v52 = vpack.c.bf16 %v91_v46, %v90_v45  ;;  %v48_v61 = vmul.f32 %v376_v7, %v24_v55 }
   0xe   :  { %195 = vmatprep.mubr.bf16.mxu0 %v327_v1  ;;  %v76_v53 = vadd.f32 %v381_v8, %v54_v47  ;;  %v77_v54 = vadd.f32 %v381_v8, %v55_v48  ;;  %v84_v59 = vmax.f32 %v68_v50, 0.0  ;;  %v49_v62 = vmul.f32 %v376_v7, %v25_v56 }
   0xf   :  { %312 = vmatmul.mubr.msk.bf16.vlgmr.msra.gmra.mxu1 %vm128_vm0, %v100_v40  ;;  %v85_v60 = vmax.f32 %v69_v51, 0.0  ;;  %v56_v2 = vmul.f32 %v376_v7, %v32_v57  ;;  %v57_v3 = vmul.f32 %v376_v7, %v33_v58  ;;  %v70_v5 = vadd.f32 %v381_v8, %v48_v61 }
  0x10   :  { %235 = vmatprep.mubr.bf16.mxu1 %v327_v1  ;;  %v92_v63 = vmax.f32 %v76_v53, 0.0  ;;  %v93_v0 = vmax.f32 %v77_v54, 0.0  ;;  %v71_v6 = vadd.f32 %v381_v8, %v49_v62 }
  0x11   :  { %v98_v4 = vpack.c.bf16 %v85_v60, %v84_v59  ;;  %v78_v10 = vadd.f32 %v381_v8, %v56_v2  ;;  %v79_v11 = vadd.f32 %v381_v8, %v57_v3  ;;  %v86_v12 = vmax.f32 %v70_v5, 0.0 }
  0x12   :  { %v102_v9 = vpack.c.bf16 %v93_v0, %v92_v63  ;;  %v87_v13 = vmax.f32 %v71_v6, 0.0 }
  0x13   :  { %v94_v7 = vmax.f32 %v78_v10, 0.0  ;;  %v95_v14 = vmax.f32 %v79_v11, 0.0 }
  0x14   :  { %v99_v15 = vpack.c.bf16 %v87_v13, %v86_v12 }
  0x15   :  { %309 = vmatmul.mubr.msk.bf16.gmra.mxu0 %vm128_vm0, %v97_v49  ;;  %v103_v16 = vpack.c.bf16 %v95_v14, %v94_v7 }
  0x16   :  { %205 = vmatprep.mubr.bf16.mxu0 %v327_v1 }
  0x17   :  { %313 = vmatmul.mubr.msk.bf16.gmra.mxu1 %vm128_vm0, %v101_v52 }
  0x18   :  { %245 = vmatprep.mubr.bf16.mxu1 %v327_v1 }
  0x1d   :  { %310 = vmatmul.mubr.msk.bf16.gmra.mxu0 %vm128_vm0, %v98_v4 }
  0x1e   :  { %215 = vmatprep.mubr.bf16.mxu0 %v327_v1 }
  0x1f   :  { %314 = vmatmul.mubr.msk.bf16.gmra.mxu1 %vm128_vm0, %v102_v9 }
  0x20   :  { %255 = vmatprep.mubr.bf16.mxu1 %v327_v1 }
  0x25   :  { %311 = vmatmul.mubr.msk.bf16.gmra.mxu0 %vm128_vm0, %v99_v15 }
  0x27   :  { %315 = vmatmul.mubr.msk.bf16.gmra.mxu1 %vm128_vm0, %v103_v16 }
  0xcd   :  { %v187_v17 = vpop.f32.mrf.mxu0 }
  0xce   :  { %266 = vst [vmem:[%s571_s4] sm:$0xff] %v187_v17 }
  0xcf   :  { %v227_v8 = vpop.f32.mrf.mxu1  ;;  %v189_v18 = vpop.f32.mrf.mxu0 }
  0xd0   :  { %282 = vst [vmem:[%s571_s4 + $0x80] sm:$0xff] %v227_v8  ;;  %267 = vst [vmem:[%s571_s4 + $0x8] sm:$0xff] %v189_v18 }
  0xd1   :  { %v229_v1 = vpop.f32.mrf.mxu1  ;;  %v191_v19 = vpop.f32.mrf.mxu0 }
  0xd2   :  { %283 = vst [vmem:[%s571_s4 + $0x88] sm:$0xff] %v229_v1  ;;  %268 = vst [vmem:[%s571_s4 + $0x10] sm:$0xff] %v191_v19 }
  0xd3   :  { %v231_v20 = vpop.f32.mrf.mxu1  ;;  %v193_v21 = vpop.f32.mrf.mxu0 }
  0xd4   :  { %284 = vst [vmem:[%s571_s4 + $0x90] sm:$0xff] %v231_v20  ;;  %269 = vst [vmem:[%s571_s4 + $0x18] sm:$0xff] %v193_v21 }
  0xd5   :  { %v233_v22 = vpop.f32.mrf.mxu1  ;;  %v197_v23 = vpop.f32.mrf.mxu0 }
  0xd6   :  { %285 = vst [vmem:[%s571_s4 + $0x98] sm:$0xff] %v233_v22  ;;  %270 = vst [vmem:[%s571_s4 + $0x20] sm:$0xff] %v197_v23 }
  0xd7   :  { %v237_v24 = vpop.f32.mrf.mxu1  ;;  %v199_v25 = vpop.f32.mrf.mxu0 }
  0xd8   :  { %286 = vst [vmem:[%s571_s4 + $0xa0] sm:$0xff] %v237_v24  ;;  %271 = vst [vmem:[%s571_s4 + $0x28] sm:$0xff] %v199_v25 }
  0xd9   :  { %v239_v26 = vpop.f32.mrf.mxu1  ;;  %v201_v27 = vpop.f32.mrf.mxu0 }
  0xda   :  { %287 = vst [vmem:[%s571_s4 + $0xa8] sm:$0xff] %v239_v26  ;;  %272 = vst [vmem:[%s571_s4 + $0x30] sm:$0xff] %v201_v27 }
  0xdb   :  { %v241_v28 = vpop.f32.mrf.mxu1  ;;  %v203_v29 = vpop.f32.mrf.mxu0 }
  0xdc   :  { %288 = vst [vmem:[%s571_s4 + $0xb0] sm:$0xff] %v241_v28  ;;  %273 = vst [vmem:[%s571_s4 + $0x38] sm:$0xff] %v203_v29 }
  0xdd   :  { %v243_v30 = vpop.f32.mrf.mxu1  ;;  %v207_v31 = vpop.f32.mrf.mxu0 }
  0xde   :  { %289 = vst [vmem:[%s571_s4 + $0xb8] sm:$0xff] %v243_v30  ;;  %274 = vst [vmem:[%s571_s4 + $0x40] sm:$0xff] %v207_v31 }
  0xdf   :  { %v247_v32 = vpop.f32.mrf.mxu1  ;;  %v209_v33 = vpop.f32.mrf.mxu0 }
  0xe0   :  { %290 = vst [vmem:[%s571_s4 + $0xc0] sm:$0xff] %v247_v32  ;;  %275 = vst [vmem:[%s571_s4 + $0x48] sm:$0xff] %v209_v33 }
  0xe1   :  { %v249_v34 = vpop.f32.mrf.mxu1  ;;  %v211_v35 = vpop.f32.mrf.mxu0 }
  0xe2   :  { %291 = vst [vmem:[%s571_s4 + $0xc8] sm:$0xff] %v249_v34  ;;  %276 = vst [vmem:[%s571_s4 + $0x50] sm:$0xff] %v211_v35 }
  0xe3   :  { %v251_v36 = vpop.f32.mrf.mxu1  ;;  %v213_v37 = vpop.f32.mrf.mxu0 }
  0xe4   :  { %292 = vst [vmem:[%s571_s4 + $0xd0] sm:$0xff] %v251_v36  ;;  %277 = vst [vmem:[%s571_s4 + $0x58] sm:$0xff] %v213_v37 }
  0xe5   :  { %v253_v38 = vpop.f32.mrf.mxu1  ;;  %v217_v39 = vpop.f32.mrf.mxu0 }
  0xe6   :  { %293 = vst [vmem:[%s571_s4 + $0xd8] sm:$0xff] %v253_v38  ;;  %278 = vst [vmem:[%s571_s4 + $0x60] sm:$0xff] %v217_v39 }
  0xe7   :  { %v257_v40 = vpop.f32.mrf.mxu1  ;;  %v219_v41 = vpop.f32.mrf.mxu0 }
  0xe8   :  { %294 = vst [vmem:[%s571_s4 + $0xe0] sm:$0xff] %v257_v40  ;;  %279 = vst [vmem:[%s571_s4 + $0x68] sm:$0xff] %v219_v41 }
  0xe9   :  { %v259_v42 = vpop.f32.mrf.mxu1  ;;  %v221_v43 = vpop.f32.mrf.mxu0 }
  0xea   :  { %295 = vst [vmem:[%s571_s4 + $0xe8] sm:$0xff] %v259_v42  ;;  %280 = vst [vmem:[%s571_s4 + $0x70] sm:$0xff] %v221_v43 }
  0xeb   :  { %v261_v44 = vpop.f32.mrf.mxu1  ;;  %v223_v45 = vpop.f32.mrf.mxu0 }
  0xec   :  { %296 = vst [vmem:[%s571_s4 + $0xf0] sm:$0xff] %v261_v44  ;;  %281 = vst [vmem:[%s571_s4 + $0x78] sm:$0xff] %v223_v45 }
  0xed   :  { %v263_v46 = vpop.f32.mrf.mxu1 }
  0xee   :  { %297 = vst [vmem:[%s571_s4 + $0xf8] sm:$0xff] %v263_v46 }

// kernel: cnn_decoder_forward.19
= control target key start
LH: loop header
LB: loop body
LE: loop exit
PB: predicated region body
PF: predicated region fallthrough
CT: control target
= control target key end

     0   :  { %vm20_vm0 = vcmask 122880   ;;  %vm88_vm1 = vcmask 130048   ;;  %v455_v0 = vmov 0.0   ;;  %s1353_s0 = inlined_call_operand.vmem [shape: f32[512,16], index: 0, kind: input, shape index: {}]   ;;  %s1354_s1 = inlined_call_operand.vmem [shape: f32[1,16], index: 1, kind: input, shape index: {}]   ;;  %s1355_s2 = inlined_call_operand.vmem [shape: f32[1,16], index: 2, kind: input, shape index: {}]   ;;  %s1356_s3 = inlined_call_operand.vmem [shape: f32[1,16], index: 3, kind: output, shape index: {0}]   ;;  %s1357_s4 = inlined_call_operand.vmem [shape: f32[1,16], index: 4, kind: output, shape index: {1}]  }
   0x1   :  { %21 = vst.msk [vmem:[#allocation2] sm:$0x1] %vm20_vm0, %v455_v0  ;;  %22 = vst.msk [vmem:[#allocation3] sm:$0x1] %vm20_vm0, %v455_v0  ;;  %v486_v1 = vld [vmem:[%s1353_s0] sm:$0xff]  ;;  %v491_v2 = vld [vmem:[%s1353_s0 + $0x8] sm:$0xff] }
   0x2   :  { %v496_v3 = vld [vmem:[%s1353_s0 + $0x10] sm:$0xff]  ;;  %v501_v4 = vld [vmem:[%s1353_s0 + $0x18] sm:$0xff]  ;;  %v89_v5 = vsel %vm88_vm1, %v486_v1, 0.0  ;;  %v90_v6 = vsel %vm88_vm1, %v491_v2, 0.0  ;;  %v512_v8 = vld [vmem:[%s1353_s0 + $0x20] sm:$0xff] }
   0x3   :  { %v92_v7 = vsel %vm88_vm1, %v496_v3, 0.0  ;;  %v91_v9 = vadd.f32 %v90_v6, %v89_v5  ;;  %v94_v10 = vsel %vm88_vm1, %v501_v4, 0.0  ;;  %v519_v11 = vld [vmem:[%s1353_s0 + $0x28] sm:$0xff]  ;;  %v96_v13 = vsel %vm88_vm1, %v512_v8, 0.0  ;;  %v526_v14 = vld [vmem:[%s1353_s0 + $0x30] sm:$0xff]  ;;  %v531_v16 = vld [vmem:[%s1353_s0 + $0x38] sm:$0xff] }
   0x4   :  { %v536_v17 = vld [vmem:[%s1353_s0 + $0x40] sm:$0xff]  ;;  %v98_v18 = vsel %vm88_vm1, %v519_v11, 0.0  ;;  %v543_v19 = vld [vmem:[%s1353_s0 + $0x48] sm:$0xff]  ;;  %v548_v20 = vld [vmem:[%s1353_s0 + $0x50] sm:$0xff]  ;;  %v100_v23 = vsel %vm88_vm1, %v526_v14, 0.0  ;;  %v102_v25 = vsel %vm88_vm1, %v531_v16, 0.0 }
   0x5   :  { %v93_v12 = vadd.f32 %v92_v7, %v91_v9  ;;  %v553_v21 = vld [vmem:[%s1353_s0 + $0x58] sm:$0xff]  ;;  %v104_v26 = vsel %vm88_vm1, %v536_v17, 0.0  ;;  %v564_v27 = vld [vmem:[%s1353_s0 + $0x108] sm:$0xff]  ;;  %v569_v28 = vld [vmem:[%s1353_s0 + $0x110] sm:$0xff]  ;;  %v106_v30 = vsel %vm88_vm1, %v543_v19, 0.0  ;;  %v108_v31 = vsel %vm88_vm1, %v548_v20, 0.0 }
   0x6   :  { %v574_v29 = vld [vmem:[%s1353_s0 + $0x118] sm:$0xff]  ;;  %v582_v32 = vsel %vm88_vm1, %v553_v21, 0.0  ;;  %v587_v33 = vld [vmem:[%s1353_s0 + $0x120] sm:$0xff]  ;;  %v592_v34 = vld [vmem:[%s1353_s0 + $0x128] sm:$0xff]  ;;  %v601_v37 = vsel %vm88_vm1, %v564_v27, 0.0  ;;  %v605_v38 = vsel %vm88_vm1, %v569_v28, 0.0 }
   0x7   :  { %v95_v15 = vadd.f32 %v94_v10, %v93_v12  ;;  %v597_v35 = vld [vmem:[%s1353_s0 + $0x130] sm:$0xff]  ;;  %1380 = vst [vmem:[#allocation4_spill] sm:$0xff] %v601_v37  ;;  %1381 = vst [vmem:[#allocation5_spill] sm:$0xff] %v605_v38  ;;  %v609_v39 = vsel %vm88_vm1, %v574_v29, 0.0  ;;  %v614_v40 = vld [vmem:[%s1353_s0 + $0x138] sm:$0xff]  ;;  %v628_v43 = vsel %vm88_vm1, %v587_v33, 0.0 }
   0x8   :  { %1382 = vst [vmem:[#allocation6_spill] sm:$0xff] %v609_v39  ;;  %v619_v41 = vld [vmem:[%s1353_s0 + $0x140] sm:$0xff]  ;;  %v624_v42 = vld [vmem:[%s1353_s0 + $0x148] sm:$0xff]  ;;  %1383 = vst [vmem:[#allocation7_spill] sm:$0xff] %v628_v43  ;;  %v632_v44 = vsel %vm88_vm1, %v592_v34, 0.0  ;;  %v636_v45 = vsel %vm88_vm1, %v597_v35, 0.0 }
   0x9   :  { %v97_v22 = vadd.f32 %v96_v13, %v95_v15  ;;  %1384 = vst [vmem:[#allocation8_spill] sm:$0xff] %v632_v44  ;;  %1385 = vst [vmem:[#allocation9_spill] sm:$0xff] %v636_v45  ;;  %v641_v46 = vld [vmem:[%s1353_s0 + $0x150] sm:$0xff]  ;;  %v646_v47 = vld [vmem:[%s1353_s0 + $0x158] sm:$0xff]  ;;  %v655_v50 = vsel %vm88_vm1, %v614_v40, 0.0  ;;  %v659_v51 = vsel %vm88_vm1, %v619_v41, 0.0 }
   0xa   :  { %v651_v48 = vld [vmem:[%s1353_s0 + $0x160] sm:$0xff]  ;;  %1386 = vst [vmem:[#allocation10_spill] sm:$0xff] %v655_v50  ;;  %1387 = vst [vmem:[#allocation11_spill] sm:$0xff] %v659_v51  ;;  %v663_v52 = vsel %vm88_vm1, %v624_v42, 0.0  ;;  %v668_v53 = vld [vmem:[%s1353_s0 + $0x168] sm:$0xff]  ;;  %v682_v56 = vsel %vm88_vm1, %v641_v46, 0.0 }
   0xb   :  { %v99_v24 = vadd.f32 %v98_v18, %v97_v22  ;;  %1388 = vst [vmem:[#allocation12_spill] sm:$0xff] %v663_v52  ;;  %v673_v54 = vld [vmem:[%s1353_s0 + $0x170] sm:$0xff]  ;;  %v678_v55 = vld [vmem:[%s1353_s0 + $0x178] sm:$0xff]  ;;  %1389 = vst [vmem:[#allocation13_spill] sm:$0xff] %v682_v56  ;;  %v686_v57 = vsel %vm88_vm1, %v646_v47, 0.0  ;;  %v690_v58 = vsel %vm88_vm1, %v651_v48, 0.0 }
   0xc   :  { %1390 = vst [vmem:[#allocation14_spill] sm:$0xff] %v686_v57  ;;  %1391 = vst [vmem:[#allocation15_spill] sm:$0xff] %v690_v58  ;;  %v695_v59 = vld [vmem:[%s1353_s0 + $0x60] sm:$0xff]  ;;  %v705_v61 = vld [vmem:[%s1353_s0 + $0x188] sm:$0xff]  ;;  %v714_v0 = vsel %vm88_vm1, %v668_v53, 0.0  ;;  %v718_v5 = vsel %vm88_vm1, %v673_v54, 0.0 }
   0xd   :  { %v101_v36 = vadd.f32 %v100_v23, %v99_v24  ;;  %v700_v60 = vld [vmem:[%s1353_s0 + $0x180] sm:$0xff]  ;;  %v710_v62 = vld [vmem:[%s1353_s0 + $0x190] sm:$0xff]  ;;  %1392 = vst [vmem:[#allocation16_spill] sm:$0xff] %v714_v0  ;;  %1393 = vst [vmem:[#allocation17_spill] sm:$0xff] %v718_v5  ;;  %v722_v6 = vsel %vm88_vm1, %v678_v55, 0.0  ;;  %v745_v13 = vsel %vm88_vm1, %v705_v61, 0.0 }
   0xe   :  { %1394 = vst [vmem:[#allocation18_spill] sm:$0xff] %v722_v6  ;;  %v727_v7 = vld [vmem:[%s1353_s0 + $0x198] sm:$0xff]  ;;  %v732_v9 = vld [vmem:[%s1353_s0 + $0x1a0] sm:$0xff]  ;;  %v737_v10 = vld [vmem:[%s1353_s0 + $0x1a8] sm:$0xff]  ;;  %v741_v12 = vsel %vm88_vm1, %v700_v60, 0.0  ;;  %v749_v15 = vsel %vm88_vm1, %v710_v62, 0.0 }
   0xf   :  { %v103_v49 = vadd.f32 %v102_v25, %v101_v36  ;;  %1395 = vst [vmem:[#allocation19_spill] sm:$0xff] %v741_v12  ;;  %1396 = vst [vmem:[#allocation20_spill] sm:$0xff] %v745_v13  ;;  %v754_v18 = vld [vmem:[%s1353_s0 + $0x68] sm:$0xff]  ;;  %v759_v22 = vld [vmem:[%s1353_s0 + $0x1b0] sm:$0xff]  ;;  %v777_v36 = vsel %vm88_vm1, %v732_v9, 0.0 }
  0x10   :  { %1397 = vst [vmem:[#allocation21_spill] sm:$0xff] %v749_v15  ;;  %v764_v23 = vld [vmem:[%s1353_s0 + $0x1b8] sm:$0xff]  ;;  %v769_v24 = vld [vmem:[%s1353_s0 + $0x1c0] sm:$0xff]  ;;  %1399 = vst [vmem:[#allocation23_spill] sm:$0xff] %v777_v36  ;;  %v800_v36 = vsel %vm88_vm1, %v759_v22, 0.0 }
  0x11   :  { %v105_v63 = vadd.f32 %v104_v26, %v103_v49  ;;  %v773_v26 = vsel %vm88_vm1, %v727_v7, 0.0  ;;  %v781_v49 = vsel %vm88_vm1, %v737_v10, 0.0  ;;  %v786_v15 = vld [vmem:[%s1353_s0 + $0x1c8] sm:$0xff]  ;;  %1403 = vst [vmem:[#allocation27_spill] sm:$0xff] %v800_v36  ;;  %v813_v13 = vld [vmem:[%s1353_s0 + $0x1e0] sm:$0xff]  ;;  %v823_v36 = vld [vmem:[%s1353_s0 + $0x1f0] sm:$0xff] }
  0x12   :  { %1398 = vst [vmem:[#allocation22_spill] sm:$0xff] %v773_v26  ;;  %1400 = vst [vmem:[#allocation24_spill] sm:$0xff] %v781_v49  ;;  %v804_v49 = vsel %vm88_vm1, %v764_v23, 0.0  ;;  %v808_v26 = vsel %vm88_vm1, %v769_v24, 0.0  ;;  %v818_v12 = vld [vmem:[%s1353_s0 + $0x1e8] sm:$0xff]  ;;  %v827_v6 = vsel %vm88_vm1, %v786_v15, 0.0 }
  0x13   :  { %v107_v25 = vadd.f32 %v106_v30, %v105_v63  ;;  %v791_v30 = vld [vmem:[%s1353_s0 + $0x1d0] sm:$0xff]  ;;  %v796_v63 = vld [vmem:[%s1353_s0 + $0x1d8] sm:$0xff]  ;;  %1404 = vst [vmem:[#allocation28_spill] sm:$0xff] %v804_v49  ;;  %1405 = vst [vmem:[#allocation29_spill] sm:$0xff] %v808_v26 }
  0x14   :  { %1401 = vst [vmem:[#allocation25_spill] sm:$0xff] %v791_v30  ;;  %1402 = vst [vmem:[#allocation26_spill] sm:$0xff] %v796_v63  ;;  %v831_v26 = vsel %vm88_vm1, %v791_v30, 0.0  ;;  %v835_v5 = vsel %vm88_vm1, %v796_v63, 0.0  ;;  %v840_v0 = vld [vmem:[%s1353_s0 + $0x1f8] sm:$0xff]  ;;  %v894_v56 = vld [vmem:[%s1353_s0 + $0xa0] sm:$0xff] }
  0x15   :  { %1406 = vst [vmem:[#allocation30_spill] sm:$0xff] %v813_v13  ;;  %1407 = vst [vmem:[#allocation31_spill] sm:$0xff] %v818_v12  ;;  %v109_v49 = vadd.f32 %v108_v31, %v107_v25  ;;  %v112_v31 = vsel %vm88_vm1, %v695_v59, 0.0  ;;  %v846_v25 = vsel %vm88_vm1, %v813_v13, 0.0  ;;  %v862_v57 = vsel %vm88_vm1, %v840_v0, 0.0  ;;  %v899_v51 = vld [vmem:[%s1353_s0 + $0xa8] sm:$0xff] }
  0x16   :  { %1408 = vst [vmem:[#allocation32_spill] sm:$0xff] %v823_v36  ;;  %1409 = vst [vmem:[#allocation33_spill] sm:$0xff] %v827_v6  ;;  %v850_v6 = vsel %vm88_vm1, %v818_v12, 0.0  ;;  %v904_v50 = vld [vmem:[%s1353_s0 + $0xb0] sm:$0xff]  ;;  %v909_v45 = vld [vmem:[%s1353_s0 + $0xb8] sm:$0xff] }
  0x17   :  { %1410 = vst [vmem:[#allocation34_spill] sm:$0xff] %v831_v26  ;;  %1411 = vst [vmem:[#allocation35_spill] sm:$0xff] %v835_v5  ;;  %v854_v26 = vsel %vm88_vm1, %v823_v36, 0.0  ;;  %v37_v5 = vld [vmem:[%s1353_s0 + $0x70] sm:$0xff]  ;;  %v111_v58 = vadd.f32 %v582_v32, %v109_v49  ;;  %v114_v32 = vsel %vm88_vm1, %v754_v18, 0.0  ;;  %v919_v43 = vld [vmem:[%s1353_s0 + $0xc0] sm:$0xff] }
  0x18   :  { %1412 = vst [vmem:[#allocation36_spill] sm:$0xff] %v840_v0  ;;  %1413 = vst [vmem:[#allocation37_spill] sm:$0xff] %v846_v25  ;;  %v867_v25 = vld [vmem:[%s1353_s0 + $0x78] sm:$0xff]  ;;  %v884_v49 = vld [vmem:[%s1353_s0 + $0x90] sm:$0xff]  ;;  %v116_v44 = vsel %vm88_vm1, %v37_v5, 0.0  ;;  %v228_v0 = vmul.f32 %v496_v3, %v496_v3  ;;  %v128_v3 = vsel %vm88_vm1, %v894_v56, 0.0 }
  0x19   :  { %1414 = vst [vmem:[#allocation38_spill] sm:$0xff] %v850_v6  ;;  %1415 = vst [vmem:[#allocation39_spill] sm:$0xff] %v854_v26  ;;  %v872_v6 = vld [vmem:[%s1353_s0 + $0x80] sm:$0xff]  ;;  %v877_v26 = vld [vmem:[%s1353_s0 + $0x88] sm:$0xff]  ;;  %v113_v52 = vadd.f32 %v112_v31, %v111_v58  ;;  %v226_v58 = vmul.f32 %v486_v1, %v486_v1  ;;  %v227_v31 = vmul.f32 %v491_v2, %v491_v2  ;;  %v118_v1 = vsel %vm88_vm1, %v867_v25, 0.0 }
  0x1a   :  { %1416 = vst [vmem:[#allocation40_spill] sm:$0xff] %v862_v57  ;;  %1417 = vst [vmem:[#allocation41_spill] sm:$0xff] %v867_v25  ;;  %v889_v57 = vld [vmem:[%s1353_s0 + $0x98] sm:$0xff]  ;;  %v924_v39 = vld [vmem:[%s1353_s0 + $0xc8] sm:$0xff]  ;;  %v120_v2 = vsel %vm88_vm1, %v872_v6, 0.0  ;;  %v973_v63 = vsel %vm88_vm1, %v909_v45, 0.0 }
  0x1b   :  { %1418 = vst [vmem:[#allocation42_spill] sm:$0xff] %v872_v6  ;;  %1419 = vst [vmem:[#allocation43_spill] sm:$0xff] %v877_v26  ;;  %v929_v38 = vld [vmem:[%s1353_s0 + $0xd0] sm:$0xff]  ;;  %v115_v37 = vadd.f32 %v114_v32, %v113_v52  ;;  %v940_v36 = vld [vmem:[%s1353_s0 + $0xd8] sm:$0xff]  ;;  %v122_v52 = vsel %vm88_vm1, %v877_v26, 0.0  ;;  %v124_v32 = vsel %vm88_vm1, %v884_v49, 0.0 }
  0x1c   :  { %1420 = vst [vmem:[#allocation44_spill] sm:$0xff] %v884_v49  ;;  %1421 = vst [vmem:[#allocation45_spill] sm:$0xff] %v889_v57  ;;  %v945_v12 = vld [vmem:[%s1353_s0 + $0xe0] sm:$0xff]  ;;  %v126_v6 = vsel %vm88_vm1, %v889_v57, 0.0  ;;  %v958_v25 = vld [vmem:[%s1353_s0 + $0xe8] sm:$0xff]  ;;  %v130_v49 = vsel %vm88_vm1, %v899_v51, 0.0 }
  0x1d   :  { %1422 = vst [vmem:[#allocation46_spill] sm:$0xff] %v894_v56  ;;  %1423 = vst [vmem:[#allocation47_spill] sm:$0xff] %v899_v51  ;;  %v963_v13 = vld [vmem:[%s1353_s0 + $0xf0] sm:$0xff]  ;;  %v117_v26 = vadd.f32 %v116_v44, %v115_v37  ;;  %v132_v57 = vsel %vm88_vm1, %v904_v50, 0.0  ;;  %v229_v56 = vmul.f32 %v501_v4, %v501_v4  ;;  %v977_v30 = vsel %vm88_vm1, %v919_v43, 0.0 }
  0x1e   :  { %1424 = vst [vmem:[#allocation48_spill] sm:$0xff] %v904_v50  ;;  %1425 = vst [vmem:[#allocation49_spill] sm:$0xff] %v909_v45  ;;  %v981_v37 = vsel %vm88_vm1, %v924_v39, 0.0  ;;  %v985_v44 = vsel %vm88_vm1, %v929_v38, 0.0  ;;  %v989_v4 = vsel %vm88_vm1, %v940_v36, 0.0  ;;  %v993_v45 = vsel %vm88_vm1, %v945_v12, 0.0 }
  0x1f   :  { %1426 = vst [vmem:[#allocation50_spill] sm:$0xff] %v919_v43  ;;  %1427 = vst [vmem:[#allocation51_spill] sm:$0xff] %v924_v39  ;;  %v119_v50 = vadd.f32 %v118_v1, %v117_v26  ;;  %v230_v43 = vmul.f32 %v512_v8, %v512_v8  ;;  %v999_v39 = vsel %vm88_vm1, %v958_v25, 0.0  ;;  %v231_v26 = vmul.f32 %v519_v11, %v519_v11 }
  0x20   :  { %1428 = vst [vmem:[#allocation52_spill] sm:$0xff] %v929_v38  ;;  %1429 = vst [vmem:[#allocation53_spill] sm:$0xff] %v940_v36  ;;  %v1003_v38 = vsel %vm88_vm1, %v963_v13, 0.0  ;;  %v232_v1 = vmul.f32 %v526_v14, %v526_v14  ;;  %v234_v8 = vmul.f32 %v536_v17, %v536_v17  ;;  %v237_v51 = vmul.f32 %v553_v21, %v553_v21 }
  0x21   :  { %1430 = vst [vmem:[#allocation54_spill] sm:$0xff] %v945_v12  ;;  %1431 = vst [vmem:[#allocation55_spill] sm:$0xff] %v958_v25  ;;  %v121_v36 = vadd.f32 %v120_v2, %v119_v50  ;;  %v233_v12 = vmul.f32 %v531_v16, %v531_v16  ;;  %v235_v25 = vmul.f32 %v543_v19, %v543_v19 }
  0x22   :  { %1432 = vst [vmem:[#allocation56_spill] sm:$0xff] %v963_v13  ;;  %v236_v13 = vmul.f32 %v548_v20, %v548_v20  ;;  %v238_v11 = vmul.f32 %v695_v59, %v695_v59  ;;  %v1023_v14 = vmul.f32 %v754_v18, %v754_v18  ;;  %v1025_v50 = vmul.f32 %v37_v5, %v37_v5 }
  0x23   :  { %v123_v16 = vadd.f32 %v122_v52, %v121_v36  ;;  %v259_v17 = vmul.f32 %v564_v27, %v564_v27  ;;  %v260_v19 = vmul.f32 %v569_v28, %v569_v28  ;;  %v261_v20 = vmul.f32 %v574_v29, %v574_v29 }
  0x24   :  { %v262_v21 = vmul.f32 %v587_v33, %v587_v33  ;;  %v263_v59 = vmul.f32 %v592_v34, %v592_v34  ;;  %v264_v18 = vmul.f32 %v597_v35, %v597_v35  ;;  %v265_v36 = vmul.f32 %v614_v40, %v614_v40 }
  0x25   :  { %v125_v5 = vadd.f32 %v124_v32, %v123_v16  ;;  %v266_v27 = vmul.f32 %v619_v41, %v619_v41  ;;  %v267_v28 = vmul.f32 %v624_v42, %v624_v42  ;;  %v268_v29 = vmul.f32 %v641_v46, %v641_v46 }
  0x26   :  { %v269_v33 = vmul.f32 %v646_v47, %v646_v47  ;;  %v290_v34 = vsel %vm88_vm1, %v226_v58, 0.0  ;;  %v291_v35 = vsel %vm88_vm1, %v227_v31, 0.0  ;;  %v270_v40 = vmul.f32 %v651_v48, %v651_v48 }
  0x27   :  { %v127_v2 = vadd.f32 %v126_v6, %v125_v5  ;;  %v292_v52 = vadd.f32 %v291_v35, %v290_v34  ;;  %v293_v41 = vsel %vm88_vm1, %v228_v0, 0.0  ;;  %v271_v42 = vmul.f32 %v668_v53, %v668_v53  ;;  %v1435_v35 = vld [vmem:[#allocation30_spill] sm:$0xff] }
  0x28   :  { %v272_v46 = vmul.f32 %v673_v54, %v673_v54  ;;  %v273_v47 = vmul.f32 %v678_v55, %v678_v55  ;;  %v295_v58 = vsel %vm88_vm1, %v229_v56, 0.0  ;;  %v274_v6 = vmul.f32 %v700_v60, %v700_v60 }
  0x29   :  { %v129_v32 = vadd.f32 %v128_v3, %v127_v2  ;;  %v275_v48 = vmul.f32 %v705_v61, %v705_v61  ;;  %v294_v31 = vadd.f32 %v293_v41, %v292_v52  ;;  %v276_v0 = vmul.f32 %v710_v62, %v710_v62 }
  0x2a   :  { %v277_v53 = vmul.f32 %v727_v7, %v727_v7  ;;  %v278_v54 = vmul.f32 %v732_v9, %v732_v9  ;;  %v297_v55 = vsel %vm88_vm1, %v230_v43, 0.0  ;;  %v279_v3 = vmul.f32 %v737_v10, %v737_v10  ;;  %v1434_v10 = vld [vmem:[#allocation26_spill] sm:$0xff] }
  0x2b   :  { %v131_v56 = vadd.f32 %v130_v49, %v129_v32  ;;  %v280_v60 = vmul.f32 %v759_v22, %v759_v22  ;;  %v296_v61 = vadd.f32 %v295_v58, %v294_v31  ;;  %v281_v16 = vmul.f32 %v764_v23, %v764_v23  ;;  %v1433_v49 = vld [vmem:[#allocation25_spill] sm:$0xff]  ;;  %v1436_v23 = vld [vmem:[#allocation31_spill] sm:$0xff] }
  0x2c   :  { %v282_v62 = vmul.f32 %v769_v24, %v769_v24  ;;  %v283_v7 = vmul.f32 %v786_v15, %v786_v15  ;;  %v299_v9 = vsel %vm88_vm1, %v231_v26, 0.0  ;;  %v284_v5 = vmul.f32 %v1433_v49, %v1433_v49  ;;  %v1437_v24 = vld [vmem:[#allocation32_spill] sm:$0xff] }
  0x2d   :  { %v133_v43 = vadd.f32 %v132_v57, %v131_v56  ;;  %v285_v34 = vmul.f32 %v1434_v10, %v1434_v10  ;;  %v298_v22 = vadd.f32 %v297_v55, %v296_v61  ;;  %v286_v2 = vmul.f32 %v1435_v35, %v1435_v35  ;;  %v1438_v26 = vld [vmem:[#allocation36_spill] sm:$0xff] }
  0x2e   :  { %v287_v52 = vmul.f32 %v1436_v23, %v1436_v23  ;;  %v288_v41 = vmul.f32 %v1437_v24, %v1437_v24  ;;  %v301_v15 = vsel %vm88_vm1, %v232_v1, 0.0  ;;  %v289_v58 = vmul.f32 %v1438_v26, %v1438_v26  ;;  %v1439_v24 = vld [vmem:[#allocation41_spill] sm:$0xff] }
  0x2f   :  { %v135_v57 = vadd.f32 %v973_v63, %v133_v43  ;;  %v300_v32 = vadd.f32 %v299_v9, %v298_v22  ;;  %v303_v31 = vsel %vm88_vm1, %v233_v12, 0.0  ;;  %v305_v55 = vsel %vm88_vm1, %v234_v8, 0.0 }
  0x30   :  { %v307_v56 = vsel %vm88_vm1, %v235_v25, 0.0  ;;  %v309_v61 = vsel %vm88_vm1, %v236_v13, 0.0  ;;  %v311_v49 = vsel %vm88_vm1, %v237_v51, 0.0  ;;  %v313_v1 = vsel %vm88_vm1, %v238_v11, 0.0 }
  0x31   :  { %v137_v10 = vadd.f32 %v977_v30, %v135_v57  ;;  %v302_v35 = vadd.f32 %v301_v15, %v300_v32  ;;  %v1105_v63 = vsel %vm88_vm1, %v259_v17, 0.0  ;;  %v1108_v9 = vsel %vm88_vm1, %v260_v19, 0.0 }
  0x32   :  { %v1111_v12 = vsel %vm88_vm1, %v261_v20, 0.0  ;;  %v1114_v25 = vsel %vm88_vm1, %v262_v21, 0.0  ;;  %v1117_v13 = vsel %vm88_vm1, %v263_v59, 0.0  ;;  %v1121_v8 = vsel %vm88_vm1, %v264_v18, 0.0 }
  0x33   :  { %v139_v51 = vadd.f32 %v981_v37, %v137_v10  ;;  %v304_v30 = vadd.f32 %v303_v31, %v302_v35  ;;  %v1124_v11 = vsel %vm88_vm1, %v265_v36, 0.0  ;;  %v1127_v17 = vsel %vm88_vm1, %v266_v27, 0.0 }
  0x34   :  { %v1130_v19 = vsel %vm88_vm1, %v267_v28, 0.0  ;;  %v1133_v20 = vsel %vm88_vm1, %v268_v29, 0.0  ;;  %v1136_v21 = vsel %vm88_vm1, %v269_v33, 0.0  ;;  %v1140_v18 = vsel %vm88_vm1, %v270_v40, 0.0 }
  0x35   :  { %v141_v37 = vadd.f32 %v985_v44, %v139_v51  ;;  %v306_v59 = vadd.f32 %v305_v55, %v304_v30  ;;  %v1143_v36 = vsel %vm88_vm1, %v271_v42, 0.0  ;;  %v1146_v27 = vsel %vm88_vm1, %v272_v46, 0.0  ;;  %v1443_v51 = vld [vmem:[#allocation4_spill] sm:$0xff] }
  0x36   :  { %v1149_v28 = vsel %vm88_vm1, %v273_v47, 0.0  ;;  %v1152_v29 = vsel %vm88_vm1, %v274_v6, 0.0  ;;  %v1155_v33 = vsel %vm88_vm1, %v275_v48, 0.0  ;;  %v1159_v40 = vsel %vm88_vm1, %v276_v0, 0.0 }
  0x37   :  { %v143_v44 = vadd.f32 %v989_v4, %v141_v37  ;;  %v308_v43 = vadd.f32 %v307_v56, %v306_v59  ;;  %v1162_v42 = vsel %vm88_vm1, %v277_v53, 0.0  ;;  %v1165_v46 = vsel %vm88_vm1, %v278_v54, 0.0  ;;  %v1179_v4 = vld [vmem:[%s1353_s0 + $0xf8] sm:$0xff]  ;;  %v1444_v59 = vld [vmem:[#allocation45_spill] sm:$0xff] }
  0x38   :  { %v1168_v47 = vsel %vm88_vm1, %v279_v3, 0.0  ;;  %v1171_v6 = vsel %vm88_vm1, %v280_v60, 0.0  ;;  %v1174_v48 = vsel %vm88_vm1, %v281_v16, 0.0  ;;  %v1183_v54 = vsel %vm88_vm1, %v282_v62, 0.0  ;;  %v1441_v56 = vld [vmem:[#allocation43_spill] sm:$0xff] }
  0x39   :  { %v145_v0 = vadd.f32 %v993_v45, %v143_v44  ;;  %v310_v53 = vadd.f32 %v309_v61, %v308_v43  ;;  %v1186_v3 = vsel %vm88_vm1, %v283_v7, 0.0  ;;  %v1189_v60 = vsel %vm88_vm1, %v284_v5, 0.0  ;;  %v1203_v45 = vld [vmem:[%s1353_s0 + $0x100] sm:$0xff]  ;;  %v1445_v43 = vld [vmem:[#allocation5_spill] sm:$0xff] }
  0x3a   :  { %v1192_v16 = vsel %vm88_vm1, %v285_v34, 0.0  ;;  %v1195_v22 = vsel %vm88_vm1, %v286_v2, 0.0  ;;  %v1198_v23 = vsel %vm88_vm1, %v287_v52, 0.0  ;;  %v1207_v5 = vsel %vm88_vm1, %v288_v41, 0.0  ;;  %v1440_v41 = vld [vmem:[#allocation42_spill] sm:$0xff] }
  0x3b   :  { %v147_v62 = vadd.f32 %v999_v39, %v145_v0  ;;  %v312_v7 = vadd.f32 %v311_v49, %v310_v53  ;;  %v1210_v34 = vsel %vm88_vm1, %v289_v58, 0.0  ;;  %v150_v2 = vsel %vm88_vm1, %v1179_v4, 0.0 }
  0x3c   :  { %v241_v52 = vmul.f32 %v1439_v24, %v1439_v24  ;;  %v315_v15 = vsel %vm88_vm1, %v1023_v14, 0.0  ;;  %v152_v39 = vsel %vm88_vm1, %v1203_v45, 0.0  ;;  %v242_v32 = vmul.f32 %v1440_v41, %v1440_v41  ;;  %v1447_v24 = vld [vmem:[#allocation6_spill] sm:$0xff]  ;;  %v1449_v41 = vld [vmem:[#allocation7_spill] sm:$0xff] }
  0x3d   :  { %v149_v57 = vadd.f32 %v1003_v38, %v147_v62  ;;  %v314_v26 = vadd.f32 %v313_v1, %v312_v7  ;;  %v317_v58 = vsel %vm88_vm1, %v1025_v50, 0.0  ;;  %v243_v61 = vmul.f32 %v1441_v56, %v1441_v56  ;;  %v1442_v38 = vld [vmem:[#allocation44_spill] sm:$0xff]  ;;  %v1446_v62 = vld [vmem:[#allocation46_spill] sm:$0xff] }
  0x3e   :  { %v319_v49 = vsel %vm88_vm1, %v241_v52, 0.0  ;;  %v244_v35 = vmul.f32 %v1442_v38, %v1442_v38  ;;  %v321_v1 = vsel %vm88_vm1, %v242_v32, 0.0  ;;  %v245_v50 = vmul.f32 %v1444_v59, %v1444_v59 }
  0x3f   :  { %v151_v31 = vadd.f32 %v150_v2, %v149_v57  ;;  %v316_v55 = vadd.f32 %v315_v15, %v314_v26  ;;  %v323_v44 = vsel %vm88_vm1, %v243_v61, 0.0  ;;  %v246_v7 = vmul.f32 %v1446_v62, %v1446_v62  ;;  %v1448_v57 = vld [vmem:[#allocation47_spill] sm:$0xff]  ;;  %v1451_v61 = vld [vmem:[#allocation8_spill] sm:$0xff] }
  0x40   :  { %v325_v2 = vsel %vm88_vm1, %v244_v35, 0.0  ;;  %v247_v26 = vmul.f32 %v1448_v57, %v1448_v57 }
  0x41   :  { %v153_v14 = vadd.f32 %v152_v39, %v151_v31  ;;  %v318_v10 = vadd.f32 %v317_v58, %v316_v55  ;;  %v327_v39 = vsel %vm88_vm1, %v245_v50, 0.0  ;;  %v1450_v31 = vld [vmem:[#allocation48_spill] sm:$0xff]  ;;  %v329_v56 = vsel %vm88_vm1, %v246_v7, 0.0 }
  0x42   :  { %v248_v55 = vmul.f32 %v1450_v31, %v1450_v31  ;;  %v331_v35 = vsel %vm88_vm1, %v247_v26, 0.0 }
  0x43   :  { %v155_v30 = vadd.f32 %v1443_v51, %v153_v14  ;;  %v320_v37 = vadd.f32 %v319_v49, %v318_v10  ;;  %v1452_v10 = vld [vmem:[#allocation49_spill] sm:$0xff] }
  0x44   :  { %v249_v38 = vmul.f32 %v1452_v10, %v1452_v10  ;;  %v333_v50 = vsel %vm88_vm1, %v248_v55, 0.0 }
  0x45   :  { %v157_v0 = vadd.f32 %v1445_v43, %v155_v30  ;;  %v322_v53 = vadd.f32 %v321_v1, %v320_v37  ;;  %v1453_v1 = vld [vmem:[#allocation9_spill] sm:$0xff]  ;;  %v1454_v37 = vld [vmem:[#allocation50_spill] sm:$0xff] }
  0x46   :  { %v250_v59 = vmul.f32 %v1454_v37, %v1454_v37  ;;  %v335_v7 = vsel %vm88_vm1, %v249_v38, 0.0 }
  0x47   :  { %v159_v52 = vadd.f32 %v1447_v24, %v157_v0  ;;  %v324_v15 = vadd.f32 %v323_v44, %v322_v53  ;;  %v1455_v44 = vld [vmem:[#allocation10_spill] sm:$0xff]  ;;  %v1456_v53 = vld [vmem:[#allocation51_spill] sm:$0xff] }
  0x48   :  { %v251_v62 = vmul.f32 %v1456_v53, %v1456_v53  ;;  %v337_v26 = vsel %vm88_vm1, %v250_v59, 0.0 }
  0x49   :  { %v161_v32 = vadd.f32 %v1449_v41, %v159_v52  ;;  %v326_v58 = vadd.f32 %v325_v2, %v324_v15  ;;  %v1457_v2 = vld [vmem:[#allocation11_spill] sm:$0xff]  ;;  %v1458_v15 = vld [vmem:[#allocation52_spill] sm:$0xff] }
  0x4a   :  { %v252_v57 = vmul.f32 %v1458_v15, %v1458_v15  ;;  %v339_v55 = vsel %vm88_vm1, %v251_v62, 0.0 }
  0x4b   :  { %v163_v49 = vadd.f32 %v1451_v61, %v161_v32  ;;  %v328_v14 = vadd.f32 %v327_v39, %v326_v58  ;;  %v1459_v39 = vld [vmem:[#allocation12_spill] sm:$0xff]  ;;  %v1460_v58 = vld [vmem:[#allocation53_spill] sm:$0xff] }
  0x4c   :  { %v253_v31 = vmul.f32 %v1460_v58, %v1460_v58  ;;  %v341_v38 = vsel %vm88_vm1, %v252_v57, 0.0  ;;  %v1468_v57 = vld [vmem:[#allocation17_spill] sm:$0xff]  ;;  %v1469_v58 = vld [vmem:[#allocation18_spill] sm:$0xff] }
  0x4d   :  { %v165_v51 = vadd.f32 %v1453_v1, %v163_v49  ;;  %v330_v30 = vadd.f32 %v329_v56, %v328_v14  ;;  %v1461_v56 = vld [vmem:[#allocation13_spill] sm:$0xff]  ;;  %v1462_v14 = vld [vmem:[#allocation54_spill] sm:$0xff] }
  0x4e   :  { %v254_v10 = vmul.f32 %v1462_v14, %v1462_v14  ;;  %v343_v59 = vsel %vm88_vm1, %v253_v31, 0.0 }
  0x4f   :  { %v167_v43 = vadd.f32 %v1455_v44, %v165_v51  ;;  %v332_v0 = vadd.f32 %v331_v35, %v330_v30  ;;  %v1463_v35 = vld [vmem:[#allocation14_spill] sm:$0xff]  ;;  %v1464_v30 = vld [vmem:[#allocation55_spill] sm:$0xff] }
  0x50   :  { %v255_v37 = vmul.f32 %v1464_v30, %v1464_v30  ;;  %v345_v62 = vsel %vm88_vm1, %v254_v10, 0.0  ;;  %v1471_v10 = vld [vmem:[#allocation20_spill] sm:$0xff] }
  0x51   :  { %v169_v24 = vadd.f32 %v1457_v2, %v167_v43  ;;  %v334_v52 = vadd.f32 %v333_v50, %v332_v0  ;;  %v1465_v50 = vld [vmem:[#allocation15_spill] sm:$0xff]  ;;  %v1466_v0 = vld [vmem:[#allocation56_spill] sm:$0xff] }
  0x52   :  { %v256_v53 = vmul.f32 %v1466_v0, %v1466_v0  ;;  %v347_v15 = vsel %vm88_vm1, %v255_v37, 0.0  ;;  %v1473_v37 = vld [vmem:[#allocation22_spill] sm:$0xff]  ;;  %v1475_v0 = vld [vmem:[#allocation24_spill] sm:$0xff] }
  0x53   :  { %v171_v41 = vadd.f32 %v1459_v39, %v169_v24  ;;  %v336_v32 = vadd.f32 %v335_v7, %v334_v52  ;;  %v1467_v7 = vld [vmem:[#allocation16_spill] sm:$0xff]  ;;  %v257_v52 = vmul.f32 %v1179_v4, %v1179_v4 }
  0x55   :  { %v173_v61 = vadd.f32 %v1461_v56, %v171_v41  ;;  %v338_v49 = vadd.f32 %v337_v26, %v336_v32  ;;  %v258_v41 = vmul.f32 %v1203_v45, %v1203_v45  ;;  %v349_v32 = vsel %vm88_vm1, %v256_v53, 0.0 }
  0x56   :  { %v351_v56 = vsel %vm88_vm1, %v257_v52, 0.0  ;;  %v1477_v52 = vld [vmem:[#allocation28_spill] sm:$0xff] }
  0x57   :  { %v175_v1 = vadd.f32 %v1463_v35, %v173_v61  ;;  %v340_v51 = vadd.f32 %v339_v55, %v338_v49  ;;  %v1470_v61 = vld [vmem:[#allocation19_spill] sm:$0xff]  ;;  %v353_v4 = vsel %vm88_vm1, %v258_v41, 0.0  ;;  %v1479_v41 = vld [vmem:[#allocation33_spill] sm:$0xff] }
  0x59   :  { %v177_v44 = vadd.f32 %v1465_v50, %v175_v1  ;;  %v342_v43 = vadd.f32 %v341_v38, %v340_v51  ;;  %v1472_v1 = vld [vmem:[#allocation21_spill] sm:$0xff]  ;;  %v1474_v50 = vld [vmem:[#allocation23_spill] sm:$0xff] }
  0x5b   :  { %v179_v2 = vadd.f32 %v1467_v7, %v177_v44  ;;  %v344_v24 = vadd.f32 %v343_v59, %v342_v43  ;;  %v1476_v7 = vld [vmem:[#allocation27_spill] sm:$0xff] }
  0x5d   :  { %v181_v26 = vadd.f32 %v1468_v57, %v179_v2  ;;  %v346_v39 = vadd.f32 %v345_v62, %v344_v24 }
  0x5f   :  { %v183_v31 = vadd.f32 %v1469_v58, %v181_v26  ;;  %v348_v55 = vadd.f32 %v347_v15, %v346_v39  ;;  %v1478_v26 = vld [vmem:[#allocation29_spill] sm:$0xff]  ;;  %v1480_v58 = vld [vmem:[#allocation34_spill] sm:$0xff] }
  0x61   :  { %v185_v49 = vadd.f32 %v1470_v61, %v183_v31  ;;  %v350_v14 = vadd.f32 %v349_v32, %v348_v55  ;;  %v1481_v55 = vld [vmem:[#allocation35_spill] sm:$0xff]  ;;  %v1482_v61 = vld [vmem:[#allocation37_spill] sm:$0xff] }
  0x63   :  { %v187_v38 = vadd.f32 %v1471_v10, %v185_v49  ;;  %v352_v35 = vadd.f32 %v351_v56, %v350_v14  ;;  %v1483_v14 = vld [vmem:[#allocation38_spill] sm:$0xff]  ;;  %v1484_v10 = vld [vmem:[#allocation39_spill] sm:$0xff] }
  0x65   :  { %v189_v51 = vadd.f32 %v1472_v1, %v187_v38  ;;  %v354_v30 = vadd.f32 %v353_v4, %v352_v35  ;;  %v1485_v35 = vld [vmem:[#allocation40_spill] sm:$0xff] }
  0x67   :  { %v191_v45 = vadd.f32 %v1473_v37, %v189_v51  ;;  %v356_v59 = vadd.f32 %v1105_v63, %v354_v30 }
  0x69   :  { %v193_v44 = vadd.f32 %v1474_v50, %v191_v45  ;;  %v358_v43 = vadd.f32 %v1108_v9, %v356_v59 }
  0x6b   :  { %v195_v53 = vadd.f32 %v1475_v0, %v193_v44  ;;  %v360_v62 = vadd.f32 %v1111_v12, %v358_v43 }
  0x6d   :  { %v197_v2 = vadd.f32 %v1476_v7, %v195_v53  ;;  %v362_v24 = vadd.f32 %v1114_v25, %v360_v62 }
  0x6f   :  { %v199_v15 = vadd.f32 %v1477_v52, %v197_v2  ;;  %v364_v57 = vadd.f32 %v1117_v13, %v362_v24 }
  0x71   :  { %v201_v39 = vadd.f32 %v1478_v26, %v199_v15  ;;  %v366_v63 = vadd.f32 %v1121_v8, %v364_v57 }
  0x73   :  { %v203_v32 = vadd.f32 %v1479_v41, %v201_v39  ;;  %v368_v9 = vadd.f32 %v1124_v11, %v366_v63 }
  0x75   :  { %v205_v31 = vadd.f32 %v1480_v58, %v203_v32  ;;  %v370_v12 = vadd.f32 %v1127_v17, %v368_v9  ;;  %v440_v9 = vld [vmem:[%s1355_s2] sm:$0x1] }
  0x77   :  { %v207_v56 = vadd.f32 %v1481_v55, %v205_v31  ;;  %v372_v25 = vadd.f32 %v1130_v19, %v370_v12 }
  0x79   :  { %v209_v49 = vadd.f32 %v1482_v61, %v207_v56  ;;  %v374_v13 = vadd.f32 %v1133_v20, %v372_v25 }
  0x7b   :  { %v211_v4 = vadd.f32 %v1483_v14, %v209_v49  ;;  %v376_v8 = vadd.f32 %v1136_v21, %v374_v13 }
  0x7d   :  { %v213_v38 = vadd.f32 %v1484_v10, %v211_v4  ;;  %v378_v11 = vadd.f32 %v1140_v18, %v376_v8  ;;  %v87_v18 = vld [vmem:[#allocation2] sm:$0x1] }
  0x7f   :  { %v215_v1 = vadd.f32 %v1485_v35, %v213_v38  ;;  %v380_v17 = vadd.f32 %v1143_v36, %v378_v11 }
  0x81   :  { %v216_v51 = vrot.slane %v215_v1, 4  ;;  %v382_v30 = vadd.f32 %v1146_v27, %v380_v17 }
  0x83   :  { %v217_v19 = vadd.f32 %v216_v51, %v215_v1  ;;  %v384_v37 = vadd.f32 %v1149_v28, %v382_v30 }
  0x85   :  { %v218_v45 = vrot.slane %v217_v19, 2  ;;  %v386_v20 = vadd.f32 %v1152_v29, %v384_v37 }
  0x87   :  { %v219_v59 = vadd.f32 %v218_v45, %v217_v19  ;;  %v388_v21 = vadd.f32 %v1155_v33, %v386_v20 }
  0x89   :  { %v220_v50 = vrot.slane %v219_v59, 1  ;;  %v390_v44 = vadd.f32 %v1159_v40, %v388_v21 }
  0x8b   :  { %v221_v43 = vadd.f32 %v220_v50, %v219_v59  ;;  %v392_v0 = vadd.f32 %v1162_v42, %v390_v44 }
  0x8d   :  { %v222_v36 = vadd.f32 %v221_v43, %v87_v18  ;;  %v394_v53 = vadd.f32 %v1165_v46, %v392_v0 }
  0x8f   :  { %224 = vst.msk [vmem:[#allocation2] sm:$0x1] %vm20_vm0, %v222_v36  ;;  %v396_v27 = vadd.f32 %v1168_v47, %v394_v53 }
  0x91   :  { %v398_v28 = vadd.f32 %v1171_v6, %v396_v27 }
  0x93   :  { %v400_v29 = vadd.f32 %v1174_v48, %v398_v28 }
  0x95   :  { %v402_v33 = vadd.f32 %v1183_v54, %v400_v29  ;;  %v225_v54 = vld [vmem:[#allocation3] sm:$0x1] }
  0x96   :  { %v428_v26 = vld [vmem:[#allocation2] sm:$0x1] }
  0x97   :  { %v404_v62 = vadd.f32 %v1186_v3, %v402_v33 }
  0x99   :  { %v406_v40 = vadd.f32 %v1189_v60, %v404_v62  ;;  %v429_v60 = vmul.f32 0.001953125, %v428_v26 }
  0x9b   :  { %v408_v7 = vadd.f32 %v1192_v16, %v406_v40  ;;  %v432_v16 = vmul.f32 %v429_v60, %v429_v60 }
  0x9d   :  { %v410_v42 = vadd.f32 %v1195_v22, %v408_v7 }
  0x9f   :  { %v412_v46 = vadd.f32 %v1198_v23, %v410_v42 }
  0xa1   :  { %v414_v2 = vadd.f32 %v1207_v5, %v412_v46 }
  0xa3   :  { %v416_v47 = vadd.f32 %v1210_v34, %v414_v2  ;;  %v435_v34 = vld [vmem:[%s1354_s1] sm:$0x1] }
  0xa5   :  { %v417_v24 = vrot.slane %v416_v47, 4 }
  0xa7   :  { %v418_v6 = vadd.f32 %v417_v24, %v416_v47 }
  0xa9   :  { %v419_v52 = vrot.slane %v418_v6, 2 }
  0xab   :  { %v420_v48 = vadd.f32 %v419_v52, %v418_v6 }
  0xad   :  { %v421_v15 = vrot.slane %v420_v48, 1 }
  0xaf   :  { %v422_v57 = vadd.f32 %v421_v15, %v420_v48 }
  0xb1   :  { %v423_v3 = vadd.f32 %v422_v57, %v225_v54 }
  0xb3   :  { %424 = vst.msk [vmem:[#allocation3] sm:$0x1] %vm20_vm0, %v423_v3 }
  0xba   :  { %v430_v22 = vld [vmem:[#allocation3] sm:$0x1] }
  0xbb   :  { %v431_v39 = vmul.f32 0.001953125, %v430_v22 }
  0xbd   :  { %v433_v23 = vsub.f32 %v431_v39, %v432_v16 }
  0xbf   :  { %v434_v63 = vmax.f32 %v433_v23, 0.0 }
  0xc1   :  { %v436_v5 = vadd.f32 1e-05, %v434_v63 }
  0xc3   :  { %453 = vrsqrt.f32 %v436_v5 }
  0xd0   :  { %v454_v41 = vpop.eup %453 }
  0xd1   :  { %v438_v32 = vmul.f32 %v454_v41, %v435_v34 }
  0xd3   :  { %439 = vst.msk [vmem:[%s1356_s3] sm:$0x1] %vm20_vm0, %v438_v32  ;;  %v441_v58 = vmul.f32 %v438_v32, %v429_v60 }
  0xd5   :  { %v442_v31 = vsub.f32 %v440_v9, %v441_v58 }
  0xd7   :  { %443 = vst.msk [vmem:[%s1357_s4] sm:$0x1] %vm20_vm0, %v442_v31 }

// kernel: cnn_decoder_forward.20
= control target key start
LH: loop header
LB: loop body
LE: loop exit
PB: predicated region body
PF: predicated region fallthrough
CT: control target
= control target key end

     0   :  { %vm328_vm0 = vcmask 130048   ;;  %s1501_s1 = inlined_call_operand.vmem [shape: bf16[16,128], index: 1, kind: input, shape index: {}]   ;;  %s1502_s0 = inlined_call_operand.vmem [shape: f32[512,16], index: 0, kind: input, shape index: {}]   ;;  %s1503_s2 = inlined_call_operand.vmem [shape: f32[1,16], index: 2, kind: input, shape index: {}]   ;;  %s1504_s3 = inlined_call_operand.vmem [shape: f32[1,16], index: 3, kind: input, shape index: {}]   ;;  %s1505_s4 = inlined_call_operand.vmem [shape: f32[512,128], index: 4, kind: output, shape index: {}]  }
   0x1   :  { %v918_v0 = vld [vmem:[%s1501_s1] sm:$0xff]   ;;  %v19_v2 = vld [vmem:[%s1502_s0 + $0x8] sm:$0xff]  ;;  %v20_v11 = vld [vmem:[%s1502_s0 + $0x10] sm:$0xff] }
   0x2   :  { %v18_v1 = vld [vmem:[%s1502_s0] sm:$0xff]  ;;  %850 = vmatprep.subr.bf16.mxu0 %v918_v0  ;;  %916 = vmatprep.subr.bf16.mxu1 %v918_v0  ;;  %v51_v8 = vld [vmem:[%s1502_s0 + $0x108] sm:$0xff]  ;;  %v21_v12 = vld [vmem:[%s1502_s0 + $0x18] sm:$0xff] }
   0x3   :  { %v956_v3 = vld [vmem:[%s1503_s2] ss:$0 sm:$0xff]  ;;  %851 = vmatpush3.bf16.msra.mxu0 %v918_v0  ;;  %917 = vmatpush3.bf16.msra.mxu1 %v918_v0  ;;  %v52_v13 = vld [vmem:[%s1502_s0 + $0x110] sm:$0xff]  ;;  %v53_v18 = vld [vmem:[%s1502_s0 + $0x118] sm:$0xff] }
   0x4   :  { %v961_v4 = vld [vmem:[%s1504_s3] ss:$0 sm:$0xff]  ;;  %v90_v5 = vmul.f32 %v956_v3, %v18_v1  ;;  %v91_v6 = vmul.f32 %v956_v3, %v19_v2  ;;  %v123_v10 = vmul.f32 %v956_v3, %v51_v8  ;;  %v92_v16 = vmul.f32 %v956_v3, %v20_v11  ;;  %v23_v28 = vld [vmem:[%s1502_s0 + $0x28] sm:$0xff]  ;;  %v24_v39 = vld [vmem:[%s1502_s0 + $0x30] sm:$0xff] }
   0x5   :  { %v50_v7 = vld [vmem:[%s1502_s0 + $0x100] sm:$0xff]  ;;  %v93_v17 = vmul.f32 %v956_v3, %v21_v12  ;;  %v124_v21 = vmul.f32 %v956_v3, %v52_v13  ;;  %v125_v22 = vmul.f32 %v956_v3, %v53_v18  ;;  %v55_v34 = vld [vmem:[%s1502_s0 + $0x128] sm:$0xff]  ;;  %v25_v40 = vld [vmem:[%s1502_s0 + $0x38] sm:$0xff]  ;;  %v95_v44 = vmul.f32 %v956_v3, %v23_v28 }
   0x6   :  { %v122_v9 = vmul.f32 %v956_v3, %v50_v7  ;;  %v160_v14 = vadd.f32 %v961_v4, %v90_v5  ;;  %v161_v15 = vadd.f32 %v961_v4, %v91_v6  ;;  %v193_v20 = vadd.f32 %v961_v4, %v123_v10  ;;  %v22_v23 = vld [vmem:[%s1502_s0 + $0x20] sm:$0xff]  ;;  %v56_v45 = vld [vmem:[%s1502_s0 + $0x130] sm:$0xff]  ;;  %v57_v50 = vld [vmem:[%s1502_s0 + $0x138] sm:$0xff] }
   0x7   :  { %v162_v26 = vadd.f32 %v961_v4, %v92_v16  ;;  %v163_v27 = vadd.f32 %v961_v4, %v93_v17  ;;  %v194_v31 = vadd.f32 %v961_v4, %v124_v21  ;;  %v195_v32 = vadd.f32 %v961_v4, %v125_v22  ;;  %v54_v33 = vld [vmem:[%s1502_s0 + $0x120] sm:$0xff]  ;;  %v27_v0 = vld [vmem:[%s1502_s0 + $0x48] sm:$0xff]  ;;  %v28_v13 = vld [vmem:[%s1502_s0 + $0x50] sm:$0xff] }
   0x8   :  { %v192_v19 = vadd.f32 %v961_v4, %v122_v9  ;;  %v224_v24 = vmax.f32 %v160_v14, 0.0  ;;  %v225_v25 = vmax.f32 %v161_v15, 0.0  ;;  %v257_v30 = vmax.f32 %v193_v20, 0.0  ;;  %v26_v55 = vld [vmem:[%s1502_s0 + $0x40] sm:$0xff]  ;;  %v59_v8 = vld [vmem:[%s1502_s0 + $0x148] sm:$0xff]  ;;  %v29_v14 = vld [vmem:[%s1502_s0 + $0x58] sm:$0xff] }
   0x9   :  { %v226_v36 = vmax.f32 %v162_v26, 0.0  ;;  %v227_v37 = vmax.f32 %v163_v27, 0.0  ;;  %v94_v38 = vmul.f32 %v956_v3, %v22_v23  ;;  %v258_v42 = vmax.f32 %v194_v31, 0.0  ;;  %v58_v7 = vld [vmem:[%s1502_s0 + $0x140] sm:$0xff] }
   0xa   :  { %v256_v29 = vmax.f32 %v192_v19, 0.0  ;;  %v288_v35 = vpack.c.bf16 %v225_v25, %v224_v24  ;;  %v259_v43 = vmax.f32 %v195_v32, 0.0  ;;  %v126_v48 = vmul.f32 %v956_v3, %v54_v33  ;;  %v60_v19 = vld [vmem:[%s1502_s0 + $0x150] sm:$0xff]  ;;  %v61_v24 = vld [vmem:[%s1502_s0 + $0x158] sm:$0xff] }
   0xb   :  { %v289_v46 = vpack.c.bf16 %v227_v37, %v226_v36  ;;  %v164_v47 = vadd.f32 %v961_v4, %v94_v38  ;;  %v127_v49 = vmul.f32 %v956_v3, %v55_v34  ;;  %v165_v52 = vadd.f32 %v961_v4, %v95_v44  ;;  %v31_v38 = vld [vmem:[%s1502_s0 + $0x68] sm:$0xff] }
   0xc   :  { %v304_v41 = vpack.c.bf16 %v257_v30, %v256_v29  ;;  %852 = vmatprep.mubr.msk.bf16.mxu0 %vm328_vm0, %v288_v35  ;;  %v305_v51 = vpack.c.bf16 %v259_v43, %v258_v42  ;;  %v96_v53 = vmul.f32 %v956_v3, %v24_v39  ;;  %v97_v54 = vmul.f32 %v956_v3, %v25_v40  ;;  %v30_v29 = vld [vmem:[%s1502_s0 + $0x60] sm:$0xff]  ;;  %v63_v44 = vld [vmem:[%s1502_s0 + $0x168] sm:$0xff] }
   0xd   :  { %853 = vmatmul.mubr.msk.bf16.vlgmr.msra.gmra.mxu0 %vm328_vm0, %v289_v46  ;;  %v228_v56 = vmax.f32 %v164_v47, 0.0  ;;  %v196_v57 = vadd.f32 %v961_v4, %v126_v48  ;;  %v197_v58 = vadd.f32 %v961_v4, %v127_v49  ;;  %v128_v59 = vmul.f32 %v956_v3, %v56_v45  ;;  %v62_v43 = vld [vmem:[%s1502_s0 + $0x160] sm:$0xff]  ;;  %v32_v49 = vld [vmem:[%s1502_s0 + $0x70] sm:$0xff] }
   0xe   :  { %884 = vmatprep.mubr.msk.bf16.mxu1 %vm328_vm0, %v304_v41  ;;  %v229_v60 = vmax.f32 %v165_v52, 0.0  ;;  %v166_v61 = vadd.f32 %v961_v4, %v96_v53  ;;  %v167_v62 = vadd.f32 %v961_v4, %v97_v54  ;;  %v129_v63 = vmul.f32 %v956_v3, %v57_v50  ;;  %v33_v50 = vld [vmem:[%s1502_s0 + $0x78] sm:$0xff] }
   0xf   :  { %885 = vmatmul.mubr.msk.bf16.vlgmr.msra.gmra.mxu1 %vm328_vm0, %v305_v51  ;;  %v260_v1 = vmax.f32 %v196_v57, 0.0  ;;  %v261_v2 = vmax.f32 %v197_v58, 0.0  ;;  %v198_v5 = vadd.f32 %v961_v4, %v128_v59  ;;  %v98_v6 = vmul.f32 %v956_v3, %v26_v55  ;;  %v64_v55 = vld [vmem:[%s1502_s0 + $0x170] sm:$0xff] }
  0x10   :  { %v290_v9 = vpack.c.bf16 %v229_v60, %v228_v56  ;;  %v230_v10 = vmax.f32 %v166_v61, 0.0  ;;  %v231_v11 = vmax.f32 %v167_v62, 0.0  ;;  %v199_v12 = vadd.f32 %v961_v4, %v129_v63  ;;  %v65_v60 = vld [vmem:[%s1502_s0 + $0x178] sm:$0xff] }
  0x11   :  { %v306_v15 = vpack.c.bf16 %v261_v2, %v260_v1  ;;  %v262_v16 = vmax.f32 %v198_v5, 0.0  ;;  %v99_v17 = vmul.f32 %v956_v3, %v27_v0  ;;  %v168_v18 = vadd.f32 %v961_v4, %v98_v6  ;;  %v34_v1 = vld [vmem:[%s1502_s0 + $0x80] sm:$0xff] }
  0x12   :  { %856 = vmatprep.mubr.msk.bf16.mxu0 %vm328_vm0, %v290_v9  ;;  %v291_v20 = vpack.c.bf16 %v231_v11, %v230_v10  ;;  %v263_v21 = vmax.f32 %v199_v12, 0.0  ;;  %v130_v22 = vmul.f32 %v956_v3, %v58_v7  ;;  %v131_v23 = vmul.f32 %v956_v3, %v59_v8  ;;  %v35_v12 = vld [vmem:[%s1502_s0 + $0x88] sm:$0xff] }
  0x13   :  { %888 = vmatprep.mubr.msk.bf16.mxu1 %vm328_vm0, %v306_v15  ;;  %v169_v25 = vadd.f32 %v961_v4, %v99_v17  ;;  %v232_v26 = vmax.f32 %v168_v18, 0.0  ;;  %v100_v27 = vmul.f32 %v956_v3, %v28_v13  ;;  %v101_v28 = vmul.f32 %v956_v3, %v29_v14  ;;  %v66_v17 = vld [vmem:[%s1502_s0 + $0x180] sm:$0xff]  ;;  %v67_v18 = vld [vmem:[%s1502_s0 + $0x188] sm:$0xff] }
  0x14   :  { %v307_v30 = vpack.c.bf16 %v263_v21, %v262_v16  ;;  %v200_v31 = vadd.f32 %v961_v4, %v130_v22  ;;  %v201_v32 = vadd.f32 %v961_v4, %v131_v23  ;;  %v132_v33 = vmul.f32 %v956_v3, %v60_v19  ;;  %v36_v23 = vld [vmem:[%s1502_s0 + $0x90] sm:$0xff] }
  0x15   :  { %857 = vmatmul.mubr.msk.bf16.gmra.mxu0 %vm328_vm0, %v291_v20  ;;  %v233_v34 = vmax.f32 %v169_v25, 0.0  ;;  %v170_v35 = vadd.f32 %v961_v4, %v100_v27  ;;  %v171_v36 = vadd.f32 %v961_v4, %v101_v28  ;;  %v133_v37 = vmul.f32 %v956_v3, %v61_v24  ;;  %v37_v24 = vld [vmem:[%s1502_s0 + $0x98] sm:$0xff] }
  0x16   :  { %v264_v39 = vmax.f32 %v200_v31, 0.0  ;;  %v265_v40 = vmax.f32 %v201_v32, 0.0  ;;  %v202_v41 = vadd.f32 %v961_v4, %v132_v33  ;;  %v102_v42 = vmul.f32 %v956_v3, %v30_v29  ;;  %v68_v29 = vld [vmem:[%s1502_s0 + $0x190] sm:$0xff] }
  0x17   :  { %889 = vmatmul.mubr.msk.bf16.gmra.mxu1 %vm328_vm0, %v307_v30  ;;  %v292_v45 = vpack.c.bf16 %v233_v34, %v232_v26  ;;  %v234_v46 = vmax.f32 %v170_v35, 0.0  ;;  %v235_v47 = vmax.f32 %v171_v36, 0.0  ;;  %v203_v48 = vadd.f32 %v961_v4, %v133_v37  ;;  %v69_v34 = vld [vmem:[%s1502_s0 + $0x198] sm:$0xff] }
  0x18   :  { %v308_v51 = vpack.c.bf16 %v265_v40, %v264_v39  ;;  %v266_v52 = vmax.f32 %v202_v41, 0.0  ;;  %v103_v53 = vmul.f32 %v956_v3, %v31_v38  ;;  %v172_v54 = vadd.f32 %v961_v4, %v102_v42  ;;  %v38_v39 = vld [vmem:[%s1502_s0 + $0xa0] sm:$0xff] }
  0x19   :  { %860 = vmatprep.mubr.msk.bf16.mxu0 %vm328_vm0, %v292_v45  ;;  %v293_v56 = vpack.c.bf16 %v235_v47, %v234_v46  ;;  %v267_v57 = vmax.f32 %v203_v48, 0.0  ;;  %v134_v58 = vmul.f32 %v956_v3, %v62_v43  ;;  %v135_v59 = vmul.f32 %v956_v3, %v63_v44  ;;  %v39_v48 = vld [vmem:[%s1502_s0 + $0xa8] sm:$0xff] }
  0x1a   :  { %892 = vmatprep.mubr.msk.bf16.mxu1 %vm328_vm0, %v308_v51  ;;  %v173_v61 = vadd.f32 %v961_v4, %v103_v53  ;;  %v236_v62 = vmax.f32 %v172_v54, 0.0  ;;  %v104_v63 = vmul.f32 %v956_v3, %v32_v49  ;;  %v105_v0 = vmul.f32 %v956_v3, %v33_v50  ;;  %v70_v53 = vld [vmem:[%s1502_s0 + $0x1a0] sm:$0xff]  ;;  %v71_v54 = vld [vmem:[%s1502_s0 + $0x1a8] sm:$0xff] }
  0x1b   :  { %v309_v2 = vpack.c.bf16 %v267_v57, %v266_v52  ;;  %v204_v5 = vadd.f32 %v961_v4, %v134_v58  ;;  %v205_v6 = vadd.f32 %v961_v4, %v135_v59  ;;  %v136_v7 = vmul.f32 %v956_v3, %v64_v55  ;;  %v40_v59 = vld [vmem:[%s1502_s0 + $0xb0] sm:$0xff] }
  0x1c   :  { %v237_v8 = vmax.f32 %v173_v61, 0.0  ;;  %v174_v9 = vadd.f32 %v961_v4, %v104_v63  ;;  %v175_v10 = vadd.f32 %v961_v4, %v105_v0  ;;  %v137_v11 = vmul.f32 %v956_v3, %v65_v60  ;;  %v41_v60 = vld [vmem:[%s1502_s0 + $0xb8] sm:$0xff] }
  0x1d   :  { %861 = vmatmul.mubr.msk.bf16.gmra.mxu0 %vm328_vm0, %v293_v56  ;;  %v268_v13 = vmax.f32 %v204_v5, 0.0  ;;  %v269_v14 = vmax.f32 %v205_v6, 0.0  ;;  %v206_v15 = vadd.f32 %v961_v4, %v136_v7  ;;  %v106_v16 = vmul.f32 %v956_v3, %v34_v1  ;;  %v72_v1 = vld [vmem:[%s1502_s0 + $0x1b0] sm:$0xff] }
  0x1e   :  { %v294_v19 = vpack.c.bf16 %v237_v8, %v236_v62  ;;  %v238_v20 = vmax.f32 %v174_v9, 0.0  ;;  %v239_v21 = vmax.f32 %v175_v10, 0.0  ;;  %v207_v22 = vadd.f32 %v961_v4, %v137_v11  ;;  %v73_v8 = vld [vmem:[%s1502_s0 + $0x1b8] sm:$0xff] }
  0x1f   :  { %893 = vmatmul.mubr.msk.bf16.gmra.mxu1 %vm328_vm0, %v309_v2  ;;  %v310_v25 = vpack.c.bf16 %v269_v14, %v268_v13  ;;  %v270_v26 = vmax.f32 %v206_v15, 0.0  ;;  %v107_v27 = vmul.f32 %v956_v3, %v35_v12  ;;  %v176_v28 = vadd.f32 %v961_v4, %v106_v16  ;;  %v42_v13 = vld [vmem:[%s1502_s0 + $0xc0] sm:$0xff] }
  0x20   :  { %864 = vmatprep.mubr.msk.bf16.mxu0 %vm328_vm0, %v294_v19  ;;  %v295_v30 = vpack.c.bf16 %v239_v21, %v238_v20  ;;  %v271_v31 = vmax.f32 %v207_v22, 0.0  ;;  %v138_v32 = vmul.f32 %v956_v3, %v66_v17  ;;  %v139_v33 = vmul.f32 %v956_v3, %v67_v18  ;;  %v43_v22 = vld [vmem:[%s1502_s0 + $0xc8] sm:$0xff] }
  0x21   :  { %896 = vmatprep.mubr.msk.bf16.mxu1 %vm328_vm0, %v310_v25  ;;  %v177_v35 = vadd.f32 %v961_v4, %v107_v27  ;;  %v240_v36 = vmax.f32 %v176_v28, 0.0  ;;  %v108_v37 = vmul.f32 %v956_v3, %v36_v23  ;;  %v109_v38 = vmul.f32 %v956_v3, %v37_v24  ;;  %v74_v27 = vld [vmem:[%s1502_s0 + $0x1c0] sm:$0xff]  ;;  %v75_v28 = vld [vmem:[%s1502_s0 + $0x1c8] sm:$0xff] }
  0x22   :  { %v311_v40 = vpack.c.bf16 %v271_v31, %v270_v26  ;;  %v208_v41 = vadd.f32 %v961_v4, %v138_v32  ;;  %v209_v42 = vadd.f32 %v961_v4, %v139_v33  ;;  %v140_v43 = vmul.f32 %v956_v3, %v68_v29  ;;  %v44_v33 = vld [vmem:[%s1502_s0 + $0xd0] sm:$0xff] }
  0x23   :  { %v241_v44 = vmax.f32 %v177_v35, 0.0  ;;  %v178_v45 = vadd.f32 %v961_v4, %v108_v37  ;;  %v179_v46 = vadd.f32 %v961_v4, %v109_v38  ;;  %v141_v47 = vmul.f32 %v956_v3, %v69_v34  ;;  %v45_v34 = vld [vmem:[%s1502_s0 + $0xd8] sm:$0xff] }
  0x24   :  { %v272_v49 = vmax.f32 %v208_v41, 0.0  ;;  %v273_v50 = vmax.f32 %v209_v42, 0.0  ;;  %v210_v51 = vadd.f32 %v961_v4, %v140_v43  ;;  %v110_v52 = vmul.f32 %v956_v3, %v38_v39  ;;  %v76_v39 = vld [vmem:[%s1502_s0 + $0x1d0] sm:$0xff] }
  0x25   :  { %865 = vmatmul.mubr.msk.bf16.gmra.mxu0 %vm328_vm0, %v295_v30  ;;  %v296_v55 = vpack.c.bf16 %v241_v44, %v240_v36  ;;  %v242_v56 = vmax.f32 %v178_v45, 0.0  ;;  %v243_v57 = vmax.f32 %v179_v46, 0.0  ;;  %v211_v58 = vadd.f32 %v961_v4, %v141_v47  ;;  %v77_v44 = vld [vmem:[%s1502_s0 + $0x1d8] sm:$0xff] }
  0x26   :  { %v312_v61 = vpack.c.bf16 %v273_v50, %v272_v49  ;;  %v274_v62 = vmax.f32 %v210_v51, 0.0  ;;  %v111_v63 = vmul.f32 %v956_v3, %v39_v48  ;;  %v180_v0 = vadd.f32 %v961_v4, %v110_v52  ;;  %v46_v49 = vld [vmem:[%s1502_s0 + $0xe0] sm:$0xff] }
  0x27   :  { %897 = vmatmul.mubr.msk.bf16.gmra.mxu1 %vm328_vm0, %v311_v40  ;;  %868 = vmatprep.mubr.msk.bf16.mxu0 %vm328_vm0, %v296_v55  ;;  %v297_v2 = vpack.c.bf16 %v243_v57, %v242_v56  ;;  %v275_v5 = vmax.f32 %v211_v58, 0.0  ;;  %v142_v6 = vmul.f32 %v956_v3, %v70_v53  ;;  %v143_v7 = vmul.f32 %v956_v3, %v71_v54  ;;  %v47_v58 = vld [vmem:[%s1502_s0 + $0xe8] sm:$0xff] }
  0x28   :  { %900 = vmatprep.mubr.msk.bf16.mxu1 %vm328_vm0, %v312_v61  ;;  %v181_v9 = vadd.f32 %v961_v4, %v111_v63  ;;  %v244_v10 = vmax.f32 %v180_v0, 0.0  ;;  %v112_v11 = vmul.f32 %v956_v3, %v40_v59  ;;  %v113_v12 = vmul.f32 %v956_v3, %v41_v60  ;;  %v78_v63 = vld [vmem:[%s1502_s0 + $0x1e0] sm:$0xff]  ;;  %v79_v0 = vld [vmem:[%s1502_s0 + $0x1e8] sm:$0xff] }
  0x29   :  { %v313_v14 = vpack.c.bf16 %v275_v5, %v274_v62  ;;  %v212_v15 = vadd.f32 %v961_v4, %v142_v6  ;;  %v213_v16 = vadd.f32 %v961_v4, %v143_v7  ;;  %v144_v17 = vmul.f32 %v956_v3, %v72_v1  ;;  %v48_v6 = vld [vmem:[%s1502_s0 + $0xf0] sm:$0xff]  ;;  %v49_v7 = vld [vmem:[%s1502_s0 + $0xf8] sm:$0xff] }
  0x2a   :  { %v245_v18 = vmax.f32 %v181_v9, 0.0  ;;  %v182_v19 = vadd.f32 %v961_v4, %v112_v11  ;;  %v183_v20 = vadd.f32 %v961_v4, %v113_v12  ;;  %v145_v21 = vmul.f32 %v956_v3, %v73_v8  ;;  %v80_v12 = vld [vmem:[%s1502_s0 + $0x1f0] sm:$0xff] }
  0x2b   :  { %v276_v23 = vmax.f32 %v212_v15, 0.0  ;;  %v277_v24 = vmax.f32 %v213_v16, 0.0  ;;  %v214_v25 = vadd.f32 %v961_v4, %v144_v17  ;;  %v114_v26 = vmul.f32 %v956_v3, %v42_v13  ;;  %v81_v17 = vld [vmem:[%s1502_s0 + $0x1f8] sm:$0xff] }
  0x2c   :  { %v298_v29 = vpack.c.bf16 %v245_v18, %v244_v10  ;;  %v246_v30 = vmax.f32 %v182_v19, 0.0  ;;  %v247_v31 = vmax.f32 %v183_v20, 0.0  ;;  %v215_v32 = vadd.f32 %v961_v4, %v145_v21 }
  0x2d   :  { %869 = vmatmul.mubr.msk.bf16.gmra.mxu0 %vm328_vm0, %v297_v2  ;;  %v314_v35 = vpack.c.bf16 %v277_v24, %v276_v23  ;;  %v278_v36 = vmax.f32 %v214_v25, 0.0  ;;  %v115_v37 = vmul.f32 %v956_v3, %v43_v22  ;;  %v184_v38 = vadd.f32 %v961_v4, %v114_v26 }
  0x2e   :  { %872 = vmatprep.mubr.msk.bf16.mxu0 %vm328_vm0, %v298_v29  ;;  %v299_v40 = vpack.c.bf16 %v247_v31, %v246_v30  ;;  %v279_v41 = vmax.f32 %v215_v32, 0.0  ;;  %v146_v42 = vmul.f32 %v956_v3, %v74_v27  ;;  %v147_v43 = vmul.f32 %v956_v3, %v75_v28 }
  0x2f   :  { %901 = vmatmul.mubr.msk.bf16.gmra.mxu1 %vm328_vm0, %v313_v14  ;;  %v185_v45 = vadd.f32 %v961_v4, %v115_v37  ;;  %v248_v46 = vmax.f32 %v184_v38, 0.0  ;;  %v116_v47 = vmul.f32 %v956_v3, %v44_v33  ;;  %v117_v48 = vmul.f32 %v956_v3, %v45_v34 }
  0x30   :  { %904 = vmatprep.mubr.msk.bf16.mxu1 %vm328_vm0, %v314_v35  ;;  %v315_v50 = vpack.c.bf16 %v279_v41, %v278_v36  ;;  %v216_v51 = vadd.f32 %v961_v4, %v146_v42  ;;  %v217_v52 = vadd.f32 %v961_v4, %v147_v43  ;;  %v148_v53 = vmul.f32 %v956_v3, %v76_v39 }
  0x31   :  { %v249_v54 = vmax.f32 %v185_v45, 0.0  ;;  %v186_v55 = vadd.f32 %v961_v4, %v116_v47  ;;  %v187_v56 = vadd.f32 %v961_v4, %v117_v48  ;;  %v149_v57 = vmul.f32 %v956_v3, %v77_v44 }
  0x32   :  { %v280_v59 = vmax.f32 %v216_v51, 0.0  ;;  %v281_v60 = vmax.f32 %v217_v52, 0.0  ;;  %v218_v61 = vadd.f32 %v961_v4, %v148_v53  ;;  %v118_v62 = vmul.f32 %v956_v3, %v46_v49 }
  0x33   :  { %v300_v1 = vpack.c.bf16 %v249_v54, %v248_v46  ;;  %v250_v2 = vmax.f32 %v186_v55, 0.0  ;;  %v219_v5 = vadd.f32 %v961_v4, %v149_v57  ;;  %v251_v9 = vmax.f32 %v187_v56, 0.0 }
  0x34   :  { %v316_v8 = vpack.c.bf16 %v281_v60, %v280_v59  ;;  %v119_v10 = vmul.f32 %v956_v3, %v47_v58  ;;  %v188_v11 = vadd.f32 %v961_v4, %v118_v62  ;;  %v282_v13 = vmax.f32 %v218_v61, 0.0 }
  0x35   :  { %873 = vmatmul.mubr.msk.bf16.gmra.mxu0 %vm328_vm0, %v299_v40  ;;  %v283_v14 = vmax.f32 %v219_v5, 0.0  ;;  %v150_v15 = vmul.f32 %v956_v3, %v78_v63  ;;  %v151_v16 = vmul.f32 %v956_v3, %v79_v0  ;;  %v120_v20 = vmul.f32 %v956_v3, %v48_v6 }
  0x36   :  { %876 = vmatprep.mubr.msk.bf16.mxu0 %vm328_vm0, %v300_v1  ;;  %v189_v18 = vadd.f32 %v961_v4, %v119_v10  ;;  %v252_v19 = vmax.f32 %v188_v11, 0.0  ;;  %v121_v21 = vmul.f32 %v956_v3, %v49_v7  ;;  %v152_v24 = vmul.f32 %v956_v3, %v80_v12 }
  0x37   :  { %905 = vmatmul.mubr.msk.bf16.gmra.mxu1 %vm328_vm0, %v315_v50  ;;  %v220_v22 = vadd.f32 %v961_v4, %v150_v15  ;;  %v221_v23 = vadd.f32 %v961_v4, %v151_v16  ;;  %v301_v25 = vpack.c.bf16 %v251_v9, %v250_v2  ;;  %v153_v27 = vmul.f32 %v956_v3, %v81_v17 }
  0x38   :  { %908 = vmatprep.mubr.msk.bf16.mxu1 %vm328_vm0, %v316_v8  ;;  %v253_v26 = vmax.f32 %v189_v18, 0.0  ;;  %v190_v30 = vadd.f32 %v961_v4, %v120_v20  ;;  %v191_v31 = vadd.f32 %v961_v4, %v121_v21  ;;  %v317_v32 = vpack.c.bf16 %v283_v14, %v282_v13 }
  0x39   :  { %v284_v28 = vmax.f32 %v220_v22, 0.0  ;;  %v285_v29 = vmax.f32 %v221_v23, 0.0  ;;  %v222_v34 = vadd.f32 %v961_v4, %v152_v24  ;;  %v223_v35 = vadd.f32 %v961_v4, %v153_v27 }
  0x3a   :  { %v302_v33 = vpack.c.bf16 %v253_v26, %v252_v19  ;;  %v254_v37 = vmax.f32 %v190_v30, 0.0  ;;  %v255_v38 = vmax.f32 %v191_v31, 0.0 }
  0x3b   :  { %v318_v36 = vpack.c.bf16 %v285_v29, %v284_v28  ;;  %v286_v3 = vmax.f32 %v222_v34, 0.0  ;;  %v287_v39 = vmax.f32 %v223_v35, 0.0 }
  0x3c   :  { %v303_v40 = vpack.c.bf16 %v255_v38, %v254_v37 }
  0x3d   :  { %877 = vmatmul.mubr.msk.bf16.gmra.mxu0 %vm328_vm0, %v301_v25  ;;  %v319_v41 = vpack.c.bf16 %v287_v39, %v286_v3 }
  0x3e   :  { %880 = vmatprep.mubr.msk.bf16.mxu0 %vm328_vm0, %v302_v33 }
  0x3f   :  { %909 = vmatmul.mubr.msk.bf16.gmra.mxu1 %vm328_vm0, %v317_v32 }
  0x40   :  { %912 = vmatprep.mubr.msk.bf16.mxu1 %vm328_vm0, %v318_v36 }
  0x45   :  { %881 = vmatmul.mubr.msk.bf16.gmra.mxu0 %vm328_vm0, %v303_v40 }
  0x47   :  { %913 = vmatmul.mubr.msk.bf16.gmra.mxu1 %vm328_vm0, %v319_v41 }
  0xcd   :  { %v854_v4 = vpop.f32.mrf.mxu0 }
  0xce   :  { %716 = vst [vmem:[%s1505_s4 + $0x10] sm:$0xff] %v854_v4 }
  0xcf   :  { %v886_v42 = vpop.f32.mrf.mxu1  ;;  %v459_v43 = vpop.f32.mrf.mxu0 }
  0xd0   :  { %748 = vst [vmem:[%s1505_s4 + $0x110] sm:$0xff] %v886_v42  ;;  %714 = vst [vmem:[%s1505_s4] sm:$0xff] %v459_v43 }
  0xd1   :  { %v587_v44 = vpop.f32.mrf.mxu1  ;;  %v855_v45 = vpop.f32.mrf.mxu0 }
  0xd2   :  { %746 = vst [vmem:[%s1505_s4 + $0x100] sm:$0xff] %v587_v44  ;;  %717 = vst [vmem:[%s1505_s4 + $0x18] sm:$0xff] %v855_v45 }
  0xd3   :  { %v887_v46 = vpop.f32.mrf.mxu1  ;;  %v462_v47 = vpop.f32.mrf.mxu0 }
  0xd4   :  { %749 = vst [vmem:[%s1505_s4 + $0x118] sm:$0xff] %v887_v46  ;;  %715 = vst [vmem:[%s1505_s4 + $0x8] sm:$0xff] %v462_v47 }
  0xd5   :  { %v590_v48 = vpop.f32.mrf.mxu1  ;;  %v858_v49 = vpop.f32.mrf.mxu0 }
  0xd6   :  { %747 = vst [vmem:[%s1505_s4 + $0x108] sm:$0xff] %v590_v48  ;;  %720 = vst [vmem:[%s1505_s4 + $0x30] sm:$0xff] %v858_v49 }
  0xd7   :  { %v890_v50 = vpop.f32.mrf.mxu1  ;;  %v475_v51 = vpop.f32.mrf.mxu0 }
  0xd8   :  { %752 = vst [vmem:[%s1505_s4 + $0x130] sm:$0xff] %v890_v50  ;;  %718 = vst [vmem:[%s1505_s4 + $0x20] sm:$0xff] %v475_v51 }
  0xd9   :  { %v603_v52 = vpop.f32.mrf.mxu1  ;;  %v859_v53 = vpop.f32.mrf.mxu0 }
  0xda   :  { %750 = vst [vmem:[%s1505_s4 + $0x120] sm:$0xff] %v603_v52  ;;  %721 = vst [vmem:[%s1505_s4 + $0x38] sm:$0xff] %v859_v53 }
  0xdb   :  { %v891_v54 = vpop.f32.mrf.mxu1  ;;  %v478_v55 = vpop.f32.mrf.mxu0 }
  0xdc   :  { %753 = vst [vmem:[%s1505_s4 + $0x138] sm:$0xff] %v891_v54  ;;  %719 = vst [vmem:[%s1505_s4 + $0x28] sm:$0xff] %v478_v55 }
  0xdd   :  { %v606_v56 = vpop.f32.mrf.mxu1  ;;  %v862_v57 = vpop.f32.mrf.mxu0 }
  0xde   :  { %751 = vst [vmem:[%s1505_s4 + $0x128] sm:$0xff] %v606_v56  ;;  %724 = vst [vmem:[%s1505_s4 + $0x50] sm:$0xff] %v862_v57 }
  0xdf   :  { %v894_v58 = vpop.f32.mrf.mxu1  ;;  %v491_v59 = vpop.f32.mrf.mxu0 }
  0xe0   :  { %756 = vst [vmem:[%s1505_s4 + $0x150] sm:$0xff] %v894_v58  ;;  %722 = vst [vmem:[%s1505_s4 + $0x40] sm:$0xff] %v491_v59 }
  0xe1   :  { %v619_v60 = vpop.f32.mrf.mxu1  ;;  %v863_v61 = vpop.f32.mrf.mxu0 }
  0xe2   :  { %754 = vst [vmem:[%s1505_s4 + $0x140] sm:$0xff] %v619_v60  ;;  %725 = vst [vmem:[%s1505_s4 + $0x58] sm:$0xff] %v863_v61 }
  0xe3   :  { %v895_v62 = vpop.f32.mrf.mxu1  ;;  %v494_v63 = vpop.f32.mrf.mxu0 }
  0xe4   :  { %757 = vst [vmem:[%s1505_s4 + $0x158] sm:$0xff] %v895_v62  ;;  %723 = vst [vmem:[%s1505_s4 + $0x48] sm:$0xff] %v494_v63 }
  0xe5   :  { %v622_v0 = vpop.f32.mrf.mxu1  ;;  %v866_v1 = vpop.f32.mrf.mxu0 }
  0xe6   :  { %755 = vst [vmem:[%s1505_s4 + $0x148] sm:$0xff] %v622_v0  ;;  %728 = vst [vmem:[%s1505_s4 + $0x70] sm:$0xff] %v866_v1 }
  0xe7   :  { %v898_v2 = vpop.f32.mrf.mxu1  ;;  %v507_v5 = vpop.f32.mrf.mxu0 }
  0xe8   :  { %760 = vst [vmem:[%s1505_s4 + $0x170] sm:$0xff] %v898_v2  ;;  %726 = vst [vmem:[%s1505_s4 + $0x60] sm:$0xff] %v507_v5 }
  0xe9   :  { %v635_v6 = vpop.f32.mrf.mxu1  ;;  %v867_v7 = vpop.f32.mrf.mxu0 }
  0xea   :  { %758 = vst [vmem:[%s1505_s4 + $0x160] sm:$0xff] %v635_v6  ;;  %729 = vst [vmem:[%s1505_s4 + $0x78] sm:$0xff] %v867_v7 }
  0xeb   :  { %v899_v8 = vpop.f32.mrf.mxu1  ;;  %v510_v9 = vpop.f32.mrf.mxu0 }
  0xec   :  { %761 = vst [vmem:[%s1505_s4 + $0x178] sm:$0xff] %v899_v8  ;;  %727 = vst [vmem:[%s1505_s4 + $0x68] sm:$0xff] %v510_v9 }
  0xed   :  { %v638_v10 = vpop.f32.mrf.mxu1  ;;  %v870_v11 = vpop.f32.mrf.mxu0 }
  0xee   :  { %759 = vst [vmem:[%s1505_s4 + $0x168] sm:$0xff] %v638_v10  ;;  %732 = vst [vmem:[%s1505_s4 + $0x90] sm:$0xff] %v870_v11 }
  0xef   :  { %v902_v12 = vpop.f32.mrf.mxu1  ;;  %v523_v13 = vpop.f32.mrf.mxu0 }
  0xf0   :  { %764 = vst [vmem:[%s1505_s4 + $0x190] sm:$0xff] %v902_v12  ;;  %730 = vst [vmem:[%s1505_s4 + $0x80] sm:$0xff] %v523_v13 }
  0xf1   :  { %v651_v14 = vpop.f32.mrf.mxu1  ;;  %v871_v15 = vpop.f32.mrf.mxu0 }
  0xf2   :  { %762 = vst [vmem:[%s1505_s4 + $0x180] sm:$0xff] %v651_v14  ;;  %733 = vst [vmem:[%s1505_s4 + $0x98] sm:$0xff] %v871_v15 }
  0xf3   :  { %v903_v16 = vpop.f32.mrf.mxu1  ;;  %v526_v17 = vpop.f32.mrf.mxu0 }
  0xf4   :  { %765 = vst [vmem:[%s1505_s4 + $0x198] sm:$0xff] %v903_v16  ;;  %731 = vst [vmem:[%s1505_s4 + $0x88] sm:$0xff] %v526_v17 }
  0xf5   :  { %v654_v18 = vpop.f32.mrf.mxu1  ;;  %v874_v19 = vpop.f32.mrf.mxu0 }
  0xf6   :  { %763 = vst [vmem:[%s1505_s4 + $0x188] sm:$0xff] %v654_v18  ;;  %736 = vst [vmem:[%s1505_s4 + $0xb0] sm:$0xff] %v874_v19 }
  0xf7   :  { %v906_v20 = vpop.f32.mrf.mxu1  ;;  %v539_v21 = vpop.f32.mrf.mxu0 }
  0xf8   :  { %768 = vst [vmem:[%s1505_s4 + $0x1b0] sm:$0xff] %v906_v20  ;;  %734 = vst [vmem:[%s1505_s4 + $0xa0] sm:$0xff] %v539_v21 }
  0xf9   :  { %v667_v22 = vpop.f32.mrf.mxu1  ;;  %v875_v23 = vpop.f32.mrf.mxu0 }
  0xfa   :  { %766 = vst [vmem:[%s1505_s4 + $0x1a0] sm:$0xff] %v667_v22  ;;  %737 = vst [vmem:[%s1505_s4 + $0xb8] sm:$0xff] %v875_v23 }
  0xfb   :  { %v907_v24 = vpop.f32.mrf.mxu1  ;;  %v542_v25 = vpop.f32.mrf.mxu0 }
  0xfc   :  { %769 = vst [vmem:[%s1505_s4 + $0x1b8] sm:$0xff] %v907_v24  ;;  %735 = vst [vmem:[%s1505_s4 + $0xa8] sm:$0xff] %v542_v25 }
  0xfd   :  { %v670_v26 = vpop.f32.mrf.mxu1  ;;  %v878_v27 = vpop.f32.mrf.mxu0 }
  0xfe   :  { %767 = vst [vmem:[%s1505_s4 + $0x1a8] sm:$0xff] %v670_v26  ;;  %740 = vst [vmem:[%s1505_s4 + $0xd0] sm:$0xff] %v878_v27 }
  0xff   :  { %v910_v28 = vpop.f32.mrf.mxu1  ;;  %v555_v29 = vpop.f32.mrf.mxu0 }
 0x100   :  { %772 = vst [vmem:[%s1505_s4 + $0x1d0] sm:$0xff] %v910_v28  ;;  %738 = vst [vmem:[%s1505_s4 + $0xc0] sm:$0xff] %v555_v29 }
 0x101   :  { %v683_v30 = vpop.f32.mrf.mxu1  ;;  %v879_v31 = vpop.f32.mrf.mxu0 }
 0x102   :  { %770 = vst [vmem:[%s1505_s4 + $0x1c0] sm:$0xff] %v683_v30  ;;  %741 = vst [vmem:[%s1505_s4 + $0xd8] sm:$0xff] %v879_v31 }
 0x103   :  { %v911_v32 = vpop.f32.mrf.mxu1  ;;  %v558_v33 = vpop.f32.mrf.mxu0 }
 0x104   :  { %773 = vst [vmem:[%s1505_s4 + $0x1d8] sm:$0xff] %v911_v32  ;;  %739 = vst [vmem:[%s1505_s4 + $0xc8] sm:$0xff] %v558_v33 }
 0x105   :  { %v686_v34 = vpop.f32.mrf.mxu1  ;;  %v882_v35 = vpop.f32.mrf.mxu0 }
 0x106   :  { %771 = vst [vmem:[%s1505_s4 + $0x1c8] sm:$0xff] %v686_v34  ;;  %744 = vst [vmem:[%s1505_s4 + $0xf0] sm:$0xff] %v882_v35 }
 0x107   :  { %v914_v36 = vpop.f32.mrf.mxu1  ;;  %v571_v37 = vpop.f32.mrf.mxu0 }
 0x108   :  { %776 = vst [vmem:[%s1505_s4 + $0x1f0] sm:$0xff] %v914_v36  ;;  %742 = vst [vmem:[%s1505_s4 + $0xe0] sm:$0xff] %v571_v37 }
 0x109   :  { %v699_v38 = vpop.f32.mrf.mxu1  ;;  %v883_v3 = vpop.f32.mrf.mxu0 }
 0x10a   :  { %774 = vst [vmem:[%s1505_s4 + $0x1e0] sm:$0xff] %v699_v38  ;;  %745 = vst [vmem:[%s1505_s4 + $0xf8] sm:$0xff] %v883_v3 }
 0x10b   :  { %v915_v39 = vpop.f32.mrf.mxu1  ;;  %v574_v40 = vpop.f32.mrf.mxu0 }
 0x10c   :  { %777 = vst [vmem:[%s1505_s4 + $0x1f8] sm:$0xff] %v915_v39  ;;  %743 = vst [vmem:[%s1505_s4 + $0xe8] sm:$0xff] %v574_v40 }
 0x10d   :  { %v702_v41 = vpop.f32.mrf.mxu1 }
 0x10e   :  { %775 = vst [vmem:[%s1505_s4 + $0x1e8] sm:$0xff] %v702_v41 }

// kernel: cnn_decoder_forward.21
= control target key start
LH: loop header
LB: loop body
LE: loop exit
PB: predicated region body
PF: predicated region fallthrough
CT: control target
= control target key end

     0   :  { %s1085_s15 = smov 0   ;;  %s2146_s0 = inlined_call_operand.vmem [shape: f32[2048,8], index: 0, kind: input, shape index: {}]   ;;  %s2147_s1 = inlined_call_operand.vmem [shape: f32[1,8], index: 1, kind: input, shape index: {}]   ;;  %s2148_s2 = inlined_call_operand.vmem [shape: f32[1,8], index: 2, kind: input, shape index: {}]   ;;  %s2149_s3 = inlined_call_operand.vmem [shape: f32[1,8], index: 3, kind: output, shape index: {0}]   ;;  %s2150_s4 = inlined_call_operand.vmem [shape: f32[1,8], index: 4, kind: output, shape index: {1}]  }
   0x1 LB: > { %s1091_s16 = sadd.s32 4294967295, %s1057_s15   ;;  %p1033_p0 = scmp.ge.s32.totalorder %s1057_s15, 1  ;;  %s1057_s15 = sphi %s1085_s15, %s15_s15  }
   0x2   : > { %p156_p1 = scmp.lt.s32.totalorder %s1057_s15, 3 }
   0x4   : > { %p157_p2 = pnand %p1033_p0, %p156_p1 }
   0x5   : > { %s1034_s17 = sshll.u32 (!%p157_p2), %s1091_s16, 7  ;;  %p1036_p4 = scmp.ne.s32.totalorder (!%p157_p2), %s1091_s16, 0 }
   0x6   : > { %160 = sbr.rel (%p157_p2) target bundleno = 365 (0x16d), region = 32  ;;  %p178_p3 = scmp.lt.s32.totalorder (!%p157_p2), %s1034_s17, 255 }
   0xb   : > { %s2152_s17 = smov (!%p178_p3, %s1034_s17), 255  ;;  %186 = sbr.rel (%p1036_p4) target bundleno = 18 (0x12), region = 36 }
   0xc   : > { %s1035_s18 = sshll.u32 %s2152_s17, 3 }
   0xd   : > { %s1099_s21 = scalar_lea.vmem %s2146_s0, %s1035_s18 }
  0x10   : > { %vm187_vm0 = vcmask 57344   ;;  %v1059_v0 = vmov 0.0  }
  0x11   : > { %188 = vst.msk [vmem:[#allocation2] sm:$0x1] %vm187_vm0, %v1059_v0  ;;  %189 = vst.msk [vmem:[#allocation3] sm:$0x1] %vm187_vm0, %v1059_v0 }
  0x12 PF: > { %v1103_v1 = vld [vmem:[%s1099_s21] sm:$0xff]  ;;  %v1106_v2 = vld [vmem:[%s1099_s21 + $0x8] sm:$0xff]  ;;  %v1109_v3 = vld [vmem:[%s1099_s21 + $0x10] sm:$0xff]  ;;  %vm319_vm1 = vcmask 64512   ;;  %vm582_vm2 = vcmask 57344   ;;  %p1037_p5 = scmp.ne.s32.totalorder %s1091_s16, 1 }
  0x13   : > { %v320_v4 = vsel %vm319_vm1, %v1103_v1, 0.0  ;;  %v321_v5 = vsel %vm319_vm1, %v1106_v2, 0.0  ;;  %v323_v6 = vsel %vm319_vm1, %v1109_v3, 0.0  ;;  %v1118_v7 = vld [vmem:[%s1099_s21 + $0x18] sm:$0xff]  ;;  %v1123_v10 = vld [vmem:[%s1099_s21 + $0x20] sm:$0xff]  ;;  %v1128_v13 = vld [vmem:[%s1099_s21 + $0x28] sm:$0xff] }
  0x14   : > { %v322_v8 = vadd.f32 %v321_v5, %v320_v4  ;;  %v325_v9 = vsel %vm319_vm1, %v1118_v7, 0.0  ;;  %v327_v12 = vsel %vm319_vm1, %v1123_v10, 0.0  ;;  %v329_v15 = vsel %vm319_vm1, %v1128_v13, 0.0  ;;  %v1133_v16 = vld [vmem:[%s1099_s21 + $0x30] sm:$0xff]  ;;  %v1138_v19 = vld [vmem:[%s1099_s21 + $0x38] sm:$0xff]  ;;  %v1143_v22 = vld [vmem:[%s1099_s21 + $0x40] sm:$0xff] }
  0x15   : > { %v331_v18 = vsel %vm319_vm1, %v1133_v16, 0.0  ;;  %v333_v21 = vsel %vm319_vm1, %v1138_v19, 0.0  ;;  %v335_v24 = vsel %vm319_vm1, %v1143_v22, 0.0  ;;  %v1148_v25 = vld [vmem:[%s1099_s21 + $0x48] sm:$0xff]  ;;  %v1153_v28 = vld [vmem:[%s1099_s21 + $0x50] sm:$0xff]  ;;  %v1158_v31 = vld [vmem:[%s1099_s21 + $0x58] sm:$0xff] }
  0x16   : > { %v324_v11 = vadd.f32 %v323_v6, %v322_v8  ;;  %v337_v27 = vsel %vm319_vm1, %v1148_v25, 0.0  ;;  %v339_v30 = vsel %vm319_vm1, %v1153_v28, 0.0  ;;  %v341_v33 = vsel %vm319_vm1, %v1158_v31, 0.0  ;;  %v1163_v34 = vld [vmem:[%s1099_s21 + $0x60] sm:$0xff]  ;;  %v1168_v37 = vld [vmem:[%s1099_s21 + $0x68] sm:$0xff]  ;;  %v1173_v40 = vld [vmem:[%s1099_s21 + $0x70] sm:$0xff] }
  0x17   : > { %v343_v36 = vsel %vm319_vm1, %v1163_v34, 0.0  ;;  %v345_v39 = vsel %vm319_vm1, %v1168_v37, 0.0  ;;  %v347_v42 = vsel %vm319_vm1, %v1173_v40, 0.0  ;;  %v1178_v43 = vld [vmem:[%s1099_s21 + $0x78] sm:$0xff]  ;;  %v1183_v46 = vld [vmem:[%s1099_s21 + $0x80] sm:$0xff]  ;;  %v1188_v49 = vld [vmem:[%s1099_s21 + $0x88] sm:$0xff] }
  0x18   : > { %v326_v14 = vadd.f32 %v325_v9, %v324_v11  ;;  %v349_v45 = vsel %vm319_vm1, %v1178_v43, 0.0  ;;  %v351_v48 = vsel %vm319_vm1, %v1183_v46, 0.0  ;;  %v353_v51 = vsel %vm319_vm1, %v1188_v49, 0.0  ;;  %v1193_v52 = vld [vmem:[%s1099_s21 + $0x90] sm:$0xff]  ;;  %v1198_v55 = vld [vmem:[%s1099_s21 + $0x98] sm:$0xff]  ;;  %v1203_v58 = vld [vmem:[%s1099_s21 + $0xa0] sm:$0xff] }
  0x19   : > { %v355_v54 = vsel %vm319_vm1, %v1193_v52, 0.0  ;;  %v357_v57 = vsel %vm319_vm1, %v1198_v55, 0.0  ;;  %v359_v60 = vsel %vm319_vm1, %v1203_v58, 0.0  ;;  %v1208_v61 = vld [vmem:[%s1099_s21 + $0xa8] sm:$0xff]  ;;  %v1213_v0 = vld [vmem:[%s1099_s21 + $0xb0] sm:$0xff]  ;;  %v1218_v6 = vld [vmem:[%s1099_s21 + $0xb8] sm:$0xff] }
  0x1a   : > { %v328_v17 = vadd.f32 %v327_v12, %v326_v14  ;;  %v361_v63 = vsel %vm319_vm1, %v1208_v61, 0.0  ;;  %v363_v5 = vsel %vm319_vm1, %v1213_v0, 0.0  ;;  %v365_v9 = vsel %vm319_vm1, %v1218_v6, 0.0  ;;  %v1223_v11 = vld [vmem:[%s1099_s21 + $0xc0] sm:$0xff] }
  0x1b   : > { %v367_v14 = vsel %vm319_vm1, %v1223_v11, 0.0 }
  0x1c   : > { %v330_v20 = vadd.f32 %v329_v15, %v328_v17  ;;  %v1228_v15 = vld [vmem:[%s1099_s21 + $0xc8] sm:$0xff] }
  0x1e   : > { %v332_v23 = vadd.f32 %v331_v18, %v330_v20  ;;  %v369_v18 = vsel %vm319_vm1, %v1228_v15, 0.0  ;;  %v1233_v20 = vld [vmem:[%s1099_s21 + $0xd0] sm:$0xff] }
  0x20   : > { %v334_v26 = vadd.f32 %v333_v21, %v332_v23  ;;  %v371_v23 = vsel %vm319_vm1, %v1233_v20, 0.0 }
  0x22   : > { %v336_v29 = vadd.f32 %v335_v24, %v334_v26  ;;  %v585_v24 = vmul.f32 %v1103_v1, %v1103_v1  ;;  %v586_v26 = vmul.f32 %v1106_v2, %v1106_v2  ;;  %v589_v1 = vmul.f32 %v1123_v10, %v1123_v10 }
  0x23   : > { %v590_v10 = vmul.f32 %v1128_v13, %v1128_v13 }
  0x24   : > { %v338_v32 = vadd.f32 %v337_v27, %v336_v29  ;;  %v587_v27 = vmul.f32 %v1109_v3, %v1109_v3  ;;  %v1244_v29 = vld [vmem:[%s1099_s21 + $0xd8] sm:$0xff]  ;;  %v713_v3 = vsel %vm319_vm1, %v585_v24, 0.0 }
  0x26   : > { %v340_v35 = vadd.f32 %v339_v30, %v338_v32  ;;  %v373_v32 = vsel %vm319_vm1, %v1244_v29, 0.0 }
  0x28   : > { %v342_v38 = vadd.f32 %v341_v33, %v340_v35  ;;  %v588_v33 = vmul.f32 %v1118_v7, %v1118_v7  ;;  %v1251_v35 = vld [vmem:[%s1099_s21 + $0xe0] sm:$0xff] }
  0x29   : > { %v375_v2 = vsel %vm319_vm1, %v1251_v35, 0.0 }
  0x2a   : > { %v344_v41 = vadd.f32 %v343_v36, %v342_v38  ;;  %v714_v38 = vsel %vm319_vm1, %v586_v26, 0.0 }
  0x2b   : > { %v715_v7 = vadd.f32 %v714_v38, %v713_v3  ;;  %v1317_v3 = vld [vmem:[%s1099_s21 + $0x120] sm:$0xff] }
  0x2c   : > { %v346_v44 = vadd.f32 %v345_v39, %v344_v41  ;;  %v716_v39 = vsel %vm319_vm1, %v587_v27, 0.0  ;;  %v1261_v41 = vld [vmem:[%s1099_s21 + $0xe8] sm:$0xff]  ;;  %v595_v27 = vmul.f32 %v1153_v28, %v1153_v28  ;;  %v391_v28 = vsel %vm319_vm1, %v1317_v3, 0.0 }
  0x2e   : > { %v348_v47 = vadd.f32 %v347_v42, %v346_v44  ;;  %v377_v44 = vsel %vm319_vm1, %v1261_v41, 0.0 }
  0x30   : > { %v350_v50 = vadd.f32 %v349_v45, %v348_v47  ;;  %v718_v45 = vsel %vm319_vm1, %v588_v33, 0.0  ;;  %v1269_v47 = vld [vmem:[%s1099_s21 + $0xf0] sm:$0xff] }
  0x32   : > { %v352_v53 = vadd.f32 %v351_v48, %v350_v50  ;;  %v717_v50 = vadd.f32 %v716_v39, %v715_v7  ;;  %v732_v7 = vsel %vm319_vm1, %v595_v27, 0.0 }
  0x34   : > { %v354_v56 = vadd.f32 %v353_v51, %v352_v53  ;;  %v379_v51 = vsel %vm319_vm1, %v1269_v47, 0.0  ;;  %v591_v53 = vmul.f32 %v1133_v16, %v1133_v16 }
  0x36   : > { %v356_v59 = vadd.f32 %v355_v54, %v354_v56  ;;  %v720_v54 = vsel %vm319_vm1, %v589_v1, 0.0  ;;  %v1277_v56 = vld [vmem:[%s1099_s21 + $0xf8] sm:$0xff]  ;;  %v596_v1 = vmul.f32 %v1158_v31, %v1158_v31 }
  0x37   : > { %v381_v13 = vsel %vm319_vm1, %v1277_v56, 0.0 }
  0x38   : > { %v358_v62 = vadd.f32 %v357_v57, %v356_v59  ;;  %v719_v59 = vadd.f32 %v718_v45, %v717_v50  ;;  %v734_v50 = vsel %vm319_vm1, %v596_v1, 0.0 }
  0x3a   : > { %v360_v4 = vadd.f32 %v359_v60, %v358_v62  ;;  %v592_v60 = vmul.f32 %v1138_v19, %v1138_v19  ;;  %v722_v62 = vsel %vm319_vm1, %v590_v10, 0.0 }
  0x3c   : > { %v362_v8 = vadd.f32 %v361_v63, %v360_v4  ;;  %v1285_v63 = vld [vmem:[%s1099_s21 + $0x100] sm:$0xff] }
  0x3d   : > { %v383_v16 = vsel %vm319_vm1, %v1285_v63, 0.0 }
  0x3e   : > { %v364_v12 = vadd.f32 %v363_v5, %v362_v8  ;;  %v721_v5 = vadd.f32 %v720_v54, %v719_v59  ;;  %v593_v8 = vmul.f32 %v1143_v22, %v1143_v22 }
  0x40   : > { %v366_v17 = vadd.f32 %v365_v9, %v364_v12  ;;  %v724_v9 = vsel %vm319_vm1, %v591_v53, 0.0  ;;  %v1293_v12 = vld [vmem:[%s1099_s21 + $0x108] sm:$0xff] }
  0x41   : > { %v385_v19 = vsel %vm319_vm1, %v1293_v12, 0.0 }
  0x42   : > { %v368_v21 = vadd.f32 %v367_v14, %v366_v17  ;;  %v723_v17 = vadd.f32 %v722_v62, %v721_v5 }
  0x44   : > { %v370_v30 = vadd.f32 %v369_v18, %v368_v21  ;;  %v594_v18 = vmul.f32 %v1148_v25, %v1148_v25  ;;  %v726_v21 = vsel %vm319_vm1, %v592_v60, 0.0  ;;  %v725_v26 = vadd.f32 %v724_v9, %v723_v17 }
  0x46   : > { %v372_v36 = vadd.f32 %v371_v23, %v370_v30  ;;  %v1301_v23 = vld [vmem:[%s1099_s21 + $0x110] sm:$0xff]  ;;  %v728_v30 = vsel %vm319_vm1, %v593_v8, 0.0 }
  0x47   : > { %v387_v22 = vsel %vm319_vm1, %v1301_v23, 0.0 }
  0x48   : > { %v374_v42 = vadd.f32 %v373_v32, %v372_v36  ;;  %v1309_v32 = vld [vmem:[%s1099_s21 + $0x118] sm:$0xff]  ;;  %v727_v36 = vadd.f32 %v726_v21, %v725_v26 }
  0x49   : > { %v389_v25 = vsel %vm319_vm1, %v1309_v32, 0.0 }
  0x4a   : > { %v376_v48 = vadd.f32 %v375_v2, %v374_v42  ;;  %v730_v2 = vsel %vm319_vm1, %v594_v18, 0.0  ;;  %v729_v39 = vadd.f32 %v728_v30, %v727_v36  ;;  %v597_v42 = vmul.f32 %v1163_v34, %v1163_v34 }
  0x4c   : > { %v378_v57 = vadd.f32 %v377_v44, %v376_v48  ;;  %v1325_v44 = vld [vmem:[%s1099_s21 + $0x128] sm:$0xff]  ;;  %v731_v45 = vadd.f32 %v730_v2, %v729_v39  ;;  %v598_v48 = vmul.f32 %v1168_v37, %v1168_v37  ;;  %v736_v59 = vsel %vm319_vm1, %v597_v42, 0.0 }
  0x4d   : > { %v393_v31 = vsel %vm319_vm1, %v1325_v44, 0.0 }
  0x4e   : > { %v380_v4 = vadd.f32 %v379_v51, %v378_v57  ;;  %v1333_v51 = vld [vmem:[%s1099_s21 + $0x130] sm:$0xff]  ;;  %v733_v54 = vadd.f32 %v732_v7, %v731_v45  ;;  %v599_v57 = vmul.f32 %v1173_v40, %v1173_v40  ;;  %v738_v5 = vsel %vm319_vm1, %v598_v48, 0.0 }
  0x4f   : > { %v395_v34 = vsel %vm319_vm1, %v1333_v51, 0.0 }
  0x50   : > { %v382_v14 = vadd.f32 %v381_v13, %v380_v4  ;;  %v1341_v13 = vld [vmem:[%s1099_s21 + $0x138] sm:$0xff]  ;;  %v735_v62 = vadd.f32 %v734_v50, %v733_v54  ;;  %v600_v4 = vmul.f32 %v1178_v43, %v1178_v43  ;;  %v740_v17 = vsel %vm319_vm1, %v599_v57, 0.0 }
  0x51   : > { %v397_v37 = vsel %vm319_vm1, %v1341_v13, 0.0 }
  0x52   : > { %v384_v24 = vadd.f32 %v383_v16, %v382_v14  ;;  %v1349_v16 = vld [vmem:[%s1099_s21 + $0x140] sm:$0xff]  ;;  %v737_v9 = vadd.f32 %v736_v59, %v735_v62  ;;  %v601_v14 = vmul.f32 %v1183_v46, %v1183_v46  ;;  %v742_v26 = vsel %vm319_vm1, %v600_v4, 0.0 }
  0x53   : > { %v399_v40 = vsel %vm319_vm1, %v1349_v16, 0.0 }
  0x54   : > { %v386_v33 = vadd.f32 %v385_v19, %v384_v24  ;;  %v1357_v19 = vld [vmem:[%s1099_s21 + $0x148] sm:$0xff]  ;;  %v739_v21 = vadd.f32 %v738_v5, %v737_v9  ;;  %v602_v24 = vmul.f32 %v1188_v49, %v1188_v49  ;;  %v744_v36 = vsel %vm319_vm1, %v601_v14, 0.0 }
  0x55   : > { %v401_v43 = vsel %vm319_vm1, %v1357_v19, 0.0 }
  0x56   : > { %v388_v38 = vadd.f32 %v387_v22, %v386_v33  ;;  %v1365_v22 = vld [vmem:[%s1099_s21 + $0x150] sm:$0xff]  ;;  %v741_v30 = vadd.f32 %v740_v17, %v739_v21  ;;  %v603_v33 = vmul.f32 %v1193_v52, %v1193_v52  ;;  %v746_v39 = vsel %vm319_vm1, %v602_v24, 0.0 }
  0x57   : > { %v403_v46 = vsel %vm319_vm1, %v1365_v22, 0.0 }
  0x58   : > { %v390_v10 = vadd.f32 %v389_v25, %v388_v38  ;;  %v1373_v25 = vld [vmem:[%s1099_s21 + $0x158] sm:$0xff]  ;;  %v743_v2 = vadd.f32 %v742_v26, %v741_v30  ;;  %v604_v38 = vmul.f32 %v1198_v55, %v1198_v55  ;;  %v748_v45 = vsel %vm319_vm1, %v603_v33, 0.0 }
  0x59   : > { %v405_v49 = vsel %vm319_vm1, %v1373_v25, 0.0 }
  0x5a   : > { %v392_v53 = vadd.f32 %v391_v28, %v390_v10  ;;  %v1381_v28 = vld [vmem:[%s1099_s21 + $0x160] sm:$0xff]  ;;  %v745_v7 = vadd.f32 %v744_v36, %v743_v2  ;;  %v605_v10 = vmul.f32 %v1203_v58, %v1203_v58  ;;  %v750_v54 = vsel %vm319_vm1, %v604_v38, 0.0 }
  0x5b   : > { %v407_v52 = vsel %vm319_vm1, %v1381_v28, 0.0 }
  0x5c   : > { %v394_v60 = vadd.f32 %v393_v31, %v392_v53  ;;  %v1389_v31 = vld [vmem:[%s1099_s21 + $0x168] sm:$0xff]  ;;  %v747_v50 = vadd.f32 %v746_v39, %v745_v7  ;;  %v606_v53 = vmul.f32 %v1208_v61, %v1208_v61  ;;  %v752_v62 = vsel %vm319_vm1, %v605_v10, 0.0 }
  0x5d   : > { %v409_v55 = vsel %vm319_vm1, %v1389_v31, 0.0 }
  0x5e   : > { %v396_v8 = vadd.f32 %v395_v34, %v394_v60  ;;  %v1397_v34 = vld [vmem:[%s1099_s21 + $0x170] sm:$0xff]  ;;  %v749_v59 = vadd.f32 %v748_v45, %v747_v50  ;;  %v607_v60 = vmul.f32 %v1213_v0, %v1213_v0  ;;  %v754_v9 = vsel %vm319_vm1, %v606_v53, 0.0 }
  0x5f   : > { %v411_v58 = vsel %vm319_vm1, %v1397_v34, 0.0 }
  0x60   : > { %v398_v18 = vadd.f32 %v397_v37, %v396_v8  ;;  %v1405_v37 = vld [vmem:[%s1099_s21 + $0x178] sm:$0xff]  ;;  %v751_v5 = vadd.f32 %v750_v54, %v749_v59  ;;  %v608_v8 = vmul.f32 %v1218_v6, %v1218_v6  ;;  %v756_v21 = vsel %vm319_vm1, %v607_v60, 0.0 }
  0x61   : > { %v413_v61 = vsel %vm319_vm1, %v1405_v37, 0.0 }
  0x62   : > { %v400_v27 = vadd.f32 %v399_v40, %v398_v18  ;;  %v1413_v40 = vld [vmem:[%s1099_s21 + $0x180] sm:$0xff]  ;;  %v753_v17 = vadd.f32 %v752_v62, %v751_v5  ;;  %v609_v18 = vmul.f32 %v1223_v11, %v1223_v11  ;;  %v758_v30 = vsel %vm319_vm1, %v608_v8, 0.0 }
  0x63   : > { %v415_v0 = vsel %vm319_vm1, %v1413_v40, 0.0 }
  0x64   : > { %v402_v1 = vadd.f32 %v401_v43, %v400_v27  ;;  %v1421_v43 = vld [vmem:[%s1099_s21 + $0x188] sm:$0xff]  ;;  %v755_v26 = vadd.f32 %v754_v9, %v753_v17  ;;  %v610_v27 = vmul.f32 %v1228_v15, %v1228_v15  ;;  %v760_v2 = vsel %vm319_vm1, %v609_v18, 0.0 }
  0x65   : > { %v417_v6 = vsel %vm319_vm1, %v1421_v43, 0.0 }
  0x66   : > { %v404_v42 = vadd.f32 %v403_v46, %v402_v1  ;;  %v1429_v46 = vld [vmem:[%s1099_s21 + $0x190] sm:$0xff]  ;;  %v757_v36 = vadd.f32 %v756_v21, %v755_v26  ;;  %v611_v1 = vmul.f32 %v1233_v20, %v1233_v20  ;;  %v762_v7 = vsel %vm319_vm1, %v610_v27, 0.0 }
  0x67   : > { %v419_v11 = vsel %vm319_vm1, %v1429_v46, 0.0 }
  0x68   : > { %v406_v48 = vadd.f32 %v405_v49, %v404_v42  ;;  %v1437_v49 = vld [vmem:[%s1099_s21 + $0x198] sm:$0xff]  ;;  %v759_v39 = vadd.f32 %v758_v30, %v757_v36  ;;  %v612_v42 = vmul.f32 %v1244_v29, %v1244_v29  ;;  %v764_v50 = vsel %vm319_vm1, %v611_v1, 0.0 }
  0x69   : > { %v421_v15 = vsel %vm319_vm1, %v1437_v49, 0.0 }
  0x6a   : > { %v408_v57 = vadd.f32 %v407_v52, %v406_v48  ;;  %v1445_v52 = vld [vmem:[%s1099_s21 + $0x1a0] sm:$0xff]  ;;  %v761_v45 = vadd.f32 %v760_v2, %v759_v39  ;;  %v613_v48 = vmul.f32 %v1251_v35, %v1251_v35  ;;  %v766_v59 = vsel %vm319_vm1, %v612_v42, 0.0 }
  0x6b   : > { %v423_v20 = vsel %vm319_vm1, %v1445_v52, 0.0 }
  0x6c   : > { %v410_v4 = vadd.f32 %v409_v55, %v408_v57  ;;  %v1453_v55 = vld [vmem:[%s1099_s21 + $0x1a8] sm:$0xff]  ;;  %v763_v54 = vadd.f32 %v762_v7, %v761_v45  ;;  %v614_v57 = vmul.f32 %v1261_v41, %v1261_v41  ;;  %v768_v5 = vsel %vm319_vm1, %v613_v48, 0.0 }
  0x6d   : > { %v425_v29 = vsel %vm319_vm1, %v1453_v55, 0.0 }
  0x6e   : > { %v412_v14 = vadd.f32 %v411_v58, %v410_v4  ;;  %v1461_v58 = vld [vmem:[%s1099_s21 + $0x1b0] sm:$0xff]  ;;  %v765_v62 = vadd.f32 %v764_v50, %v763_v54  ;;  %v615_v4 = vmul.f32 %v1269_v47, %v1269_v47  ;;  %v770_v17 = vsel %vm319_vm1, %v614_v57, 0.0 }
  0x6f   : > { %v427_v35 = vsel %vm319_vm1, %v1461_v58, 0.0 }
  0x70   : > { %v414_v24 = vadd.f32 %v413_v61, %v412_v14  ;;  %v1469_v61 = vld [vmem:[%s1099_s21 + $0x1b8] sm:$0xff]  ;;  %v767_v9 = vadd.f32 %v766_v59, %v765_v62  ;;  %v616_v14 = vmul.f32 %v1277_v56, %v1277_v56  ;;  %v772_v26 = vsel %vm319_vm1, %v615_v4, 0.0 }
  0x71   : > { %v429_v41 = vsel %vm319_vm1, %v1469_v61, 0.0 }
  0x72   : > { %v416_v33 = vadd.f32 %v415_v0, %v414_v24  ;;  %v1477_v0 = vld [vmem:[%s1099_s21 + $0x1c0] sm:$0xff]  ;;  %v769_v21 = vadd.f32 %v768_v5, %v767_v9  ;;  %v617_v24 = vmul.f32 %v1285_v63, %v1285_v63  ;;  %v774_v36 = vsel %vm319_vm1, %v616_v14, 0.0 }
  0x73   : > { %v431_v47 = vsel %vm319_vm1, %v1477_v0, 0.0 }
  0x74   : > { %v418_v38 = vadd.f32 %v417_v6, %v416_v33  ;;  %v1485_v6 = vld [vmem:[%s1099_s21 + $0x1c8] sm:$0xff]  ;;  %v771_v30 = vadd.f32 %v770_v17, %v769_v21  ;;  %v618_v33 = vmul.f32 %v1293_v12, %v1293_v12  ;;  %v776_v39 = vsel %vm319_vm1, %v617_v24, 0.0 }
  0x75   : > { %v433_v56 = vsel %vm319_vm1, %v1485_v6, 0.0 }
  0x76   : > { %v420_v10 = vadd.f32 %v419_v11, %v418_v38  ;;  %v1493_v11 = vld [vmem:[%s1099_s21 + $0x1d0] sm:$0xff]  ;;  %v773_v2 = vadd.f32 %v772_v26, %v771_v30  ;;  %v619_v38 = vmul.f32 %v1301_v23, %v1301_v23  ;;  %v778_v45 = vsel %vm319_vm1, %v618_v33, 0.0 }
  0x77   : > { %v435_v63 = vsel %vm319_vm1, %v1493_v11, 0.0 }
  0x78   : > { %v422_v53 = vadd.f32 %v421_v15, %v420_v10  ;;  %v1501_v15 = vld [vmem:[%s1099_s21 + $0x1d8] sm:$0xff]  ;;  %v775_v7 = vadd.f32 %v774_v36, %v773_v2  ;;  %v620_v10 = vmul.f32 %v1309_v32, %v1309_v32  ;;  %v780_v54 = vsel %vm319_vm1, %v619_v38, 0.0 }
  0x79   : > { %v437_v12 = vsel %vm319_vm1, %v1501_v15, 0.0 }
  0x7a   : > { %v424_v60 = vadd.f32 %v423_v20, %v422_v53  ;;  %v1509_v20 = vld [vmem:[%s1099_s21 + $0x1e0] sm:$0xff]  ;;  %v777_v50 = vadd.f32 %v776_v39, %v775_v7  ;;  %v621_v53 = vmul.f32 %v1317_v3, %v1317_v3  ;;  %v782_v62 = vsel %vm319_vm1, %v620_v10, 0.0 }
  0x7b   : > { %v439_v23 = vsel %vm319_vm1, %v1509_v20, 0.0 }
  0x7c   : > { %v426_v8 = vadd.f32 %v425_v29, %v424_v60  ;;  %v1517_v29 = vld [vmem:[%s1099_s21 + $0x1e8] sm:$0xff]  ;;  %v779_v59 = vadd.f32 %v778_v45, %v777_v50  ;;  %v622_v60 = vmul.f32 %v1325_v44, %v1325_v44  ;;  %v784_v9 = vsel %vm319_vm1, %v621_v53, 0.0 }
  0x7d   : > { %v441_v32 = vsel %vm319_vm1, %v1517_v29, 0.0 }
  0x7e   : > { %v428_v18 = vadd.f32 %v427_v35, %v426_v8  ;;  %v1525_v35 = vld [vmem:[%s1099_s21 + $0x1f0] sm:$0xff]  ;;  %v781_v5 = vadd.f32 %v780_v54, %v779_v59  ;;  %v623_v8 = vmul.f32 %v1333_v51, %v1333_v51  ;;  %v786_v21 = vsel %vm319_vm1, %v622_v60, 0.0 }
  0x7f   : > { %v443_v3 = vsel %vm319_vm1, %v1525_v35, 0.0 }
  0x80   : > { %v430_v27 = vadd.f32 %v429_v41, %v428_v18  ;;  %v1533_v41 = vld [vmem:[%s1099_s21 + $0x1f8] sm:$0xff]  ;;  %v783_v17 = vadd.f32 %v782_v62, %v781_v5  ;;  %v624_v18 = vmul.f32 %v1341_v13, %v1341_v13  ;;  %v788_v30 = vsel %vm319_vm1, %v623_v8, 0.0 }
  0x81   : > { %v445_v44 = vsel %vm319_vm1, %v1533_v41, 0.0 }
  0x82   : > { %v432_v1 = vadd.f32 %v431_v47, %v430_v27  ;;  %v1541_v47 = vld [vmem:[%s1099_s21 + $0x200] sm:$0xff]  ;;  %v785_v26 = vadd.f32 %v784_v9, %v783_v17  ;;  %v625_v27 = vmul.f32 %v1349_v16, %v1349_v16  ;;  %v790_v2 = vsel %vm319_vm1, %v624_v18, 0.0 }
  0x83   : > { %v447_v51 = vsel %vm319_vm1, %v1541_v47, 0.0 }
  0x84   : > { %v434_v42 = vadd.f32 %v433_v56, %v432_v1  ;;  %v1549_v56 = vld [vmem:[%s1099_s21 + $0x208] sm:$0xff]  ;;  %v787_v36 = vadd.f32 %v786_v21, %v785_v26  ;;  %v626_v1 = vmul.f32 %v1357_v19, %v1357_v19  ;;  %v792_v7 = vsel %vm319_vm1, %v625_v27, 0.0 }
  0x85   : > { %v449_v13 = vsel %vm319_vm1, %v1549_v56, 0.0 }
  0x86   : > { %v436_v48 = vadd.f32 %v435_v63, %v434_v42  ;;  %v1557_v63 = vld [vmem:[%s1099_s21 + $0x210] sm:$0xff]  ;;  %v789_v39 = vadd.f32 %v788_v30, %v787_v36  ;;  %v627_v42 = vmul.f32 %v1365_v22, %v1365_v22  ;;  %v794_v50 = vsel %vm319_vm1, %v626_v1, 0.0 }
  0x87   : > { %v451_v16 = vsel %vm319_vm1, %v1557_v63, 0.0 }
  0x88   : > { %v438_v57 = vadd.f32 %v437_v12, %v436_v48  ;;  %v1565_v12 = vld [vmem:[%s1099_s21 + $0x218] sm:$0xff]  ;;  %v791_v45 = vadd.f32 %v790_v2, %v789_v39  ;;  %v628_v48 = vmul.f32 %v1373_v25, %v1373_v25  ;;  %v796_v59 = vsel %vm319_vm1, %v627_v42, 0.0 }
  0x89   : > { %v453_v19 = vsel %vm319_vm1, %v1565_v12, 0.0 }
  0x8a   : > { %v440_v4 = vadd.f32 %v439_v23, %v438_v57  ;;  %v1573_v23 = vld [vmem:[%s1099_s21 + $0x220] sm:$0xff]  ;;  %v793_v54 = vadd.f32 %v792_v7, %v791_v45  ;;  %v629_v57 = vmul.f32 %v1381_v28, %v1381_v28  ;;  %v798_v5 = vsel %vm319_vm1, %v628_v48, 0.0 }
  0x8b   : > { %v455_v22 = vsel %vm319_vm1, %v1573_v23, 0.0 }
  0x8c   : > { %v442_v14 = vadd.f32 %v441_v32, %v440_v4  ;;  %v1581_v32 = vld [vmem:[%s1099_s21 + $0x228] sm:$0xff]  ;;  %v795_v62 = vadd.f32 %v794_v50, %v793_v54  ;;  %v630_v4 = vmul.f32 %v1389_v31, %v1389_v31  ;;  %v800_v17 = vsel %vm319_vm1, %v629_v57, 0.0 }
  0x8d   : > { %v457_v25 = vsel %vm319_vm1, %v1581_v32, 0.0 }
  0x8e   : > { %v444_v24 = vadd.f32 %v443_v3, %v442_v14  ;;  %v1589_v3 = vld [vmem:[%s1099_s21 + $0x230] sm:$0xff]  ;;  %v797_v9 = vadd.f32 %v796_v59, %v795_v62  ;;  %v631_v14 = vmul.f32 %v1397_v34, %v1397_v34  ;;  %v802_v26 = vsel %vm319_vm1, %v630_v4, 0.0 }
  0x8f   : > { %v459_v28 = vsel %vm319_vm1, %v1589_v3, 0.0 }
  0x90   : > { %v446_v33 = vadd.f32 %v445_v44, %v444_v24  ;;  %v1597_v44 = vld [vmem:[%s1099_s21 + $0x238] sm:$0xff]  ;;  %v799_v21 = vadd.f32 %v798_v5, %v797_v9  ;;  %v632_v24 = vmul.f32 %v1405_v37, %v1405_v37  ;;  %v804_v36 = vsel %vm319_vm1, %v631_v14, 0.0 }
  0x91   : > { %v461_v31 = vsel %vm319_vm1, %v1597_v44, 0.0 }
  0x92   : > { %v448_v38 = vadd.f32 %v447_v51, %v446_v33  ;;  %v1605_v51 = vld [vmem:[%s1099_s21 + $0x240] sm:$0xff]  ;;  %v801_v30 = vadd.f32 %v800_v17, %v799_v21  ;;  %v633_v33 = vmul.f32 %v1413_v40, %v1413_v40  ;;  %v806_v39 = vsel %vm319_vm1, %v632_v24, 0.0 }
  0x93   : > { %v463_v34 = vsel %vm319_vm1, %v1605_v51, 0.0 }
  0x94   : > { %v450_v10 = vadd.f32 %v449_v13, %v448_v38  ;;  %v1613_v13 = vld [vmem:[%s1099_s21 + $0x248] sm:$0xff]  ;;  %v803_v2 = vadd.f32 %v802_v26, %v801_v30  ;;  %v634_v38 = vmul.f32 %v1421_v43, %v1421_v43  ;;  %v808_v45 = vsel %vm319_vm1, %v633_v33, 0.0 }
  0x95   : > { %v465_v37 = vsel %vm319_vm1, %v1613_v13, 0.0 }
  0x96   : > { %v452_v53 = vadd.f32 %v451_v16, %v450_v10  ;;  %v1621_v16 = vld [vmem:[%s1099_s21 + $0x250] sm:$0xff]  ;;  %v805_v7 = vadd.f32 %v804_v36, %v803_v2  ;;  %v635_v10 = vmul.f32 %v1429_v46, %v1429_v46  ;;  %v810_v54 = vsel %vm319_vm1, %v634_v38, 0.0 }
  0x97   : > { %v467_v40 = vsel %vm319_vm1, %v1621_v16, 0.0 }
  0x98   : > { %v454_v60 = vadd.f32 %v453_v19, %v452_v53  ;;  %v1629_v19 = vld [vmem:[%s1099_s21 + $0x258] sm:$0xff]  ;;  %v807_v50 = vadd.f32 %v806_v39, %v805_v7  ;;  %v636_v53 = vmul.f32 %v1437_v49, %v1437_v49  ;;  %v812_v62 = vsel %vm319_vm1, %v635_v10, 0.0 }
  0x99   : > { %v469_v43 = vsel %vm319_vm1, %v1629_v19, 0.0 }
  0x9a   : > { %v456_v8 = vadd.f32 %v455_v22, %v454_v60  ;;  %v1637_v22 = vld [vmem:[%s1099_s21 + $0x260] sm:$0xff]  ;;  %v809_v59 = vadd.f32 %v808_v45, %v807_v50  ;;  %v637_v60 = vmul.f32 %v1445_v52, %v1445_v52  ;;  %v814_v9 = vsel %vm319_vm1, %v636_v53, 0.0 }
  0x9b   : > { %v471_v46 = vsel %vm319_vm1, %v1637_v22, 0.0 }
  0x9c   : > { %v458_v18 = vadd.f32 %v457_v25, %v456_v8  ;;  %v1645_v25 = vld [vmem:[%s1099_s21 + $0x268] sm:$0xff]  ;;  %v811_v5 = vadd.f32 %v810_v54, %v809_v59  ;;  %v638_v8 = vmul.f32 %v1453_v55, %v1453_v55  ;;  %v816_v21 = vsel %vm319_vm1, %v637_v60, 0.0 }
  0x9d   : > { %v473_v49 = vsel %vm319_vm1, %v1645_v25, 0.0 }
  0x9e   : > { %v460_v27 = vadd.f32 %v459_v28, %v458_v18  ;;  %v1653_v28 = vld [vmem:[%s1099_s21 + $0x270] sm:$0xff]  ;;  %v813_v17 = vadd.f32 %v812_v62, %v811_v5  ;;  %v639_v18 = vmul.f32 %v1461_v58, %v1461_v58  ;;  %v818_v30 = vsel %vm319_vm1, %v638_v8, 0.0 }
  0x9f   : > { %v475_v52 = vsel %vm319_vm1, %v1653_v28, 0.0 }
  0xa0   : > { %v462_v1 = vadd.f32 %v461_v31, %v460_v27  ;;  %v1661_v31 = vld [vmem:[%s1099_s21 + $0x278] sm:$0xff]  ;;  %v815_v26 = vadd.f32 %v814_v9, %v813_v17  ;;  %v640_v27 = vmul.f32 %v1469_v61, %v1469_v61  ;;  %v820_v2 = vsel %vm319_vm1, %v639_v18, 0.0 }
  0xa1   : > { %v477_v55 = vsel %vm319_vm1, %v1661_v31, 0.0 }
  0xa2   : > { %v464_v42 = vadd.f32 %v463_v34, %v462_v1  ;;  %v1669_v34 = vld [vmem:[%s1099_s21 + $0x280] sm:$0xff]  ;;  %v817_v36 = vadd.f32 %v816_v21, %v815_v26  ;;  %v641_v1 = vmul.f32 %v1477_v0, %v1477_v0  ;;  %v822_v7 = vsel %vm319_vm1, %v640_v27, 0.0 }
  0xa3   : > { %v479_v58 = vsel %vm319_vm1, %v1669_v34, 0.0 }
  0xa4   : > { %v466_v48 = vadd.f32 %v465_v37, %v464_v42  ;;  %v1677_v37 = vld [vmem:[%s1099_s21 + $0x288] sm:$0xff]  ;;  %v819_v39 = vadd.f32 %v818_v30, %v817_v36  ;;  %v642_v42 = vmul.f32 %v1485_v6, %v1485_v6  ;;  %v824_v50 = vsel %vm319_vm1, %v641_v1, 0.0 }
  0xa5   : > { %v481_v61 = vsel %vm319_vm1, %v1677_v37, 0.0 }
  0xa6   : > { %v468_v57 = vadd.f32 %v467_v40, %v466_v48  ;;  %v1685_v40 = vld [vmem:[%s1099_s21 + $0x290] sm:$0xff]  ;;  %v821_v45 = vadd.f32 %v820_v2, %v819_v39  ;;  %v643_v48 = vmul.f32 %v1493_v11, %v1493_v11  ;;  %v826_v59 = vsel %vm319_vm1, %v642_v42, 0.0 }
  0xa7   : > { %v483_v0 = vsel %vm319_vm1, %v1685_v40, 0.0 }
  0xa8   : > { %v470_v4 = vadd.f32 %v469_v43, %v468_v57  ;;  %v1693_v43 = vld [vmem:[%s1099_s21 + $0x298] sm:$0xff]  ;;  %v823_v54 = vadd.f32 %v822_v7, %v821_v45  ;;  %v644_v57 = vmul.f32 %v1501_v15, %v1501_v15  ;;  %v828_v5 = vsel %vm319_vm1, %v643_v48, 0.0 }
  0xa9   : > { %v485_v6 = vsel %vm319_vm1, %v1693_v43, 0.0 }
  0xaa   : > { %v472_v14 = vadd.f32 %v471_v46, %v470_v4  ;;  %v1701_v46 = vld [vmem:[%s1099_s21 + $0x2a0] sm:$0xff]  ;;  %v825_v62 = vadd.f32 %v824_v50, %v823_v54  ;;  %v645_v4 = vmul.f32 %v1509_v20, %v1509_v20  ;;  %v830_v17 = vsel %vm319_vm1, %v644_v57, 0.0 }
  0xab   : > { %v487_v11 = vsel %vm319_vm1, %v1701_v46, 0.0 }
  0xac   : > { %v474_v24 = vadd.f32 %v473_v49, %v472_v14  ;;  %v1709_v49 = vld [vmem:[%s1099_s21 + $0x2a8] sm:$0xff]  ;;  %v827_v9 = vadd.f32 %v826_v59, %v825_v62  ;;  %v646_v14 = vmul.f32 %v1517_v29, %v1517_v29  ;;  %v832_v26 = vsel %vm319_vm1, %v645_v4, 0.0 }
  0xad   : > { %v489_v15 = vsel %vm319_vm1, %v1709_v49, 0.0 }
  0xae   : > { %v476_v33 = vadd.f32 %v475_v52, %v474_v24  ;;  %v1717_v52 = vld [vmem:[%s1099_s21 + $0x2b0] sm:$0xff]  ;;  %v829_v21 = vadd.f32 %v828_v5, %v827_v9  ;;  %v647_v24 = vmul.f32 %v1525_v35, %v1525_v35  ;;  %v834_v36 = vsel %vm319_vm1, %v646_v14, 0.0 }
  0xaf   : > { %v491_v20 = vsel %vm319_vm1, %v1717_v52, 0.0 }
  0xb0   : > { %v478_v38 = vadd.f32 %v477_v55, %v476_v33  ;;  %v1725_v55 = vld [vmem:[%s1099_s21 + $0x2b8] sm:$0xff]  ;;  %v831_v30 = vadd.f32 %v830_v17, %v829_v21  ;;  %v648_v33 = vmul.f32 %v1533_v41, %v1533_v41  ;;  %v836_v39 = vsel %vm319_vm1, %v647_v24, 0.0 }
  0xb1   : > { %v493_v29 = vsel %vm319_vm1, %v1725_v55, 0.0 }
  0xb2   : > { %v480_v10 = vadd.f32 %v479_v58, %v478_v38  ;;  %v1733_v58 = vld [vmem:[%s1099_s21 + $0x2c0] sm:$0xff]  ;;  %v833_v2 = vadd.f32 %v832_v26, %v831_v30  ;;  %v649_v38 = vmul.f32 %v1541_v47, %v1541_v47  ;;  %v838_v45 = vsel %vm319_vm1, %v648_v33, 0.0 }
  0xb3   : > { %v495_v35 = vsel %vm319_vm1, %v1733_v58, 0.0 }
  0xb4   : > { %v482_v53 = vadd.f32 %v481_v61, %v480_v10  ;;  %v1741_v61 = vld [vmem:[%s1099_s21 + $0x2c8] sm:$0xff]  ;;  %v835_v7 = vadd.f32 %v834_v36, %v833_v2  ;;  %v650_v10 = vmul.f32 %v1549_v56, %v1549_v56  ;;  %v840_v54 = vsel %vm319_vm1, %v649_v38, 0.0 }
  0xb5   : > { %v497_v41 = vsel %vm319_vm1, %v1741_v61, 0.0 }
  0xb6   : > { %v484_v60 = vadd.f32 %v483_v0, %v482_v53  ;;  %v1749_v0 = vld [vmem:[%s1099_s21 + $0x2d0] sm:$0xff]  ;;  %v837_v50 = vadd.f32 %v836_v39, %v835_v7  ;;  %v651_v53 = vmul.f32 %v1557_v63, %v1557_v63  ;;  %v842_v62 = vsel %vm319_vm1, %v650_v10, 0.0 }
  0xb7   : > { %v499_v47 = vsel %vm319_vm1, %v1749_v0, 0.0 }
  0xb8   : > { %v486_v8 = vadd.f32 %v485_v6, %v484_v60  ;;  %v1757_v6 = vld [vmem:[%s1099_s21 + $0x2d8] sm:$0xff]  ;;  %v839_v59 = vadd.f32 %v838_v45, %v837_v50  ;;  %v652_v60 = vmul.f32 %v1565_v12, %v1565_v12  ;;  %v844_v9 = vsel %vm319_vm1, %v651_v53, 0.0 }
  0xb9   : > { %v501_v56 = vsel %vm319_vm1, %v1757_v6, 0.0 }
  0xba   : > { %v488_v18 = vadd.f32 %v487_v11, %v486_v8  ;;  %v1765_v11 = vld [vmem:[%s1099_s21 + $0x2e0] sm:$0xff]  ;;  %v841_v5 = vadd.f32 %v840_v54, %v839_v59  ;;  %v653_v8 = vmul.f32 %v1573_v23, %v1573_v23  ;;  %v846_v21 = vsel %vm319_vm1, %v652_v60, 0.0 }
  0xbb   : > { %v503_v63 = vsel %vm319_vm1, %v1765_v11, 0.0 }
  0xbc   : > { %v490_v27 = vadd.f32 %v489_v15, %v488_v18  ;;  %v1773_v15 = vld [vmem:[%s1099_s21 + $0x2e8] sm:$0xff]  ;;  %v843_v17 = vadd.f32 %v842_v62, %v841_v5  ;;  %v654_v18 = vmul.f32 %v1581_v32, %v1581_v32  ;;  %v848_v30 = vsel %vm319_vm1, %v653_v8, 0.0 }
  0xbd   : > { %v505_v12 = vsel %vm319_vm1, %v1773_v15, 0.0 }
  0xbe   : > { %v492_v1 = vadd.f32 %v491_v20, %v490_v27  ;;  %v1781_v20 = vld [vmem:[%s1099_s21 + $0x2f0] sm:$0xff]  ;;  %v845_v26 = vadd.f32 %v844_v9, %v843_v17  ;;  %v655_v27 = vmul.f32 %v1589_v3, %v1589_v3  ;;  %v850_v2 = vsel %vm319_vm1, %v654_v18, 0.0 }
  0xbf   : > { %v507_v23 = vsel %vm319_vm1, %v1781_v20, 0.0 }
  0xc0   : > { %v494_v42 = vadd.f32 %v493_v29, %v492_v1  ;;  %v1789_v29 = vld [vmem:[%s1099_s21 + $0x2f8] sm:$0xff]  ;;  %v847_v36 = vadd.f32 %v846_v21, %v845_v26  ;;  %v656_v1 = vmul.f32 %v1597_v44, %v1597_v44  ;;  %v852_v7 = vsel %vm319_vm1, %v655_v27, 0.0 }
  0xc1   : > { %v509_v32 = vsel %vm319_vm1, %v1789_v29, 0.0 }
  0xc2   : > { %v496_v48 = vadd.f32 %v495_v35, %v494_v42  ;;  %v1797_v35 = vld [vmem:[%s1099_s21 + $0x300] sm:$0xff]  ;;  %v849_v39 = vadd.f32 %v848_v30, %v847_v36  ;;  %v657_v42 = vmul.f32 %v1605_v51, %v1605_v51  ;;  %v854_v50 = vsel %vm319_vm1, %v656_v1, 0.0 }
  0xc3   : > { %v511_v3 = vsel %vm319_vm1, %v1797_v35, 0.0 }
  0xc4   : > { %v498_v57 = vadd.f32 %v497_v41, %v496_v48  ;;  %v1805_v41 = vld [vmem:[%s1099_s21 + $0x308] sm:$0xff]  ;;  %v851_v45 = vadd.f32 %v850_v2, %v849_v39  ;;  %v658_v48 = vmul.f32 %v1613_v13, %v1613_v13  ;;  %v856_v59 = vsel %vm319_vm1, %v657_v42, 0.0 }
  0xc5   : > { %v513_v44 = vsel %vm319_vm1, %v1805_v41, 0.0 }
  0xc6   : > { %v500_v4 = vadd.f32 %v499_v47, %v498_v57  ;;  %v1813_v47 = vld [vmem:[%s1099_s21 + $0x310] sm:$0xff]  ;;  %v853_v54 = vadd.f32 %v852_v7, %v851_v45  ;;  %v659_v57 = vmul.f32 %v1621_v16, %v1621_v16  ;;  %v858_v5 = vsel %vm319_vm1, %v658_v48, 0.0 }
  0xc7   : > { %v515_v51 = vsel %vm319_vm1, %v1813_v47, 0.0 }
  0xc8   : > { %v502_v14 = vadd.f32 %v501_v56, %v500_v4  ;;  %v1821_v56 = vld [vmem:[%s1099_s21 + $0x318] sm:$0xff]  ;;  %v855_v62 = vadd.f32 %v854_v50, %v853_v54  ;;  %v660_v4 = vmul.f32 %v1629_v19, %v1629_v19  ;;  %v860_v17 = vsel %vm319_vm1, %v659_v57, 0.0 }
  0xc9   : > { %v517_v13 = vsel %vm319_vm1, %v1821_v56, 0.0 }
  0xca   : > { %v504_v24 = vadd.f32 %v503_v63, %v502_v14  ;;  %v1829_v63 = vld [vmem:[%s1099_s21 + $0x320] sm:$0xff]  ;;  %v857_v9 = vadd.f32 %v856_v59, %v855_v62  ;;  %v661_v14 = vmul.f32 %v1637_v22, %v1637_v22  ;;  %v862_v26 = vsel %vm319_vm1, %v660_v4, 0.0 }
  0xcb   : > { %v519_v16 = vsel %vm319_vm1, %v1829_v63, 0.0 }
  0xcc   : > { %v506_v33 = vadd.f32 %v505_v12, %v504_v24  ;;  %v1837_v12 = vld [vmem:[%s1099_s21 + $0x328] sm:$0xff]  ;;  %v859_v21 = vadd.f32 %v858_v5, %v857_v9  ;;  %v662_v24 = vmul.f32 %v1645_v25, %v1645_v25  ;;  %v864_v36 = vsel %vm319_vm1, %v661_v14, 0.0 }
  0xcd   : > { %v521_v19 = vsel %vm319_vm1, %v1837_v12, 0.0 }
  0xce   : > { %v508_v38 = vadd.f32 %v507_v23, %v506_v33  ;;  %v1845_v23 = vld [vmem:[%s1099_s21 + $0x330] sm:$0xff]  ;;  %v861_v30 = vadd.f32 %v860_v17, %v859_v21  ;;  %v663_v33 = vmul.f32 %v1653_v28, %v1653_v28  ;;  %v866_v39 = vsel %vm319_vm1, %v662_v24, 0.0 }
  0xcf   : > { %v523_v22 = vsel %vm319_vm1, %v1845_v23, 0.0 }
  0xd0   : > { %v510_v10 = vadd.f32 %v509_v32, %v508_v38  ;;  %v1853_v32 = vld [vmem:[%s1099_s21 + $0x338] sm:$0xff]  ;;  %v863_v2 = vadd.f32 %v862_v26, %v861_v30  ;;  %v664_v38 = vmul.f32 %v1661_v31, %v1661_v31  ;;  %v868_v45 = vsel %vm319_vm1, %v663_v33, 0.0 }
  0xd1   : > { %v525_v25 = vsel %vm319_vm1, %v1853_v32, 0.0 }
  0xd2   : > { %v512_v53 = vadd.f32 %v511_v3, %v510_v10  ;;  %v1861_v3 = vld [vmem:[%s1099_s21 + $0x340] sm:$0xff]  ;;  %v865_v7 = vadd.f32 %v864_v36, %v863_v2  ;;  %v665_v10 = vmul.f32 %v1669_v34, %v1669_v34  ;;  %v870_v54 = vsel %vm319_vm1, %v664_v38, 0.0 }
  0xd3   : > { %v527_v28 = vsel %vm319_vm1, %v1861_v3, 0.0 }
  0xd4   : > { %v514_v60 = vadd.f32 %v513_v44, %v512_v53  ;;  %v1869_v44 = vld [vmem:[%s1099_s21 + $0x348] sm:$0xff]  ;;  %v867_v50 = vadd.f32 %v866_v39, %v865_v7  ;;  %v666_v53 = vmul.f32 %v1677_v37, %v1677_v37  ;;  %v872_v62 = vsel %vm319_vm1, %v665_v10, 0.0 }
  0xd5   : > { %v529_v31 = vsel %vm319_vm1, %v1869_v44, 0.0 }
  0xd6   : > { %v516_v8 = vadd.f32 %v515_v51, %v514_v60  ;;  %v1877_v51 = vld [vmem:[%s1099_s21 + $0x350] sm:$0xff]  ;;  %v869_v59 = vadd.f32 %v868_v45, %v867_v50  ;;  %v667_v60 = vmul.f32 %v1685_v40, %v1685_v40  ;;  %v874_v9 = vsel %vm319_vm1, %v666_v53, 0.0 }
  0xd7   : > { %v531_v34 = vsel %vm319_vm1, %v1877_v51, 0.0 }
  0xd8   : > { %v518_v18 = vadd.f32 %v517_v13, %v516_v8  ;;  %v1885_v13 = vld [vmem:[%s1099_s21 + $0x358] sm:$0xff]  ;;  %v871_v5 = vadd.f32 %v870_v54, %v869_v59  ;;  %v668_v8 = vmul.f32 %v1693_v43, %v1693_v43  ;;  %v876_v21 = vsel %vm319_vm1, %v667_v60, 0.0 }
  0xd9   : > { %v533_v37 = vsel %vm319_vm1, %v1885_v13, 0.0 }
  0xda   : > { %v520_v27 = vadd.f32 %v519_v16, %v518_v18  ;;  %v1893_v16 = vld [vmem:[%s1099_s21 + $0x360] sm:$0xff]  ;;  %v873_v17 = vadd.f32 %v872_v62, %v871_v5  ;;  %v669_v18 = vmul.f32 %v1701_v46, %v1701_v46  ;;  %v878_v30 = vsel %vm319_vm1, %v668_v8, 0.0 }
  0xdb   : > { %v535_v40 = vsel %vm319_vm1, %v1893_v16, 0.0 }
  0xdc   : > { %v522_v1 = vadd.f32 %v521_v19, %v520_v27  ;;  %v1901_v19 = vld [vmem:[%s1099_s21 + $0x368] sm:$0xff]  ;;  %v875_v26 = vadd.f32 %v874_v9, %v873_v17  ;;  %v670_v27 = vmul.f32 %v1709_v49, %v1709_v49  ;;  %v880_v2 = vsel %vm319_vm1, %v669_v18, 0.0 }
  0xdd   : > { %v537_v43 = vsel %vm319_vm1, %v1901_v19, 0.0 }
  0xde   : > { %v524_v42 = vadd.f32 %v523_v22, %v522_v1  ;;  %v1909_v22 = vld [vmem:[%s1099_s21 + $0x370] sm:$0xff]  ;;  %v877_v36 = vadd.f32 %v876_v21, %v875_v26  ;;  %v671_v1 = vmul.f32 %v1717_v52, %v1717_v52  ;;  %v882_v7 = vsel %vm319_vm1, %v670_v27, 0.0 }
  0xdf   : > { %v539_v46 = vsel %vm319_vm1, %v1909_v22, 0.0 }
  0xe0   : > { %v526_v48 = vadd.f32 %v525_v25, %v524_v42  ;;  %v1917_v25 = vld [vmem:[%s1099_s21 + $0x378] sm:$0xff]  ;;  %v879_v39 = vadd.f32 %v878_v30, %v877_v36  ;;  %v672_v42 = vmul.f32 %v1725_v55, %v1725_v55  ;;  %v884_v50 = vsel %vm319_vm1, %v671_v1, 0.0 }
  0xe1   : > { %v541_v49 = vsel %vm319_vm1, %v1917_v25, 0.0 }
  0xe2   : > { %v528_v57 = vadd.f32 %v527_v28, %v526_v48  ;;  %v1925_v28 = vld [vmem:[%s1099_s21 + $0x380] sm:$0xff]  ;;  %v881_v45 = vadd.f32 %v880_v2, %v879_v39  ;;  %v673_v48 = vmul.f32 %v1733_v58, %v1733_v58  ;;  %v886_v59 = vsel %vm319_vm1, %v672_v42, 0.0 }
  0xe3   : > { %v543_v52 = vsel %vm319_vm1, %v1925_v28, 0.0 }
  0xe4   : > { %v530_v4 = vadd.f32 %v529_v31, %v528_v57  ;;  %v1933_v31 = vld [vmem:[%s1099_s21 + $0x388] sm:$0xff]  ;;  %v883_v54 = vadd.f32 %v882_v7, %v881_v45  ;;  %v674_v57 = vmul.f32 %v1741_v61, %v1741_v61  ;;  %v888_v5 = vsel %vm319_vm1, %v673_v48, 0.0 }
  0xe5   : > { %v545_v55 = vsel %vm319_vm1, %v1933_v31, 0.0 }
  0xe6   : > { %v532_v14 = vadd.f32 %v531_v34, %v530_v4  ;;  %v1941_v34 = vld [vmem:[%s1099_s21 + $0x390] sm:$0xff]  ;;  %v885_v62 = vadd.f32 %v884_v50, %v883_v54  ;;  %v675_v4 = vmul.f32 %v1749_v0, %v1749_v0  ;;  %v890_v17 = vsel %vm319_vm1, %v674_v57, 0.0 }
  0xe7   : > { %v547_v58 = vsel %vm319_vm1, %v1941_v34, 0.0 }
  0xe8   : > { %v534_v24 = vadd.f32 %v533_v37, %v532_v14  ;;  %v1949_v37 = vld [vmem:[%s1099_s21 + $0x398] sm:$0xff]  ;;  %v887_v9 = vadd.f32 %v886_v59, %v885_v62  ;;  %v676_v14 = vmul.f32 %v1757_v6, %v1757_v6  ;;  %v892_v26 = vsel %vm319_vm1, %v675_v4, 0.0 }
  0xe9   : > { %v549_v61 = vsel %vm319_vm1, %v1949_v37, 0.0 }
  0xea   : > { %v536_v33 = vadd.f32 %v535_v40, %v534_v24  ;;  %v1957_v40 = vld [vmem:[%s1099_s21 + $0x3a0] sm:$0xff]  ;;  %v889_v21 = vadd.f32 %v888_v5, %v887_v9  ;;  %v677_v24 = vmul.f32 %v1765_v11, %v1765_v11  ;;  %v894_v36 = vsel %vm319_vm1, %v676_v14, 0.0 }
  0xeb   : > { %v551_v0 = vsel %vm319_vm1, %v1957_v40, 0.0 }
  0xec   : > { %v538_v38 = vadd.f32 %v537_v43, %v536_v33  ;;  %v1965_v43 = vld [vmem:[%s1099_s21 + $0x3a8] sm:$0xff]  ;;  %v891_v30 = vadd.f32 %v890_v17, %v889_v21  ;;  %v678_v33 = vmul.f32 %v1773_v15, %v1773_v15  ;;  %v896_v39 = vsel %vm319_vm1, %v677_v24, 0.0 }
  0xed   : > { %v553_v6 = vsel %vm319_vm1, %v1965_v43, 0.0 }
  0xee   : > { %v540_v10 = vadd.f32 %v539_v46, %v538_v38  ;;  %v1973_v46 = vld [vmem:[%s1099_s21 + $0x3b0] sm:$0xff]  ;;  %v893_v2 = vadd.f32 %v892_v26, %v891_v30  ;;  %v679_v38 = vmul.f32 %v1781_v20, %v1781_v20  ;;  %v898_v45 = vsel %vm319_vm1, %v678_v33, 0.0 }
  0xef   : > { %v555_v11 = vsel %vm319_vm1, %v1973_v46, 0.0 }
  0xf0   : > { %v542_v53 = vadd.f32 %v541_v49, %v540_v10  ;;  %v1981_v49 = vld [vmem:[%s1099_s21 + $0x3b8] sm:$0xff]  ;;  %v895_v7 = vadd.f32 %v894_v36, %v893_v2  ;;  %v680_v10 = vmul.f32 %v1789_v29, %v1789_v29  ;;  %v900_v54 = vsel %vm319_vm1, %v679_v38, 0.0 }
  0xf1   : > { %v557_v15 = vsel %vm319_vm1, %v1981_v49, 0.0 }
  0xf2   : > { %v544_v60 = vadd.f32 %v543_v52, %v542_v53  ;;  %v1989_v52 = vld [vmem:[%s1099_s21 + $0x3c0] sm:$0xff]  ;;  %v897_v50 = vadd.f32 %v896_v39, %v895_v7  ;;  %v681_v53 = vmul.f32 %v1797_v35, %v1797_v35  ;;  %v902_v62 = vsel %vm319_vm1, %v680_v10, 0.0 }
  0xf3   : > { %v559_v20 = vsel %vm319_vm1, %v1989_v52, 0.0 }
  0xf4   : > { %v546_v8 = vadd.f32 %v545_v55, %v544_v60  ;;  %v1997_v55 = vld [vmem:[%s1099_s21 + $0x3c8] sm:$0xff]  ;;  %v899_v59 = vadd.f32 %v898_v45, %v897_v50  ;;  %v682_v60 = vmul.f32 %v1805_v41, %v1805_v41  ;;  %v904_v9 = vsel %vm319_vm1, %v681_v53, 0.0 }
  0xf5   : > { %v561_v29 = vsel %vm319_vm1, %v1997_v55, 0.0 }
  0xf6   : > { %v548_v18 = vadd.f32 %v547_v58, %v546_v8  ;;  %v2005_v58 = vld [vmem:[%s1099_s21 + $0x3d0] sm:$0xff]  ;;  %v901_v5 = vadd.f32 %v900_v54, %v899_v59  ;;  %v683_v8 = vmul.f32 %v1813_v47, %v1813_v47  ;;  %v906_v21 = vsel %vm319_vm1, %v682_v60, 0.0 }
  0xf7   : > { %v563_v35 = vsel %vm319_vm1, %v2005_v58, 0.0  ;;  %v689_v54 = vmul.f32 %v1861_v3, %v1861_v3  ;;  %v692_v3 = vmul.f32 %v1885_v13, %v1885_v13  ;;  %v695_v13 = vmul.f32 %v1909_v22, %v1909_v22 }
  0xf8   : > { %v550_v27 = vadd.f32 %v549_v61, %v548_v18  ;;  %v2013_v61 = vld [vmem:[%s1099_s21 + $0x3d8] sm:$0xff]  ;;  %v903_v17 = vadd.f32 %v902_v62, %v901_v5  ;;  %v684_v18 = vmul.f32 %v1821_v56, %v1821_v56  ;;  %v908_v30 = vsel %vm319_vm1, %v683_v8, 0.0 }
  0xf9   : > { %v565_v41 = vsel %vm319_vm1, %v2013_v61, 0.0  ;;  %v920_v5 = vsel %vm319_vm1, %v689_v54, 0.0  ;;  %v703_v54 = vmul.f32 %v1973_v46, %v1973_v46 }
  0xfa   : > { %v552_v1 = vadd.f32 %v551_v0, %v550_v27  ;;  %v2021_v0 = vld [vmem:[%s1099_s21 + $0x3e0] sm:$0xff]  ;;  %v905_v26 = vadd.f32 %v904_v9, %v903_v17  ;;  %v685_v27 = vmul.f32 %v1829_v63, %v1829_v63  ;;  %v910_v2 = vsel %vm319_vm1, %v684_v18, 0.0 }
  0xfb   : > { %v567_v47 = vsel %vm319_vm1, %v2021_v0, 0.0 }
  0xfc   : > { %v554_v42 = vadd.f32 %v553_v6, %v552_v1  ;;  %v2029_v6 = vld [vmem:[%s1099_s21 + $0x3e8] sm:$0xff]  ;;  %v907_v36 = vadd.f32 %v906_v21, %v905_v26  ;;  %v686_v1 = vmul.f32 %v1837_v12, %v1837_v12  ;;  %v912_v7 = vsel %vm319_vm1, %v685_v27, 0.0  ;;  %v318_v27 = vld [vmem:[#allocation2] sm:$0x1] }
  0xfd   : > { %v569_v56 = vsel %vm319_vm1, %v2029_v6, 0.0 }
  0xfe   : > { %v556_v48 = vadd.f32 %v555_v11, %v554_v42  ;;  %v2037_v11 = vld [vmem:[%s1099_s21 + $0x3f0] sm:$0xff]  ;;  %v909_v39 = vadd.f32 %v908_v30, %v907_v36  ;;  %v687_v42 = vmul.f32 %v1845_v23, %v1845_v23  ;;  %v914_v50 = vsel %vm319_vm1, %v686_v1, 0.0 }
  0xff   : > { %v571_v63 = vsel %vm319_vm1, %v2037_v11, 0.0 }
 0x100   : > { %v558_v57 = vadd.f32 %v557_v15, %v556_v48  ;;  %v2045_v15 = vld [vmem:[%s1099_s21 + $0x3f8] sm:$0xff]  ;;  %v911_v45 = vadd.f32 %v910_v2, %v909_v39  ;;  %v688_v48 = vmul.f32 %v1853_v32, %v1853_v32  ;;  %v916_v23 = vsel %vm319_vm1, %v687_v42, 0.0 }
 0x101   : > { %v573_v12 = vsel %vm319_vm1, %v2045_v15, 0.0  ;;  %v691_v32 = vmul.f32 %v1877_v51, %v1877_v51  ;;  %v694_v51 = vmul.f32 %v1901_v19, %v1901_v19  ;;  %v697_v2 = vmul.f32 %v1925_v28, %v1925_v28 }
 0x102   : > { %v560_v4 = vadd.f32 %v559_v20, %v558_v57  ;;  %v913_v53 = vadd.f32 %v912_v7, %v911_v45  ;;  %v918_v60 = vsel %vm319_vm1, %v688_v48, 0.0  ;;  %v698_v39 = vmul.f32 %v1933_v31, %v1933_v31 }
 0x103   : > { %v936_v7 = vsel %vm319_vm1, %v697_v2, 0.0  ;;  %v700_v28 = vmul.f32 %v1949_v37, %v1949_v37  ;;  %v701_v48 = vmul.f32 %v1957_v40, %v1957_v40 }
 0x104   : > { %v562_v14 = vadd.f32 %v561_v29, %v560_v4  ;;  %v915_v59 = vadd.f32 %v914_v50, %v913_v53  ;;  %v690_v29 = vmul.f32 %v1869_v44, %v1869_v44  ;;  %v693_v44 = vmul.f32 %v1893_v16, %v1893_v16 }
 0x105   : > { %v696_v16 = vmul.f32 %v1917_v25, %v1917_v25  ;;  %v699_v25 = vmul.f32 %v1941_v34, %v1941_v34  ;;  %v938_v45 = vsel %vm319_vm1, %v698_v39, 0.0  ;;  %v942_v34 = vsel %vm319_vm1, %v700_v28, 0.0 }
 0x106   : > { %v564_v24 = vadd.f32 %v563_v35, %v562_v14  ;;  %v917_v4 = vadd.f32 %v916_v23, %v915_v59  ;;  %v922_v9 = vsel %vm319_vm1, %v690_v29, 0.0  ;;  %v928_v30 = vsel %vm319_vm1, %v693_v44, 0.0 }
 0x107   : > { %v940_v31 = vsel %vm319_vm1, %v699_v25, 0.0  ;;  %v944_v37 = vsel %vm319_vm1, %v701_v48, 0.0  ;;  %v705_v29 = vmul.f32 %v1989_v52, %v1989_v52  ;;  %v711_v44 = vmul.f32 %v2037_v11, %v2037_v11 }
 0x108   : > { %v566_v33 = vadd.f32 %v565_v41, %v564_v24  ;;  %v919_v8 = vadd.f32 %v918_v60, %v917_v4  ;;  %v924_v41 = vsel %vm319_vm1, %v691_v32, 0.0  ;;  %v926_v24 = vsel %vm319_vm1, %v692_v3, 0.0 }
 0x109   : > { %v707_v32 = vmul.f32 %v2005_v58, %v2005_v58  ;;  %v709_v3 = vmul.f32 %v2021_v0, %v2021_v0 }
 0x10a   : > { %v568_v38 = vadd.f32 %v567_v47, %v566_v33  ;;  %v921_v17 = vadd.f32 %v920_v5, %v919_v8 }
 0x10c   : > { %v570_v10 = vadd.f32 %v569_v56, %v568_v38  ;;  %v923_v21 = vadd.f32 %v922_v9, %v921_v17  ;;  %v930_v56 = vsel %vm319_vm1, %v694_v51, 0.0  ;;  %v932_v38 = vsel %vm319_vm1, %v695_v13, 0.0 }
 0x10d   : > { %v964_v51 = vsel %vm319_vm1, %v711_v44, 0.0 }
 0x10e   : > { %v572_v20 = vadd.f32 %v571_v63, %v570_v10  ;;  %v925_v47 = vadd.f32 %v924_v41, %v923_v21  ;;  %v934_v63 = vsel %vm319_vm1, %v696_v16, 0.0 }
 0x110   : > { %v574_v57 = vadd.f32 %v573_v12, %v572_v20  ;;  %v927_v36 = vadd.f32 %v926_v24, %v925_v47  ;;  %v702_v20 = vmul.f32 %v1965_v43, %v1965_v43  ;;  %v948_v43 = vsel %vm319_vm1, %v703_v54, 0.0 }
 0x112   : > { %v575_v62 = vrot.slane %v574_v57, 4  ;;  %v929_v19 = vadd.f32 %v928_v30, %v927_v36  ;;  %v946_v40 = vsel %vm319_vm1, %v702_v20, 0.0  ;;  %v584_v36 = vld [vmem:[#allocation3] sm:$0x1] }
 0x114   : > { %v576_v35 = vadd.f32 %v575_v62, %v574_v57  ;;  %v931_v22 = vadd.f32 %v930_v56, %v929_v19  ;;  %v704_v57 = vmul.f32 %v1981_v49, %v1981_v49  ;;  %v706_v62 = vmul.f32 %v1997_v55, %v1997_v55 }
 0x115   : > { %v952_v49 = vsel %vm319_vm1, %v705_v29, 0.0  ;;  %v956_v55 = vsel %vm319_vm1, %v707_v32, 0.0 }
 0x116   : > { %v577_v14 = vrot.slane %v576_v35, 2  ;;  %v933_v42 = vadd.f32 %v932_v38, %v931_v22  ;;  %v950_v46 = vsel %vm319_vm1, %v704_v57, 0.0  ;;  %v954_v52 = vsel %vm319_vm1, %v706_v62, 0.0 }
 0x118   : > { %v578_v18 = vadd.f32 %v577_v14, %v576_v35  ;;  %v935_v10 = vadd.f32 %v934_v63, %v933_v42  ;;  %v708_v35 = vmul.f32 %v2013_v61, %v2013_v61  ;;  %v710_v14 = vmul.f32 %v2029_v6, %v2029_v6 }
 0x119   : > { %v960_v61 = vsel %vm319_vm1, %v709_v3, 0.0 }
 0x11a   : > { %v579_v26 = vrot.slane %v578_v18, 1  ;;  %v937_v12 = vadd.f32 %v936_v7, %v935_v10  ;;  %v958_v58 = vsel %vm319_vm1, %v708_v35, 0.0  ;;  %v962_v0 = vsel %vm319_vm1, %v710_v14, 0.0 }
 0x11c   : > { %v580_v33 = vadd.f32 %v579_v26, %v578_v18  ;;  %v939_v50 = vadd.f32 %v938_v45, %v937_v12  ;;  %v712_v18 = vmul.f32 %v2045_v15, %v2045_v15 }
 0x11e   : > { %v581_v1 = vadd.f32 %v580_v33, %v318_v27  ;;  %v941_v53 = vadd.f32 %v940_v31, %v939_v50  ;;  %v966_v6 = vsel %vm319_vm1, %v712_v18, 0.0 }
 0x120   : > { %583 = vst.msk [vmem:[#allocation2] sm:$0x1] %vm582_vm2, %v581_v1  ;;  %v943_v23 = vadd.f32 %v942_v34, %v941_v53 }
 0x122   : > { %v945_v59 = vadd.f32 %v944_v37, %v943_v23 }
 0x124   : > { %v947_v60 = vadd.f32 %v946_v40, %v945_v59 }
 0x126   : > { %v949_v4 = vadd.f32 %v948_v43, %v947_v60 }
 0x128   : > { %v951_v5 = vadd.f32 %v950_v46, %v949_v4 }
 0x12a   : > { %v953_v8 = vadd.f32 %v952_v49, %v951_v5 }
 0x12c   : > { %v955_v9 = vadd.f32 %v954_v52, %v953_v8 }
 0x12e   : > { %v957_v17 = vadd.f32 %v956_v55, %v955_v9 }
 0x130   : > { %v959_v41 = vadd.f32 %v958_v58, %v957_v17 }
 0x132   : > { %v961_v21 = vadd.f32 %v960_v61, %v959_v41 }
 0x134   : > { %v963_v24 = vadd.f32 %v962_v0, %v961_v21 }
 0x136   : > { %v965_v26 = vadd.f32 %v964_v51, %v963_v24 }
 0x138   : > { %v967_v47 = vadd.f32 %v966_v6, %v965_v26 }
 0x13a   : > { %v968_v27 = vrot.slane %v967_v47, 4 }
 0x13c   : > { %v969_v13 = vadd.f32 %v968_v27, %v967_v47 }
 0x13e   : > { %v970_v30 = vrot.slane %v969_v13, 2 }
 0x140   : > { %v971_v11 = vadd.f32 %v970_v30, %v969_v13 }
 0x142   : > { %v972_v33 = vrot.slane %v971_v11, 1 }
 0x144   : > { %v973_v16 = vadd.f32 %v972_v33, %v971_v11  ;;  %979 = sbr.rel (%p1037_p5) target bundleno = 365 (0x16d), region = 40 }
 0x146   : > { %v974_v56 = vadd.f32 %v973_v16, %v584_v36 }
 0x148   : > { %975 = vst.msk [vmem:[#allocation3] sm:$0x1] %vm582_vm2, %v974_v56 }
 0x149   : > { %v980_v15 = vld [vmem:[#allocation2] sm:$0x1] }
 0x14a   : > { %v981_v19 = vmul.f32 0.00048828125, %v980_v15  ;;  %v987_v42 = vld [vmem:[%s2147_s1] sm:$0x1] }
 0x14b   : > { %v992_v10 = vld [vmem:[%s2148_s2] sm:$0x1] }
 0x14c   : > { %v984_v38 = vmul.f32 %v981_v19, %v981_v19 }
 0x14f   : > { %v982_v1 = vld [vmem:[#allocation3] sm:$0x1] }
 0x150   : > { %v983_v2 = vmul.f32 0.00048828125, %v982_v1 }
 0x152   : > { %v985_v22 = vsub.f32 %v983_v2, %v984_v38 }
 0x154   : > { %v986_v39 = vmax.f32 %v985_v22, 0.0 }
 0x156   : > { %v988_v63 = vadd.f32 1e-05, %v986_v39 }
 0x158   : > { %1049 = vrsqrt.f32 %v988_v63 }
 0x165   : > { %v1050_v25 = vpop.eup %1049 }
 0x166   : > { %v990_v7 = vmul.f32 %v1050_v25, %v987_v42 }
 0x168   : > { %991 = vst.msk [vmem:[%s2149_s3] sm:$0x1] %vm582_vm2, %v990_v7  ;;  %v993_v28 = vmul.f32 %v990_v7, %v981_v19 }
 0x16a   : > { %v994_v45 = vsub.f32 %v992_v10, %v993_v28 }
 0x16c   : > { %995 = vst.msk [vmem:[%s2150_s4] sm:$0x1] %vm582_vm2, %v994_v45 }
 0x16d PF: > { %s15_s15 = sadd.s32 1, %s1057_s15  }
 0x16e   : > { %p12_p6 = scmp.ge.s32.totalorder %s15_s15, 4  }
 0x170   :  { %14 = sbr.rel (!%p12_p6) target bundleno = 1 (0x1), region = 74 }

// kernel: cnn_decoder_forward.22
= control target key start
LH: loop header
LB: loop body
LE: loop exit
PB: predicated region body
PF: predicated region fallthrough
CT: control target
= control target key end

     0   :  { %s2039_s15 = smov 0   ;;  %s2794_s0 = inlined_call_operand.vmem [shape: f32[2048,8], index: 0, kind: input, shape index: {}]   ;;  %s2795_s1 = inlined_call_operand.vmem [shape: bf16[8,16], index: 1, kind: input, shape index: {}]   ;;  %s2796_s2 = inlined_call_operand.vmem [shape: f32[1,8], index: 2, kind: input, shape index: {}]   ;;  %s2797_s3 = inlined_call_operand.vmem [shape: f32[1,8], index: 3, kind: input, shape index: {}]   ;;  %s2798_s4 = inlined_call_operand.vmem [shape: f32[2048,16], index: 4, kind: output, shape index: {}]  }
   0x1 LB: > { %s1720_s16 = sadd.s32 4294967295, %s2012_s15   ;;  %p1724_p0 = scmp.ge.s32.totalorder %s2012_s15, 1  ;;  %s2012_s15 = sphi %s2039_s15, %s14_s15  }
   0x2   : > { %p163_p1 = scmp.lt.s32.totalorder %s2012_s15, 3 }
   0x4   : > { %p164_p2 = pnand %p1724_p0, %p163_p1 }
   0x5   : > { %s1725_s19 = sshll.u32 (!%p164_p2), %s1720_s16, 7 }
   0x6   : > { %167 = sbr.rel (%p164_p2) target bundleno = 346 (0x15a), region = 36  ;;  %p190_p3 = scmp.lt.s32.totalorder (!%p164_p2), %s1725_s19, 255 }
   0xb   : > { %v792_v0 = vld [vmem:[%s2795_s1] sm:$0xf]  ;;  %vm986_vm0 = vcmask 1043456   ;;  %s2800_s19 = smov (!%p190_p3, %s1725_s19), 255  ;;  %vm793_vm1 = vcmask 64512   ;;  %vm1535_vm2 = vcmask 130048  }
   0xc   : > { %1994 = vmatprep.subr.msk.bf16.mxu0 %vm986_vm0, %v792_v0  ;;  %1995 = vmatprep.subr.msk.bf16.mxu1 %vm986_vm0, %v792_v0  ;;  %v988_v1 = vsel %vm986_vm0, %v792_v0, 0  ;;  %s1726_s20 = sshll.u32 %s2800_s19, 3  ;;  %v2056_v2 = vld [vmem:[%s2796_s2] ss:$0 sm:$0xff] }
   0xd   : > { %1863 = vmatpush3.bf16.msra.mxu0 %v988_v1  ;;  %1993 = vmatpush3.bf16.msra.mxu1 %v988_v1  ;;  %s2063_s25 = scalar_lea.vmem %s2794_s0, %s1726_s20  ;;  %v2068_v3 = vld [vmem:[%s2797_s3] ss:$0 sm:$0xff]  ;;  %s2533_s8 = scalar_lea.vmem %s2798_s4, %s1726_s20 }
   0xe   : > { %v202_v4 = vld [vmem:[%s2063_s25] sm:$0xff]  ;;  %v203_v5 = vld [vmem:[%s2063_s25 + $0x8] sm:$0xff]  ;;  %v204_v11 = vld [vmem:[%s2063_s25 + $0x10] sm:$0xff] }
   0xf   : > { %v266_v6 = vld [vmem:[%s2063_s25 + $0x200] sm:$0xff]  ;;  %v338_v7 = vmul.f32 %v2056_v2, %v202_v4  ;;  %v339_v8 = vmul.f32 %v2056_v2, %v203_v5  ;;  %v267_v9 = vld [vmem:[%s2063_s25 + $0x208] sm:$0xff]  ;;  %v205_v12 = vld [vmem:[%s2063_s25 + $0x18] sm:$0xff]  ;;  %v340_v14 = vmul.f32 %v2056_v2, %v204_v11 }
  0x10   : > { %v402_v10 = vmul.f32 %v2056_v2, %v266_v6  ;;  %v403_v13 = vmul.f32 %v2056_v2, %v267_v9  ;;  %v341_v15 = vmul.f32 %v2056_v2, %v205_v12  ;;  %v268_v16 = vld [vmem:[%s2063_s25 + $0x210] sm:$0xff]  ;;  %v269_v17 = vld [vmem:[%s2063_s25 + $0x218] sm:$0xff]  ;;  %v206_v26 = vld [vmem:[%s2063_s25 + $0x20] sm:$0xff] }
  0x11   : > { %v472_v18 = vadd.f32 %v2068_v3, %v338_v7  ;;  %v473_v19 = vadd.f32 %v2068_v3, %v339_v8  ;;  %v404_v21 = vmul.f32 %v2056_v2, %v268_v16  ;;  %v474_v23 = vadd.f32 %v2068_v3, %v340_v14  ;;  %v207_v27 = vld [vmem:[%s2063_s25 + $0x28] sm:$0xff]  ;;  %v270_v32 = vld [vmem:[%s2063_s25 + $0x220] sm:$0xff]  ;;  %v208_v38 = vld [vmem:[%s2063_s25 + $0x30] sm:$0xff] }
  0x12   : > { %v536_v20 = vadd.f32 %v2068_v3, %v402_v10  ;;  %v537_v22 = vadd.f32 %v2068_v3, %v403_v13  ;;  %v475_v24 = vadd.f32 %v2068_v3, %v341_v15  ;;  %v405_v25 = vmul.f32 %v2056_v2, %v269_v17  ;;  %v271_v37 = vld [vmem:[%s2063_s25 + $0x228] sm:$0xff]  ;;  %v209_v43 = vld [vmem:[%s2063_s25 + $0x38] sm:$0xff]  ;;  %v272_v52 = vld [vmem:[%s2063_s25 + $0x230] sm:$0xff] }
  0x13   : > { %v600_v28 = vmax.f32 %v472_v18, 0.0  ;;  %v601_v29 = vmax.f32 %v473_v19, 0.0  ;;  %v538_v31 = vadd.f32 %v2068_v3, %v404_v21  ;;  %v602_v34 = vmax.f32 %v474_v23, 0.0  ;;  %v273_v53 = vld [vmem:[%s2063_s25 + $0x238] sm:$0xff]  ;;  %v210_v57 = vld [vmem:[%s2063_s25 + $0x40] sm:$0xff]  ;;  %v211_v62 = vld [vmem:[%s2063_s25 + $0x48] sm:$0xff] }
  0x14   : > { %v664_v30 = vmax.f32 %v536_v20, 0.0  ;;  %v665_v33 = vmax.f32 %v537_v22, 0.0  ;;  %v603_v35 = vmax.f32 %v475_v24, 0.0  ;;  %v539_v36 = vadd.f32 %v2068_v3, %v405_v25  ;;  %v274_v5 = vld [vmem:[%s2063_s25 + $0x240] sm:$0xff]  ;;  %v275_v6 = vld [vmem:[%s2063_s25 + $0x248] sm:$0xff]  ;;  %v212_v15 = vld [vmem:[%s2063_s25 + $0x50] sm:$0xff] }
  0x15   : > { %v728_v39 = vpack.c.bf16 %v601_v29, %v600_v28  ;;  %v666_v40 = vmax.f32 %v538_v31, 0.0  ;;  %v342_v41 = vmul.f32 %v2056_v2, %v206_v26  ;;  %v343_v42 = vmul.f32 %v2056_v2, %v207_v27  ;;  %v213_v20 = vld [vmem:[%s2063_s25 + $0x58] sm:$0xff]  ;;  %v276_v21 = vld [vmem:[%s2063_s25 + $0x250] sm:$0xff]  ;;  %v214_v31 = vld [vmem:[%s2063_s25 + $0x60] sm:$0xff] }
  0x16   : > { %v760_v44 = vpack.c.bf16 %v665_v33, %v664_v30  ;;  %v729_v45 = vpack.c.bf16 %v603_v35, %v602_v34  ;;  %v667_v46 = vmax.f32 %v539_v36, 0.0  ;;  %v406_v47 = vmul.f32 %v2056_v2, %v270_v32  ;;  %v277_v26 = vld [vmem:[%s2063_s25 + $0x258] sm:$0xff]  ;;  %v215_v36 = vld [vmem:[%s2063_s25 + $0x68] sm:$0xff] }
  0x17   : > { %1864 = vmatprep.mubr.msk.bf16.mxu0 %vm793_vm1, %v728_v39  ;;  %v476_v48 = vadd.f32 %v2068_v3, %v342_v41  ;;  %v477_v49 = vadd.f32 %v2068_v3, %v343_v42  ;;  %v407_v50 = vmul.f32 %v2056_v2, %v271_v37  ;;  %v344_v51 = vmul.f32 %v2056_v2, %v208_v38  ;;  %v278_v41 = vld [vmem:[%s2063_s25 + $0x260] sm:$0xff] }
  0x18   : > { %1928 = vmatprep.mubr.msk.bf16.mxu1 %vm793_vm1, %v760_v44  ;;  %1865 = vmatmul.mubr.msk.bf16.vlgmr.msra.gmra.mxu0 %vm793_vm1, %v729_v45  ;;  %v761_v54 = vpack.c.bf16 %v667_v46, %v666_v40  ;;  %v540_v55 = vadd.f32 %v2068_v3, %v406_v47  ;;  %v345_v56 = vmul.f32 %v2056_v2, %v209_v43  ;;  %v279_v46 = vld [vmem:[%s2063_s25 + $0x268] sm:$0xff]  ;;  %v216_v47 = vld [vmem:[%s2063_s25 + $0x70] sm:$0xff] }
  0x19   : > { %v604_v58 = vmax.f32 %v476_v48, 0.0  ;;  %v605_v59 = vmax.f32 %v477_v49, 0.0  ;;  %v541_v60 = vadd.f32 %v2068_v3, %v407_v50  ;;  %v478_v61 = vadd.f32 %v2068_v3, %v344_v51 }
  0x1a   : > { %1929 = vmatmul.mubr.msk.bf16.vlgmr.msra.gmra.mxu1 %vm793_vm1, %v761_v54  ;;  %v668_v63 = vmax.f32 %v540_v55, 0.0  ;;  %v479_v0 = vadd.f32 %v2068_v3, %v345_v56  ;;  %v408_v1 = vmul.f32 %v2056_v2, %v272_v52  ;;  %v409_v4 = vmul.f32 %v2056_v2, %v273_v53  ;;  %v217_v52 = vld [vmem:[%s2063_s25 + $0x78] sm:$0xff] }
  0x1b   : > { %v730_v7 = vpack.c.bf16 %v605_v59, %v604_v58  ;;  %v669_v8 = vmax.f32 %v541_v60, 0.0  ;;  %v606_v9 = vmax.f32 %v478_v61, 0.0  ;;  %v346_v10 = vmul.f32 %v2056_v2, %v210_v57  ;;  %v280_v61 = vld [vmem:[%s2063_s25 + $0x270] sm:$0xff] }
  0x1c   : > { %v607_v11 = vmax.f32 %v479_v0, 0.0  ;;  %v542_v12 = vadd.f32 %v2068_v3, %v408_v1  ;;  %v543_v13 = vadd.f32 %v2068_v3, %v409_v4  ;;  %v347_v14 = vmul.f32 %v2056_v2, %v211_v62  ;;  %v281_v62 = vld [vmem:[%s2063_s25 + $0x278] sm:$0xff] }
  0x1d   : > { %1868 = vmatprep.mubr.msk.bf16.mxu0 %vm793_vm1, %v730_v7  ;;  %v762_v16 = vpack.c.bf16 %v669_v8, %v668_v63  ;;  %v480_v17 = vadd.f32 %v2068_v3, %v346_v10  ;;  %v410_v18 = vmul.f32 %v2056_v2, %v274_v5  ;;  %v411_v19 = vmul.f32 %v2056_v2, %v275_v6  ;;  %v218_v5 = vld [vmem:[%s2063_s25 + $0x80] sm:$0xff]  ;;  %v219_v10 = vld [vmem:[%s2063_s25 + $0x88] sm:$0xff] }
  0x1e   : > { %v731_v22 = vpack.c.bf16 %v607_v11, %v606_v9  ;;  %v670_v23 = vmax.f32 %v542_v12, 0.0  ;;  %v671_v24 = vmax.f32 %v543_v13, 0.0  ;;  %v481_v25 = vadd.f32 %v2068_v3, %v347_v14 }
  0x1f   : > { %1932 = vmatprep.mubr.msk.bf16.mxu1 %vm793_vm1, %v762_v16  ;;  %v608_v27 = vmax.f32 %v480_v17, 0.0  ;;  %v544_v28 = vadd.f32 %v2068_v3, %v410_v18  ;;  %v545_v29 = vadd.f32 %v2068_v3, %v411_v19  ;;  %v348_v30 = vmul.f32 %v2056_v2, %v212_v15  ;;  %v282_v15 = vld [vmem:[%s2063_s25 + $0x280] sm:$0xff]  ;;  %v283_v16 = vld [vmem:[%s2063_s25 + $0x288] sm:$0xff] }
  0x20   : > { %1869 = vmatmul.mubr.msk.bf16.gmra.mxu0 %vm793_vm1, %v731_v22  ;;  %v763_v32 = vpack.c.bf16 %v671_v24, %v670_v23  ;;  %v609_v33 = vmax.f32 %v481_v25, 0.0  ;;  %v349_v34 = vmul.f32 %v2056_v2, %v213_v20  ;;  %v412_v35 = vmul.f32 %v2056_v2, %v276_v21  ;;  %v220_v25 = vld [vmem:[%s2063_s25 + $0x90] sm:$0xff] }
  0x21   : > { %v672_v37 = vmax.f32 %v544_v28, 0.0  ;;  %v673_v38 = vmax.f32 %v545_v29, 0.0  ;;  %v482_v39 = vadd.f32 %v2068_v3, %v348_v30  ;;  %v413_v40 = vmul.f32 %v2056_v2, %v277_v26  ;;  %v221_v30 = vld [vmem:[%s2063_s25 + $0x98] sm:$0xff] }
  0x22   : > { %1933 = vmatmul.mubr.msk.bf16.gmra.mxu1 %vm793_vm1, %v763_v32  ;;  %v732_v42 = vpack.c.bf16 %v609_v33, %v608_v27  ;;  %v483_v43 = vadd.f32 %v2068_v3, %v349_v34  ;;  %v546_v44 = vadd.f32 %v2068_v3, %v412_v35  ;;  %v350_v45 = vmul.f32 %v2056_v2, %v214_v31  ;;  %v284_v31 = vld [vmem:[%s2063_s25 + $0x290] sm:$0xff] }
  0x23   : > { %v764_v48 = vpack.c.bf16 %v673_v38, %v672_v37  ;;  %v610_v49 = vmax.f32 %v482_v39, 0.0  ;;  %v547_v50 = vadd.f32 %v2068_v3, %v413_v40  ;;  %v351_v51 = vmul.f32 %v2056_v2, %v215_v36  ;;  %v285_v36 = vld [vmem:[%s2063_s25 + $0x298] sm:$0xff] }
  0x24   : > { %1872 = vmatprep.mubr.msk.bf16.mxu0 %vm793_vm1, %v732_v42  ;;  %v611_v53 = vmax.f32 %v483_v43, 0.0  ;;  %v674_v54 = vmax.f32 %v546_v44, 0.0  ;;  %v484_v55 = vadd.f32 %v2068_v3, %v350_v45  ;;  %v414_v56 = vmul.f32 %v2056_v2, %v278_v41  ;;  %v222_v41 = vld [vmem:[%s2063_s25 + $0xa0] sm:$0xff] }
  0x25   : > { %1936 = vmatprep.mubr.msk.bf16.mxu1 %vm793_vm1, %v764_v48  ;;  %v675_v57 = vmax.f32 %v547_v50, 0.0  ;;  %v485_v58 = vadd.f32 %v2068_v3, %v351_v51  ;;  %v415_v59 = vmul.f32 %v2056_v2, %v279_v46  ;;  %v352_v60 = vmul.f32 %v2056_v2, %v216_v47  ;;  %v223_v46 = vld [vmem:[%s2063_s25 + $0xa8] sm:$0xff]  ;;  %v286_v51 = vld [vmem:[%s2063_s25 + $0x2a0] sm:$0xff] }
  0x26   : > { %v733_v63 = vpack.c.bf16 %v611_v53, %v610_v49  ;;  %v612_v0 = vmax.f32 %v484_v55, 0.0  ;;  %v548_v1 = vadd.f32 %v2068_v3, %v414_v56  ;;  %v353_v4 = vmul.f32 %v2056_v2, %v217_v52  ;;  %v287_v56 = vld [vmem:[%s2063_s25 + $0x2a8] sm:$0xff] }
  0x27   : > { %v765_v6 = vpack.c.bf16 %v675_v57, %v674_v54  ;;  %v613_v7 = vmax.f32 %v485_v58, 0.0  ;;  %v549_v8 = vadd.f32 %v2068_v3, %v415_v59  ;;  %v486_v9 = vadd.f32 %v2068_v3, %v352_v60  ;;  %v224_v57 = vld [vmem:[%s2063_s25 + $0xb0] sm:$0xff] }
  0x28   : > { %1873 = vmatmul.mubr.msk.bf16.gmra.mxu0 %vm793_vm1, %v733_v63  ;;  %v676_v11 = vmax.f32 %v548_v1, 0.0  ;;  %v487_v12 = vadd.f32 %v2068_v3, %v353_v4  ;;  %v416_v13 = vmul.f32 %v2056_v2, %v280_v61  ;;  %v417_v14 = vmul.f32 %v2056_v2, %v281_v62  ;;  %v225_v62 = vld [vmem:[%s2063_s25 + $0xb8] sm:$0xff] }
  0x29   : > { %v734_v17 = vpack.c.bf16 %v613_v7, %v612_v0  ;;  %v677_v18 = vmax.f32 %v549_v8, 0.0  ;;  %v614_v19 = vmax.f32 %v486_v9, 0.0  ;;  %v354_v20 = vmul.f32 %v2056_v2, %v218_v5  ;;  %v288_v9 = vld [vmem:[%s2063_s25 + $0x2b0] sm:$0xff] }
  0x2a   : > { %1937 = vmatmul.mubr.msk.bf16.gmra.mxu1 %vm793_vm1, %v765_v6  ;;  %v615_v21 = vmax.f32 %v487_v12, 0.0  ;;  %v550_v22 = vadd.f32 %v2068_v3, %v416_v13  ;;  %v551_v23 = vadd.f32 %v2068_v3, %v417_v14  ;;  %v355_v24 = vmul.f32 %v2056_v2, %v219_v10  ;;  %v289_v10 = vld [vmem:[%s2063_s25 + $0x2b8] sm:$0xff] }
  0x2b   : > { %1876 = vmatprep.mubr.msk.bf16.mxu0 %vm793_vm1, %v734_v17  ;;  %v766_v26 = vpack.c.bf16 %v677_v18, %v676_v11  ;;  %v488_v27 = vadd.f32 %v2068_v3, %v354_v20  ;;  %v418_v28 = vmul.f32 %v2056_v2, %v282_v15  ;;  %v419_v29 = vmul.f32 %v2056_v2, %v283_v16  ;;  %v226_v15 = vld [vmem:[%s2063_s25 + $0xc0] sm:$0xff]  ;;  %v227_v20 = vld [vmem:[%s2063_s25 + $0xc8] sm:$0xff] }
  0x2c   : > { %v735_v32 = vpack.c.bf16 %v615_v21, %v614_v19  ;;  %v678_v33 = vmax.f32 %v550_v22, 0.0  ;;  %v679_v34 = vmax.f32 %v551_v23, 0.0  ;;  %v489_v35 = vadd.f32 %v2068_v3, %v355_v24 }
  0x2d   : > { %1940 = vmatprep.mubr.msk.bf16.mxu1 %vm793_vm1, %v766_v26  ;;  %v616_v37 = vmax.f32 %v488_v27, 0.0  ;;  %v552_v38 = vadd.f32 %v2068_v3, %v418_v28  ;;  %v553_v39 = vadd.f32 %v2068_v3, %v419_v29  ;;  %v356_v40 = vmul.f32 %v2056_v2, %v220_v25  ;;  %v290_v25 = vld [vmem:[%s2063_s25 + $0x2c0] sm:$0xff]  ;;  %v291_v26 = vld [vmem:[%s2063_s25 + $0x2c8] sm:$0xff] }
  0x2e   : > { %v767_v42 = vpack.c.bf16 %v679_v34, %v678_v33  ;;  %v617_v43 = vmax.f32 %v489_v35, 0.0  ;;  %v357_v44 = vmul.f32 %v2056_v2, %v221_v30  ;;  %v420_v45 = vmul.f32 %v2056_v2, %v284_v31  ;;  %v228_v35 = vld [vmem:[%s2063_s25 + $0xd0] sm:$0xff] }
  0x2f   : > { %v680_v47 = vmax.f32 %v552_v38, 0.0  ;;  %v681_v48 = vmax.f32 %v553_v39, 0.0  ;;  %v490_v49 = vadd.f32 %v2068_v3, %v356_v40  ;;  %v421_v50 = vmul.f32 %v2056_v2, %v285_v36  ;;  %v229_v40 = vld [vmem:[%s2063_s25 + $0xd8] sm:$0xff] }
  0x30   : > { %1877 = vmatmul.mubr.msk.bf16.gmra.mxu0 %vm793_vm1, %v735_v32  ;;  %v736_v52 = vpack.c.bf16 %v617_v43, %v616_v37  ;;  %v491_v53 = vadd.f32 %v2068_v3, %v357_v44  ;;  %v554_v54 = vadd.f32 %v2068_v3, %v420_v45  ;;  %v358_v55 = vmul.f32 %v2056_v2, %v222_v41  ;;  %v292_v41 = vld [vmem:[%s2063_s25 + $0x2d0] sm:$0xff] }
  0x31   : > { %v768_v58 = vpack.c.bf16 %v681_v48, %v680_v47  ;;  %v618_v59 = vmax.f32 %v490_v49, 0.0  ;;  %v555_v60 = vadd.f32 %v2068_v3, %v421_v50  ;;  %v359_v61 = vmul.f32 %v2056_v2, %v223_v46  ;;  %v293_v46 = vld [vmem:[%s2063_s25 + $0x2d8] sm:$0xff] }
  0x32   : > { %1941 = vmatmul.mubr.msk.bf16.gmra.mxu1 %vm793_vm1, %v767_v42  ;;  %1880 = vmatprep.mubr.msk.bf16.mxu0 %vm793_vm1, %v736_v52  ;;  %v619_v63 = vmax.f32 %v491_v53, 0.0  ;;  %v682_v0 = vmax.f32 %v554_v54, 0.0  ;;  %v492_v1 = vadd.f32 %v2068_v3, %v358_v55  ;;  %v422_v4 = vmul.f32 %v2056_v2, %v286_v51  ;;  %v230_v51 = vld [vmem:[%s2063_s25 + $0xe0] sm:$0xff] }
  0x33   : > { %1944 = vmatprep.mubr.msk.bf16.mxu1 %vm793_vm1, %v768_v58  ;;  %v683_v5 = vmax.f32 %v555_v60, 0.0  ;;  %v493_v6 = vadd.f32 %v2068_v3, %v359_v61  ;;  %v423_v7 = vmul.f32 %v2056_v2, %v287_v56  ;;  %v360_v8 = vmul.f32 %v2056_v2, %v224_v57  ;;  %v231_v56 = vld [vmem:[%s2063_s25 + $0xe8] sm:$0xff]  ;;  %v294_v61 = vld [vmem:[%s2063_s25 + $0x2e0] sm:$0xff] }
  0x34   : > { %v737_v11 = vpack.c.bf16 %v619_v63, %v618_v59  ;;  %v620_v12 = vmax.f32 %v492_v1, 0.0  ;;  %v556_v13 = vadd.f32 %v2068_v3, %v422_v4  ;;  %v361_v14 = vmul.f32 %v2056_v2, %v225_v62  ;;  %v295_v4 = vld [vmem:[%s2063_s25 + $0x2e8] sm:$0xff] }
  0x35   : > { %v769_v16 = vpack.c.bf16 %v683_v5, %v682_v0  ;;  %v621_v17 = vmax.f32 %v493_v6, 0.0  ;;  %v557_v18 = vadd.f32 %v2068_v3, %v423_v7  ;;  %v494_v19 = vadd.f32 %v2068_v3, %v360_v8  ;;  %v232_v5 = vld [vmem:[%s2063_s25 + $0xf0] sm:$0xff] }
  0x36   : > { %v684_v21 = vmax.f32 %v556_v13, 0.0  ;;  %v495_v22 = vadd.f32 %v2068_v3, %v361_v14  ;;  %v424_v23 = vmul.f32 %v2056_v2, %v288_v9  ;;  %v425_v24 = vmul.f32 %v2056_v2, %v289_v10  ;;  %v233_v10 = vld [vmem:[%s2063_s25 + $0xf8] sm:$0xff] }
  0x37   : > { %v738_v27 = vpack.c.bf16 %v621_v17, %v620_v12  ;;  %v685_v28 = vmax.f32 %v557_v18, 0.0  ;;  %v622_v29 = vmax.f32 %v494_v19, 0.0  ;;  %v362_v30 = vmul.f32 %v2056_v2, %v226_v15  ;;  %v296_v19 = vld [vmem:[%s2063_s25 + $0x2f0] sm:$0xff] }
  0x38   : > { %1881 = vmatmul.mubr.msk.bf16.gmra.mxu0 %vm793_vm1, %v737_v11  ;;  %v623_v31 = vmax.f32 %v495_v22, 0.0  ;;  %v558_v32 = vadd.f32 %v2068_v3, %v424_v23  ;;  %v559_v33 = vadd.f32 %v2068_v3, %v425_v24  ;;  %v363_v34 = vmul.f32 %v2056_v2, %v227_v20  ;;  %v297_v20 = vld [vmem:[%s2063_s25 + $0x2f8] sm:$0xff]  ;;  %v234_v24 = vld [vmem:[%s2063_s25 + $0x100] sm:$0xff] }
  0x39   : > { %1884 = vmatprep.mubr.msk.bf16.mxu0 %vm793_vm1, %v738_v27  ;;  %v770_v36 = vpack.c.bf16 %v685_v28, %v684_v21  ;;  %v496_v37 = vadd.f32 %v2068_v3, %v362_v30  ;;  %v426_v38 = vmul.f32 %v2056_v2, %v290_v25  ;;  %v427_v39 = vmul.f32 %v2056_v2, %v291_v26 }
  0x3a   : > { %1945 = vmatmul.mubr.msk.bf16.gmra.mxu1 %vm793_vm1, %v769_v16  ;;  %v739_v42 = vpack.c.bf16 %v623_v31, %v622_v29  ;;  %v686_v43 = vmax.f32 %v558_v32, 0.0  ;;  %v687_v44 = vmax.f32 %v559_v33, 0.0  ;;  %v497_v45 = vadd.f32 %v2068_v3, %v363_v34  ;;  %v235_v29 = vld [vmem:[%s2063_s25 + $0x108] sm:$0xff]  ;;  %v298_v34 = vld [vmem:[%s2063_s25 + $0x300] sm:$0xff] }
  0x3b   : > { %1948 = vmatprep.mubr.msk.bf16.mxu1 %vm793_vm1, %v770_v36  ;;  %v624_v47 = vmax.f32 %v496_v37, 0.0  ;;  %v560_v48 = vadd.f32 %v2068_v3, %v426_v38  ;;  %v561_v49 = vadd.f32 %v2068_v3, %v427_v39  ;;  %v364_v50 = vmul.f32 %v2056_v2, %v228_v35  ;;  %v299_v35 = vld [vmem:[%s2063_s25 + $0x308] sm:$0xff] }
  0x3c   : > { %v771_v52 = vpack.c.bf16 %v687_v44, %v686_v43  ;;  %v625_v53 = vmax.f32 %v497_v45, 0.0  ;;  %v365_v54 = vmul.f32 %v2056_v2, %v229_v40  ;;  %v428_v55 = vmul.f32 %v2056_v2, %v292_v41  ;;  %v236_v44 = vld [vmem:[%s2063_s25 + $0x110] sm:$0xff] }
  0x3d   : > { %v688_v57 = vmax.f32 %v560_v48, 0.0  ;;  %v689_v58 = vmax.f32 %v561_v49, 0.0  ;;  %v498_v59 = vadd.f32 %v2068_v3, %v364_v50  ;;  %v429_v60 = vmul.f32 %v2056_v2, %v293_v46  ;;  %v237_v49 = vld [vmem:[%s2063_s25 + $0x118] sm:$0xff]  ;;  %v300_v50 = vld [vmem:[%s2063_s25 + $0x310] sm:$0xff] }
  0x3e   : > { %v740_v62 = vpack.c.bf16 %v625_v53, %v624_v47  ;;  %v499_v63 = vadd.f32 %v2068_v3, %v365_v54  ;;  %v562_v0 = vadd.f32 %v2068_v3, %v428_v55  ;;  %v366_v1 = vmul.f32 %v2056_v2, %v230_v51  ;;  %v301_v55 = vld [vmem:[%s2063_s25 + $0x318] sm:$0xff] }
  0x3f   : > { %v772_v6 = vpack.c.bf16 %v689_v58, %v688_v57  ;;  %v626_v7 = vmax.f32 %v498_v59, 0.0  ;;  %v563_v8 = vadd.f32 %v2068_v3, %v429_v60  ;;  %v367_v9 = vmul.f32 %v2056_v2, %v231_v56  ;;  %v238_v60 = vld [vmem:[%s2063_s25 + $0x120] sm:$0xff] }
  0x40   : > { %1885 = vmatmul.mubr.msk.bf16.gmra.mxu0 %vm793_vm1, %v739_v42  ;;  %v627_v11 = vmax.f32 %v499_v63, 0.0  ;;  %v690_v12 = vmax.f32 %v562_v0, 0.0  ;;  %v500_v13 = vadd.f32 %v2068_v3, %v366_v1  ;;  %v430_v14 = vmul.f32 %v2056_v2, %v294_v61  ;;  %v239_v0 = vld [vmem:[%s2063_s25 + $0x128] sm:$0xff] }
  0x41   : > { %1888 = vmatprep.mubr.msk.bf16.mxu0 %vm793_vm1, %v740_v62  ;;  %v691_v15 = vmax.f32 %v563_v8, 0.0  ;;  %v501_v16 = vadd.f32 %v2068_v3, %v367_v9  ;;  %v431_v17 = vmul.f32 %v2056_v2, %v295_v4  ;;  %v368_v18 = vmul.f32 %v2056_v2, %v232_v5 }
  0x42   : > { %1949 = vmatmul.mubr.msk.bf16.gmra.mxu1 %vm793_vm1, %v771_v52  ;;  %v628_v21 = vmax.f32 %v500_v13, 0.0  ;;  %v564_v22 = vadd.f32 %v2068_v3, %v430_v14  ;;  %v369_v23 = vmul.f32 %v2056_v2, %v233_v10  ;;  %v741_v25 = vpack.c.bf16 %v627_v11, %v626_v7  ;;  %v302_v7 = vld [vmem:[%s2063_s25 + $0x320] sm:$0xff]  ;;  %v240_v13 = vld [vmem:[%s2063_s25 + $0x130] sm:$0xff] }
  0x43   : > { %1952 = vmatprep.mubr.msk.bf16.mxu1 %vm793_vm1, %v772_v6  ;;  %v629_v26 = vmax.f32 %v501_v16, 0.0  ;;  %v565_v27 = vadd.f32 %v2068_v3, %v431_v17  ;;  %v502_v28 = vadd.f32 %v2068_v3, %v368_v18  ;;  %v432_v32 = vmul.f32 %v2056_v2, %v296_v19  ;;  %v241_v18 = vld [vmem:[%s2063_s25 + $0x138] sm:$0xff] }
  0x44   : > { %v692_v30 = vmax.f32 %v564_v22, 0.0  ;;  %v503_v31 = vadd.f32 %v2068_v3, %v369_v23  ;;  %v433_v33 = vmul.f32 %v2056_v2, %v297_v20  ;;  %v773_v36 = vpack.c.bf16 %v691_v15, %v690_v12  ;;  %v303_v12 = vld [vmem:[%s2063_s25 + $0x328] sm:$0xff] }
  0x45   : > { %v742_v37 = vpack.c.bf16 %v629_v26, %v628_v21  ;;  %v693_v38 = vmax.f32 %v565_v27, 0.0  ;;  %v370_v39 = vmul.f32 %v2056_v2, %v234_v24  ;;  %v630_v40 = vmax.f32 %v502_v28, 0.0  ;;  %v304_v27 = vld [vmem:[%s2063_s25 + $0x330] sm:$0xff]  ;;  %v305_v28 = vld [vmem:[%s2063_s25 + $0x338] sm:$0xff] }
  0x46   : > { %v566_v41 = vadd.f32 %v2068_v3, %v432_v32  ;;  %v567_v42 = vadd.f32 %v2068_v3, %v433_v33  ;;  %v371_v43 = vmul.f32 %v2056_v2, %v235_v29  ;;  %v434_v47 = vmul.f32 %v2056_v2, %v298_v34  ;;  %v242_v33 = vld [vmem:[%s2063_s25 + $0x140] sm:$0xff] }
  0x47   : > { %v774_v45 = vpack.c.bf16 %v693_v38, %v692_v30  ;;  %v504_v46 = vadd.f32 %v2068_v3, %v370_v39  ;;  %v435_v48 = vmul.f32 %v2056_v2, %v299_v35  ;;  %v631_v51 = vmax.f32 %v503_v31, 0.0 }
  0x48   : > { %1889 = vmatmul.mubr.msk.bf16.gmra.mxu0 %vm793_vm1, %v741_v25  ;;  %v694_v52 = vmax.f32 %v566_v41, 0.0  ;;  %v695_v53 = vmax.f32 %v567_v42, 0.0  ;;  %v505_v54 = vadd.f32 %v2068_v3, %v371_v43  ;;  %v568_v57 = vadd.f32 %v2068_v3, %v434_v47  ;;  %v306_v41 = vld [vmem:[%s2063_s25 + $0x340] sm:$0xff]  ;;  %v307_v42 = vld [vmem:[%s2063_s25 + $0x348] sm:$0xff] }
  0x49   : > { %1892 = vmatprep.mubr.msk.bf16.mxu0 %vm793_vm1, %v742_v37  ;;  %v632_v56 = vmax.f32 %v504_v46, 0.0  ;;  %v569_v58 = vadd.f32 %v2068_v3, %v435_v48  ;;  %v372_v59 = vmul.f32 %v2056_v2, %v236_v44  ;;  %v373_v62 = vmul.f32 %v2056_v2, %v237_v49  ;;  %v243_v37 = vld [vmem:[%s2063_s25 + $0x148] sm:$0xff] }
  0x4a   : > { %1953 = vmatmul.mubr.msk.bf16.gmra.mxu1 %vm793_vm1, %v773_v36  ;;  %v633_v61 = vmax.f32 %v505_v54, 0.0  ;;  %v436_v63 = vmul.f32 %v2056_v2, %v300_v50  ;;  %v696_v1 = vmax.f32 %v568_v57, 0.0  ;;  %v437_v6 = vmul.f32 %v2056_v2, %v301_v55  ;;  %v244_v54 = vld [vmem:[%s2063_s25 + $0x150] sm:$0xff]  ;;  %v245_v55 = vld [vmem:[%s2063_s25 + $0x158] sm:$0xff] }
  0x4b   : > { %1956 = vmatprep.mubr.msk.bf16.mxu1 %vm793_vm1, %v774_v45  ;;  %v697_v4 = vmax.f32 %v569_v58, 0.0  ;;  %v506_v5 = vadd.f32 %v2068_v3, %v372_v59  ;;  %v743_v8 = vpack.c.bf16 %v631_v51, %v630_v40  ;;  %v507_v9 = vadd.f32 %v2068_v3, %v373_v62 }
  0x4c   : > { %v570_v10 = vadd.f32 %v2068_v3, %v436_v63  ;;  %v374_v11 = vmul.f32 %v2056_v2, %v238_v60  ;;  %v775_v14 = vpack.c.bf16 %v695_v53, %v694_v52  ;;  %v744_v15 = vpack.c.bf16 %v633_v61, %v632_v56  ;;  %v308_v60 = vld [vmem:[%s2063_s25 + $0x350] sm:$0xff] }
  0x4d   : > { %v571_v16 = vadd.f32 %v2068_v3, %v437_v6  ;;  %v375_v17 = vmul.f32 %v2056_v2, %v239_v0  ;;  %v776_v19 = vpack.c.bf16 %v697_v4, %v696_v1  ;;  %v634_v20 = vmax.f32 %v506_v5, 0.0  ;;  %v309_v1 = vld [vmem:[%s2063_s25 + $0x358] sm:$0xff]  ;;  %v246_v4 = vld [vmem:[%s2063_s25 + $0x160] sm:$0xff] }
  0x4e   : > { %v508_v21 = vadd.f32 %v2068_v3, %v374_v11  ;;  %v438_v22 = vmul.f32 %v2056_v2, %v302_v7  ;;  %v635_v23 = vmax.f32 %v507_v9, 0.0  ;;  %v439_v25 = vmul.f32 %v2056_v2, %v303_v12  ;;  %v247_v9 = vld [vmem:[%s2063_s25 + $0x168] sm:$0xff]  ;;  %v310_v11 = vld [vmem:[%s2063_s25 + $0x360] sm:$0xff] }
  0x4f   : > { %v509_v24 = vadd.f32 %v2068_v3, %v375_v17  ;;  %v376_v26 = vmul.f32 %v2056_v2, %v240_v13  ;;  %v698_v29 = vmax.f32 %v570_v10, 0.0  ;;  %v699_v30 = vmax.f32 %v571_v16, 0.0  ;;  %v311_v16 = vld [vmem:[%s2063_s25 + $0x368] sm:$0xff] }
  0x50   : > { %1893 = vmatmul.mubr.msk.bf16.gmra.mxu0 %vm793_vm1, %v743_v8  ;;  %v572_v31 = vadd.f32 %v2068_v3, %v438_v22  ;;  %v377_v32 = vmul.f32 %v2056_v2, %v241_v18  ;;  %v636_v34 = vmax.f32 %v508_v21, 0.0  ;;  %v573_v36 = vadd.f32 %v2068_v3, %v439_v25 }
  0x51   : > { %1896 = vmatprep.mubr.msk.bf16.mxu0 %vm793_vm1, %v744_v15  ;;  %v637_v35 = vmax.f32 %v509_v24, 0.0  ;;  %v510_v38 = vadd.f32 %v2068_v3, %v376_v26  ;;  %v440_v39 = vmul.f32 %v2056_v2, %v304_v27  ;;  %v441_v40 = vmul.f32 %v2056_v2, %v305_v28 }
  0x52   : > { %1957 = vmatmul.mubr.msk.bf16.gmra.mxu1 %vm793_vm1, %v775_v14  ;;  %v700_v43 = vmax.f32 %v572_v31, 0.0  ;;  %v701_v44 = vmax.f32 %v573_v36, 0.0  ;;  %v511_v45 = vadd.f32 %v2068_v3, %v377_v32  ;;  %v378_v46 = vmul.f32 %v2056_v2, %v242_v33  ;;  %v250_v33 = vld [vmem:[%s2063_s25 + $0x180] sm:$0xff] }
  0x53   : > { %1960 = vmatprep.mubr.msk.bf16.mxu1 %vm793_vm1, %v776_v19  ;;  %v745_v47 = vpack.c.bf16 %v635_v23, %v634_v20  ;;  %v777_v48 = vpack.c.bf16 %v699_v30, %v698_v29  ;;  %v379_v49 = vmul.f32 %v2056_v2, %v243_v37  ;;  %v746_v50 = vpack.c.bf16 %v637_v35, %v636_v34  ;;  %v248_v29 = vld [vmem:[%s2063_s25 + $0x170] sm:$0xff]  ;;  %v249_v30 = vld [vmem:[%s2063_s25 + $0x178] sm:$0xff] }
  0x54   : > { %v512_v51 = vadd.f32 %v2068_v3, %v378_v46  ;;  %v442_v52 = vmul.f32 %v2056_v2, %v306_v41  ;;  %v443_v53 = vmul.f32 %v2056_v2, %v307_v42  ;;  %v638_v56 = vmax.f32 %v510_v38, 0.0  ;;  %v312_v37 = vld [vmem:[%s2063_s25 + $0x370] sm:$0xff]  ;;  %v313_v38 = vld [vmem:[%s2063_s25 + $0x378] sm:$0xff] }
  0x55   : > { %v574_v57 = vadd.f32 %v2068_v3, %v440_v39  ;;  %v575_v58 = vadd.f32 %v2068_v3, %v441_v40  ;;  %v513_v59 = vadd.f32 %v2068_v3, %v379_v49  ;;  %v778_v61 = vpack.c.bf16 %v701_v44, %v700_v43  ;;  %v251_v39 = vld [vmem:[%s2063_s25 + $0x188] sm:$0xff]  ;;  %v314_v44 = vld [vmem:[%s2063_s25 + $0x380] sm:$0xff] }
  0x56   : > { %v639_v62 = vmax.f32 %v511_v45, 0.0  ;;  %v576_v63 = vadd.f32 %v2068_v3, %v442_v52  ;;  %v577_v0 = vadd.f32 %v2068_v3, %v443_v53  ;;  %v640_v5 = vmax.f32 %v512_v51, 0.0  ;;  %v315_v45 = vld [vmem:[%s2063_s25 + $0x388] sm:$0xff] }
  0x57   : > { %v641_v6 = vmax.f32 %v513_v59, 0.0  ;;  %v380_v7 = vmul.f32 %v2056_v2, %v244_v54  ;;  %v381_v8 = vmul.f32 %v2056_v2, %v245_v55  ;;  %v444_v10 = vmul.f32 %v2056_v2, %v308_v60 }
  0x58   : > { %1897 = vmatmul.mubr.msk.bf16.gmra.mxu0 %vm793_vm1, %v745_v47  ;;  %v702_v12 = vmax.f32 %v574_v57, 0.0  ;;  %v703_v13 = vmax.f32 %v575_v58, 0.0  ;;  %v445_v14 = vmul.f32 %v2056_v2, %v309_v1  ;;  %v382_v15 = vmul.f32 %v2056_v2, %v246_v4  ;;  %v253_v1 = vld [vmem:[%s2063_s25 + $0x198] sm:$0xff] }
  0x59   : > { %1900 = vmatprep.mubr.msk.bf16.mxu0 %vm793_vm1, %v746_v50  ;;  %v747_v17 = vpack.c.bf16 %v639_v62, %v638_v56  ;;  %v704_v18 = vmax.f32 %v576_v63, 0.0  ;;  %v705_v19 = vmax.f32 %v577_v0, 0.0  ;;  %v383_v20 = vmul.f32 %v2056_v2, %v247_v9  ;;  %v252_v0 = vld [vmem:[%s2063_s25 + $0x190] sm:$0xff] }
  0x5a   : > { %1961 = vmatmul.mubr.msk.bf16.gmra.mxu1 %vm793_vm1, %v777_v48  ;;  %v748_v21 = vpack.c.bf16 %v641_v6, %v640_v5  ;;  %v514_v22 = vadd.f32 %v2068_v3, %v380_v7  ;;  %v515_v23 = vadd.f32 %v2068_v3, %v381_v8  ;;  %v446_v24 = vmul.f32 %v2056_v2, %v310_v11  ;;  %v254_v7 = vld [vmem:[%s2063_s25 + $0x1a0] sm:$0xff]  ;;  %v255_v8 = vld [vmem:[%s2063_s25 + $0x1a8] sm:$0xff] }
  0x5b   : > { %1964 = vmatprep.mubr.msk.bf16.mxu1 %vm793_vm1, %v778_v61  ;;  %v578_v25 = vadd.f32 %v2068_v3, %v444_v10  ;;  %v516_v26 = vadd.f32 %v2068_v3, %v382_v15  ;;  %v517_v27 = vadd.f32 %v2068_v3, %v383_v20  ;;  %v447_v28 = vmul.f32 %v2056_v2, %v311_v16 }
  0x5c   : > { %v779_v31 = vpack.c.bf16 %v703_v13, %v702_v12  ;;  %v579_v32 = vadd.f32 %v2068_v3, %v445_v14  ;;  %v780_v34 = vpack.c.bf16 %v705_v19, %v704_v18  ;;  %v580_v35 = vadd.f32 %v2068_v3, %v446_v24  ;;  %v316_v12 = vld [vmem:[%s2063_s25 + $0x390] sm:$0xff]  ;;  %v317_v13 = vld [vmem:[%s2063_s25 + $0x398] sm:$0xff]  ;;  %v318_v18 = vld [vmem:[%s2063_s25 + $0x3a0] sm:$0xff] }
  0x5d   : > { %v581_v36 = vadd.f32 %v2068_v3, %v447_v28  ;;  %v642_v40 = vmax.f32 %v514_v22, 0.0  ;;  %v643_v41 = vmax.f32 %v515_v23, 0.0  ;;  %v384_v42 = vmul.f32 %v2056_v2, %v248_v29  ;;  %v319_v19 = vld [vmem:[%s2063_s25 + $0x3a8] sm:$0xff] }
  0x5e   : > { %v385_v43 = vmul.f32 %v2056_v2, %v249_v30  ;;  %v706_v46 = vmax.f32 %v578_v25, 0.0  ;;  %v644_v47 = vmax.f32 %v516_v26, 0.0  ;;  %v645_v48 = vmax.f32 %v517_v27, 0.0 }
  0x5f   : > { %v386_v49 = vmul.f32 %v2056_v2, %v250_v33  ;;  %v707_v50 = vmax.f32 %v579_v32, 0.0  ;;  %v448_v51 = vmul.f32 %v2056_v2, %v312_v37  ;;  %v449_v52 = vmul.f32 %v2056_v2, %v313_v38 }
  0x60   : > { %1901 = vmatmul.mubr.msk.bf16.gmra.mxu0 %vm793_vm1, %v747_v17  ;;  %v387_v53 = vmul.f32 %v2056_v2, %v251_v39  ;;  %v708_v54 = vmax.f32 %v580_v35, 0.0  ;;  %v709_v55 = vmax.f32 %v581_v36, 0.0  ;;  %v450_v56 = vmul.f32 %v2056_v2, %v314_v44  ;;  %v256_v39 = vld [vmem:[%s2063_s25 + $0x1b0] sm:$0xff] }
  0x61   : > { %1904 = vmatprep.mubr.msk.bf16.mxu0 %vm793_vm1, %v748_v21  ;;  %v451_v57 = vmul.f32 %v2056_v2, %v315_v45  ;;  %v749_v58 = vpack.c.bf16 %v643_v41, %v642_v40  ;;  %v518_v59 = vadd.f32 %v2068_v3, %v384_v42  ;;  %v519_v60 = vadd.f32 %v2068_v3, %v385_v43  ;;  %v257_v40 = vld [vmem:[%s2063_s25 + $0x1b8] sm:$0xff]  ;;  %v258_v42 = vld [vmem:[%s2063_s25 + $0x1c0] sm:$0xff]  ;;  %v259_v43 = vld [vmem:[%s2063_s25 + $0x1c8] sm:$0xff] }
  0x62   : > { %1965 = vmatmul.mubr.msk.bf16.gmra.mxu1 %vm793_vm1, %v779_v31  ;;  %v750_v61 = vpack.c.bf16 %v645_v48, %v644_v47  ;;  %v520_v62 = vadd.f32 %v2068_v3, %v386_v49  ;;  %v521_v63 = vadd.f32 %v2068_v3, %v387_v53  ;;  %v781_v4 = vpack.c.bf16 %v707_v50, %v706_v46  ;;  %v320_v47 = vld [vmem:[%s2063_s25 + $0x3b0] sm:$0xff]  ;;  %v321_v48 = vld [vmem:[%s2063_s25 + $0x3b8] sm:$0xff] }
  0x63   : > { %1968 = vmatprep.mubr.msk.bf16.mxu1 %vm793_vm1, %v780_v34  ;;  %v582_v5 = vadd.f32 %v2068_v3, %v448_v51  ;;  %v583_v6 = vadd.f32 %v2068_v3, %v449_v52  ;;  %v782_v9 = vpack.c.bf16 %v709_v55, %v708_v54  ;;  %v584_v10 = vadd.f32 %v2068_v3, %v450_v56  ;;  %v2436_v34 = vld [vmem:[%s2797_s3] ss:$0 sm:$0xff]  ;;  %v323_v55 = vld [vmem:[%s2063_s25 + $0x3c8] sm:$0xff] }
  0x64   : > { %v585_v11 = vadd.f32 %v2068_v3, %v451_v57  ;;  %v646_v14 = vmax.f32 %v518_v59, 0.0  ;;  %v647_v15 = vmax.f32 %v519_v60, 0.0  ;;  %v388_v16 = vmul.f32 %v2056_v2, %v252_v0  ;;  %v2455_v51 = vld [vmem:[%s2796_s2] ss:$0 sm:$0xff] }
  0x65   : > { %v389_v17 = vmul.f32 %v2056_v2, %v253_v1  ;;  %v648_v20 = vmax.f32 %v520_v62, 0.0  ;;  %v649_v21 = vmax.f32 %v521_v63, 0.0  ;;  %v390_v22 = vmul.f32 %v2056_v2, %v254_v7  ;;  %v322_v54 = vld [vmem:[%s2063_s25 + $0x3c0] sm:$0xff] }
  0x66   : > { %v391_v23 = vmul.f32 %v2056_v2, %v255_v8  ;;  %v710_v24 = vmax.f32 %v582_v5, 0.0  ;;  %v711_v25 = vmax.f32 %v583_v6, 0.0  ;;  %v452_v26 = vmul.f32 %v2056_v2, %v316_v12  ;;  %v260_v12 = vld [vmem:[%s2063_s25 + $0x1d0] sm:$0xff] }
  0x67   : > { %v453_v27 = vmul.f32 %v2056_v2, %v317_v13  ;;  %v712_v28 = vmax.f32 %v584_v10, 0.0  ;;  %v713_v29 = vmax.f32 %v585_v11, 0.0  ;;  %v454_v30 = vmul.f32 %v2056_v2, %v318_v18  ;;  %v261_v13 = vld [vmem:[%s2063_s25 + $0x1d8] sm:$0xff]  ;;  %v263_v18 = vld [vmem:[%s2063_s25 + $0x1e8] sm:$0xff] }
  0x68   : > { %1905 = vmatmul.mubr.msk.bf16.gmra.mxu0 %vm793_vm1, %v749_v58  ;;  %v455_v31 = vmul.f32 %v2056_v2, %v319_v19  ;;  %v751_v32 = vpack.c.bf16 %v647_v15, %v646_v14  ;;  %v522_v33 = vadd.f32 %v2068_v3, %v388_v16  ;;  %v523_v35 = vadd.f32 %v2436_v34, %v389_v17  ;;  %v262_v17 = vld [vmem:[%s2063_s25 + $0x1e0] sm:$0xff] }
  0x69   : > { %1908 = vmatprep.mubr.msk.bf16.mxu0 %vm793_vm1, %v750_v61  ;;  %v752_v36 = vpack.c.bf16 %v649_v21, %v648_v20  ;;  %v524_v37 = vadd.f32 %v2436_v34, %v390_v22  ;;  %v525_v38 = vadd.f32 %v2436_v34, %v391_v23  ;;  %v783_v2 = vpack.c.bf16 %v711_v25, %v710_v24  ;;  %v324_v22 = vld [vmem:[%s2063_s25 + $0x3d0] sm:$0xff]  ;;  %v325_v23 = vld [vmem:[%s2063_s25 + $0x3d8] sm:$0xff] }
  0x6a   : > { %1969 = vmatmul.mubr.msk.bf16.gmra.mxu1 %vm793_vm1, %v781_v4  ;;  %v586_v3 = vadd.f32 %v2436_v34, %v452_v26  ;;  %v587_v41 = vadd.f32 %v2436_v34, %v453_v27  ;;  %v784_v44 = vpack.c.bf16 %v713_v29, %v712_v28  ;;  %v588_v45 = vadd.f32 %v2436_v34, %v454_v30  ;;  %v326_v28 = vld [vmem:[%s2063_s25 + $0x3e0] sm:$0xff]  ;;  %v327_v29 = vld [vmem:[%s2063_s25 + $0x3e8] sm:$0xff] }
  0x6b   : > { %1972 = vmatprep.mubr.msk.bf16.mxu1 %vm793_vm1, %v782_v9  ;;  %v589_v46 = vadd.f32 %v2436_v34, %v455_v31  ;;  %v650_v49 = vmax.f32 %v522_v33, 0.0  ;;  %v651_v50 = vmax.f32 %v523_v35, 0.0  ;;  %v392_v52 = vmul.f32 %v2455_v51, %v256_v39 }
  0x6c   : > { %v393_v53 = vmul.f32 %v2455_v51, %v257_v40  ;;  %v652_v56 = vmax.f32 %v524_v37, 0.0  ;;  %v653_v57 = vmax.f32 %v525_v38, 0.0  ;;  %v394_v58 = vmul.f32 %v2455_v51, %v258_v42 }
  0x6d   : > { %v395_v59 = vmul.f32 %v2455_v51, %v259_v43  ;;  %v714_v60 = vmax.f32 %v586_v3, 0.0  ;;  %v715_v61 = vmax.f32 %v587_v41, 0.0  ;;  %v456_v62 = vmul.f32 %v2455_v51, %v320_v47  ;;  %v264_v47 = vld [vmem:[%s2063_s25 + $0x1f0] sm:$0xff] }
  0x6e   : > { %v457_v63 = vmul.f32 %v2455_v51, %v321_v48  ;;  %v716_v0 = vmax.f32 %v588_v45, 0.0  ;;  %v717_v1 = vmax.f32 %v589_v46, 0.0  ;;  %v458_v4 = vmul.f32 %v2455_v51, %v322_v54  ;;  %v265_v48 = vld [vmem:[%s2063_s25 + $0x1f8] sm:$0xff] }
  0x6f   : > { %v459_v5 = vmul.f32 %v2455_v51, %v323_v55  ;;  %v753_v6 = vpack.c.bf16 %v651_v50, %v650_v49  ;;  %v526_v7 = vadd.f32 %v2436_v34, %v392_v52  ;;  %v527_v8 = vadd.f32 %v2436_v34, %v393_v53 }
  0x70   : > { %1909 = vmatmul.mubr.msk.bf16.gmra.mxu0 %vm793_vm1, %v751_v32  ;;  %v754_v9 = vpack.c.bf16 %v653_v57, %v652_v56  ;;  %v528_v10 = vadd.f32 %v2436_v34, %v394_v58  ;;  %v529_v11 = vadd.f32 %v2436_v34, %v395_v59  ;;  %v785_v14 = vpack.c.bf16 %v715_v61, %v714_v60  ;;  %v328_v56 = vld [vmem:[%s2063_s25 + $0x3f0] sm:$0xff]  ;;  %v329_v57 = vld [vmem:[%s2063_s25 + $0x3f8] sm:$0xff] }
  0x71   : > { %1912 = vmatprep.mubr.msk.bf16.mxu0 %vm793_vm1, %v752_v36  ;;  %v590_v15 = vadd.f32 %v2436_v34, %v456_v62  ;;  %v591_v16 = vadd.f32 %v2436_v34, %v457_v63  ;;  %v786_v19 = vpack.c.bf16 %v717_v1, %v716_v0  ;;  %v592_v20 = vadd.f32 %v2436_v34, %v458_v4 }
  0x72   : > { %1973 = vmatmul.mubr.msk.bf16.gmra.mxu1 %vm793_vm1, %v783_v2  ;;  %v593_v21 = vadd.f32 %v2436_v34, %v459_v5  ;;  %v654_v24 = vmax.f32 %v526_v7, 0.0  ;;  %v655_v25 = vmax.f32 %v527_v8, 0.0  ;;  %v396_v26 = vmul.f32 %v2455_v51, %v260_v12 }
  0x73   : > { %1976 = vmatprep.mubr.msk.bf16.mxu1 %vm793_vm1, %v784_v44  ;;  %v397_v27 = vmul.f32 %v2455_v51, %v261_v13  ;;  %v656_v30 = vmax.f32 %v528_v10, 0.0  ;;  %v657_v31 = vmax.f32 %v529_v11, 0.0  ;;  %v398_v32 = vmul.f32 %v2455_v51, %v262_v17 }
  0x74   : > { %v399_v33 = vmul.f32 %v2455_v51, %v263_v18  ;;  %v718_v35 = vmax.f32 %v590_v15, 0.0  ;;  %v719_v36 = vmax.f32 %v591_v16, 0.0  ;;  %v460_v37 = vmul.f32 %v2455_v51, %v324_v22 }
  0x75   : > { %v461_v38 = vmul.f32 %v2455_v51, %v325_v23  ;;  %v720_v39 = vmax.f32 %v592_v20, 0.0  ;;  %v721_v40 = vmax.f32 %v593_v21, 0.0  ;;  %v462_v2 = vmul.f32 %v2455_v51, %v326_v28 }
  0x76   : > { %v463_v3 = vmul.f32 %v2455_v51, %v327_v29  ;;  %v755_v41 = vpack.c.bf16 %v655_v25, %v654_v24  ;;  %v530_v42 = vadd.f32 %v2436_v34, %v396_v26  ;;  %v531_v43 = vadd.f32 %v2436_v34, %v397_v27 }
  0x77   : > { %v756_v44 = vpack.c.bf16 %v657_v31, %v656_v30  ;;  %v532_v45 = vadd.f32 %v2436_v34, %v398_v32  ;;  %v533_v46 = vadd.f32 %v2436_v34, %v399_v33  ;;  %v787_v49 = vpack.c.bf16 %v719_v36, %v718_v35 }
  0x78   : > { %1913 = vmatmul.mubr.msk.bf16.gmra.mxu0 %vm793_vm1, %v753_v6  ;;  %v594_v50 = vadd.f32 %v2436_v34, %v460_v37  ;;  %v595_v52 = vadd.f32 %v2436_v34, %v461_v38  ;;  %v788_v53 = vpack.c.bf16 %v721_v40, %v720_v39  ;;  %v596_v54 = vadd.f32 %v2436_v34, %v462_v2 }
  0x79   : > { %1916 = vmatprep.mubr.msk.bf16.mxu0 %vm793_vm1, %v754_v9  ;;  %v597_v55 = vadd.f32 %v2436_v34, %v463_v3  ;;  %v658_v58 = vmax.f32 %v530_v42, 0.0  ;;  %v659_v59 = vmax.f32 %v531_v43, 0.0  ;;  %v400_v60 = vmul.f32 %v2455_v51, %v264_v47 }
  0x7a   : > { %1977 = vmatmul.mubr.msk.bf16.gmra.mxu1 %vm793_vm1, %v785_v14  ;;  %v401_v61 = vmul.f32 %v2455_v51, %v265_v48  ;;  %v660_v62 = vmax.f32 %v532_v45, 0.0  ;;  %v661_v63 = vmax.f32 %v533_v46, 0.0  ;;  %v722_v0 = vmax.f32 %v594_v50, 0.0 }
  0x7b   : > { %1980 = vmatprep.mubr.msk.bf16.mxu1 %vm793_vm1, %v786_v19  ;;  %v723_v1 = vmax.f32 %v595_v52, 0.0  ;;  %v464_v4 = vmul.f32 %v2455_v51, %v328_v56  ;;  %v465_v5 = vmul.f32 %v2455_v51, %v329_v57  ;;  %v724_v6 = vmax.f32 %v596_v54, 0.0 }
  0x7c   : > { %v725_v7 = vmax.f32 %v597_v55, 0.0  ;;  %v757_v8 = vpack.c.bf16 %v659_v59, %v658_v58  ;;  %v534_v9 = vadd.f32 %v2436_v34, %v400_v60  ;;  %v535_v10 = vadd.f32 %v2436_v34, %v401_v61 }
  0x7d   : > { %v758_v11 = vpack.c.bf16 %v661_v63, %v660_v62  ;;  %v789_v12 = vpack.c.bf16 %v723_v1, %v722_v0  ;;  %v598_v13 = vadd.f32 %v2436_v34, %v464_v4  ;;  %v599_v14 = vadd.f32 %v2436_v34, %v465_v5 }
  0x7e   : > { %v790_v15 = vpack.c.bf16 %v725_v7, %v724_v6  ;;  %v662_v51 = vmax.f32 %v534_v9, 0.0  ;;  %v663_v16 = vmax.f32 %v535_v10, 0.0 }
  0x7f   : > { %v726_v17 = vmax.f32 %v598_v13, 0.0  ;;  %v727_v18 = vmax.f32 %v599_v14, 0.0 }
  0x80   : > { %1917 = vmatmul.mubr.msk.bf16.gmra.mxu0 %vm793_vm1, %v755_v41  ;;  %v759_v19 = vpack.c.bf16 %v663_v16, %v662_v51 }
  0x81   : > { %1920 = vmatprep.mubr.msk.bf16.mxu0 %vm793_vm1, %v756_v44  ;;  %v791_v20 = vpack.c.bf16 %v727_v18, %v726_v17 }
  0x82   : > { %1981 = vmatmul.mubr.msk.bf16.gmra.mxu1 %vm793_vm1, %v787_v49 }
  0x83   : > { %1984 = vmatprep.mubr.msk.bf16.mxu1 %vm793_vm1, %v788_v53 }
  0x88   : > { %1921 = vmatmul.mubr.msk.bf16.gmra.mxu0 %vm793_vm1, %v757_v8 }
  0x89   : > { %1924 = vmatprep.mubr.msk.bf16.mxu0 %vm793_vm1, %v758_v11 }
  0x8a   : > { %1985 = vmatmul.mubr.msk.bf16.gmra.mxu1 %vm793_vm1, %v789_v12 }
  0x8b   : > { %1988 = vmatprep.mubr.msk.bf16.mxu1 %vm793_vm1, %v790_v15 }
  0x90   : > { %1925 = vmatmul.mubr.msk.bf16.gmra.mxu0 %vm793_vm1, %v759_v19 }
  0x92   : > { %1989 = vmatmul.mubr.msk.bf16.gmra.mxu1 %vm793_vm1, %v791_v20 }
  0xd8   : > { %v1866_v34 = vpop.f32.mrf.mxu0 }
  0xd9   : > { %1538 = vst.msk [vmem:[%s2533_s8 + $0x10] sm:$0xff] %vm1535_vm2, %v1866_v34 }
  0xda   : > { %v1930_v21 = vpop.f32.mrf.mxu1  ;;  %v1024_v22 = vpop.f32.mrf.mxu0 }
  0xdb   : > { %1602 = vst.msk [vmem:[%s2533_s8 + $0x210] sm:$0xff] %vm1535_vm2, %v1930_v21  ;;  %1536 = vst.msk [vmem:[%s2533_s8] sm:$0xff] %vm1535_vm2, %v1024_v22 }
  0xdc   : > { %v1280_v23 = vpop.f32.mrf.mxu1  ;;  %v1867_v24 = vpop.f32.mrf.mxu0 }
  0xdd   : > { %1600 = vst.msk [vmem:[%s2533_s8 + $0x200] sm:$0xff] %vm1535_vm2, %v1280_v23  ;;  %1539 = vst.msk [vmem:[%s2533_s8 + $0x18] sm:$0xff] %vm1535_vm2, %v1867_v24 }
  0xde   : > { %v1931_v25 = vpop.f32.mrf.mxu1  ;;  %v1027_v26 = vpop.f32.mrf.mxu0 }
  0xdf   : > { %1603 = vst.msk [vmem:[%s2533_s8 + $0x218] sm:$0xff] %vm1535_vm2, %v1931_v25  ;;  %1537 = vst.msk [vmem:[%s2533_s8 + $0x8] sm:$0xff] %vm1535_vm2, %v1027_v26 }
  0xe0   : > { %v1283_v27 = vpop.f32.mrf.mxu1  ;;  %v1870_v28 = vpop.f32.mrf.mxu0 }
  0xe1   : > { %1601 = vst.msk [vmem:[%s2533_s8 + $0x208] sm:$0xff] %vm1535_vm2, %v1283_v27  ;;  %1542 = vst.msk [vmem:[%s2533_s8 + $0x30] sm:$0xff] %vm1535_vm2, %v1870_v28 }
  0xe2   : > { %v1934_v29 = vpop.f32.mrf.mxu1  ;;  %v1040_v30 = vpop.f32.mrf.mxu0 }
  0xe3   : > { %1606 = vst.msk [vmem:[%s2533_s8 + $0x230] sm:$0xff] %vm1535_vm2, %v1934_v29  ;;  %1540 = vst.msk [vmem:[%s2533_s8 + $0x20] sm:$0xff] %vm1535_vm2, %v1040_v30 }
  0xe4   : > { %v1296_v31 = vpop.f32.mrf.mxu1  ;;  %v1871_v32 = vpop.f32.mrf.mxu0 }
  0xe5   : > { %1604 = vst.msk [vmem:[%s2533_s8 + $0x220] sm:$0xff] %vm1535_vm2, %v1296_v31  ;;  %1543 = vst.msk [vmem:[%s2533_s8 + $0x38] sm:$0xff] %vm1535_vm2, %v1871_v32 }
  0xe6   : > { %v1935_v33 = vpop.f32.mrf.mxu1  ;;  %v1043_v35 = vpop.f32.mrf.mxu0 }
  0xe7   : > { %1607 = vst.msk [vmem:[%s2533_s8 + $0x238] sm:$0xff] %vm1535_vm2, %v1935_v33  ;;  %1541 = vst.msk [vmem:[%s2533_s8 + $0x28] sm:$0xff] %vm1535_vm2, %v1043_v35 }
  0xe8   : > { %v1299_v36 = vpop.f32.mrf.mxu1  ;;  %v1874_v37 = vpop.f32.mrf.mxu0 }
  0xe9   : > { %1605 = vst.msk [vmem:[%s2533_s8 + $0x228] sm:$0xff] %vm1535_vm2, %v1299_v36  ;;  %1546 = vst.msk [vmem:[%s2533_s8 + $0x50] sm:$0xff] %vm1535_vm2, %v1874_v37 }
  0xea   : > { %v1938_v38 = vpop.f32.mrf.mxu1  ;;  %v1056_v39 = vpop.f32.mrf.mxu0 }
  0xeb   : > { %1610 = vst.msk [vmem:[%s2533_s8 + $0x250] sm:$0xff] %vm1535_vm2, %v1938_v38  ;;  %1544 = vst.msk [vmem:[%s2533_s8 + $0x40] sm:$0xff] %vm1535_vm2, %v1056_v39 }
  0xec   : > { %v1312_v40 = vpop.f32.mrf.mxu1  ;;  %v1875_v2 = vpop.f32.mrf.mxu0 }
  0xed   : > { %1608 = vst.msk [vmem:[%s2533_s8 + $0x240] sm:$0xff] %vm1535_vm2, %v1312_v40  ;;  %1547 = vst.msk [vmem:[%s2533_s8 + $0x58] sm:$0xff] %vm1535_vm2, %v1875_v2 }
  0xee   : > { %v1939_v3 = vpop.f32.mrf.mxu1  ;;  %v1059_v41 = vpop.f32.mrf.mxu0 }
  0xef   : > { %1611 = vst.msk [vmem:[%s2533_s8 + $0x258] sm:$0xff] %vm1535_vm2, %v1939_v3  ;;  %1545 = vst.msk [vmem:[%s2533_s8 + $0x48] sm:$0xff] %vm1535_vm2, %v1059_v41 }
  0xf0   : > { %v1315_v42 = vpop.f32.mrf.mxu1  ;;  %v1878_v43 = vpop.f32.mrf.mxu0 }
  0xf1   : > { %1609 = vst.msk [vmem:[%s2533_s8 + $0x248] sm:$0xff] %vm1535_vm2, %v1315_v42  ;;  %1550 = vst.msk [vmem:[%s2533_s8 + $0x70] sm:$0xff] %vm1535_vm2, %v1878_v43 }
  0xf2   : > { %v1942_v44 = vpop.f32.mrf.mxu1  ;;  %v1072_v45 = vpop.f32.mrf.mxu0 }
  0xf3   : > { %1614 = vst.msk [vmem:[%s2533_s8 + $0x270] sm:$0xff] %vm1535_vm2, %v1942_v44  ;;  %1548 = vst.msk [vmem:[%s2533_s8 + $0x60] sm:$0xff] %vm1535_vm2, %v1072_v45 }
  0xf4   : > { %v1328_v46 = vpop.f32.mrf.mxu1  ;;  %v1879_v47 = vpop.f32.mrf.mxu0 }
  0xf5   : > { %1612 = vst.msk [vmem:[%s2533_s8 + $0x260] sm:$0xff] %vm1535_vm2, %v1328_v46  ;;  %1551 = vst.msk [vmem:[%s2533_s8 + $0x78] sm:$0xff] %vm1535_vm2, %v1879_v47 }
  0xf6   : > { %v1943_v48 = vpop.f32.mrf.mxu1  ;;  %v1075_v49 = vpop.f32.mrf.mxu0 }
  0xf7   : > { %1615 = vst.msk [vmem:[%s2533_s8 + $0x278] sm:$0xff] %vm1535_vm2, %v1943_v48  ;;  %1549 = vst.msk [vmem:[%s2533_s8 + $0x68] sm:$0xff] %vm1535_vm2, %v1075_v49 }
  0xf8   : > { %v1331_v50 = vpop.f32.mrf.mxu1  ;;  %v1882_v52 = vpop.f32.mrf.mxu0 }
  0xf9   : > { %1613 = vst.msk [vmem:[%s2533_s8 + $0x268] sm:$0xff] %vm1535_vm2, %v1331_v50  ;;  %1554 = vst.msk [vmem:[%s2533_s8 + $0x90] sm:$0xff] %vm1535_vm2, %v1882_v52 }
  0xfa   : > { %v1946_v53 = vpop.f32.mrf.mxu1  ;;  %v1088_v54 = vpop.f32.mrf.mxu0 }
  0xfb   : > { %1618 = vst.msk [vmem:[%s2533_s8 + $0x290] sm:$0xff] %vm1535_vm2, %v1946_v53  ;;  %1552 = vst.msk [vmem:[%s2533_s8 + $0x80] sm:$0xff] %vm1535_vm2, %v1088_v54 }
  0xfc   : > { %v1344_v55 = vpop.f32.mrf.mxu1  ;;  %v1883_v56 = vpop.f32.mrf.mxu0 }
  0xfd   : > { %1616 = vst.msk [vmem:[%s2533_s8 + $0x280] sm:$0xff] %vm1535_vm2, %v1344_v55  ;;  %1555 = vst.msk [vmem:[%s2533_s8 + $0x98] sm:$0xff] %vm1535_vm2, %v1883_v56 }
  0xfe   : > { %v1947_v57 = vpop.f32.mrf.mxu1  ;;  %v1091_v58 = vpop.f32.mrf.mxu0 }
  0xff   : > { %1619 = vst.msk [vmem:[%s2533_s8 + $0x298] sm:$0xff] %vm1535_vm2, %v1947_v57  ;;  %1553 = vst.msk [vmem:[%s2533_s8 + $0x88] sm:$0xff] %vm1535_vm2, %v1091_v58 }
 0x100   : > { %v1347_v59 = vpop.f32.mrf.mxu1  ;;  %v1886_v60 = vpop.f32.mrf.mxu0 }
 0x101   : > { %1617 = vst.msk [vmem:[%s2533_s8 + $0x288] sm:$0xff] %vm1535_vm2, %v1347_v59  ;;  %1558 = vst.msk [vmem:[%s2533_s8 + $0xb0] sm:$0xff] %vm1535_vm2, %v1886_v60 }
 0x102   : > { %v1950_v61 = vpop.f32.mrf.mxu1  ;;  %v1104_v62 = vpop.f32.mrf.mxu0 }
 0x103   : > { %1622 = vst.msk [vmem:[%s2533_s8 + $0x2b0] sm:$0xff] %vm1535_vm2, %v1950_v61  ;;  %1556 = vst.msk [vmem:[%s2533_s8 + $0xa0] sm:$0xff] %vm1535_vm2, %v1104_v62 }
 0x104   : > { %v1360_v63 = vpop.f32.mrf.mxu1  ;;  %v1887_v0 = vpop.f32.mrf.mxu0 }
 0x105   : > { %1620 = vst.msk [vmem:[%s2533_s8 + $0x2a0] sm:$0xff] %vm1535_vm2, %v1360_v63  ;;  %1559 = vst.msk [vmem:[%s2533_s8 + $0xb8] sm:$0xff] %vm1535_vm2, %v1887_v0 }
 0x106   : > { %v1951_v1 = vpop.f32.mrf.mxu1  ;;  %v1107_v4 = vpop.f32.mrf.mxu0 }
 0x107   : > { %1623 = vst.msk [vmem:[%s2533_s8 + $0x2b8] sm:$0xff] %vm1535_vm2, %v1951_v1  ;;  %1557 = vst.msk [vmem:[%s2533_s8 + $0xa8] sm:$0xff] %vm1535_vm2, %v1107_v4 }
 0x108   : > { %v1363_v5 = vpop.f32.mrf.mxu1  ;;  %v1890_v6 = vpop.f32.mrf.mxu0 }
 0x109   : > { %1621 = vst.msk [vmem:[%s2533_s8 + $0x2a8] sm:$0xff] %vm1535_vm2, %v1363_v5  ;;  %1562 = vst.msk [vmem:[%s2533_s8 + $0xd0] sm:$0xff] %vm1535_vm2, %v1890_v6 }
 0x10a   : > { %v1954_v7 = vpop.f32.mrf.mxu1  ;;  %v1120_v8 = vpop.f32.mrf.mxu0 }
 0x10b   : > { %1626 = vst.msk [vmem:[%s2533_s8 + $0x2d0] sm:$0xff] %vm1535_vm2, %v1954_v7  ;;  %1560 = vst.msk [vmem:[%s2533_s8 + $0xc0] sm:$0xff] %vm1535_vm2, %v1120_v8 }
 0x10c   : > { %v1376_v9 = vpop.f32.mrf.mxu1  ;;  %v1891_v10 = vpop.f32.mrf.mxu0 }
 0x10d   : > { %1624 = vst.msk [vmem:[%s2533_s8 + $0x2c0] sm:$0xff] %vm1535_vm2, %v1376_v9  ;;  %1563 = vst.msk [vmem:[%s2533_s8 + $0xd8] sm:$0xff] %vm1535_vm2, %v1891_v10 }
 0x10e   : > { %v1955_v11 = vpop.f32.mrf.mxu1  ;;  %v1123_v12 = vpop.f32.mrf.mxu0 }
 0x10f   : > { %1627 = vst.msk [vmem:[%s2533_s8 + $0x2d8] sm:$0xff] %vm1535_vm2, %v1955_v11  ;;  %1561 = vst.msk [vmem:[%s2533_s8 + $0xc8] sm:$0xff] %vm1535_vm2, %v1123_v12 }
 0x110   : > { %v1379_v13 = vpop.f32.mrf.mxu1  ;;  %v1894_v14 = vpop.f32.mrf.mxu0 }
 0x111   : > { %1625 = vst.msk [vmem:[%s2533_s8 + $0x2c8] sm:$0xff] %vm1535_vm2, %v1379_v13  ;;  %1566 = vst.msk [vmem:[%s2533_s8 + $0xf0] sm:$0xff] %vm1535_vm2, %v1894_v14 }
 0x112   : > { %v1958_v15 = vpop.f32.mrf.mxu1  ;;  %v1136_v51 = vpop.f32.mrf.mxu0 }
 0x113   : > { %1630 = vst.msk [vmem:[%s2533_s8 + $0x2f0] sm:$0xff] %vm1535_vm2, %v1958_v15  ;;  %1564 = vst.msk [vmem:[%s2533_s8 + $0xe0] sm:$0xff] %vm1535_vm2, %v1136_v51 }
 0x114   : > { %v1392_v16 = vpop.f32.mrf.mxu1  ;;  %v1895_v17 = vpop.f32.mrf.mxu0 }
 0x115   : > { %1628 = vst.msk [vmem:[%s2533_s8 + $0x2e0] sm:$0xff] %vm1535_vm2, %v1392_v16  ;;  %1567 = vst.msk [vmem:[%s2533_s8 + $0xf8] sm:$0xff] %vm1535_vm2, %v1895_v17 }
 0x116   : > { %v1959_v18 = vpop.f32.mrf.mxu1  ;;  %v1139_v19 = vpop.f32.mrf.mxu0 }
 0x117   : > { %1631 = vst.msk [vmem:[%s2533_s8 + $0x2f8] sm:$0xff] %vm1535_vm2, %v1959_v18  ;;  %1565 = vst.msk [vmem:[%s2533_s8 + $0xe8] sm:$0xff] %vm1535_vm2, %v1139_v19 }
 0x118   : > { %v1395_v20 = vpop.f32.mrf.mxu1  ;;  %v1898_v34 = vpop.f32.mrf.mxu0 }
 0x119   : > { %1629 = vst.msk [vmem:[%s2533_s8 + $0x2e8] sm:$0xff] %vm1535_vm2, %v1395_v20  ;;  %1570 = vst.msk [vmem:[%s2533_s8 + $0x110] sm:$0xff] %vm1535_vm2, %v1898_v34 }
 0x11a   : > { %v1962_v21 = vpop.f32.mrf.mxu1  ;;  %v1152_v22 = vpop.f32.mrf.mxu0 }
 0x11b   : > { %1634 = vst.msk [vmem:[%s2533_s8 + $0x310] sm:$0xff] %vm1535_vm2, %v1962_v21  ;;  %1568 = vst.msk [vmem:[%s2533_s8 + $0x100] sm:$0xff] %vm1535_vm2, %v1152_v22 }
 0x11c   : > { %v1408_v23 = vpop.f32.mrf.mxu1  ;;  %v1899_v24 = vpop.f32.mrf.mxu0 }
 0x11d   : > { %1632 = vst.msk [vmem:[%s2533_s8 + $0x300] sm:$0xff] %vm1535_vm2, %v1408_v23  ;;  %1571 = vst.msk [vmem:[%s2533_s8 + $0x118] sm:$0xff] %vm1535_vm2, %v1899_v24 }
 0x11e   : > { %v1963_v25 = vpop.f32.mrf.mxu1  ;;  %v1155_v26 = vpop.f32.mrf.mxu0 }
 0x11f   : > { %1635 = vst.msk [vmem:[%s2533_s8 + $0x318] sm:$0xff] %vm1535_vm2, %v1963_v25  ;;  %1569 = vst.msk [vmem:[%s2533_s8 + $0x108] sm:$0xff] %vm1535_vm2, %v1155_v26 }
 0x120   : > { %v1411_v27 = vpop.f32.mrf.mxu1  ;;  %v1902_v28 = vpop.f32.mrf.mxu0 }
 0x121   : > { %1633 = vst.msk [vmem:[%s2533_s8 + $0x308] sm:$0xff] %vm1535_vm2, %v1411_v27  ;;  %1574 = vst.msk [vmem:[%s2533_s8 + $0x130] sm:$0xff] %vm1535_vm2, %v1902_v28 }
 0x122   : > { %v1966_v29 = vpop.f32.mrf.mxu1  ;;  %v1168_v30 = vpop.f32.mrf.mxu0 }
 0x123   : > { %1638 = vst.msk [vmem:[%s2533_s8 + $0x330] sm:$0xff] %vm1535_vm2, %v1966_v29  ;;  %1572 = vst.msk [vmem:[%s2533_s8 + $0x120] sm:$0xff] %vm1535_vm2, %v1168_v30 }
 0x124   : > { %v1424_v31 = vpop.f32.mrf.mxu1  ;;  %v1903_v32 = vpop.f32.mrf.mxu0 }
 0x125   : > { %1636 = vst.msk [vmem:[%s2533_s8 + $0x320] sm:$0xff] %vm1535_vm2, %v1424_v31  ;;  %1575 = vst.msk [vmem:[%s2533_s8 + $0x138] sm:$0xff] %vm1535_vm2, %v1903_v32 }
 0x126   : > { %v1967_v33 = vpop.f32.mrf.mxu1  ;;  %v1171_v35 = vpop.f32.mrf.mxu0 }
 0x127   : > { %1639 = vst.msk [vmem:[%s2533_s8 + $0x338] sm:$0xff] %vm1535_vm2, %v1967_v33  ;;  %1573 = vst.msk [vmem:[%s2533_s8 + $0x128] sm:$0xff] %vm1535_vm2, %v1171_v35 }
 0x128   : > { %v1427_v36 = vpop.f32.mrf.mxu1  ;;  %v1906_v37 = vpop.f32.mrf.mxu0 }
 0x129   : > { %1637 = vst.msk [vmem:[%s2533_s8 + $0x328] sm:$0xff] %vm1535_vm2, %v1427_v36  ;;  %1578 = vst.msk [vmem:[%s2533_s8 + $0x150] sm:$0xff] %vm1535_vm2, %v1906_v37 }
 0x12a   : > { %v1970_v38 = vpop.f32.mrf.mxu1  ;;  %v1184_v39 = vpop.f32.mrf.mxu0 }
 0x12b   : > { %1642 = vst.msk [vmem:[%s2533_s8 + $0x350] sm:$0xff] %vm1535_vm2, %v1970_v38  ;;  %1576 = vst.msk [vmem:[%s2533_s8 + $0x140] sm:$0xff] %vm1535_vm2, %v1184_v39 }
 0x12c   : > { %v1440_v40 = vpop.f32.mrf.mxu1  ;;  %v1907_v2 = vpop.f32.mrf.mxu0 }
 0x12d   : > { %1640 = vst.msk [vmem:[%s2533_s8 + $0x340] sm:$0xff] %vm1535_vm2, %v1440_v40  ;;  %1579 = vst.msk [vmem:[%s2533_s8 + $0x158] sm:$0xff] %vm1535_vm2, %v1907_v2 }
 0x12e   : > { %v1971_v3 = vpop.f32.mrf.mxu1  ;;  %v1187_v41 = vpop.f32.mrf.mxu0 }
 0x12f   : > { %1643 = vst.msk [vmem:[%s2533_s8 + $0x358] sm:$0xff] %vm1535_vm2, %v1971_v3  ;;  %1577 = vst.msk [vmem:[%s2533_s8 + $0x148] sm:$0xff] %vm1535_vm2, %v1187_v41 }
 0x130   : > { %v1443_v42 = vpop.f32.mrf.mxu1  ;;  %v1910_v43 = vpop.f32.mrf.mxu0 }
 0x131   : > { %1641 = vst.msk [vmem:[%s2533_s8 + $0x348] sm:$0xff] %vm1535_vm2, %v1443_v42  ;;  %1582 = vst.msk [vmem:[%s2533_s8 + $0x170] sm:$0xff] %vm1535_vm2, %v1910_v43 }
 0x132   : > { %v1974_v44 = vpop.f32.mrf.mxu1  ;;  %v1200_v45 = vpop.f32.mrf.mxu0 }
 0x133   : > { %1646 = vst.msk [vmem:[%s2533_s8 + $0x370] sm:$0xff] %vm1535_vm2, %v1974_v44  ;;  %1580 = vst.msk [vmem:[%s2533_s8 + $0x160] sm:$0xff] %vm1535_vm2, %v1200_v45 }
 0x134   : > { %v1456_v46 = vpop.f32.mrf.mxu1  ;;  %v1911_v47 = vpop.f32.mrf.mxu0 }
 0x135   : > { %1644 = vst.msk [vmem:[%s2533_s8 + $0x360] sm:$0xff] %vm1535_vm2, %v1456_v46  ;;  %1583 = vst.msk [vmem:[%s2533_s8 + $0x178] sm:$0xff] %vm1535_vm2, %v1911_v47 }
 0x136   : > { %v1975_v48 = vpop.f32.mrf.mxu1  ;;  %v1203_v49 = vpop.f32.mrf.mxu0 }
 0x137   : > { %1647 = vst.msk [vmem:[%s2533_s8 + $0x378] sm:$0xff] %vm1535_vm2, %v1975_v48  ;;  %1581 = vst.msk [vmem:[%s2533_s8 + $0x168] sm:$0xff] %vm1535_vm2, %v1203_v49 }
 0x138   : > { %v1459_v50 = vpop.f32.mrf.mxu1  ;;  %v1914_v52 = vpop.f32.mrf.mxu0 }
 0x139   : > { %1645 = vst.msk [vmem:[%s2533_s8 + $0x368] sm:$0xff] %vm1535_vm2, %v1459_v50  ;;  %1586 = vst.msk [vmem:[%s2533_s8 + $0x190] sm:$0xff] %vm1535_vm2, %v1914_v52 }
 0x13a   : > { %v1978_v53 = vpop.f32.mrf.mxu1  ;;  %v1216_v54 = vpop.f32.mrf.mxu0 }
 0x13b   : > { %1650 = vst.msk [vmem:[%s2533_s8 + $0x390] sm:$0xff] %vm1535_vm2, %v1978_v53  ;;  %1584 = vst.msk [vmem:[%s2533_s8 + $0x180] sm:$0xff] %vm1535_vm2, %v1216_v54 }
 0x13c   : > { %v1472_v55 = vpop.f32.mrf.mxu1  ;;  %v1915_v56 = vpop.f32.mrf.mxu0 }
 0x13d   : > { %1648 = vst.msk [vmem:[%s2533_s8 + $0x380] sm:$0xff] %vm1535_vm2, %v1472_v55  ;;  %1587 = vst.msk [vmem:[%s2533_s8 + $0x198] sm:$0xff] %vm1535_vm2, %v1915_v56 }
 0x13e   : > { %v1979_v57 = vpop.f32.mrf.mxu1  ;;  %v1219_v58 = vpop.f32.mrf.mxu0 }
 0x13f   : > { %1651 = vst.msk [vmem:[%s2533_s8 + $0x398] sm:$0xff] %vm1535_vm2, %v1979_v57  ;;  %1585 = vst.msk [vmem:[%s2533_s8 + $0x188] sm:$0xff] %vm1535_vm2, %v1219_v58 }
 0x140   : > { %v1475_v59 = vpop.f32.mrf.mxu1  ;;  %v1918_v60 = vpop.f32.mrf.mxu0 }
 0x141   : > { %1649 = vst.msk [vmem:[%s2533_s8 + $0x388] sm:$0xff] %vm1535_vm2, %v1475_v59  ;;  %1590 = vst.msk [vmem:[%s2533_s8 + $0x1b0] sm:$0xff] %vm1535_vm2, %v1918_v60 }
 0x142   : > { %v1982_v61 = vpop.f32.mrf.mxu1  ;;  %v1232_v62 = vpop.f32.mrf.mxu0 }
 0x143   : > { %1654 = vst.msk [vmem:[%s2533_s8 + $0x3b0] sm:$0xff] %vm1535_vm2, %v1982_v61  ;;  %1588 = vst.msk [vmem:[%s2533_s8 + $0x1a0] sm:$0xff] %vm1535_vm2, %v1232_v62 }
 0x144   : > { %v1488_v63 = vpop.f32.mrf.mxu1  ;;  %v1919_v0 = vpop.f32.mrf.mxu0 }
 0x145   : > { %1652 = vst.msk [vmem:[%s2533_s8 + $0x3a0] sm:$0xff] %vm1535_vm2, %v1488_v63  ;;  %1591 = vst.msk [vmem:[%s2533_s8 + $0x1b8] sm:$0xff] %vm1535_vm2, %v1919_v0 }
 0x146   : > { %v1983_v1 = vpop.f32.mrf.mxu1  ;;  %v1235_v4 = vpop.f32.mrf.mxu0 }
 0x147   : > { %1655 = vst.msk [vmem:[%s2533_s8 + $0x3b8] sm:$0xff] %vm1535_vm2, %v1983_v1  ;;  %1589 = vst.msk [vmem:[%s2533_s8 + $0x1a8] sm:$0xff] %vm1535_vm2, %v1235_v4 }
 0x148   : > { %v1491_v5 = vpop.f32.mrf.mxu1  ;;  %v1922_v6 = vpop.f32.mrf.mxu0 }
 0x149   : > { %1653 = vst.msk [vmem:[%s2533_s8 + $0x3a8] sm:$0xff] %vm1535_vm2, %v1491_v5  ;;  %1594 = vst.msk [vmem:[%s2533_s8 + $0x1d0] sm:$0xff] %vm1535_vm2, %v1922_v6 }
 0x14a   : > { %v1986_v7 = vpop.f32.mrf.mxu1  ;;  %v1248_v8 = vpop.f32.mrf.mxu0 }
 0x14b   : > { %1658 = vst.msk [vmem:[%s2533_s8 + $0x3d0] sm:$0xff] %vm1535_vm2, %v1986_v7  ;;  %1592 = vst.msk [vmem:[%s2533_s8 + $0x1c0] sm:$0xff] %vm1535_vm2, %v1248_v8 }
 0x14c   : > { %v1504_v9 = vpop.f32.mrf.mxu1  ;;  %v1923_v10 = vpop.f32.mrf.mxu0 }
 0x14d   : > { %1656 = vst.msk [vmem:[%s2533_s8 + $0x3c0] sm:$0xff] %vm1535_vm2, %v1504_v9  ;;  %1595 = vst.msk [vmem:[%s2533_s8 + $0x1d8] sm:$0xff] %vm1535_vm2, %v1923_v10 }
 0x14e   : > { %v1987_v11 = vpop.f32.mrf.mxu1  ;;  %v1251_v12 = vpop.f32.mrf.mxu0 }
 0x14f   : > { %1659 = vst.msk [vmem:[%s2533_s8 + $0x3d8] sm:$0xff] %vm1535_vm2, %v1987_v11  ;;  %1593 = vst.msk [vmem:[%s2533_s8 + $0x1c8] sm:$0xff] %vm1535_vm2, %v1251_v12 }
 0x150   : > { %v1507_v13 = vpop.f32.mrf.mxu1  ;;  %v1926_v14 = vpop.f32.mrf.mxu0 }
 0x151   : > { %1657 = vst.msk [vmem:[%s2533_s8 + $0x3c8] sm:$0xff] %vm1535_vm2, %v1507_v13  ;;  %1598 = vst.msk [vmem:[%s2533_s8 + $0x1f0] sm:$0xff] %vm1535_vm2, %v1926_v14 }
 0x152   : > { %v1990_v15 = vpop.f32.mrf.mxu1  ;;  %v1264_v51 = vpop.f32.mrf.mxu0 }
 0x153   : > { %1662 = vst.msk [vmem:[%s2533_s8 + $0x3f0] sm:$0xff] %vm1535_vm2, %v1990_v15  ;;  %1596 = vst.msk [vmem:[%s2533_s8 + $0x1e0] sm:$0xff] %vm1535_vm2, %v1264_v51 }
 0x154   : > { %v1520_v16 = vpop.f32.mrf.mxu1  ;;  %v1927_v17 = vpop.f32.mrf.mxu0 }
 0x155   : > { %1660 = vst.msk [vmem:[%s2533_s8 + $0x3e0] sm:$0xff] %vm1535_vm2, %v1520_v16  ;;  %1599 = vst.msk [vmem:[%s2533_s8 + $0x1f8] sm:$0xff] %vm1535_vm2, %v1927_v17 }
 0x156   : > { %v1991_v18 = vpop.f32.mrf.mxu1  ;;  %v1267_v19 = vpop.f32.mrf.mxu0 }
 0x157   : > { %1663 = vst.msk [vmem:[%s2533_s8 + $0x3f8] sm:$0xff] %vm1535_vm2, %v1991_v18  ;;  %1597 = vst.msk [vmem:[%s2533_s8 + $0x1e8] sm:$0xff] %vm1535_vm2, %v1267_v19 }
 0x158   : > { %v1523_v20 = vpop.f32.mrf.mxu1 }
 0x159   : > { %1661 = vst.msk [vmem:[%s2533_s8 + $0x3e8] sm:$0xff] %vm1535_vm2, %v1523_v20 }
 0x15a PF: > { %s14_s15 = sadd.s32 1, %s2012_s15  }
 0x15b   : > { %p11_p4 = scmp.ge.s32.totalorder %s14_s15, 4  }
 0x15d   :  { %13 = sbr.rel (!%p11_p4) target bundleno = 1 (0x1), region = 66 }

// kernel: cnn_decoder_forward.23
= control target key start
LH: loop header
LB: loop body
LE: loop exit
PB: predicated region body
PF: predicated region fallthrough
CT: control target
= control target key end

     0   :  { %s174_s0 = inlined_call_operand.vmem [shape: f32[64,128], index: 0, kind: input, shape index: {}]   ;;  %s175_s1 = inlined_call_operand.vmem [shape: f32[64,128], index: 1, kind: output, shape index: {}]  }
   0x1   :  { %v8_v0 = vld [vmem:[%s174_s0] sm:$0xff]  ;;  %v9_v1 = vld [vmem:[%s174_s0 + $0x8] sm:$0xff]  ;;  %v10_v2 = vld [vmem:[%s174_s0 + $0x10] sm:$0xff] }
   0x2   :  { %v16_v3 = vsub.f32 0.0, %v8_v0  ;;  %v17_v4 = vsub.f32 0.0, %v9_v1  ;;  %v18_v5 = vsub.f32 0.0, %v10_v2  ;;  %v11_v6 = vld [vmem:[%s174_s0 + $0x18] sm:$0xff]  ;;  %v12_v7 = vld [vmem:[%s174_s0 + $0x20] sm:$0xff]  ;;  %v13_v8 = vld [vmem:[%s174_s0 + $0x28] sm:$0xff] }
   0x3   :  { %v19_v9 = vsub.f32 0.0, %v11_v6  ;;  %v20_v10 = vsub.f32 0.0, %v12_v7  ;;  %v21_v11 = vsub.f32 0.0, %v13_v8  ;;  %v14_v12 = vld [vmem:[%s174_s0 + $0x30] sm:$0xff]  ;;  %v15_v13 = vld [vmem:[%s174_s0 + $0x38] sm:$0xff] }
   0x4   :  { %v24_v14 = vmul.f32 1.442695, %v16_v3  ;;  %v26_v15 = vmul.f32 1.442695, %v17_v4  ;;  %v28_v16 = vmul.f32 1.442695, %v18_v5 }
   0x5   :  { %v30_v17 = vmul.f32 1.442695, %v19_v9  ;;  %v32_v18 = vmul.f32 1.442695, %v20_v10  ;;  %v22_v19 = vsub.f32 0.0, %v14_v12  ;;  %v23_v20 = vsub.f32 0.0, %v15_v13 }
   0x6   :  { %84 = vpow2.f32 %v24_v14  ;;  %v34_v21 = vmul.f32 1.442695, %v21_v11 }
   0x7   :  { %86 = vpow2.f32 %v26_v15  ;;  %v36_v22 = vmul.f32 1.442695, %v22_v19  ;;  %v38_v23 = vmul.f32 1.442695, %v23_v20 }
   0x8   :  { %88 = vpow2.f32 %v28_v16 }
   0x9   :  { %90 = vpow2.f32 %v30_v17 }
   0xa   :  { %92 = vpow2.f32 %v32_v18 }
   0xb   :  { %94 = vpow2.f32 %v34_v21 }
   0xc   :  { %96 = vpow2.f32 %v36_v22 }
   0xd   :  { %98 = vpow2.f32 %v38_v23 }
  0x13   :  { %v85_v24 = vpop.eup %84 }
  0x14   :  { %v87_v25 = vpop.eup %86  ;;  %v40_v26 = vadd.f32 1.0, %v85_v24 }
  0x15   :  { %v89_v27 = vpop.eup %88  ;;  %v41_v28 = vadd.f32 1.0, %v87_v25 }
  0x16   :  { %v91_v29 = vpop.eup %90  ;;  %100 = vrcp.f32 %v40_v26  ;;  %v42_v30 = vadd.f32 1.0, %v89_v27 }
  0x17   :  { %v93_v31 = vpop.eup %92  ;;  %102 = vrcp.f32 %v41_v28  ;;  %v43_v32 = vadd.f32 1.0, %v91_v29 }
  0x18   :  { %v95_v33 = vpop.eup %94  ;;  %104 = vrcp.f32 %v42_v30  ;;  %v44_v34 = vadd.f32 1.0, %v93_v31 }
  0x19   :  { %v97_v35 = vpop.eup %96  ;;  %106 = vrcp.f32 %v43_v32  ;;  %v45_v36 = vadd.f32 1.0, %v95_v33 }
  0x1a   :  { %v99_v37 = vpop.eup %98  ;;  %108 = vrcp.f32 %v44_v34  ;;  %v46_v38 = vadd.f32 1.0, %v97_v35 }
  0x1b   :  { %110 = vrcp.f32 %v45_v36  ;;  %v47_v39 = vadd.f32 1.0, %v99_v37 }
  0x1c   :  { %112 = vrcp.f32 %v46_v38 }
  0x1d   :  { %114 = vrcp.f32 %v47_v39 }
  0x23   :  { %v101_v40 = vpop.eup %100 }
  0x24   :  { %v103_v41 = vpop.eup %102  ;;  %v56_v42 = vmax.f32 %v101_v40, 0.0 }
  0x25   :  { %v105_v43 = vpop.eup %104  ;;  %v57_v44 = vmax.f32 %v103_v41, 0.0 }
  0x26   :  { %v107_v45 = vpop.eup %106  ;;  %v64_v46 = vmin.f32 %v56_v42, 1.0  ;;  %v58_v47 = vmax.f32 %v105_v43, 0.0 }
  0x27   :  { %v109_v48 = vpop.eup %108  ;;  %v65_v49 = vmin.f32 %v57_v44, 1.0  ;;  %v59_v50 = vmax.f32 %v107_v45, 0.0 }
  0x28   :  { %v111_v51 = vpop.eup %110  ;;  %72 = vst [vmem:[%s175_s1] sm:$0xff] %v64_v46  ;;  %v66_v52 = vmin.f32 %v58_v47, 1.0  ;;  %v60_v53 = vmax.f32 %v109_v48, 0.0 }
  0x29   :  { %v113_v54 = vpop.eup %112  ;;  %73 = vst [vmem:[%s175_s1 + $0x8] sm:$0xff] %v65_v49  ;;  %v67_v55 = vmin.f32 %v59_v50, 1.0  ;;  %v61_v56 = vmax.f32 %v111_v51, 0.0 }
  0x2a   :  { %v115_v57 = vpop.eup %114  ;;  %74 = vst [vmem:[%s175_s1 + $0x10] sm:$0xff] %v66_v52  ;;  %v68_v58 = vmin.f32 %v60_v53, 1.0  ;;  %v62_v59 = vmax.f32 %v113_v54, 0.0 }
  0x2b   :  { %75 = vst [vmem:[%s175_s1 + $0x18] sm:$0xff] %v67_v55  ;;  %v69_v60 = vmin.f32 %v61_v56, 1.0  ;;  %v63_v61 = vmax.f32 %v115_v57, 0.0 }
  0x2c   :  { %76 = vst [vmem:[%s175_s1 + $0x20] sm:$0xff] %v68_v58  ;;  %v70_v62 = vmin.f32 %v62_v59, 1.0 }
  0x2d   :  { %77 = vst [vmem:[%s175_s1 + $0x28] sm:$0xff] %v69_v60  ;;  %v71_v63 = vmin.f32 %v63_v61, 1.0 }
  0x2e   :  { %78 = vst [vmem:[%s175_s1 + $0x30] sm:$0xff] %v70_v62 }
  0x2f   :  { %79 = vst [vmem:[%s175_s1 + $0x38] sm:$0xff] %v71_v63 }

</bundles_post_ra>
